<compile_context>
chip_gen: v7x
topology: tpu7x:2x2x1
jax: 0.10.0
libtpu: 0.0.40
codegen_flags: <defaults>
</compile_context>

<pallas_src>
import math

import jax
import jax.numpy as jnp
from jax import lax
from jax.experimental import pallas as pl
from jax.experimental.pallas import tpu as pltpu

EPS = 1e-5
NEG = -1e9   # additive suppression for cross-batch blocks (exp -> 0)


# --------------------------- packed slab layouts -----------------------------
def _wcols(D, F, C):
    """Column ranges inside the per-layer D-major bf16 weight slab."""
    enc = dict(wqkv=(0, 3 * D), wo=(3 * D, 4 * D), w1=(4 * D, 4 * D + F))
    dec = dict(swqkv=(0, 3 * D), swo=(3 * D, 4 * D),
               cwq=(4 * D, 5 * D), cwkv=(5 * D, 7 * D), cwo=(7 * D, 8 * D),
               w1=(8 * D, 8 * D + F), out_w=(8 * D + F, 8 * D + F + C))
    NW = 8 * D + F + C        # decoder width >= encoder width (encoder is padded)
    return enc, dec, NW


def _pcols(D, F, C):
    """Column ranges inside the per-layer f32 small-parameter slab."""
    enc = dict(ln1g=(0, D), ln1b=(D, 2 * D), bqkv=(2 * D, 5 * D), bo=(5 * D, 6 * D),
               ln2g=(6 * D, 7 * D), ln2b=(7 * D, 8 * D),
               b1=(8 * D, 8 * D + F), b2=(8 * D + F, 9 * D + F))
    dec = dict(ln1g=(0, D), ln1b=(D, 2 * D), sbqkv=(2 * D, 5 * D), sbo=(5 * D, 6 * D),
               ln2g=(6 * D, 7 * D), ln2b=(7 * D, 8 * D),
               cbq=(8 * D, 9 * D), cbkv=(9 * D, 11 * D), cbo=(11 * D, 12 * D),
               ln3g=(12 * D, 13 * D), ln3b=(13 * D, 14 * D),
               b1=(14 * D, 14 * D + F), b2=(14 * D + F, 15 * D + F),
               out_b=(15 * D + F, 15 * D + F + C))
    NP = 15 * D + F + C
    return enc, dec, NP


# ------------------------------ kernel helpers -------------------------------
def _layer_norm(x, g, b):
    mu = jnp.mean(x, axis=-1, keepdims=True)
    var = jnp.mean((x - mu) ** 2, axis=-1, keepdims=True)
    return (x - mu) * lax.rsqrt(var + EPS) * g + b


def _mm(x_f32, w_bf16):
    """(M,K) f32 x (K,N) bf16 -> (M,N) f32 (bf16 MXU inputs, f32 accumulation)."""
    return jnp.dot(x_f32.astype(jnp.bfloat16), w_bf16,
                   preferred_element_type=jnp.float32)


def _sdpa2d(q, k, v, add_mask):
    """Block-diagonal 2D attention.  q,k,v: (M,D) f32; add_mask: (M,M) f32.

    The 1/sqrt(D) scale is already folded into the Q weights.  add_mask carries
    the PyTorch additive 1/0 tril in the diagonal blocks and -1e9 cross-batch.
    NOTE: pl.reciprocal(approx=True) deviates ~1e-3 from exact softmax; use
    approx=False for strict parity checks.
    """
    s = lax.dot_general(q.astype(jnp.bfloat16), k.astype(jnp.bfloat16),
                        (((1,), (1,)), ((), ())),
                        preferred_element_type=jnp.float32)
    s = s + add_mask
    m = jnp.max(s, axis=-1, keepdims=True)
    e = jnp.exp(s - m)
    p = e * pl.reciprocal(jnp.sum(e, axis=-1, keepdims=True), approx=True)
    return jnp.dot(p.astype(jnp.bfloat16), v.astype(jnp.bfloat16),
                   preferred_element_type=jnp.float32)


# ------------------------- fused transformer kernel --------------------------
def _fused_transformer(x2d, smask, xmask, wmaj, w2slab, pslab, *, Le, Ld, num_code):
    M, D = x2d.shape
    L = wmaj.shape[0]
    F = w2slab.shape[1]
    C = num_code
    NW = wmaj.shape[-1]
    NP = pslab.shape[-1]
    encw, decw, _ = _wcols(D, F, C)
    encp, decp, _ = _pcols(D, F, C)
    assert L == Le + Ld and Le >= 1 and Ld >= 1

    def kernel(x_ref, smask_ref, xmask_ref, wmaj_ref, w2_ref, p_ref,
               logits_ref, acc_ref, mem_ref):
        l = pl.program_id(0)

        @pl.when(l == 0)
        def _seed_encoder():
            acc_ref[...] = x_ref[...]

        @pl.when(l == Le)
        def _start_decoder():
            mem_ref[...] = acc_ref[...]       # encoder output -> VMEM "memory"
            acc_ref[...] = x_ref[...]         # decoder stream restarts from input

        def w(r):                              # bf16 D-major weight slice (D, n)
            return wmaj_ref[0, :, r[0]:r[1]]

        def pv(r):                             # f32 small-param slice (1, n)
            return p_ref[0, :, r[0]:r[1]]

        @pl.when(l < Le)
        def _encoder_layer():
            x = acc_ref[...]
            # pre-norm self-attention (fused QKV)
            h = _layer_norm(x, pv(encp["ln1g"]), pv(encp["ln1b"]))
            qkv = _mm(h, w(encw["wqkv"])) + pv(encp["bqkv"])
            a = _sdpa2d(qkv[:, :D], qkv[:, D:2 * D], qkv[:, 2 * D:3 * D],
                        smask_ref[...])
            x = x + _mm(a, w(encw["wo"])) + pv(encp["bo"])
            # pre-norm ReLU feed-forward (bf16 intermediate before w2)
            h = _layer_norm(x, pv(encp["ln2g"]), pv(encp["ln2b"]))
            ff = jnp.maximum(_mm(h, w(encw["w1"])) + pv(encp["b1"]),
                             0.0).astype(jnp.bfloat16)
            ff = jnp.dot(ff, w2_ref[0],
                         preferred_element_type=jnp.float32) + pv(encp["b2"])
            acc_ref[...] = x + ff

        @pl.when(l >= Le)
        def _decoder_layer():
            x = acc_ref[...]
            mem = mem_ref[...]
            # pre-norm masked self-attention (fused QKV)
            h = _layer_norm(x, pv(decp["ln1g"]), pv(decp["ln1b"]))
            qkv = _mm(h, w(decw["swqkv"])) + pv(decp["sbqkv"])
            a = _sdpa2d(qkv[:, :D], qkv[:, D:2 * D], qkv[:, 2 * D:3 * D],
                        smask_ref[...])
            x = x + _mm(a, w(decw["swo"])) + pv(decp["sbo"])
            # pre-norm cross-attention over encoder memory (fused KV, no tril)
            h = _layer_norm(x, pv(decp["ln2g"]), pv(decp["ln2b"]))
            q = _mm(h, w(decw["cwq"])) + pv(decp["cbq"])
            kv = _mm(mem, w(decw["cwkv"])) + pv(decp["cbkv"])
            a = _sdpa2d(q, kv[:, :D], kv[:, D:2 * D], xmask_ref[...])
            x = x + _mm(a, w(decw["cwo"])) + pv(decp["cbo"])
            # pre-norm ReLU feed-forward
            h = _layer_norm(x, pv(decp["ln3g"]), pv(decp["ln3b"]))
            ff = jnp.maximum(_mm(h, w(decw["w1"])) + pv(decp["b1"]),
                             0.0).astype(jnp.bfloat16)
            ff = jnp.dot(ff, w2_ref[0],
                         preferred_element_type=jnp.float32) + pv(decp["b2"])
            x = x + ff
            acc_ref[...] = x

            # fused final projection to num_code logits on the last layer
            @pl.when(l == Le + Ld - 1)
            def _final_projection():
                logits_ref[...] = _mm(x, w(decw["out_w"])) + pv(decp["out_b"])

    return pl.pallas_call(
        kernel,
        out_shape=jax.ShapeDtypeStruct((M, C), jnp.float32),
        grid_spec=pltpu.PrefetchScalarGridSpec(
            num_scalar_prefetch=0,
            grid=(L,),
            in_specs=[
                pl.BlockSpec((M, D), lambda l: (0, 0)),        # embedded input (resident)
                pl.BlockSpec((M, M), lambda l: (0, 0)),        # self-attn mask (resident)
                pl.BlockSpec((M, M), lambda l: (0, 0)),        # cross-attn mask (resident)
                pl.BlockSpec((1, D, NW), lambda l: (l, 0, 0)),  # per-layer bf16 D-major slab
                pl.BlockSpec((1, F, D), lambda l: (l, 0, 0)),   # per-layer bf16 FFN w2
                pl.BlockSpec((1, 1, NP), lambda l: (l, 0, 0)),  # per-layer f32 biases/LN
            ],
            out_specs=pl.BlockSpec((M, C), lambda l: (0, 0)),
            scratch_shapes=[pltpu.VMEM((M, D), jnp.float32),    # resident activation
                            pltpu.VMEM((M, D), jnp.float32)],   # encoder memory
        ),
        compiler_params=pltpu.CompilerParams(
            dimension_semantics=("arbitrary",),                 # layer axis is sequential
            vmem_limit_bytes=32 * 1024 * 1024,
        ),
    )(x2d, smask, xmask, wmaj, w2slab, pslab)


# ------------------------------ parameter init -------------------------------
def init_params(key, *, D, F, num_code, num_visits, num_gender, num_race,
                num_encoder_layers, num_decoder_layers):
    C = num_code
    Le, Ld = num_encoder_layers, num_decoder_layers
    encw, decw, NW = _wcols(D, F, C)
    encp, decp, NP = _pcols(D, F, C)
    sq = 1.0 / math.sqrt(D)                 # folded attention scale

    key_iter = iter(jax.random.split(key, 256))

    def nrm(shape, scale=0.02):
        return jax.random.normal(next(key_iter), shape, jnp.float32) * scale

    def pack_w(cols, pieces):
        slab = jnp.zeros((D, NW), jnp.float32)
        for name, val in pieces.items():
            a, b = cols[name]
            slab = slab.at[:, a:b].set(val)
        return slab

    def pack_p(cols, pieces):
        vec = jnp.zeros((NP,), jnp.float32)
        for name, val in pieces.items():
            a, b = cols[name]
            vec = vec.at[a:b].set(val)
        return vec

    wmaj, pvec, w2s = [], [], []

    for _ in range(Le):
        wqkv = jnp.concatenate([nrm((D, D)) * sq, nrm((D, 2 * D))], axis=1)
        bqkv = jnp.concatenate([nrm((D,)) * sq, nrm((2 * D,))])
        wmaj.append(pack_w(encw, dict(wqkv=wqkv, wo=nrm((D, D)), w1=nrm((D, F)))))
        pvec.append(pack_p(encp, dict(
            ln1g=jnp.ones(D), ln1b=jnp.zeros(D), bqkv=bqkv, bo=nrm((D,)),
            ln2g=jnp.ones(D), ln2b=jnp.zeros(D), b1=nrm((F,)), b2=nrm((D,)))))
        w2s.append(nrm((F, D)))

    out_w = nrm((D, C))
    out_b = nrm((C,))
    for li in range(Ld):
        last = (li == Ld - 1)
        swqkv = jnp.concatenate([nrm((D, D)) * sq, nrm((D, 2 * D))], axis=1)
        sbqkv = jnp.concatenate([nrm((D,)) * sq, nrm((2 * D,))])
        wmaj.append(pack_w(decw, dict(
            swqkv=swqkv, swo=nrm((D, D)),
            cwq=nrm((D, D)) * sq, cwkv=nrm((D, 2 * D)), cwo=nrm((D, D)),
            w1=nrm((D, F)),
            out_w=out_w if last else jnp.zeros((D, C), jnp.float32))))
        pvec.append(pack_p(decp, dict(
            ln1g=jnp.ones(D), ln1b=jnp.zeros(D), sbqkv=sbqkv, sbo=nrm((D,)),
            ln2g=jnp.ones(D), ln2b=jnp.zeros(D),
            cbq=nrm((D,)) * sq, cbkv=nrm((2 * D,)), cbo=nrm((D,)),
            ln3g=jnp.ones(D), ln3b=jnp.zeros(D),
            b1=nrm((F,)), b2=nrm((D,)),
            out_b=out_b if last else jnp.zeros((C,), jnp.float32))))
        w2s.append(nrm((F, D)))

    L = Le + Ld
    return dict(
        visit_number_emb=nrm((num_visits, D)),
        gender_emb=nrm((num_gender, D)),
        race_emb=nrm((num_race, D)),
        age_w=nrm((1, D)), age_b=nrm((D,)),
        pos_w=nrm((2, D)), pos_b=nrm((D,)),
        visit_emb=nrm((num_code, D)),
        # NOTE: embedding_projection = Linear(6D, D) exists in __init__ but is
        # never used in forward(), so it is not materialized here.
        wmaj=jnp.stack(wmaj).astype(jnp.bfloat16),            # (L, D, NW)
        w2=jnp.stack(w2s).astype(jnp.bfloat16),               # (L, F, D)
        pvec=jnp.stack(pvec).reshape(L, 1, NP),               # (L, 1, NP) f32
        num_encoder_layers=Le, num_decoder_layers=Ld,
    )


# --------------------------------- forward -----------------------------------
def transform_ehr_m2_forward(params, x, attn_masks, masks, visit_numbers, gender,
                             race, age, position_encodings, *, nhead=1):
    del attn_masks, masks  # accepted but unused by the PyTorch forward
    assert nhead == 1, "the module's mask reshape only works for nhead == 1"
    B, V, Cv = x.shape
    D = params["visit_emb"].shape[1]
    num_code = params["visit_emb"].shape[0]
    S = V * Cv
    assert S == 20, "the module hard-codes a 20x20 attention mask"

    # --- embedding glue (gathers / tiny linears; not the hot path) ---
    max_visit = params["visit_number_emb"].shape[0] - 1
    vn = jnp.clip(visit_numbers, 0, max_visit)
    emb_vn = params["visit_number_emb"][vn]                                  # (B, V, D)
    emb_g = params["gender_emb"][gender]                                     # (B, D)
    emb_r = params["race_emb"][race]                                         # (B, D)
    emb_age = age.astype(jnp.float32)[:, None] @ params["age_w"] + params["age_b"]
    emb_pos = position_encodings.astype(jnp.float32) @ params["pos_w"] + params["pos_b"]
    emb_x = params["visit_emb"][x]                                           # (B, V, C, D)
    # In the PyTorch forward these are concatenated and then immediately
    # discarded (embedded_input is overwritten by embedded_x.reshape(...)).
    _ = (emb_vn, emb_g, emb_r, emb_age, emb_pos)

    seq2d = emb_x.reshape(B * S, D).astype(jnp.float32)                      # (B*S, D)

    # get_encoder_mask(): additive float tril of ones (PyTorch float-mask
    # semantics, bug reproduced) in the diagonal blocks; -1e9 suppresses the
    # cross-batch blocks of the block-diagonal 2D attention.
    tril = jnp.tril(jnp.ones((S, S), jnp.float32))
    blk = jnp.kron(jnp.eye(B, dtype=jnp.float32), jnp.ones((S, S), jnp.float32))
    smask = jnp.where(blk > 0, jnp.kron(jnp.eye(B, dtype=jnp.float32), tril), NEG)
    xmask = jnp.where(blk > 0, 0.0, NEG)

    logits2d = _fused_transformer(
        seq2d, smask, xmask, params["wmaj"], params["w2"], params["pvec"],
        Le=params["num_encoder_layers"], Ld=params["num_decoder_layers"],
        num_code=num_code)
    return logits2d.reshape(B, S, num_code)


# ----------------------------------- main ------------------------------------
if __name__ == "__main__":
    key = jax.random.PRNGKey(0)

    B, V, C = 2, 4, 5                 # S = V*C = 20 (required by the module)
    D, F = 128, 2048                  # embedding_dim default, PyTorch dff default
    num_code = 128
    num_visits_table = 16
    nhead = 1                         # forced by the mask reshape in forward()
    num_encoder_layers = 2
    num_decoder_layers = 2

    pkey, dkey = jax.random.split(key)
    params = init_params(pkey, D=D, F=F, num_code=num_code,
                         num_visits=num_visits_table, num_gender=2, num_race=33,
                         num_encoder_layers=num_encoder_layers,
                         num_decoder_layers=num_decoder_layers)

    ks = jax.random.split(dkey, 8)
    x = jax.random.randint(ks[0], (B, V, C), 0, num_code)
    visit_numbers = jax.random.randint(ks[1], (B, V), 0, 30)        # gets clamped
    gender = jax.random.randint(ks[2], (B,), 0, 2)
    race = jax.random.randint(ks[3], (B,), 0, 33)
    age = jax.random.randint(ks[4], (B,), 20, 90)
    position_encodings = jax.random.randint(ks[5], (B, V, 2), 0, 10)
    attn_masks = jnp.ones((B, V * C), jnp.int32)                    # unused by forward
    masks = jnp.ones((B, V * C), jnp.int32)                         # unused by forward

    logits = transform_ehr_m2_forward(params, x, attn_masks, masks, visit_numbers,
                                      gender, race, age, position_encodings,
                                      nhead=nhead)
    jax.block_until_ready(logits)
    assert logits.shape == (B, V * C, num_code)
    assert bool(jnp.all(jnp.isfinite(logits)))
    print("KERNEL_OK")
</pallas_src>

<mosaic_0001>
module attributes {stable_mosaic.version = 11 : i64} {
  func.func @kernel(%arg0: i32, %arg1: memref<40x128xf32, #tpu.memory_space<vmem>>, %arg2: memref<40x40xf32, #tpu.memory_space<vmem>>, %arg3: memref<40x40xf32, #tpu.memory_space<vmem>>, %arg4: memref<1x128x3200xbf16, #tpu.memory_space<vmem>>, %arg5: memref<1x2048x128xbf16, #tpu.memory_space<vmem>>, %arg6: memref<1x1x4096xf32, #tpu.memory_space<vmem>>, %arg7: memref<40x128xf32, #tpu.memory_space<vmem>>, %arg8: memref<40x128xf32, #tpu.memory_space<vmem>>, %arg9: memref<40x128xf32, #tpu.memory_space<vmem>>) attributes {dimension_semantics = [#tpu.dimension_semantics<arbitrary>], iteration_bounds = array<i64: 4>, scalar_prefetch = 0 : i64, scratch_operands = 2 : i64, tpu.core_type = #tpu.core_type<tc>, window_params = [{pipeline_mode = #tpu.pipeline_mode<synchronous>, transform_indices = @transform_0, window_bounds = array<i64: 40, 128>}, {pipeline_mode = #tpu.pipeline_mode<synchronous>, transform_indices = @transform_1, window_bounds = array<i64: 40, 40>}, {pipeline_mode = #tpu.pipeline_mode<synchronous>, transform_indices = @transform_2, window_bounds = array<i64: 40, 40>}, {transform_indices = @transform_3, window_bounds = array<i64: 1, 128, 3200>}, {transform_indices = @transform_4, window_bounds = array<i64: 1, 2048, 128>}, {transform_indices = @transform_5, window_bounds = array<i64: 1, 1, 4096>}, {pipeline_mode = #tpu.pipeline_mode<synchronous>, transform_indices = @transform_6, window_bounds = array<i64: 40, 128>}]} {
    %c0_i32 = arith.constant 0 : i32
    %0 = arith.cmpi eq, %arg0, %c0_i32 : i32
    %1 = arith.extui %0 : i1 to i32
    %c0_i32_0 = arith.constant 0 : i32
    %2 = arith.cmpi ne, %1, %c0_i32_0 : i32
    scf.if %2 {
      %c0 = arith.constant 0 : index
      %c0_6 = arith.constant 0 : index
      %12 = vector.load %arg1[%c0, %c0_6] : memref<40x128xf32, #tpu.memory_space<vmem>>, vector<40x128xf32>
      %c0_7 = arith.constant 0 : index
      %c0_8 = arith.constant 0 : index
      %13 = vector.load %arg8[%c0_7, %c0_8] : memref<40x128xf32, #tpu.memory_space<vmem>>, vector<40x128xf32>
      tpu.vector_store %arg8[%c0_7, %c0_8], %12 {strides = array<i32>} : memref<40x128xf32, #tpu.memory_space<vmem>>, vector<40x128xf32>,
    } else {
    }
    %c2_i32 = arith.constant 2 : i32
    %3 = arith.cmpi eq, %arg0, %c2_i32 : i32
    %4 = arith.extui %3 : i1 to i32
    %c0_i32_1 = arith.constant 0 : i32
    %5 = arith.cmpi ne, %4, %c0_i32_1 : i32
    scf.if %5 {
      %c0 = arith.constant 0 : index
      %c0_6 = arith.constant 0 : index
      %12 = vector.load %arg8[%c0, %c0_6] : memref<40x128xf32, #tpu.memory_space<vmem>>, vector<40x128xf32>
      %c0_7 = arith.constant 0 : index
      %c0_8 = arith.constant 0 : index
      %13 = vector.load %arg9[%c0_7, %c0_8] : memref<40x128xf32, #tpu.memory_space<vmem>>, vector<40x128xf32>
      tpu.vector_store %arg9[%c0_7, %c0_8], %12 {strides = array<i32>} : memref<40x128xf32, #tpu.memory_space<vmem>>, vector<40x128xf32>,
      %c0_9 = arith.constant 0 : index
      %c0_10 = arith.constant 0 : index
      %14 = vector.load %arg1[%c0_9, %c0_10] : memref<40x128xf32, #tpu.memory_space<vmem>>, vector<40x128xf32>
      %c0_11 = arith.constant 0 : index
      %c0_12 = arith.constant 0 : index
      %15 = vector.load %arg8[%c0_11, %c0_12] : memref<40x128xf32, #tpu.memory_space<vmem>>, vector<40x128xf32>
      tpu.vector_store %arg8[%c0_11, %c0_12], %14 {strides = array<i32>} : memref<40x128xf32, #tpu.memory_space<vmem>>, vector<40x128xf32>,
    } else {
    }
    %c2_i32_2 = arith.constant 2 : i32
    %6 = arith.cmpi slt, %arg0, %c2_i32_2 : i32
    %7 = arith.extui %6 : i1 to i32
    %c0_i32_3 = arith.constant 0 : i32
    %8 = arith.cmpi ne, %7, %c0_i32_3 : i32
    scf.if %8 {
      %c0 = arith.constant 0 : index
      %c0_6 = arith.constant 0 : index
      %12 = vector.load %arg8[%c0, %c0_6] : memref<40x128xf32, #tpu.memory_space<vmem>>, vector<40x128xf32>
      %c0_7 = arith.constant 0 : index
      %c0_8 = arith.constant 0 : index
      %c0_9 = arith.constant 0 : index
      %13 = vector.load %arg6[%c0_7, %c0_8, %c0_9] : memref<1x1x4096xf32, #tpu.memory_space<vmem>>, vector<1x1x128xf32>
      %14 = vector.shape_cast %13 : vector<1x1x128xf32> to vector<1x128xf32>
      %c0_10 = arith.constant 0 : index
      %c0_11 = arith.constant 0 : index
      %c128 = arith.constant 128 : index
      %15 = vector.load %arg6[%c0_10, %c0_11, %c128] : memref<1x1x4096xf32, #tpu.memory_space<vmem>>, vector<1x1x128xf32>
      %16 = vector.shape_cast %15 : vector<1x1x128xf32> to vector<1x128xf32>
      %cst = arith.constant dense<0.000000e+00> : vector<40xf32>
      %17 = vector.multi_reduction <add>, %12, %cst [1] : vector<40x128xf32> to vector<40xf32>
      %18 = vector.shape_cast %17 : vector<40xf32> to vector<40x1xf32>
      %cst_12 = arith.constant 1.280000e+02 : f32
      %19 = vector.broadcast %cst_12 : f32 to vector<40x1xf32>
      %20 = arith.divf %18, %19 : vector<40x1xf32>
      %21 = vector.broadcast %20 : vector<40x1xf32> to vector<40x128xf32>
      %22 = arith.subf %12, %21 : vector<40x128xf32>
      %23 = arith.mulf %22, %22 : vector<40x128xf32>
      %cst_13 = arith.constant dense<0.000000e+00> : vector<40xf32>
      %24 = vector.multi_reduction <add>, %23, %cst_13 [1] : vector<40x128xf32> to vector<40xf32>
      %25 = vector.shape_cast %24 : vector<40xf32> to vector<40x1xf32>
      %cst_14 = arith.constant 1.280000e+02 : f32
      %26 = vector.broadcast %cst_14 : f32 to vector<40x1xf32>
      %27 = arith.divf %25, %26 : vector<40x1xf32>
      %28 = vector.broadcast %20 : vector<40x1xf32> to vector<40x128xf32>
      %29 = arith.subf %12, %28 : vector<40x128xf32>
      %cst_15 = arith.constant 9.99999974E-6 : f32
      %30 = vector.broadcast %cst_15 : f32 to vector<40x1xf32>
      %31 = arith.addf %27, %30 : vector<40x1xf32>
      %32 = math.rsqrt %31 : vector<40x1xf32>
      %33 = vector.broadcast %32 : vector<40x1xf32> to vector<40x128xf32>
      %34 = arith.mulf %29, %33 : vector<40x128xf32>
      %35 = vector.broadcast %14 : vector<1x128xf32> to vector<40x128xf32>
      %36 = arith.mulf %34, %35 : vector<40x128xf32>
      %37 = vector.broadcast %16 : vector<1x128xf32> to vector<40x128xf32>
      %38 = arith.addf %36, %37 : vector<40x128xf32>
      %c0_16 = arith.constant 0 : index
      %c0_17 = arith.constant 0 : index
      %c0_18 = arith.constant 0 : index
      %39 = vector.load %arg4[%c0_16, %c0_17, %c0_18] : memref<1x128x3200xbf16, #tpu.memory_space<vmem>>, vector<1x128x384xbf16>
      %40 = vector.shape_cast %39 : vector<1x128x384xbf16> to vector<128x384xbf16>
      %41 = arith.truncf %38 : vector<40x128xf32> to vector<40x128xbf16>
      %cst_19 = arith.constant dense<0.000000e+00> : vector<40x384xf32>
      %42 = tpu.matmul %41, %40, %cst_19 {dimension_numbers = #tpu.dot_dimension_numbers<[1], [0], [0], [1], [0, 0, 1, 1], [], []>} : vector<40x128xbf16>, vector<128x384xbf16>, vector<40x384xf32> -> vector<40x384xf32>
      %c0_20 = arith.constant 0 : index
      %c0_21 = arith.constant 0 : index
      %c256 = arith.constant 256 : index
      %43 = vector.load %arg6[%c0_20, %c0_21, %c256] : memref<1x1x4096xf32, #tpu.memory_space<vmem>>, vector<1x1x384xf32>
      %44 = vector.shape_cast %43 : vector<1x1x384xf32> to vector<1x384xf32>
      %45 = vector.broadcast %44 : vector<1x384xf32> to vector<40x384xf32>
      %46 = arith.addf %42, %45 : vector<40x384xf32>
      %47 = vector.extract_strided_slice %46 {offsets = [0, 0], sizes = [40, 128], strides = [1, 1]} : vector<40x384xf32> to vector<40x128xf32>
      %48 = vector.extract_strided_slice %46 {offsets = [0, 128], sizes = [40, 128], strides = [1, 1]} : vector<40x384xf32> to vector<40x128xf32>
      %49 = vector.extract_strided_slice %46 {offsets = [0, 256], sizes = [40, 128], strides = [1, 1]} : vector<40x384xf32> to vector<40x128xf32>
      %c0_22 = arith.constant 0 : index
      %c0_23 = arith.constant 0 : index
      %50 = vector.load %arg2[%c0_22, %c0_23] : memref<40x40xf32, #tpu.memory_space<vmem>>, vector<40x40xf32>
      %51 = arith.truncf %47 : vector<40x128xf32> to vector<40x128xbf16>
      %52 = arith.truncf %48 : vector<40x128xf32> to vector<40x128xbf16>
      %cst_24 = arith.constant dense<0.000000e+00> : vector<40x40xf32>
      %53 = tpu.matmul %51, %52, %cst_24 {dimension_numbers = #tpu.dot_dimension_numbers<[1], [1], [0], [0], [0, 0, 1, 0], [], []>} : vector<40x128xbf16>, vector<40x128xbf16>, vector<40x40xf32> -> vector<40x40xf32>
      %54 = arith.addf %53, %50 : vector<40x40xf32>
      %cst_25 = arith.constant dense<0xFF800000> : vector<40xf32>
      %55 = vector.multi_reduction <maximumf>, %54, %cst_25 [1] : vector<40x40xf32> to vector<40xf32>
      %56 = vector.shape_cast %55 : vector<40xf32> to vector<40x1xf32>
      %57 = vector.broadcast %56 : vector<40x1xf32> to vector<40x40xf32>
      %58 = arith.subf %54, %57 : vector<40x40xf32>
      %59 = math.exp %58 : vector<40x40xf32>
      %cst_26 = arith.constant dense<0.000000e+00> : vector<40xf32>
      %60 = vector.multi_reduction <add>, %59, %cst_26 [1] : vector<40x40xf32> to vector<40xf32>
      %61 = vector.shape_cast %60 : vector<40xf32> to vector<40x1xf32>
      %62 = tpu.reciprocal %61 {approx = true} : vector<40x1xf32> -> vector<40x1xf32>
      %63 = vector.broadcast %62 : vector<40x1xf32> to vector<40x40xf32>
      %64 = arith.mulf %59, %63 : vector<40x40xf32>
      %65 = arith.truncf %64 : vector<40x40xf32> to vector<40x40xbf16>
      %66 = arith.truncf %49 : vector<40x128xf32> to vector<40x128xbf16>
      %cst_27 = arith.constant dense<0.000000e+00> : vector<40x128xf32>
      %67 = tpu.matmul %65, %66, %cst_27 {dimension_numbers = #tpu.dot_dimension_numbers<[1], [0], [0], [1], [0, 0, 1, 1], [], []>} : vector<40x40xbf16>, vector<40x128xbf16>, vector<40x128xf32> -> vector<40x128xf32>
      %c0_28 = arith.constant 0 : index
      %c0_29 = arith.constant 0 : index
      %c384 = arith.constant 384 : index
      %68 = vector.load %arg4[%c0_28, %c0_29, %c384] : memref<1x128x3200xbf16, #tpu.memory_space<vmem>>, vector<1x128x128xbf16>
      %69 = vector.shape_cast %68 : vector<1x128x128xbf16> to vector<128x128xbf16>
      %70 = arith.truncf %67 : vector<40x128xf32> to vector<40x128xbf16>
      %cst_30 = arith.constant dense<0.000000e+00> : vector<40x128xf32>
      %71 = tpu.matmul %70, %69, %cst_30 {dimension_numbers = #tpu.dot_dimension_numbers<[1], [0], [0], [1], [0, 0, 1, 1], [], []>} : vector<40x128xbf16>, vector<128x128xbf16>, vector<40x128xf32> -> vector<40x128xf32>
      %72 = arith.addf %12, %71 : vector<40x128xf32>
      %c0_31 = arith.constant 0 : index
      %c0_32 = arith.constant 0 : index
      %c640 = arith.constant 640 : index
      %73 = vector.load %arg6[%c0_31, %c0_32, %c640] : memref<1x1x4096xf32, #tpu.memory_space<vmem>>, vector<1x1x128xf32>
      %74 = vector.shape_cast %73 : vector<1x1x128xf32> to vector<1x128xf32>
      %75 = vector.broadcast %74 : vector<1x128xf32> to vector<40x128xf32>
      %76 = arith.addf %72, %75 : vector<40x128xf32>
      %c0_33 = arith.constant 0 : index
      %c0_34 = arith.constant 0 : index
      %c768 = arith.constant 768 : index
      %77 = vector.load %arg6[%c0_33, %c0_34, %c768] : memref<1x1x4096xf32, #tpu.memory_space<vmem>>, vector<1x1x128xf32>
      %78 = vector.shape_cast %77 : vector<1x1x128xf32> to vector<1x128xf32>
      %c0_35 = arith.constant 0 : index
      %c0_36 = arith.constant 0 : index
      %c896 = arith.constant 896 : index
      %79 = vector.load %arg6[%c0_35, %c0_36, %c896] : memref<1x1x4096xf32, #tpu.memory_space<vmem>>, vector<1x1x128xf32>
      %80 = vector.shape_cast %79 : vector<1x1x128xf32> to vector<1x128xf32>
      %cst_37 = arith.constant dense<0.000000e+00> : vector<40xf32>
      %81 = vector.multi_reduction <add>, %76, %cst_37 [1] : vector<40x128xf32> to vector<40xf32>
      %82 = vector.shape_cast %81 : vector<40xf32> to vector<40x1xf32>
      %cst_38 = arith.constant 1.280000e+02 : f32
      %83 = vector.broadcast %cst_38 : f32 to vector<40x1xf32>
      %84 = arith.divf %82, %83 : vector<40x1xf32>
      %85 = vector.broadcast %84 : vector<40x1xf32> to vector<40x128xf32>
      %86 = arith.subf %76, %85 : vector<40x128xf32>
      %87 = arith.mulf %86, %86 : vector<40x128xf32>
      %cst_39 = arith.constant dense<0.000000e+00> : vector<40xf32>
      %88 = vector.multi_reduction <add>, %87, %cst_39 [1] : vector<40x128xf32> to vector<40xf32>
      %89 = vector.shape_cast %88 : vector<40xf32> to vector<40x1xf32>
      %cst_40 = arith.constant 1.280000e+02 : f32
      %90 = vector.broadcast %cst_40 : f32 to vector<40x1xf32>
      %91 = arith.divf %89, %90 : vector<40x1xf32>
      %92 = vector.broadcast %84 : vector<40x1xf32> to vector<40x128xf32>
      %93 = arith.subf %76, %92 : vector<40x128xf32>
      %cst_41 = arith.constant 9.99999974E-6 : f32
      %94 = vector.broadcast %cst_41 : f32 to vector<40x1xf32>
      %95 = arith.addf %91, %94 : vector<40x1xf32>
      %96 = math.rsqrt %95 : vector<40x1xf32>
      %97 = vector.broadcast %96 : vector<40x1xf32> to vector<40x128xf32>
      %98 = arith.mulf %93, %97 : vector<40x128xf32>
      %99 = vector.broadcast %78 : vector<1x128xf32> to vector<40x128xf32>
      %100 = arith.mulf %98, %99 : vector<40x128xf32>
      %101 = vector.broadcast %80 : vector<1x128xf32> to vector<40x128xf32>
      %102 = arith.addf %100, %101 : vector<40x128xf32>
      %c0_42 = arith.constant 0 : index
      %c0_43 = arith.constant 0 : index
      %c512 = arith.constant 512 : index
      %103 = vector.load %arg4[%c0_42, %c0_43, %c512] : memref<1x128x3200xbf16, #tpu.memory_space<vmem>>, vector<1x128x2048xbf16>
      %104 = vector.shape_cast %103 : vector<1x128x2048xbf16> to vector<128x2048xbf16>
      %105 = arith.truncf %102 : vector<40x128xf32> to vector<40x128xbf16>
      %cst_44 = arith.constant dense<0.000000e+00> : vector<40x2048xf32>
      %106 = tpu.matmul %105, %104, %cst_44 {dimension_numbers = #tpu.dot_dimension_numbers<[1], [0], [0], [1], [0, 0, 1, 1], [], []>} : vector<40x128xbf16>, vector<128x2048xbf16>, vector<40x2048xf32> -> vector<40x2048xf32>
      %c0_45 = arith.constant 0 : index
      %c0_46 = arith.constant 0 : index
      %c1024 = arith.constant 1024 : index
      %107 = vector.load %arg6[%c0_45, %c0_46, %c1024] : memref<1x1x4096xf32, #tpu.memory_space<vmem>>, vector<1x1x2048xf32>
      %108 = vector.shape_cast %107 : vector<1x1x2048xf32> to vector<1x2048xf32>
      %109 = vector.broadcast %108 : vector<1x2048xf32> to vector<40x2048xf32>
      %110 = arith.addf %106, %109 : vector<40x2048xf32>
      %cst_47 = arith.constant 0.000000e+00 : f32
      %111 = vector.broadcast %cst_47 : f32 to vector<40x2048xf32>
      %112 = arith.maximumf %110, %111 : vector<40x2048xf32>
      %113 = arith.truncf %112 : vector<40x2048xf32> to vector<40x2048xbf16>
      %c0_48 = arith.constant 0 : index
      %c0_49 = arith.constant 0 : index
      %c0_50 = arith.constant 0 : index
      %114 = vector.load %arg5[%c0_48, %c0_49, %c0_50] : memref<1x2048x128xbf16, #tpu.memory_space<vmem>>, vector<1x2048x128xbf16>
      %115 = vector.shape_cast %114 : vector<1x2048x128xbf16> to vector<2048x128xbf16>
      %cst_51 = arith.constant dense<0.000000e+00> : vector<40x128xf32>
      %116 = tpu.matmul %113, %115, %cst_51 {dimension_numbers = #tpu.dot_dimension_numbers<[1], [0], [0], [1], [0, 0, 1, 1], [], []>} : vector<40x2048xbf16>, vector<2048x128xbf16>, vector<40x128xf32> -> vector<40x128xf32>
      %c0_52 = arith.constant 0 : index
      %c0_53 = arith.constant 0 : index
      %c3072 = arith.constant 3072 : index
      %117 = vector.load %arg6[%c0_52, %c0_53, %c3072] : memref<1x1x4096xf32, #tpu.memory_space<vmem>>, vector<1x1x128xf32>
      %118 = vector.shape_cast %117 : vector<1x1x128xf32> to vector<1x128xf32>
      %119 = vector.broadcast %118 : vector<1x128xf32> to vector<40x128xf32>
      %120 = arith.addf %116, %119 : vector<40x128xf32>
      %121 = arith.addf %76, %120 : vector<40x128xf32>
      %c0_54 = arith.constant 0 : index
      %c0_55 = arith.constant 0 : index
      %122 = vector.load %arg8[%c0_54, %c0_55] : memref<40x128xf32, #tpu.memory_space<vmem>>, vector<40x128xf32>
      tpu.vector_store %arg8[%c0_54, %c0_55], %121 {strides = array<i32>} : memref<40x128xf32, #tpu.memory_space<vmem>>, vector<40x128xf32>,
    } else {
    }
    %c2_i32_4 = arith.constant 2 : i32
    %9 = arith.cmpi sge, %arg0, %c2_i32_4 : i32
    %10 = arith.extui %9 : i1 to i32
    %c0_i32_5 = arith.constant 0 : i32
    %11 = arith.cmpi ne, %10, %c0_i32_5 : i32
    scf.if %11 {
      %c0 = arith.constant 0 : index
      %c0_6 = arith.constant 0 : index
      %12 = vector.load %arg8[%c0, %c0_6] : memref<40x128xf32, #tpu.memory_space<vmem>>, vector<40x128xf32>
      %c0_7 = arith.constant 0 : index
      %c0_8 = arith.constant 0 : index
      %13 = vector.load %arg9[%c0_7, %c0_8] : memref<40x128xf32, #tpu.memory_space<vmem>>, vector<40x128xf32>
      %c0_9 = arith.constant 0 : index
      %c0_10 = arith.constant 0 : index
      %c0_11 = arith.constant 0 : index
      %14 = vector.load %arg6[%c0_9, %c0_10, %c0_11] : memref<1x1x4096xf32, #tpu.memory_space<vmem>>, vector<1x1x128xf32>
      %15 = vector.shape_cast %14 : vector<1x1x128xf32> to vector<1x128xf32>
      %c0_12 = arith.constant 0 : index
      %c0_13 = arith.constant 0 : index
      %c128 = arith.constant 128 : index
      %16 = vector.load %arg6[%c0_12, %c0_13, %c128] : memref<1x1x4096xf32, #tpu.memory_space<vmem>>, vector<1x1x128xf32>
      %17 = vector.shape_cast %16 : vector<1x1x128xf32> to vector<1x128xf32>
      %cst = arith.constant dense<0.000000e+00> : vector<40xf32>
      %18 = vector.multi_reduction <add>, %12, %cst [1] : vector<40x128xf32> to vector<40xf32>
      %19 = vector.shape_cast %18 : vector<40xf32> to vector<40x1xf32>
      %cst_14 = arith.constant 1.280000e+02 : f32
      %20 = vector.broadcast %cst_14 : f32 to vector<40x1xf32>
      %21 = arith.divf %19, %20 : vector<40x1xf32>
      %22 = vector.broadcast %21 : vector<40x1xf32> to vector<40x128xf32>
      %23 = arith.subf %12, %22 : vector<40x128xf32>
      %24 = arith.mulf %23, %23 : vector<40x128xf32>
      %cst_15 = arith.constant dense<0.000000e+00> : vector<40xf32>
      %25 = vector.multi_reduction <add>, %24, %cst_15 [1] : vector<40x128xf32> to vector<40xf32>
      %26 = vector.shape_cast %25 : vector<40xf32> to vector<40x1xf32>
      %cst_16 = arith.constant 1.280000e+02 : f32
      %27 = vector.broadcast %cst_16 : f32 to vector<40x1xf32>
      %28 = arith.divf %26, %27 : vector<40x1xf32>
      %29 = vector.broadcast %21 : vector<40x1xf32> to vector<40x128xf32>
      %30 = arith.subf %12, %29 : vector<40x128xf32>
      %cst_17 = arith.constant 9.99999974E-6 : f32
      %31 = vector.broadcast %cst_17 : f32 to vector<40x1xf32>
      %32 = arith.addf %28, %31 : vector<40x1xf32>
      %33 = math.rsqrt %32 : vector<40x1xf32>
      %34 = vector.broadcast %33 : vector<40x1xf32> to vector<40x128xf32>
      %35 = arith.mulf %30, %34 : vector<40x128xf32>
      %36 = vector.broadcast %15 : vector<1x128xf32> to vector<40x128xf32>
      %37 = arith.mulf %35, %36 : vector<40x128xf32>
      %38 = vector.broadcast %17 : vector<1x128xf32> to vector<40x128xf32>
      %39 = arith.addf %37, %38 : vector<40x128xf32>
      %c0_18 = arith.constant 0 : index
      %c0_19 = arith.constant 0 : index
      %c0_20 = arith.constant 0 : index
      %40 = vector.load %arg4[%c0_18, %c0_19, %c0_20] : memref<1x128x3200xbf16, #tpu.memory_space<vmem>>, vector<1x128x384xbf16>
      %41 = vector.shape_cast %40 : vector<1x128x384xbf16> to vector<128x384xbf16>
      %42 = arith.truncf %39 : vector<40x128xf32> to vector<40x128xbf16>
      %cst_21 = arith.constant dense<0.000000e+00> : vector<40x384xf32>
      %43 = tpu.matmul %42, %41, %cst_21 {dimension_numbers = #tpu.dot_dimension_numbers<[1], [0], [0], [1], [0, 0, 1, 1], [], []>} : vector<40x128xbf16>, vector<128x384xbf16>, vector<40x384xf32> -> vector<40x384xf32>
      %c0_22 = arith.constant 0 : index
      %c0_23 = arith.constant 0 : index
      %c256 = arith.constant 256 : index
      %44 = vector.load %arg6[%c0_22, %c0_23, %c256] : memref<1x1x4096xf32, #tpu.memory_space<vmem>>, vector<1x1x384xf32>
      %45 = vector.shape_cast %44 : vector<1x1x384xf32> to vector<1x384xf32>
      %46 = vector.broadcast %45 : vector<1x384xf32> to vector<40x384xf32>
      %47 = arith.addf %43, %46 : vector<40x384xf32>
      %48 = vector.extract_strided_slice %47 {offsets = [0, 0], sizes = [40, 128], strides = [1, 1]} : vector<40x384xf32> to vector<40x128xf32>
      %49 = vector.extract_strided_slice %47 {offsets = [0, 128], sizes = [40, 128], strides = [1, 1]} : vector<40x384xf32> to vector<40x128xf32>
      %50 = vector.extract_strided_slice %47 {offsets = [0, 256], sizes = [40, 128], strides = [1, 1]} : vector<40x384xf32> to vector<40x128xf32>
      %c0_24 = arith.constant 0 : index
      %c0_25 = arith.constant 0 : index
      %51 = vector.load %arg2[%c0_24, %c0_25] : memref<40x40xf32, #tpu.memory_space<vmem>>, vector<40x40xf32>
      %52 = arith.truncf %48 : vector<40x128xf32> to vector<40x128xbf16>
      %53 = arith.truncf %49 : vector<40x128xf32> to vector<40x128xbf16>
      %cst_26 = arith.constant dense<0.000000e+00> : vector<40x40xf32>
      %54 = tpu.matmul %52, %53, %cst_26 {dimension_numbers = #tpu.dot_dimension_numbers<[1], [1], [0], [0], [0, 0, 1, 0], [], []>} : vector<40x128xbf16>, vector<40x128xbf16>, vector<40x40xf32> -> vector<40x40xf32>
      %55 = arith.addf %54, %51 : vector<40x40xf32>
      %cst_27 = arith.constant dense<0xFF800000> : vector<40xf32>
      %56 = vector.multi_reduction <maximumf>, %55, %cst_27 [1] : vector<40x40xf32> to vector<40xf32>
      %57 = vector.shape_cast %56 : vector<40xf32> to vector<40x1xf32>
      %58 = vector.broadcast %57 : vector<40x1xf32> to vector<40x40xf32>
      %59 = arith.subf %55, %58 : vector<40x40xf32>
      %60 = math.exp %59 : vector<40x40xf32>
      %cst_28 = arith.constant dense<0.000000e+00> : vector<40xf32>
      %61 = vector.multi_reduction <add>, %60, %cst_28 [1] : vector<40x40xf32> to vector<40xf32>
      %62 = vector.shape_cast %61 : vector<40xf32> to vector<40x1xf32>
      %63 = tpu.reciprocal %62 {approx = true} : vector<40x1xf32> -> vector<40x1xf32>
      %64 = vector.broadcast %63 : vector<40x1xf32> to vector<40x40xf32>
      %65 = arith.mulf %60, %64 : vector<40x40xf32>
      %66 = arith.truncf %65 : vector<40x40xf32> to vector<40x40xbf16>
      %67 = arith.truncf %50 : vector<40x128xf32> to vector<40x128xbf16>
      %cst_29 = arith.constant dense<0.000000e+00> : vector<40x128xf32>
      %68 = tpu.matmul %66, %67, %cst_29 {dimension_numbers = #tpu.dot_dimension_numbers<[1], [0], [0], [1], [0, 0, 1, 1], [], []>} : vector<40x40xbf16>, vector<40x128xbf16>, vector<40x128xf32> -> vector<40x128xf32>
      %c0_30 = arith.constant 0 : index
      %c0_31 = arith.constant 0 : index
      %c384 = arith.constant 384 : index
      %69 = vector.load %arg4[%c0_30, %c0_31, %c384] : memref<1x128x3200xbf16, #tpu.memory_space<vmem>>, vector<1x128x128xbf16>
      %70 = vector.shape_cast %69 : vector<1x128x128xbf16> to vector<128x128xbf16>
      %71 = arith.truncf %68 : vector<40x128xf32> to vector<40x128xbf16>
      %cst_32 = arith.constant dense<0.000000e+00> : vector<40x128xf32>
      %72 = tpu.matmul %71, %70, %cst_32 {dimension_numbers = #tpu.dot_dimension_numbers<[1], [0], [0], [1], [0, 0, 1, 1], [], []>} : vector<40x128xbf16>, vector<128x128xbf16>, vector<40x128xf32> -> vector<40x128xf32>
      %73 = arith.addf %12, %72 : vector<40x128xf32>
      %c0_33 = arith.constant 0 : index
      %c0_34 = arith.constant 0 : index
      %c640 = arith.constant 640 : index
      %74 = vector.load %arg6[%c0_33, %c0_34, %c640] : memref<1x1x4096xf32, #tpu.memory_space<vmem>>, vector<1x1x128xf32>
      %75 = vector.shape_cast %74 : vector<1x1x128xf32> to vector<1x128xf32>
      %76 = vector.broadcast %75 : vector<1x128xf32> to vector<40x128xf32>
      %77 = arith.addf %73, %76 : vector<40x128xf32>
      %c0_35 = arith.constant 0 : index
      %c0_36 = arith.constant 0 : index
      %c768 = arith.constant 768 : index
      %78 = vector.load %arg6[%c0_35, %c0_36, %c768] : memref<1x1x4096xf32, #tpu.memory_space<vmem>>, vector<1x1x128xf32>
      %79 = vector.shape_cast %78 : vector<1x1x128xf32> to vector<1x128xf32>
      %c0_37 = arith.constant 0 : index
      %c0_38 = arith.constant 0 : index
      %c896 = arith.constant 896 : index
      %80 = vector.load %arg6[%c0_37, %c0_38, %c896] : memref<1x1x4096xf32, #tpu.memory_space<vmem>>, vector<1x1x128xf32>
      %81 = vector.shape_cast %80 : vector<1x1x128xf32> to vector<1x128xf32>
      %cst_39 = arith.constant dense<0.000000e+00> : vector<40xf32>
      %82 = vector.multi_reduction <add>, %77, %cst_39 [1] : vector<40x128xf32> to vector<40xf32>
      %83 = vector.shape_cast %82 : vector<40xf32> to vector<40x1xf32>
      %cst_40 = arith.constant 1.280000e+02 : f32
      %84 = vector.broadcast %cst_40 : f32 to vector<40x1xf32>
      %85 = arith.divf %83, %84 : vector<40x1xf32>
      %86 = vector.broadcast %85 : vector<40x1xf32> to vector<40x128xf32>
      %87 = arith.subf %77, %86 : vector<40x128xf32>
      %88 = arith.mulf %87, %87 : vector<40x128xf32>
      %cst_41 = arith.constant dense<0.000000e+00> : vector<40xf32>
      %89 = vector.multi_reduction <add>, %88, %cst_41 [1] : vector<40x128xf32> to vector<40xf32>
      %90 = vector.shape_cast %89 : vector<40xf32> to vector<40x1xf32>
      %cst_42 = arith.constant 1.280000e+02 : f32
      %91 = vector.broadcast %cst_42 : f32 to vector<40x1xf32>
      %92 = arith.divf %90, %91 : vector<40x1xf32>
      %93 = vector.broadcast %85 : vector<40x1xf32> to vector<40x128xf32>
      %94 = arith.subf %77, %93 : vector<40x128xf32>
      %cst_43 = arith.constant 9.99999974E-6 : f32
      %95 = vector.broadcast %cst_43 : f32 to vector<40x1xf32>
      %96 = arith.addf %92, %95 : vector<40x1xf32>
      %97 = math.rsqrt %96 : vector<40x1xf32>
      %98 = vector.broadcast %97 : vector<40x1xf32> to vector<40x128xf32>
      %99 = arith.mulf %94, %98 : vector<40x128xf32>
      %100 = vector.broadcast %79 : vector<1x128xf32> to vector<40x128xf32>
      %101 = arith.mulf %99, %100 : vector<40x128xf32>
      %102 = vector.broadcast %81 : vector<1x128xf32> to vector<40x128xf32>
      %103 = arith.addf %101, %102 : vector<40x128xf32>
      %c0_44 = arith.constant 0 : index
      %c0_45 = arith.constant 0 : index
      %c512 = arith.constant 512 : index
      %104 = vector.load %arg4[%c0_44, %c0_45, %c512] : memref<1x128x3200xbf16, #tpu.memory_space<vmem>>, vector<1x128x128xbf16>
      %105 = vector.shape_cast %104 : vector<1x128x128xbf16> to vector<128x128xbf16>
      %106 = arith.truncf %103 : vector<40x128xf32> to vector<40x128xbf16>
      %cst_46 = arith.constant dense<0.000000e+00> : vector<40x128xf32>
      %107 = tpu.matmul %106, %105, %cst_46 {dimension_numbers = #tpu.dot_dimension_numbers<[1], [0], [0], [1], [0, 0, 1, 1], [], []>} : vector<40x128xbf16>, vector<128x128xbf16>, vector<40x128xf32> -> vector<40x128xf32>
      %c0_47 = arith.constant 0 : index
      %c0_48 = arith.constant 0 : index
      %c1024 = arith.constant 1024 : index
      %108 = vector.load %arg6[%c0_47, %c0_48, %c1024] : memref<1x1x4096xf32, #tpu.memory_space<vmem>>, vector<1x1x128xf32>
      %109 = vector.shape_cast %108 : vector<1x1x128xf32> to vector<1x128xf32>
      %110 = vector.broadcast %109 : vector<1x128xf32> to vector<40x128xf32>
      %111 = arith.addf %107, %110 : vector<40x128xf32>
      %c0_49 = arith.constant 0 : index
      %c0_50 = arith.constant 0 : index
      %c640_51 = arith.constant 640 : index
      %112 = vector.load %arg4[%c0_49, %c0_50, %c640_51] : memref<1x128x3200xbf16, #tpu.memory_space<vmem>>, vector<1x128x256xbf16>
      %113 = vector.shape_cast %112 : vector<1x128x256xbf16> to vector<128x256xbf16>
      %114 = arith.truncf %13 : vector<40x128xf32> to vector<40x128xbf16>
      %cst_52 = arith.constant dense<0.000000e+00> : vector<40x256xf32>
      %115 = tpu.matmul %114, %113, %cst_52 {dimension_numbers = #tpu.dot_dimension_numbers<[1], [0], [0], [1], [0, 0, 1, 1], [], []>} : vector<40x128xbf16>, vector<128x256xbf16>, vector<40x256xf32> -> vector<40x256xf32>
      %c0_53 = arith.constant 0 : index
      %c0_54 = arith.constant 0 : index
      %c1152 = arith.constant 1152 : index
      %116 = vector.load %arg6[%c0_53, %c0_54, %c1152] : memref<1x1x4096xf32, #tpu.memory_space<vmem>>, vector<1x1x256xf32>
      %117 = vector.shape_cast %116 : vector<1x1x256xf32> to vector<1x256xf32>
      %118 = vector.broadcast %117 : vector<1x256xf32> to vector<40x256xf32>
      %119 = arith.addf %115, %118 : vector<40x256xf32>
      %120 = vector.extract_strided_slice %119 {offsets = [0, 0], sizes = [40, 128], strides = [1, 1]} : vector<40x256xf32> to vector<40x128xf32>
      %121 = vector.extract_strided_slice %119 {offsets = [0, 128], sizes = [40, 128], strides = [1, 1]} : vector<40x256xf32> to vector<40x128xf32>
      %c0_55 = arith.constant 0 : index
      %c0_56 = arith.constant 0 : index
      %122 = vector.load %arg3[%c0_55, %c0_56] : memref<40x40xf32, #tpu.memory_space<vmem>>, vector<40x40xf32>
      %123 = arith.truncf %111 : vector<40x128xf32> to vector<40x128xbf16>
      %124 = arith.truncf %120 : vector<40x128xf32> to vector<40x128xbf16>
      %cst_57 = arith.constant dense<0.000000e+00> : vector<40x40xf32>
      %125 = tpu.matmul %123, %124, %cst_57 {dimension_numbers = #tpu.dot_dimension_numbers<[1], [1], [0], [0], [0, 0, 1, 0], [], []>} : vector<40x128xbf16>, vector<40x128xbf16>, vector<40x40xf32> -> vector<40x40xf32>
      %126 = arith.addf %125, %122 : vector<40x40xf32>
      %cst_58 = arith.constant dense<0xFF800000> : vector<40xf32>
      %127 = vector.multi_reduction <maximumf>, %126, %cst_58 [1] : vector<40x40xf32> to vector<40xf32>
      %128 = vector.shape_cast %127 : vector<40xf32> to vector<40x1xf32>
      %129 = vector.broadcast %128 : vector<40x1xf32> to vector<40x40xf32>
      %130 = arith.subf %126, %129 : vector<40x40xf32>
      %131 = math.exp %130 : vector<40x40xf32>
      %cst_59 = arith.constant dense<0.000000e+00> : vector<40xf32>
      %132 = vector.multi_reduction <add>, %131, %cst_59 [1] : vector<40x40xf32> to vector<40xf32>
      %133 = vector.shape_cast %132 : vector<40xf32> to vector<40x1xf32>
      %134 = tpu.reciprocal %133 {approx = true} : vector<40x1xf32> -> vector<40x1xf32>
      %135 = vector.broadcast %134 : vector<40x1xf32> to vector<40x40xf32>
      %136 = arith.mulf %131, %135 : vector<40x40xf32>
      %137 = arith.truncf %136 : vector<40x40xf32> to vector<40x40xbf16>
      %138 = arith.truncf %121 : vector<40x128xf32> to vector<40x128xbf16>
      %cst_60 = arith.constant dense<0.000000e+00> : vector<40x128xf32>
      %139 = tpu.matmul %137, %138, %cst_60 {dimension_numbers = #tpu.dot_dimension_numbers<[1], [0], [0], [1], [0, 0, 1, 1], [], []>} : vector<40x40xbf16>, vector<40x128xbf16>, vector<40x128xf32> -> vector<40x128xf32>
      %c0_61 = arith.constant 0 : index
      %c0_62 = arith.constant 0 : index
      %c896_63 = arith.constant 896 : index
      %140 = vector.load %arg4[%c0_61, %c0_62, %c896_63] : memref<1x128x3200xbf16, #tpu.memory_space<vmem>>, vector<1x128x128xbf16>
      %141 = vector.shape_cast %140 : vector<1x128x128xbf16> to vector<128x128xbf16>
      %142 = arith.truncf %139 : vector<40x128xf32> to vector<40x128xbf16>
      %cst_64 = arith.constant dense<0.000000e+00> : vector<40x128xf32>
      %143 = tpu.matmul %142, %141, %cst_64 {dimension_numbers = #tpu.dot_dimension_numbers<[1], [0], [0], [1], [0, 0, 1, 1], [], []>} : vector<40x128xbf16>, vector<128x128xbf16>, vector<40x128xf32> -> vector<40x128xf32>
      %144 = arith.addf %77, %143 : vector<40x128xf32>
      %c0_65 = arith.constant 0 : index
      %c0_66 = arith.constant 0 : index
      %c1408 = arith.constant 1408 : index
      %145 = vector.load %arg6[%c0_65, %c0_66, %c1408] : memref<1x1x4096xf32, #tpu.memory_space<vmem>>, vector<1x1x128xf32>
      %146 = vector.shape_cast %145 : vector<1x1x128xf32> to vector<1x128xf32>
      %147 = vector.broadcast %146 : vector<1x128xf32> to vector<40x128xf32>
      %148 = arith.addf %144, %147 : vector<40x128xf32>
      %c0_67 = arith.constant 0 : index
      %c0_68 = arith.constant 0 : index
      %c1536 = arith.constant 1536 : index
      %149 = vector.load %arg6[%c0_67, %c0_68, %c1536] : memref<1x1x4096xf32, #tpu.memory_space<vmem>>, vector<1x1x128xf32>
      %150 = vector.shape_cast %149 : vector<1x1x128xf32> to vector<1x128xf32>
      %c0_69 = arith.constant 0 : index
      %c0_70 = arith.constant 0 : index
      %c1664 = arith.constant 1664 : index
      %151 = vector.load %arg6[%c0_69, %c0_70, %c1664] : memref<1x1x4096xf32, #tpu.memory_space<vmem>>, vector<1x1x128xf32>
      %152 = vector.shape_cast %151 : vector<1x1x128xf32> to vector<1x128xf32>
      %cst_71 = arith.constant dense<0.000000e+00> : vector<40xf32>
      %153 = vector.multi_reduction <add>, %148, %cst_71 [1] : vector<40x128xf32> to vector<40xf32>
      %154 = vector.shape_cast %153 : vector<40xf32> to vector<40x1xf32>
      %cst_72 = arith.constant 1.280000e+02 : f32
      %155 = vector.broadcast %cst_72 : f32 to vector<40x1xf32>
      %156 = arith.divf %154, %155 : vector<40x1xf32>
      %157 = vector.broadcast %156 : vector<40x1xf32> to vector<40x128xf32>
      %158 = arith.subf %148, %157 : vector<40x128xf32>
      %159 = arith.mulf %158, %158 : vector<40x128xf32>
      %cst_73 = arith.constant dense<0.000000e+00> : vector<40xf32>
      %160 = vector.multi_reduction <add>, %159, %cst_73 [1] : vector<40x128xf32> to vector<40xf32>
      %161 = vector.shape_cast %160 : vector<40xf32> to vector<40x1xf32>
      %cst_74 = arith.constant 1.280000e+02 : f32
      %162 = vector.broadcast %cst_74 : f32 to vector<40x1xf32>
      %163 = arith.divf %161, %162 : vector<40x1xf32>
      %164 = vector.broadcast %156 : vector<40x1xf32> to vector<40x128xf32>
      %165 = arith.subf %148, %164 : vector<40x128xf32>
      %cst_75 = arith.constant 9.99999974E-6 : f32
      %166 = vector.broadcast %cst_75 : f32 to vector<40x1xf32>
      %167 = arith.addf %163, %166 : vector<40x1xf32>
      %168 = math.rsqrt %167 : vector<40x1xf32>
      %169 = vector.broadcast %168 : vector<40x1xf32> to vector<40x128xf32>
      %170 = arith.mulf %165, %169 : vector<40x128xf32>
      %171 = vector.broadcast %150 : vector<1x128xf32> to vector<40x128xf32>
      %172 = arith.mulf %170, %171 : vector<40x128xf32>
      %173 = vector.broadcast %152 : vector<1x128xf32> to vector<40x128xf32>
      %174 = arith.addf %172, %173 : vector<40x128xf32>
      %c0_76 = arith.constant 0 : index
      %c0_77 = arith.constant 0 : index
      %c1024_78 = arith.constant 1024 : index
      %175 = vector.load %arg4[%c0_76, %c0_77, %c1024_78] : memref<1x128x3200xbf16, #tpu.memory_space<vmem>>, vector<1x128x2048xbf16>
      %176 = vector.shape_cast %175 : vector<1x128x2048xbf16> to vector<128x2048xbf16>
      %177 = arith.truncf %174 : vector<40x128xf32> to vector<40x128xbf16>
      %cst_79 = arith.constant dense<0.000000e+00> : vector<40x2048xf32>
      %178 = tpu.matmul %177, %176, %cst_79 {dimension_numbers = #tpu.dot_dimension_numbers<[1], [0], [0], [1], [0, 0, 1, 1], [], []>} : vector<40x128xbf16>, vector<128x2048xbf16>, vector<40x2048xf32> -> vector<40x2048xf32>
      %c0_80 = arith.constant 0 : index
      %c0_81 = arith.constant 0 : index
      %c1792 = arith.constant 1792 : index
      %179 = vector.load %arg6[%c0_80, %c0_81, %c1792] : memref<1x1x4096xf32, #tpu.memory_space<vmem>>, vector<1x1x2048xf32>
      %180 = vector.shape_cast %179 : vector<1x1x2048xf32> to vector<1x2048xf32>
      %181 = vector.broadcast %180 : vector<1x2048xf32> to vector<40x2048xf32>
      %182 = arith.addf %178, %181 : vector<40x2048xf32>
      %cst_82 = arith.constant 0.000000e+00 : f32
      %183 = vector.broadcast %cst_82 : f32 to vector<40x2048xf32>
      %184 = arith.maximumf %182, %183 : vector<40x2048xf32>
      %185 = arith.truncf %184 : vector<40x2048xf32> to vector<40x2048xbf16>
      %c0_83 = arith.constant 0 : index
      %c0_84 = arith.constant 0 : index
      %c0_85 = arith.constant 0 : index
      %186 = vector.load %arg5[%c0_83, %c0_84, %c0_85] : memref<1x2048x128xbf16, #tpu.memory_space<vmem>>, vector<1x2048x128xbf16>
      %187 = vector.shape_cast %186 : vector<1x2048x128xbf16> to vector<2048x128xbf16>
      %cst_86 = arith.constant dense<0.000000e+00> : vector<40x128xf32>
      %188 = tpu.matmul %185, %187, %cst_86 {dimension_numbers = #tpu.dot_dimension_numbers<[1], [0], [0], [1], [0, 0, 1, 1], [], []>} : vector<40x2048xbf16>, vector<2048x128xbf16>, vector<40x128xf32> -> vector<40x128xf32>
      %c0_87 = arith.constant 0 : index
      %c0_88 = arith.constant 0 : index
      %c3840 = arith.constant 3840 : index
      %189 = vector.load %arg6[%c0_87, %c0_88, %c3840] : memref<1x1x4096xf32, #tpu.memory_space<vmem>>, vector<1x1x128xf32>
      %190 = vector.shape_cast %189 : vector<1x1x128xf32> to vector<1x128xf32>
      %191 = vector.broadcast %190 : vector<1x128xf32> to vector<40x128xf32>
      %192 = arith.addf %188, %191 : vector<40x128xf32>
      %193 = arith.addf %148, %192 : vector<40x128xf32>
      %c0_89 = arith.constant 0 : index
      %c0_90 = arith.constant 0 : index
      %194 = vector.load %arg8[%c0_89, %c0_90] : memref<40x128xf32, #tpu.memory_space<vmem>>, vector<40x128xf32>
      tpu.vector_store %arg8[%c0_89, %c0_90], %193 {strides = array<i32>} : memref<40x128xf32, #tpu.memory_space<vmem>>, vector<40x128xf32>,
      %c3_i32 = arith.constant 3 : i32
      %195 = arith.cmpi eq, %arg0, %c3_i32 : i32
      %196 = arith.extui %195 : i1 to i32
      %c0_i32_91 = arith.constant 0 : i32
      %197 = arith.cmpi ne, %196, %c0_i32_91 : i32
      scf.if %197 {
        %c0_92 = arith.constant 0 : index
        %c0_93 = arith.constant 0 : index
        %c3072 = arith.constant 3072 : index
        %198 = vector.load %arg4[%c0_92, %c0_93, %c3072] : memref<1x128x3200xbf16, #tpu.memory_space<vmem>>, vector<1x128x128xbf16>
        %199 = vector.shape_cast %198 : vector<1x128x128xbf16> to vector<128x128xbf16>
        %200 = arith.truncf %193 : vector<40x128xf32> to vector<40x128xbf16>
        %cst_94 = arith.constant dense<0.000000e+00> : vector<40x128xf32>
        %201 = tpu.matmul %200, %199, %cst_94 {dimension_numbers = #tpu.dot_dimension_numbers<[1], [0], [0], [1], [0, 0, 1, 1], [], []>} : vector<40x128xbf16>, vector<128x128xbf16>, vector<40x128xf32> -> vector<40x128xf32>
        %c0_95 = arith.constant 0 : index
        %c0_96 = arith.constant 0 : index
        %c3968 = arith.constant 3968 : index
        %202 = vector.load %arg6[%c0_95, %c0_96, %c3968] : memref<1x1x4096xf32, #tpu.memory_space<vmem>>, vector<1x1x128xf32>
        %203 = vector.shape_cast %202 : vector<1x1x128xf32> to vector<1x128xf32>
        %204 = vector.broadcast %203 : vector<1x128xf32> to vector<40x128xf32>
        %205 = arith.addf %201, %204 : vector<40x128xf32>
        %c0_97 = arith.constant 0 : index
        %c0_98 = arith.constant 0 : index
        %206 = vector.load %arg7[%c0_97, %c0_98] : memref<40x128xf32, #tpu.memory_space<vmem>>, vector<40x128xf32>
        tpu.vector_store %arg7[%c0_97, %c0_98], %205 {strides = array<i32>} : memref<40x128xf32, #tpu.memory_space<vmem>>, vector<40x128xf32>,
      } else {
      }
    } else {
    }
    return
  }
  func.func @transform_0(%arg0: i32) -> (i32, i32) {
    %c0_i32 = arith.constant 0 : i32
    %c0_i32_0 = arith.constant 0 : i32
    %c0_i32_1 = arith.constant 0 : i32
    return %c0_i32, %c0_i32_0 : i32, i32
  }
  func.func @transform_1(%arg0: i32) -> (i32, i32) {
    %c0_i32 = arith.constant 0 : i32
    %c0_i32_0 = arith.constant 0 : i32
    %c0_i32_1 = arith.constant 0 : i32
    return %c0_i32, %c0_i32_0 : i32, i32
  }
  func.func @transform_2(%arg0: i32) -> (i32, i32) {
    %c0_i32 = arith.constant 0 : i32
    %c0_i32_0 = arith.constant 0 : i32
    %c0_i32_1 = arith.constant 0 : i32
    return %c0_i32, %c0_i32_0 : i32, i32
  }
  func.func @transform_3(%arg0: i32) -> (i32, i32, i32) {
    %c0_i32 = arith.constant 0 : i32
    %c0_i32_0 = arith.constant 0 : i32
    %c0_i32_1 = arith.constant 0 : i32
    return %arg0, %c0_i32, %c0_i32_0 : i32, i32, i32
  }
  func.func @transform_4(%arg0: i32) -> (i32, i32, i32) {
    %c0_i32 = arith.constant 0 : i32
    %c0_i32_0 = arith.constant 0 : i32
    %c0_i32_1 = arith.constant 0 : i32
    return %arg0, %c0_i32, %c0_i32_0 : i32, i32, i32
  }
  func.func @transform_5(%arg0: i32) -> (i32, i32, i32) {
    %c0_i32 = arith.constant 0 : i32
    %c0_i32_0 = arith.constant 0 : i32
    %c0_i32_1 = arith.constant 0 : i32
    return %arg0, %c0_i32, %c0_i32_0 : i32, i32, i32
  }
  func.func @transform_6(%arg0: i32) -> (i32, i32) {
    %c0_i32 = arith.constant 0 : i32
    %c0_i32_0 = arith.constant 0 : i32
    %c0_i32_1 = arith.constant 0 : i32
    return %c0_i32, %c0_i32_0 : i32, i32
  }
}

</mosaic_0001>

<bundles_post_ra>
// kernel: tpu_custom_call.1
= control target key start
LH: loop header
LB: loop body
LE: loop exit
PB: predicated region body
PF: predicated region fallthrough
CT: control target
= control target key end

     0   :  { %s13745_s0 = inlined_call_operand.hbm [shape: f32[40,128], index: 0, kind: input, shape index: {}]   ;;  %s13746_s1 = inlined_call_operand.hbm [shape: f32[40,40], index: 1, kind: input, shape index: {}]   ;;  %s13747_s2 = inlined_call_operand.hbm [shape: f32[40,40], index: 2, kind: input, shape index: {}]   ;;  %s13748_s3 = inlined_call_operand.hbm [shape: bf16[4,128,3200], index: 3, kind: input, shape index: {}]   ;;  %s13749_s4 = inlined_call_operand.hbm [shape: bf16[4,2048,128], index: 4, kind: input, shape index: {}]   ;;  %s13750_s5 = inlined_call_operand.hbm [shape: f32[4,1,4096], index: 5, kind: input, shape index: {}]   ;;  %s13751_s6 = inlined_call_operand.hbm [shape: f32[40,128], index: 6, kind: output, shape index: {}]  }
   0x1   :  { %13766 = sst [smem:[#allocation23_spill]] %s13746_s1 }
   0x2   :  { %13767 = sst [smem:[#allocation24_spill]] %s13748_s3 }
   0x3   :  { %11 = vsyncpa [#allocation5], 0 }
   0x4   :  { %12 = vsyncpa [#allocation8], 0 }
   0x5   :  { %13 = vsyncpa [#allocation11], 0 }
   0x6   :  { %15 = vsyncpa [#allocation11 + $0x1], 0 }
   0x7   :  { %16 = vsyncpa [#allocation14], 0 }
   0x8   :  { %18 = vsyncpa [#allocation14 + $0x1], 0 }
   0x9   :  { %19 = vsyncpa [#allocation6], 0  ;;  %s11889_s21 = smov 0   ;;  %s11891_s22 = smov 0  }
   0xa   :  { %s11893_s23 = smov 0   ;;  %s11895_s24 = smov 0  }
   0xb LB: > { %13768 = sst [smem:[#allocation21_spill]] %s11825_s23  ;;  %s11908_s25 = sadd.s32 4294967295, %s11829_s24   ;;  %s11829_s24 = sphi %s11895_s24, %s13798_s24   ;;  %s11825_s23 = sphi %s11893_s23, %s13795_s23   ;;  %s11821_s22 = sphi %s11891_s22, %s13797_s22   ;;  %s11817_s21 = sphi %s11889_s21, %s13796_s21  }
   0xc   : > { %s11911_s26 = sadd.s32 1, %s11829_s24   ;;  %s95_s28 = sadd.s32 1, %s11825_s23 }
   0xd   : > { %s92_s27 = ssub.s32 %s11829_s24, %s11911_s26  ;;  %p102_p1 = scmp.ne.s32.totalorder %s11825_s23, %s11821_s22 }
   0xe   : > { %p93_p0 = scmp.eq.s32.totalorder %s92_s27, 0  ;;  %p103_p2 = scmp.eq.s32.totalorder %s11829_s24, 0 }
   0xf   : > { %p108_p3 = scmp.ne.s32.totalorder %s11821_s22, %s11817_s21  ;;  %p13752_p5 = scmp.eq.s32.totalorder %s11908_s25, 0 }
  0x10   : > { %s11921_s29 = scalar_select %p93_p0, %s11825_s23, %s95_s28  }
  0x11   : > { %p11923_p4 = por %p103_p2, %p102_p1  ;;  %p8937_p6 = scmp.ge.s32.totalorder %s11829_s24, 1 }
  0x12   : > { %13769 = sst [smem:[#allocation22_spill]] %s11921_s29  ;;  %p192_p7 = scmp.lt.s32.totalorder %s11829_s24, 5 }
  0x13   : > { %s13770_s30 = scalar_select %p11923_p4, 1, 0 }
  0x14   : > { %p11932_p8 = por %p13752_p5, %p108_p3  ;;  %p11937_p10 = pnand %p8937_p6, %p192_p7 }
  0x15   : > { %s11831_s9 = smov [#allocation7]   ;;  %s244_s12 = sand.u32 1, %s11829_s24  }
  0x16   : > { %s13771_s7 = scalar_select %p11932_p8, 1, 0 }
  0x17   : > { %s13772_s8 = scalar_select %p11937_p10, 1, 0 }
  0x18   : > { %p10610_p11 = pneg %p11937_p10  ;;  %s217_s10 = sshll.u32 %s11831_s9, 4  ;;  %s218_s10 = int_to_ptr.vmem [resolvable:$true] %s217_s10 }
  0x19   : > { %s11952_s13 = sand.u32 1, %s11825_s23   ;;  %s13774_s1 = sld [smem:[#allocation23_spill]] }
  0x1a   : > { %p11945_p12 = pnand %p10610_p11, %p13752_p5 }
  0x1c   : > { %s13773_s11 = scalar_select %p11945_p12, 1, 0 }
  0x1d   : > { %p11962_p1 = pneg %p11945_p12 }
  0x1f   : > { %s11579_s16 = scalar_lea.hbm %s13774_s1, 640 }
  0x20   : > { %p11580_p0 = scmp.ne.s32.totalorder %s13774_s1, %s11579_s16  ;;  %p11586_p6 = scmp.lt.u32.totalorder %s11579_s16, %s13774_s1 }
  0x21   : > { %s13775_s19 = scalar_select %p11962_p1, 1, 0 }
  0x22   : > { %p11582_p2 = pnand %p11962_p1, %p11580_p0 }
  0x24   : > { %p11583_p3 = pneg %p11582_p2 }
  0x26   : > { %p11588_p7 = pnand %p11586_p6, %p11583_p3 }
  0x28   : > { %11591 = shalt.err (!%p11588_p7)
}
  0x29   : > { %s11592_s27 = scalar_lea.vmem %s218_s10, 640  ;;  %p11600_p13 = scmp.lt.s32.totalorder %s218_s10, %s218_s10 }
  0x2a   : > { %p11593_p11 = scmp.ne.s32.totalorder %s218_s10, %s11592_s27  ;;  %p11601_p8 = scmp.lt.s32.totalorder %s11592_s27, %s11592_s27 }
  0x2c   : > { %p11595_p9 = pnand %p11593_p11, %p11962_p1  ;;  %p11602_p10 = por %p11601_p8, %p11600_p13 }
  0x2e   : > { %p11596_p5 = pneg %p11595_p9 }
  0x30   : > { %p11603_p4 = pnand %p11602_p10, %p11596_p5 }
  0x32   : > { %11606 = shalt.err (!%p11603_p4)
}
  0x33   : > { %s13755_s28 = smov 128   ;;  %s13761_s9 = smov 8  }
  0x34   : > { %10616 = dma.hbm_to_vmem [thread:$0]  (!%p11945_p12), %s13774_s1, 640, %s218_s10, [#allocation8], %s13755_s28, %s13755_s28, %s13761_s9  }
  0x35   : > { %s10585_s16 = smul.u32 1600, %s11952_s13  ;;  %p13776_p9 = scmp.ne.s32.totalorder %s13770_s30, 0 }
  0x36   : > { %p13777_p8 = scmp.lt.s32.totalorder %s11829_s24, 4  ;;  %s10586_s18 = smul.u32 25600, %s11829_s24 }
  0x37   : > { %s13779_s3 = sld [smem:[#allocation24_spill]]  ;;  %s248_s14 = scalar_lea.vmem [#allocation10], %s10585_s16 }
  0x38   : > { %p11986_p5 = pnand %p13777_p8, %p13776_p9  ;;  %s255_s10 = sshll.u32 %s248_s14, 4  ;;  %s11996_s10 = int_to_ptr.vmem [resolvable:$true] %s255_s10 }
  0x39   : > { %s11998_s30 = scalar_lea.sflag [#allocation11], %s244_s12 }
  0x3a   : > { %s13778_s17 = scalar_select %p11986_p5, 1, 0 }
  0x3b   : > { %p12004_p10 = pneg %p11986_p5 }
  0x3d   : > { %s11994_s27 = scalar_lea.hbm %s13779_s3, %s10586_s18  ;;  %s11612_s16 = scalar_lea.hbm %s13779_s3, 102400 }
  0x3e   : > { %s11607_s15 = scalar_lea.hbm %s11994_s27, 25600  ;;  %p11613_p2 = scmp.lt.u32.totalorder %s11994_s27, %s13779_s3 }
  0x3f   : > { %p11608_p4 = scmp.ne.s32.totalorder %s11994_s27, %s11607_s15  ;;  %p11614_p3 = scmp.lt.u32.totalorder %s11612_s16, %s11607_s15 }
  0x40   : > { %p11616_p7 = scmp.lt.u32.totalorder %s11607_s15, %s11994_s27 }
  0x41   : > { %p11610_p13 = pnand %p12004_p10, %p11608_p4  ;;  %p11615_p6 = por %p11614_p3, %p11613_p2 }
  0x43   : > { %p11611_p0 = pneg %p11610_p13  ;;  %p11617_p11 = por %p11616_p7, %p11615_p6 }
  0x45   : > { %p11618_p9 = pnand %p11617_p11, %p11611_p0 }
  0x47   : > { %11621 = shalt.err (!%p11618_p9)
}
  0x48   : > { %s11622_s12 = scalar_lea.vmem %s11996_s10, 25600  ;;  %s11834_s18 = smov [#allocation10]  }
  0x49   : > { %p11623_p8 = scmp.ne.s32.totalorder %s11996_s10, %s11622_s12  ;;  %s11627_s20 = sshll.u32 %s11834_s18, 4  ;;  %s11628_s20 = int_to_ptr.vmem [resolvable:$false] %s11627_s20 }
  0x4a   : > { %s11629_s21 = scalar_lea.vmem %s11628_s20, 51200  ;;  %p11630_p12 = scmp.lt.s32.totalorder %s11996_s10, %s11628_s20 }
  0x4b   : > { %p11625_p4 = pnand %p11623_p8, %p12004_p10  ;;  %p11631_p1 = scmp.lt.s32.totalorder %s11629_s21, %s11622_s12 }
  0x4d   : > { %p11626_p13 = pneg %p11625_p4  ;;  %p11632_p2 = por %p11631_p1, %p11630_p12 }
  0x4f   : > { %p11633_p3 = pnand %p11632_p2, %p11626_p13 }
  0x51   : > { %11636 = shalt.err (!%p11633_p3)
}
  0x52   : > { %s11835_s15 = smov 1600   ;;  %s11836_s16 = smov 100  }
  0x53   : > { %10623 = dma.hbm_to_vmem [thread:$0]  (!%p11986_p5), %s11994_s27, 25600, %s11996_s10, %s11998_s30, %s11835_s15, %s11835_s15, %s11836_s16  }
  0x54   : > { %s11837_s14 = smov [#allocation4]   ;;  %s11838_s1 = smov [#allocation9]  }
  0x55   : > { %s204_s9 = sshll.u32 %s11837_s14, 4  ;;  %s230_s18 = sshll.u32 %s11838_s1, 4  ;;  %s205_s9 = int_to_ptr.vmem [resolvable:$true] %s204_s9  ;;  %s12028_s18 = int_to_ptr.vmem [resolvable:$true] %s230_s18 }
  0x56   : > { %s11637_s21 = scalar_lea.hbm %s13745_s0, 640  ;;  %p13781_p1 = scmp.ne.s32.totalorder %s13775_s19, 0 }
  0x57   : > { %p11638_p12 = scmp.ne.s32.totalorder %s13745_s0, %s11637_s21  ;;  %p11644_p7 = scmp.lt.u32.totalorder %s11637_s21, %s13745_s0 }
  0x59   : > { %p11640_p0 = pnand %p11638_p12, %p13781_p1 }
  0x5b   : > { %p11641_p6 = pneg %p11640_p0 }
  0x5d   : > { %p11646_p11 = pnand %p11644_p7, %p11641_p6 }
  0x5f   : > { %11649 = shalt.err (!%p11646_p11)
}
  0x60   : > { %s11650_s1 = scalar_lea.vmem %s205_s9, 640  ;;  %p11658_p13 = scmp.lt.s32.totalorder %s205_s9, %s205_s9 }
  0x61   : > { %p11651_p9 = scmp.ne.s32.totalorder %s205_s9, %s11650_s1  ;;  %p11659_p2 = scmp.lt.s32.totalorder %s11650_s1, %s11650_s1 }
  0x63   : > { %p11653_p8 = pnand %p11651_p9, %p13781_p1  ;;  %p11660_p3 = por %p11659_p2, %p11658_p13 }
  0x65   : > { %p11654_p4 = pneg %p11653_p8 }
  0x67   : > { %p11661_p5 = pnand %p11660_p3, %p11654_p4 }
  0x69   : > { %11664 = shalt.err (!%p11661_p5)
}
  0x6a   : > { %p13782_p12 = scmp.ne.s32.totalorder %s13773_s11, 0  ;;  %s13783_s3 = smov 8  }
  0x6b   : > { %s13784_s29 = smov 128   ;;  %s11665_s14 = scalar_lea.hbm %s13747_s2, 640 }
  0x6c   : > { %10613 = dma.hbm_to_vmem [thread:$0]  (!%p13782_p12), %s13745_s0, 640, %s205_s9, [#allocation5], %s13784_s29, %s13784_s29, %s13783_s3  }
  0x6d   : > { %p11666_p0 = scmp.ne.s32.totalorder %s13747_s2, %s11665_s14  ;;  %p11672_p7 = scmp.lt.u32.totalorder %s11665_s14, %s13747_s2 }
  0x6f   : > { %p11668_p5 = pnand %p11666_p0, %p13781_p1 }
  0x71   : > { %p11669_p6 = pneg %p11668_p5 }
  0x73   : > { %p11674_p11 = pnand %p11672_p7, %p11669_p6 }
  0x75   : > { %11677 = shalt.err (!%p11674_p11)
}
  0x76   : > { %s11678_s9 = scalar_lea.vmem %s12028_s18, 640  ;;  %p11686_p13 = scmp.lt.s32.totalorder %s12028_s18, %s12028_s18 }
  0x77   : > { %p11679_p9 = scmp.ne.s32.totalorder %s12028_s18, %s11678_s9  ;;  %p11687_p2 = scmp.lt.s32.totalorder %s11678_s9, %s11678_s9 }
  0x79   : > { %p11681_p8 = pnand %p11679_p9, %p13781_p1  ;;  %p11688_p3 = por %p11687_p2, %p11686_p13 }
  0x7b   : > { %p11682_p4 = pneg %p11681_p8 }
  0x7d   : > { %p11689_p0 = pnand %p11688_p3, %p11682_p4 }
  0x7f   : > { %11692 = shalt.err (!%p11689_p0)
}
  0x80   : > { %10619 = dma.hbm_to_vmem [thread:$0]  (!%p13782_p12), %s13747_s2, 640, %s12028_s18, [#allocation8], %s13784_s29, %s13784_s29, %s13783_s3  }
  0x81   : > { %s8943_s19 = sshll.u32 %s11952_s13, 10  ;;  %s9606_s10 = sshll.u32 %s11829_s24, 14 }
  0x82   : > { %s12082_s14 = scalar_lea.hbm %s13749_s4, %s9606_s10  ;;  %s269_s11 = scalar_lea.vmem [#allocation12], %s8943_s19 }
  0x83   : > { %s276_s12 = sshll.u32 %s269_s11, 4  ;;  %s11693_s20 = scalar_lea.hbm %s12082_s14, 16384  ;;  %s12084_s12 = int_to_ptr.vmem [resolvable:$true] %s276_s12 }
  0x84   : > { %p11694_p1 = scmp.ne.s32.totalorder %s12082_s14, %s11693_s20  ;;  %s11698_s29 = scalar_lea.hbm %s13749_s4, 65536 }
  0x85   : > { %p11699_p6 = scmp.lt.u32.totalorder %s12082_s14, %s13749_s4  ;;  %p11700_p7 = scmp.lt.u32.totalorder %s11698_s29, %s11693_s20 }
  0x86   : > { %p11696_p5 = pnand %p11694_p1, %p12004_p10  ;;  %p11702_p9 = scmp.lt.u32.totalorder %s11693_s20, %s12082_s14 }
  0x87   : > { %p11701_p11 = por %p11700_p7, %p11699_p6 }
  0x88   : > { %p11697_p12 = pneg %p11696_p5 }
  0x89   : > { %p11703_p8 = por %p11702_p9, %p11701_p11 }
  0x8b   : > { %p11704_p4 = pnand %p11703_p8, %p11697_p12 }
  0x8d   : > { %11707 = shalt.err (!%p11704_p4)
}
  0x8e   : > { %s11708_s9 = scalar_lea.vmem %s12084_s12, 16384  ;;  %s11839_s1 = smov [#allocation12]  }
  0x8f   : > { %p11709_p13 = scmp.ne.s32.totalorder %s12084_s12, %s11708_s9  ;;  %s11713_s23 = sshll.u32 %s11839_s1, 4  ;;  %s11714_s23 = int_to_ptr.vmem [resolvable:$false] %s11713_s23 }
  0x90   : > { %s11715_s19 = scalar_lea.vmem %s11714_s23, 32768  ;;  %p11716_p0 = scmp.lt.s32.totalorder %s12084_s12, %s11714_s23 }
  0x91   : > { %p11711_p2 = pnand %p11709_p13, %p12004_p10  ;;  %p11717_p1 = scmp.lt.s32.totalorder %s11715_s19, %s11708_s9 }
  0x93   : > { %p11712_p3 = pneg %p11711_p2  ;;  %p11718_p5 = por %p11717_p1, %p11716_p0 }
  0x95   : > { %p11719_p6 = pnand %p11718_p5, %p11712_p3 }
  0x97   : > { %11722 = shalt.err (!%p11719_p6)
}
  0x98   : > { %s11840_s10 = smov 64   ;;  %s11841_s15 = smov 4  }
  0x99   : > { %p13785_p12 = scmp.ne.s32.totalorder %s13778_s17, 0  ;;  %s8946_s16 = sshll.u32 %s11952_s13, 5 }
  0x9a   : > { %s9607_s11 = sshll.u32 %s11829_s24, 9  ;;  %s290_s29 = scalar_lea.vmem [#allocation13], %s8946_s16 }
  0x9b   : > { %10626 = dma.hbm_to_vmem [thread:$0]  (!%p13785_p12), %s12082_s14, 16384, %s12084_s12, %s11998_s30, %s11840_s10, %s11840_s10, %s11841_s15  }
  0x9c   : > { %s12113_s3 = scalar_lea.hbm %s13750_s5, %s9607_s11  ;;  %s298_s21 = sshll.u32 %s290_s29, 4  ;;  %s299_s21 = int_to_ptr.vmem [resolvable:$true] %s298_s21 }
  0x9d   : > { %s287_s27 = scalar_lea.sflag [#allocation14], %s11952_s13  ;;  %s11723_s9 = scalar_lea.hbm %s12113_s3, 512 }
  0x9e   : > { %p11724_p7 = scmp.ne.s32.totalorder %s12113_s3, %s11723_s9  ;;  %s11728_s14 = scalar_lea.hbm %s13750_s5, 2048 }
  0x9f   : > { %p11729_p8 = scmp.lt.u32.totalorder %s12113_s3, %s13750_s5  ;;  %p11730_p4 = scmp.lt.u32.totalorder %s11728_s14, %s11723_s9 }
  0xa0   : > { %p11726_p11 = pnand %p11724_p7, %p12004_p10  ;;  %p11732_p2 = scmp.lt.u32.totalorder %s11723_s9, %s12113_s3 }
  0xa1   : > { %p11731_p13 = por %p11730_p4, %p11729_p8 }
  0xa2   : > { %p11727_p9 = pneg %p11726_p11 }
  0xa3   : > { %p11733_p3 = por %p11732_p2, %p11731_p13 }
  0xa5   : > { %p11734_p0 = pnand %p11733_p3, %p11727_p9 }
  0xa7   : > { %11737 = shalt.err (!%p11734_p0)
}
  0xa8   : > { %s11738_s13 = scalar_lea.vmem %s299_s21, 512  ;;  %s11842_s23 = smov [#allocation13]  }
  0xa9   : > { %p11739_p1 = scmp.ne.s32.totalorder %s299_s21, %s11738_s13  ;;  %s11743_s19 = sshll.u32 %s11842_s23, 4  ;;  %s11744_s19 = int_to_ptr.vmem [resolvable:$false] %s11743_s19 }
  0xaa   : > { %s11745_s10 = scalar_lea.vmem %s11744_s19, 1024  ;;  %p11746_p7 = scmp.lt.s32.totalorder %s299_s21, %s11744_s19 }
  0xab   : > { %p11741_p5 = pnand %p11739_p1, %p12004_p10  ;;  %p11747_p11 = scmp.lt.s32.totalorder %s11745_s10, %s11738_s13 }
  0xad   : > { %p11742_p6 = pneg %p11741_p5  ;;  %p11748_p12 = por %p11747_p11, %p11746_p7 }
  0xaf   : > { %p11749_p4 = pnand %p11748_p12, %p11742_p6 }
  0xb1   : > { %11752 = shalt.err (!%p11749_p4)
}
  0xb2   : > { %p13786_p8 = scmp.ne.s32.totalorder %s13778_s17, 0  ;;  %p13787_p9 = scmp.ne.s32.totalorder %s13772_s8, 0 }
  0xb3   : > { %p13788_p13 = scmp.eq.s32.totalorder (!%p13787_p9), %s11908_s25, 0 }
  0xb4   : > { %10629 = dma.hbm_to_vmem [thread:$0]  (!%p13786_p8), %s12113_s3, 512, %s299_s21, %s287_s27  }
  0xb5   : > { %307 = sbr.rel (%p13787_p9) target bundleno = 6786 (0x1a82), region = 44 }
  0xbc   : > { %11796 = dma.done.wait (%p13788_p13), [#allocation5], 640   ;;  %p13789_p10 = pmov %p13788_p13 }
  0xbe   : > { %11798 = vsyncadd (%p13789_p10), [#allocation5], 4294966656  ;;  %p13790_p2 = pmov %p13789_p10 }
  0xc0   : > { %11800 = dma.done.wait (%p13790_p2), [#allocation8], 1280   ;;  %p13791_p3 = pmov %p13790_p2 }
  0xc1   : > { %s321_s28 = sand.u32 1, %s11908_s25   ;;  %s323_s17 = sand.u32 1, %s11821_s22  }
  0xc2   : > { %11802 = vsyncadd (%p13791_p3), [#allocation8], 4294966016  ;;  %s10587_s15 = smul.u32 1600, %s323_s17  ;;  %s322_s8 = scalar_lea.sflag [#allocation11], %s321_s28 }
  0xc3   : > { %p13792_p12 = scmp.ne.s32.totalorder %s13771_s7, 0 }
  0xc4   : > { %s12145_s16 = scalar_lea.vmem [#allocation10], %s10587_s15 }
  0xc5   : > { %11804 = dma.done.wait (%p13792_p12), %s322_s8, 41984  }
  0xc6   : > { %11806 = vsyncadd (%p13792_p12), %s322_s8, 4294925312  ;;  %s8953_s11 = sshll.u32 %s323_s17, 10  ;;  %s8954_s20 = sshll.u32 %s323_s17, 5 }
  0xc7   : > { %s12151_s18 = scalar_lea.vmem [#allocation12], %s8953_s11  ;;  %s340_s3 = scalar_lea.sflag [#allocation14], %s323_s17 }
  0xc8   : > { %s12153_s29 = scalar_lea.vmem [#allocation13], %s8954_s20 }
  0xc9   : > { %11808 = dma.done.wait (%p13792_p12), %s340_s3, 512  }
  0xca   : > { %11810 = vsyncadd (%p13792_p12), %s340_s3, 4294966784  ;;  %p13793_p0 = scmp.ne.s32.totalorder %s11908_s25, 0 }
  0xcb   : > { %v382_v0 = vld [vmem:[#allocation4] sm:$0xff] (!%p13793_p0)  ;;  %v383_v1 = vld [vmem:[#allocation4 + $0x8] sm:$0xff] (!%p13793_p0)  ;;  %v384_v2 = vld [vmem:[#allocation4 + $0x10] sm:$0xff] (!%p13793_p0) }
  0xcc   : > { %381 = sbr.rel (%p13793_p0) target bundleno = 211 (0xd3), region = 72  ;;  %387 = vst [vmem:[#allocation2] sm:$0xff] (!%p13793_p0), %v382_v0  ;;  %388 = vst [vmem:[#allocation2 + $0x8] sm:$0xff] (!%p13793_p0), %v383_v1  ;;  %v385_v3 = vld [vmem:[#allocation4 + $0x18] sm:$0xff] (!%p13793_p0)  ;;  %v386_v4 = vld [vmem:[#allocation4 + $0x20] sm:$0xff] (!%p13793_p0) }
  0xcd   : > { %389 = vst [vmem:[#allocation2 + $0x10] sm:$0xff] (!%p13793_p0), %v384_v2  ;;  %390 = vst [vmem:[#allocation2 + $0x18] sm:$0xff] (!%p13793_p0), %v385_v3 }
  0xce   : > { %391 = vst [vmem:[#allocation2 + $0x20] sm:$0xff] (!%p13793_p0), %v386_v4 }
  0xd3 PF: > { %p8956_p1 = scmp.ne.s32.totalorder %s11908_s25, 2 }
  0xd4   : > { %v396_v5 = vld [vmem:[#allocation2] sm:$0xff] (!%p8956_p1)  ;;  %v397_v6 = vld [vmem:[#allocation2 + $0x8] sm:$0xff] (!%p8956_p1)  ;;  %v398_v7 = vld [vmem:[#allocation2 + $0x10] sm:$0xff] (!%p8956_p1) }
  0xd5   : > { %395 = sbr.rel (%p8956_p1) target bundleno = 220 (0xdc), region = 76  ;;  %401 = vst [vmem:[#allocation3] sm:$0xff] (!%p8956_p1), %v396_v5  ;;  %402 = vst [vmem:[#allocation3 + $0x8] sm:$0xff] (!%p8956_p1), %v397_v6  ;;  %v399_v8 = vld [vmem:[#allocation2 + $0x18] sm:$0xff] (!%p8956_p1)  ;;  %v400_v9 = vld [vmem:[#allocation2 + $0x20] sm:$0xff] (!%p8956_p1) }
  0xd6   : > { %403 = vst [vmem:[#allocation3 + $0x10] sm:$0xff] (!%p8956_p1), %v398_v7  ;;  %v406_v10 = vld [vmem:[#allocation4] sm:$0xff] (!%p8956_p1)  ;;  %404 = vst [vmem:[#allocation3 + $0x18] sm:$0xff] (!%p8956_p1), %v399_v8  ;;  %v407_v11 = vld [vmem:[#allocation4 + $0x8] sm:$0xff] (!%p8956_p1) }
  0xd7   : > { %405 = vst [vmem:[#allocation3 + $0x20] sm:$0xff] (!%p8956_p1), %v400_v9  ;;  %411 = vst [vmem:[#allocation2] sm:$0xff] (!%p8956_p1), %v406_v10  ;;  %v408_v12 = vld [vmem:[#allocation4 + $0x10] sm:$0xff] (!%p8956_p1)  ;;  %v409_v13 = vld [vmem:[#allocation4 + $0x18] sm:$0xff] (!%p8956_p1) }
  0xd8   : > { %412 = vst [vmem:[#allocation2 + $0x8] sm:$0xff] (!%p8956_p1), %v407_v11  ;;  %413 = vst [vmem:[#allocation2 + $0x10] sm:$0xff] (!%p8956_p1), %v408_v12  ;;  %v410_v14 = vld [vmem:[#allocation4 + $0x20] sm:$0xff] (!%p8956_p1) }
  0xd9   : > { %414 = vst [vmem:[#allocation2 + $0x18] sm:$0xff] (!%p8956_p1), %v409_v13  ;;  %415 = vst [vmem:[#allocation2 + $0x20] sm:$0xff] (!%p8956_p1), %v410_v14 }
  0xdc PF: > { %p8957_p5 = scmp.ge.s32.totalorder %s11908_s25, 2 }
  0xdd   : > { %v10691_v20 = vld [vmem:[%s12145_s16 + $0x4] ss:$100 sps:$4 sm:$0xff] (!%p8957_p5)   ;;  %v11843_v22 = vmov (!%p8957_p5), 0.0   ;;  %v10695_v24 = vld [vmem:[%s12145_s16 + $0xcc] ss:$100 sps:$4 sm:$0xff] (!%p8957_p5)   ;;  %v11844_v63 = vmov (!%p8957_p5), 0  }
  0xde   : > { %419 = sbr.rel (%p8957_p5) target bundleno = 2618 (0xa3a), region = 80  ;;  %v420_v15 = vld [vmem:[#allocation2] sm:$0xff] (!%p8957_p5)  ;;  %v10693_v21 = vld [vmem:[%s12145_s16] ss:$100 sps:$4 sm:$0xff] (!%p8957_p5)   ;;  %10265 = vmatprep.subr.bf16.mxu1 (!%p8957_p5), %v11843_v22  ;;  %v10694_v23 = vld [vmem:[%s12145_s16 + $0x8] ss:$100 sps:$4 sm:$0xff] (!%p8957_p5)   ;;  %685 = vmatprep.subr.bf16.mxu0 (!%p8957_p5), %v10691_v20 }
  0xdf   : > { %v422_v16 = vld [vmem:[#allocation2 + $0x10] sm:$0xff] (!%p8957_p5)  ;;  %427 = vadd.xlane.f32.xlu0 (!%p8957_p5), %v420_v15  ;;  %v421_v17 = vld [vmem:[#allocation2 + $0x8] sm:$0xff] (!%p8957_p5)  ;;  %686 = vmatpush1.bf16.msra.mxu0 (!%p8957_p5), %v10693_v21  ;;  %v10698_v46 = vld [vmem:[%s12145_s16 + $0xd0] ss:$100 sps:$4 sm:$0xff] (!%p8957_p5)   ;;  %vm11845_vm0 = vmmov (!%p8957_p5), 0   ;;  %vm940_vm1 = vcmask (!%p8957_p5), 1043456  }
  0xe0   : > { %431 = vadd.xlane.f32.xlu1 (!%p8957_p5), %v422_v16  ;;  %v423_v18 = vld [vmem:[#allocation2 + $0x18] sm:$0xff] (!%p8957_p5)  ;;  %v424_v19 = vld [vmem:[#allocation2 + $0x20] sm:$0xff] (!%p8957_p5)  ;;  %10266 = vmatpush3.bf16.msra.mxu1 (!%p8957_p5), %v10694_v23  ;;  %v10697_v45 = vld [vmem:[%s12145_s16 + $0xc8] ss:$100 sps:$4 sm:$0xff] (!%p8957_p5)   ;;  %vm869_vm2 = vcmask (!%p8957_p5), 326656  }
  0xe1   : > { %687 = vmatprep.subr.bf16.mxu0 (!%p8957_p5), %v10695_v24  ;;  %10267 = vmatprep.subr.bf16.mxu1 (!%p8957_p5), %v11843_v22  ;;  %v10699_v47 = vld [vmem:[%s12145_s16 + $0x194] ss:$100 sps:$4 sm:$0xff] (!%p8957_p5)   ;;  %v10703_v50 = vld [vmem:[%s12145_s16 + $0x25c] ss:$100 sps:$4 sm:$0xff] (!%p8957_p5)   ;;  %v10707_v53 = vld [vmem:[%s12145_s16 + $0x324] ss:$100 sps:$4 sm:$0xff] (!%p8957_p5)  }
  0xe2   : > { %v10701_v48 = vld [vmem:[%s12145_s16 + $0x190] ss:$100 sps:$4 sm:$0xff] (!%p8957_p5)   ;;  %v10702_v49 = vld [vmem:[%s12145_s16 + $0x198] ss:$100 sps:$4 sm:$0xff] (!%p8957_p5)   ;;  %v10706_v52 = vld [vmem:[%s12145_s16 + $0x260] ss:$100 sps:$4 sm:$0xff] (!%p8957_p5)   ;;  %717 = vmatprep.mubr.bf16.mxu0 (!%p8957_p5), %v11844_v63  ;;  %10281 = vmatprep.mubr.msk.bf16.mxu1 (!%p8957_p5), %vm11845_vm0, %v11843_v22 }
  0xe3   : > { %429 = vadd.xlane.f32.xlu0 (!%p8957_p5), %v421_v17  ;;  %688 = vmatpush1.bf16.msra.mxu0 (!%p8957_p5), %v10697_v45  ;;  %v10705_v51 = vld [vmem:[%s12145_s16 + $0x258] ss:$100 sps:$4 sm:$0xff] (!%p8957_p5)   ;;  %v10709_v54 = vld [vmem:[%s12145_s16 + $0x320] ss:$100 sps:$4 sm:$0xff] (!%p8957_p5)   ;;  %v10710_v55 = vld [vmem:[%s12145_s16 + $0x328] ss:$100 sps:$4 sm:$0xff] (!%p8957_p5)  }
  0xe4   : > { %433 = vadd.xlane.f32.xlu1 (!%p8957_p5), %v423_v18  ;;  %10268 = vmatpush3.bf16.msra.mxu1 (!%p8957_p5), %v10698_v46  ;;  %v10711_v56 = vld [vmem:[%s12145_s16 + $0x3ec] ss:$100 sps:$4 sm:$0xff] (!%p8957_p5)   ;;  %v10715_v59 = vld [vmem:[%s12145_s16 + $0x4b4] ss:$100 sps:$4 sm:$0xff] (!%p8957_p5)   ;;  %v10719_v62 = vld [vmem:[%s12145_s16 + $0x57c] ss:$100 sps:$4 sm:$0xff] (!%p8957_p5)  }
  0xe5   : > { %10269 = vmatprep.subr.bf16.mxu1 %v11843_v22  ;;  %689 = vmatprep.subr.bf16.mxu0 %v10699_v47  ;;  %v10713_v57 = vld [vmem:[%s12145_s16 + $0x3e8] ss:$100 sps:$4 sm:$0xff]   ;;  %v10714_v58 = vld [vmem:[%s12145_s16 + $0x3f0] ss:$100 sps:$4 sm:$0xff]   ;;  %v10718_v61 = vld [vmem:[%s12145_s16 + $0x4b8] ss:$100 sps:$4 sm:$0xff]  }
  0xe6   : > { %v10717_v60 = vld [vmem:[%s12145_s16 + $0x4b0] ss:$100 sps:$4 sm:$0xff]   ;;  %v10721_v0 = vld [vmem:[%s12145_s16 + $0x578] ss:$100 sps:$4 sm:$0xff]   ;;  %v10722_v1 = vld [vmem:[%s12145_s16 + $0x580] ss:$100 sps:$4 sm:$0xff]  }
  0xe7   : > { %435 = vadd.xlane.f32.xlu0 %v424_v19  ;;  %690 = vmatpush1.bf16.msra.mxu0 %v10701_v48  ;;  %v540_v47 = vld [vmem:[%s12153_s29 + $0x2] sm:$0x7] }
  0xe8   : > { %10270 = vmatpush3.bf16.msra.mxu1 %v10702_v49  ;;  %691 = vmatprep.subr.bf16.mxu0 %v10703_v50 }
  0xe9   : > { %10271 = vmatprep.subr.bf16.mxu1 %v11843_v22 }
  0xeb   : > { %692 = vmatpush1.bf16.msra.mxu0 %v10705_v51 }
  0xec   : > { %10272 = vmatpush3.bf16.msra.mxu1 %v10706_v52  ;;  %693 = vmatprep.subr.bf16.mxu0 %v10707_v53 }
  0xed   : > { %10273 = vmatprep.subr.bf16.mxu1 %v11843_v22 }
  0xef   : > { %694 = vmatpush1.bf16.msra.mxu0 %v10709_v54 }
  0xf0   : > { %10274 = vmatpush3.bf16.msra.mxu1 %v10710_v55  ;;  %695 = vmatprep.subr.bf16.mxu0 %v10711_v56 }
  0xf1   : > { %10275 = vmatprep.subr.bf16.mxu1 %v11843_v22 }
  0xf3   : > { %696 = vmatpush1.bf16.msra.mxu0 %v10713_v57 }
  0xf4   : > { %10276 = vmatpush3.bf16.msra.mxu1 %v10714_v58  ;;  %697 = vmatprep.subr.bf16.mxu0 %v10715_v59 }
  0xf5   : > { %10277 = vmatprep.subr.bf16.mxu1 %v11843_v22 }
  0xf7   : > { %698 = vmatpush1.bf16.msra.mxu0 %v10717_v60 }
  0xf8   : > { %10278 = vmatpush3.bf16.msra.mxu1 %v10718_v61  ;;  %699 = vmatprep.subr.bf16.mxu0 %v10719_v62 }
  0xf9   : > { %10279 = vmatprep.subr.bf16.mxu1 %v11843_v22 }
  0xfb   : > { %700 = vmatpush1.bf16.msra.mxu0 %v10721_v0 }
  0xfc   : > { %10280 = vmatpush3.bf16.msra.mxu1 %v10722_v1  ;;  %10329 = vmatprep.subr.bf16.mxu0 %v11843_v22 }
  0xfd   : > { %10293 = vmatprep.subr.bf16.mxu1 %v11843_v22 }
 0x16c   : > { %v428_v25 = vpop.xlane.xlu0 %427 }
 0x16d   : > { %v432_v26 = vpop.xlane.xlu1 %431  ;;  %v438_v27 = vmul.f32 0.0078125, %v428_v25  ;;  %v8959_v25 = vld [vmem:[%s12153_s29 + $0x1] ss:$0 sm:$0xff] }
 0x16e   : > { %v440_v28 = vmul.f32 0.0078125, %v432_v26 }
 0x16f   : > { %v12169_v29 = vsub.f32 %v420_v15, %v438_v27 }
 0x170   : > { %v12171_v30 = vsub.f32 %v422_v16, %v440_v28  ;;  %v430_v31 = vpop.xlane.xlu0 %429 }
 0x171   : > { %v434_v32 = vpop.xlane.xlu1 %433  ;;  %v439_v33 = vmul.f32 0.0078125, %v430_v31  ;;  %v448_v34 = vmul.f32 %v12169_v29, %v12169_v29 }
 0x172   : > { %v441_v35 = vmul.f32 0.0078125, %v434_v32  ;;  %v450_v38 = vmul.f32 %v12171_v30, %v12171_v30 }
 0x173   : > { %v12175_v36 = vsub.f32 %v421_v17, %v439_v33  ;;  %453 = vadd.xlane.f32.xlu1 %v448_v34 }
 0x174   : > { %v12177_v37 = vsub.f32 %v423_v18, %v441_v35  ;;  %v436_v39 = vpop.xlane.xlu0 %435 }
 0x175   : > { %v442_v40 = vmul.f32 0.0078125, %v436_v39  ;;  %v449_v41 = vmul.f32 %v12175_v36, %v12175_v36 }
 0x176   : > { %v451_v43 = vmul.f32 %v12177_v37, %v12177_v37 }
 0x177   : > { %v12183_v42 = vsub.f32 %v424_v19, %v442_v40  ;;  %457 = vadd.xlane.f32.xlu1 %v450_v38  ;;  %455 = vadd.xlane.f32.xlu0 %v449_v41  ;;  %v8958_v19 = vld [vmem:[%s12153_s29] ss:$0 sm:$0xff] }
 0x179   : > { %v452_v44 = vmul.f32 %v12183_v42, %v12183_v42 }
 0x17b   : > { %459 = vadd.xlane.f32.xlu0 %v451_v43  ;;  %461 = vadd.xlane.f32.xlu1 %v452_v44 }
 0x200   : > { %v454_v2 = vpop.xlane.xlu1 %453 }
 0x201   : > { %v463_v3 = vmul.f32 0.0078125, %v454_v2 }
 0x203   : > { %v468_v4 = vadd.f32 1e-05, %v463_v3 }
 0x204   : > { %v458_v5 = vpop.xlane.xlu1 %457  ;;  %v456_v6 = vpop.xlane.xlu0 %455 }
 0x205   : > { %11051 = vrsqrt.f32 %v468_v4  ;;  %v465_v7 = vmul.f32 0.0078125, %v458_v5  ;;  %v464_v8 = vmul.f32 0.0078125, %v456_v6 }
 0x207   : > { %v469_v9 = vadd.f32 1e-05, %v464_v8  ;;  %v470_v10 = vadd.f32 1e-05, %v465_v7 }
 0x208   : > { %v462_v11 = vpop.xlane.xlu1 %461  ;;  %v460_v12 = vpop.xlane.xlu0 %459 }
 0x209   : > { %v466_v13 = vmul.f32 0.0078125, %v460_v12  ;;  %11053 = vrsqrt.f32 %v469_v9  ;;  %v467_v14 = vmul.f32 0.0078125, %v462_v11 }
 0x20a   : > { %11055 = vrsqrt.f32 %v470_v10 }
 0x20b   : > { %v471_v15 = vadd.f32 1e-05, %v466_v13  ;;  %v472_v16 = vadd.f32 1e-05, %v467_v14 }
 0x20d   : > { %11057 = vrsqrt.f32 %v471_v15 }
 0x20e   : > { %11059 = vrsqrt.f32 %v472_v16 }
 0x20f   : > { %v11052_v17 = vpop.eup %11051 }
 0x210   : > { %v478_v18 = vmul.f32 %v11052_v17, %v12169_v29 }
 0x212   : > { %v489_v23 = vmul.f32 %v8958_v19, %v478_v18 }
 0x213   : > { %v11054_v20 = vpop.eup %11053 }
 0x214   : > { %v479_v21 = vmul.f32 %v11054_v20, %v12175_v36  ;;  %v11056_v24 = vpop.eup %11055  ;;  %v500_v28 = vadd.f32 %v8959_v25, %v489_v23 }
 0x215   : > { %v480_v32 = vmul.f32 %v11056_v24, %v12171_v30 }
 0x216   : > { %v490_v26 = vmul.f32 %v8958_v19, %v479_v21 }
 0x217   : > { %v11058_v27 = vpop.eup %11057  ;;  %v491_v29 = vmul.f32 %v8958_v19, %v480_v32 }
 0x218   : > { %v501_v31 = vadd.f32 %v8959_v25, %v490_v26  ;;  %v481_v33 = vmul.f32 %v11058_v27, %v12177_v37  ;;  %v11060_v38 = vpop.eup %11059 }
 0x219   : > { %v482_v39 = vmul.f32 %v11060_v38, %v12183_v42  ;;  %v502_v40 = vadd.f32 %v8959_v25, %v491_v29  ;;  %v542_v42 = vlaneseq }
 0x21a   : > { %v537_v34 = vpack.c.bf16 %v501_v31, %v500_v28  ;;  %v492_v35 = vmul.f32 %v8958_v19, %v481_v33 }
 0x21b   : > { %v493_v30 = vmul.f32 %v8958_v19, %v482_v39  ;;  %v12237_v44 = vshrl.u32 %v542_v42, 7 }
 0x21c   : > { %718 = vmatmul.mubr.bf16.vlgmr.msra.gmra.mrb[0].mxu0 %v537_v34  ;;  %10282 = vmatmul.mubr.bf16.vlgmr.msra.gmra.mrb[0].mxu1 %v537_v34  ;;  %v503_v36 = vadd.f32 %v8959_v25, %v492_v35 }
 0x21d   : > { %727 = vmatprep.mubr.bf16.mxu0 %v11844_v63  ;;  %10285 = vmatprep.mubr.msk.bf16.mxu1 %vm11845_vm0, %v11843_v22  ;;  %v504_v37 = vadd.f32 %v8959_v25, %v493_v30  ;;  %v12240_v45 = vsub.s32 0, %v12237_v44  ;;  %v12243_v46 = vsub.s32 2, %v12237_v44  ;;  %v12247_v48 = vsub.s32 1, %v12237_v44 }
 0x21e   : > { %v538_v41 = vpack.c.bf16 %v503_v36, %v502_v40 }
 0x21f   : > { %v539_v43 = vpack.c.bf16 %v504_v37, %v504_v37  ;;  %v12250_v49 = vrot.slane %v540_v47, %v12240_v45  ;;  %v553_v50 = vrot.slane %v540_v47, %v12243_v46  ;;  %v549_v53 = vrot.slane %v540_v47, %v12247_v48  ;;  %v803_v37 = vld [vmem:[#allocation7 + $0x8] sm:$0xff] }
 0x224   : > { %728 = vmatmul.mubr.bf16.gmra.mrb[4].mxu0 %v538_v41  ;;  %10286 = vmatmul.mubr.bf16.gmra.mrb[4].mxu1 %v538_v41  ;;  %v802_v41 = vld [vmem:[#allocation7] sm:$0xff] }
 0x225   : > { %737 = vmatprep.mubr.bf16.mxu0 %v11844_v63  ;;  %10289 = vmatprep.mubr.msk.bf16.mxu1 %vm11845_vm0, %v11843_v22 }
 0x22c   : > { %738 = vmatmul.mubr.bf16.gmra.mrb[8].mxu0 %v539_v43  ;;  %10290 = vmatmul.mubr.bf16.gmra.mrb[8].mxu1 %v539_v43 }
 0x22d   : > { %10299 = vmatprep.mubr.msk.bf16.mxu1 %vm11845_vm0, %v11843_v22  ;;  %10345 = vmatprep.mubr.msk.bf16.mxu0 %vm11845_vm0, %v11843_v22 }
 0x2ef   : > { %v719_v51 = vpop.f32.mrb[0].mxu0  ;;  %v780_v52 = vpop.f32.mrb[0].mxu1 }
 0x2f0   : > { %v721_v54 = vpop.f32.mrb[1].mxu0  ;;  %v10283_v55 = vpop.f32.mrb[1].mxu1  ;;  %v720_v58 = vadd.f32 %v719_v51, %v12250_v49  ;;  %v781_v59 = vadd.f32 %v780_v52, %v553_v50 }
 0x2f1   : > { %v723_v56 = vpop.f32.mrb[2].mxu0  ;;  %v783_v57 = vpop.f32.mrb[2].mxu1  ;;  %v722_v1 = vadd.f32 %v721_v54, %v549_v53  ;;  %v805_v55 = vld [vmem:[#allocation7 + $0x18] sm:$0xff] }
 0x2f2   : > { %v724_v60 = vadd.f32 %v723_v56, %v12250_v49  ;;  %v784_v61 = vadd.f32 %v783_v57, %v553_v50  ;;  %v725_v62 = vpop.f32.mrb[3].mxu0  ;;  %v10284_v0 = vpop.f32.mrb[3].mxu1 }
 0x2f3   : > { %v726_v2 = vadd.f32 %v725_v62, %v549_v53  ;;  %v806_v0 = vld [vmem:[#allocation7 + $0x20] sm:$0xff] }
 0x2f4   : > { %v807_v3 = vpack.c.bf16 %v724_v60, %v720_v58  ;;  %v928_v4 = vpack.c.bf16 %v784_v61, %v781_v59 }
 0x2f5   : > { %v810_v5 = vpack.c.bf16 %v726_v2, %v722_v1 }
 0x2f7   : > { %v729_v6 = vpop.f32.mrb[4].mxu0  ;;  %v788_v7 = vpop.f32.mrb[4].mxu1  ;;  %10294 = vmatpush3.bf16.xpose.msra.mxu1 %v810_v5 }
 0x2f8   : > { %v731_v8 = vpop.f32.mrb[5].mxu0  ;;  %v10287_v9 = vpop.f32.mrb[5].mxu1  ;;  %10295 = vmatprep.subr.bf16.mxu1 %v11843_v22  ;;  %v730_v12 = vadd.f32 %v729_v6, %v12250_v49  ;;  %v789_v13 = vadd.f32 %v788_v7, %v553_v50 }
 0x2f9   : > { %v733_v10 = vpop.f32.mrb[6].mxu0  ;;  %v791_v11 = vpop.f32.mrb[6].mxu1  ;;  %v732_v18 = vadd.f32 %v731_v8, %v549_v53 }
 0x2fa   : > { %v734_v14 = vadd.f32 %v733_v10, %v12250_v49  ;;  %v792_v15 = vadd.f32 %v791_v11, %v553_v50  ;;  %v735_v16 = vpop.f32.mrb[7].mxu0  ;;  %v10288_v17 = vpop.f32.mrb[7].mxu1 }
 0x2fb   : > { %v736_v19 = vadd.f32 %v735_v16, %v549_v53 }
 0x2fc   : > { %v808_v20 = vpack.c.bf16 %v734_v14, %v730_v12  ;;  %v929_v21 = vpack.c.bf16 %v792_v15, %v789_v13 }
 0x2fd   : > { %v811_v23 = vpack.c.bf16 %v736_v19, %v732_v18 }
 0x2ff   : > { %v739_v24 = vpop.f32.mrb[8].mxu0  ;;  %v796_v25 = vpop.f32.mrb[8].mxu1  ;;  %10296 = vmatpush3.bf16.xpose.msra.mxu1 %v811_v23 }
 0x300   : > { %v741_v26 = vpop.f32.mrb[9].mxu0  ;;  %v10291_v27 = vpop.f32.mrb[9].mxu1  ;;  %10297 = vmatprep.subr.bf16.mxu1 %v11843_v22  ;;  %v797_v38 = vadd.f32 %v796_v25, %v553_v50  ;;  %v740_v39 = vadd.f32 %v739_v24, %v12250_v49  ;;  %v804_v49 = vld [vmem:[#allocation7 + $0x10] sm:$0xff] }
 0x301   : > { %v742_v28 = vadd.f32 %v741_v26, %v549_v53  ;;  %v743_v31 = vpop.f32.mrb[10].mxu0  ;;  %v799_v32 = vpop.f32.mrb[10].mxu1 }
 0x302   : > { %v744_v33 = vpop.f32.mrb[11].mxu0  ;;  %v10292_v34 = vpop.f32.mrb[11].mxu1  ;;  %v930_v29 = vpack.c.bf16 %v797_v38, %v797_v38  ;;  %v809_v40 = vpack.c.bf16 %v740_v39, %v740_v39  ;;  %v10724_v38 = vld [vmem:[%s12145_s16 + $0xd4] ss:$100 sps:$4 sm:$0xff]   ;;  %v10727_v39 = vld [vmem:[%s12145_s16 + $0x32c] ss:$100 sps:$4 sm:$0xff]  }
 0x303   : > { %v812_v35 = vpack.c.bf16 %v742_v28, %v742_v28 }
 0x304   : > { %v942_v36 = vsel %vm940_vm1, %v930_v29, 0  ;;  %v10725_v29 = vld [vmem:[%s12145_s16 + $0x19c] ss:$100 sps:$4 sm:$0xff]  }
 0x307   : > { %10298 = vmatpush3.bf16.xpose.msra.mxu1 %v812_v35  ;;  %v10723_v35 = vld [vmem:[%s12145_s16 + $0xc] ss:$100 sps:$4 sm:$0xff]  }
 0x308   : > { %10311 = vmatprep.subr.bf16.mxu1 %v11843_v22  ;;  %10330 = vmatpush3.bf16.msra.mxu0 %v10723_v35 }
 0x309   : > { %10331 = vmatprep.subr.bf16.mxu0 %v11843_v22 }
 0x30c   : > { %10332 = vmatpush3.bf16.msra.mxu0 %v10724_v38 }
 0x30d   : > { %10333 = vmatprep.subr.bf16.mxu0 %v11843_v22 }
 0x30e   : > { %10300 = vmatmul.mubr.bf16.vlgmr.msra.gmra.mrb[12].mxu1 %v807_v3 }
 0x30f   : > { %10312 = vmatpush3.bf16.msra.mxu1 %v928_v4  ;;  %10303 = vmatprep.mubr.msk.bf16.mxu1 %vm11845_vm0, %v11843_v22 }
 0x310   : > { %10313 = vmatprep.subr.bf16.mxu1 %v11843_v22  ;;  %10334 = vmatpush3.bf16.msra.mxu0 %v10725_v29 }
 0x311   : > { %10335 = vmatprep.subr.bf16.mxu0 %v11843_v22 }
 0x313   : > { %10314 = vmatpush3.bf16.msra.mxu1 %v929_v21 }
 0x314   : > { %10315 = vmatprep.subr.bf16.mxu1 %v11843_v22 }
 0x316   : > { %10304 = vmatmul.mubr.bf16.gmra.mrb[16].mxu1 %v808_v20 }
 0x317   : > { %10316 = vmatpush3.bf16.msra.mxu1 %v942_v36  ;;  %10307 = vmatprep.mubr.msk.bf16.mxu1 %vm11845_vm0, %v11843_v22  ;;  %v10726_v36 = vld [vmem:[%s12145_s16 + $0x264] ss:$100 sps:$4 sm:$0xff]  }
 0x318   : > { %10336 = vmatpush3.bf16.msra.mxu0 %v10726_v36 }
 0x319   : > { %10337 = vmatprep.subr.bf16.mxu0 %v11843_v22 }
 0x31c   : > { %10338 = vmatpush3.bf16.msra.mxu0 %v10727_v39  ;;  %v11095_v39 = vld [vmem:[#allocation2 + $0x20] sm:$0xff] }
 0x31d   : > { %10339 = vmatprep.subr.bf16.mxu0 %v11843_v22 }
 0x31e   : > { %10308 = vmatmul.mubr.bf16.gmra.mrb[20].mxu1 %v809_v40  ;;  %v10728_v40 = vld [vmem:[%s12145_s16 + $0x3f4] ss:$100 sps:$4 sm:$0xff]  }
 0x31f   : > { %10317 = vmatprep.mubr.msk.bf16.mxu1 %vm11845_vm0, %v11843_v22 }
 0x320   : > { %10340 = vmatpush3.bf16.msra.mxu0 %v10728_v40 }
 0x321   : > { %10341 = vmatprep.subr.bf16.mxu0 %v11843_v22 }
 0x3e1   : > { %v847_v30 = vpop.f32.mrb[12].mxu1 }
 0x3e2   : > { %v848_v43 = vadd.f32 %v847_v30, %v802_v41  ;;  %v10301_v42 = vpop.f32.mrb[13].mxu1  ;;  %v10729_v41 = vld [vmem:[%s12145_s16 + $0x4bc] ss:$100 sps:$4 sm:$0xff]  }
 0x3e3   : > { %v850_v47 = vpop.f32.mrb[14].mxu1  ;;  %10342 = vmatpush3.bf16.msra.mxu0 %v10729_v41 }
 0x3e4   : > { %v851_v50 = vadd.f32 %v850_v47, %v803_v37  ;;  %v10302_v51 = vpop.f32.mrb[15].mxu1  ;;  %v870_v52 = vsel %vm869_vm2, %v848_v43, -inf  ;;  %10343 = vmatprep.subr.bf16.mxu0 %v11843_v22 }
 0x3e5   : > { %871 = vmax.xlane.f32.xlu0 %v870_v52 }
 0x3e6   : > { %v873_v53 = vsel %vm869_vm2, %v851_v50, -inf }
 0x3e7   : > { %874 = vmax.xlane.f32.xlu1 %v873_v53 }
 0x3e9   : > { %v855_v54 = vpop.f32.mrb[16].mxu1 }
 0x3ea   : > { %v856_v56 = vadd.f32 %v855_v54, %v804_v49  ;;  %v10305_v57 = vpop.f32.mrb[17].mxu1 }
 0x3eb   : > { %v858_v58 = vpop.f32.mrb[18].mxu1 }
 0x3ec   : > { %v859_v59 = vadd.f32 %v858_v58, %v805_v55  ;;  %v10306_v60 = vpop.f32.mrb[19].mxu1  ;;  %v876_v61 = vsel %vm869_vm2, %v856_v56, -inf }
 0x3ed   : > { %877 = vmax.xlane.f32.xlu0 %v876_v61 }
 0x3ee   : > { %v879_v62 = vsel %vm869_vm2, %v859_v59, -inf }
 0x3ef   : > { %880 = vmax.xlane.f32.xlu1 %v879_v62  ;;  %v10730_v62 = vld [vmem:[%s12145_s16 + $0x584] ss:$100 sps:$4 sm:$0xff]  }
 0x3f0   : > { %10344 = vmatpush3.bf16.msra.mxu0 %v10730_v62 }
 0x3f1   : > { %v863_v1 = vpop.f32.mrb[20].mxu1 }
 0x3f2   : > { %v864_v2 = vadd.f32 %v863_v1, %v806_v0  ;;  %v10309_v3 = vpop.f32.mrb[21].mxu1 }
 0x3f3   : > { %v866_v4 = vpop.f32.mrb[22].mxu1 }
 0x3f4   : > { %v10310_v5 = vpop.f32.mrb[23].mxu1  ;;  %v882_v6 = vsel %vm869_vm2, %v864_v2, -inf }
 0x3f5   : > { %883 = vmax.xlane.f32.xlu0 %v882_v6 }
 0x472   : > { %v872_v7 = vpop.xlane.xlu0 %871 }
 0x473   : > { %v885_v8 = vsub.f32 %v848_v43, %v872_v7 }
 0x474   : > { %v875_v9 = vpop.xlane.xlu1 %874 }
 0x475   : > { %v890_v10 = vmul.f32 1.442695, %v885_v8  ;;  %v886_v11 = vsub.f32 %v851_v50, %v875_v9 }
 0x477   : > { %11061 = vpow2.f32 %v890_v10  ;;  %v892_v12 = vmul.f32 1.442695, %v886_v11 }
 0x479   : > { %11063 = vpow2.f32 %v892_v12 }
 0x47a   : > { %v878_v13 = vpop.xlane.xlu0 %877 }
 0x47b   : > { %v887_v14 = vsub.f32 %v856_v56, %v878_v13 }
 0x47c   : > { %v881_v15 = vpop.xlane.xlu1 %880 }
 0x47d   : > { %v894_v16 = vmul.f32 1.442695, %v887_v14  ;;  %v888_v17 = vsub.f32 %v859_v59, %v881_v15 }
 0x47f   : > { %11065 = vpow2.f32 %v894_v16  ;;  %v896_v18 = vmul.f32 1.442695, %v888_v17  ;;  %v8995_v16 = vld [vmem:[%s12153_s29 + $0x5] ss:$0 sm:$0xff]  ;;  %v11091_v17 = vld [vmem:[#allocation2] sm:$0xff] }
 0x481   : > { %v11062_v19 = vpop.eup %11061  ;;  %11067 = vpow2.f32 %v896_v18 }
 0x482   : > { %v884_v20 = vpop.xlane.xlu0 %883  ;;  %v900_v21 = vsel %vm869_vm2, %v11062_v19, 0.0 }
 0x483   : > { %v11064_v23 = vpop.eup %11063  ;;  %v889_v24 = vsub.f32 %v864_v2, %v884_v20  ;;  %901 = vadd.xlane.f32.xlu1 %v900_v21 }
 0x484   : > { %v903_v25 = vsel %vm869_vm2, %v11064_v23, 0.0 }
 0x485   : > { %v898_v26 = vmul.f32 1.442695, %v889_v24  ;;  %904 = vadd.xlane.f32.xlu0 %v903_v25 }
 0x487   : > { %11069 = vpow2.f32 %v898_v26 }
 0x489   : > { %v11066_v27 = vpop.eup %11065 }
 0x48a   : > { %v906_v28 = vsel %vm869_vm2, %v11066_v27, 0.0 }
 0x48b   : > { %v11068_v31 = vpop.eup %11067  ;;  %907 = vadd.xlane.f32.xlu1 %v906_v28 }
 0x48c   : > { %v909_v32 = vsel %vm869_vm2, %v11068_v31, 0.0 }
 0x48d   : > { %910 = vadd.xlane.f32.xlu0 %v909_v32 }
 0x491   : > { %v11070_v33 = vpop.eup %11069 }
 0x492   : > { %v912_v34 = vsel %vm869_vm2, %v11070_v33, 0.0 }
 0x493   : > { %913 = vadd.xlane.f32.xlu1 %v912_v34  ;;  %v11094_v34 = vld [vmem:[#allocation2 + $0x18] sm:$0xff] }
 0x510   : > { %v902_v30 = vpop.xlane.xlu1 %901 }
 0x511   : > { %11071 = vrcp.f32 %v902_v30 }
 0x512   : > { %v905_v37 = vpop.xlane.xlu0 %904 }
 0x513   : > { %11073 = vrcp.f32 %v905_v37 }
 0x518   : > { %v908_v43 = vpop.xlane.xlu1 %907 }
 0x519   : > { %11075 = vrcp.f32 %v908_v43 }
 0x51a   : > { %v911_v42 = vpop.xlane.xlu0 %910 }
 0x51b   : > { %v11072_v47 = vpop.eup %11071  ;;  %11077 = vrcp.f32 %v911_v42  ;;  %v10731_v42 = vld [vmem:[%s12145_s16 + $0x10] ss:$100 sps:$4 sm:$0xff]  }
 0x51c   : > { %v920_v51 = vmul.f32 %v11072_v47, %v11062_v19  ;;  %v10733_v47 = vld [vmem:[%s12145_s16 + $0x14] ss:$100 sps:$4 sm:$0xff]  }
 0x51d   : > { %v11074_v50 = vpop.eup %11073  ;;  %2074 = vmatprep.subr.bf16.mxu1 %v10733_v47 }
 0x51e   : > { %v921_v52 = vmul.f32 %v11074_v50, %v11064_v23  ;;  %v11092_v23 = vld [vmem:[#allocation2 + $0x8] sm:$0xff]  ;;  %v10734_v50 = vld [vmem:[%s12145_s16 + $0x18] ss:$100 sps:$4 sm:$0xff]  }
 0x520   : > { %v925_v53 = vpack.c.bf16 %v921_v52, %v920_v51  ;;  %v914_v49 = vpop.xlane.xlu1 %913  ;;  %v10736_v51 = vld [vmem:[%s12145_s16 + $0x1c] ss:$100 sps:$4 sm:$0xff]  }
 0x521   : > { %11079 = vrcp.f32 %v914_v49  ;;  %v10739_v52 = vld [vmem:[%s12145_s16 + $0xdc] ss:$100 sps:$4 sm:$0xff]   ;;  %2135 = vmatprep.subr.bf16.mxu0 %v10736_v51 }
 0x522   : > { %10318 = vmatmul.mubr.msk.bf16.vlgmr.msra.gmra.mrb[24].mxu1 %vm869_vm2, %v925_v53  ;;  %v10742_v53 = vld [vmem:[%s12145_s16 + $0xe4] ss:$100 sps:$4 sm:$0xff]   ;;  %v10737_v49 = vld [vmem:[%s12145_s16 + $0xd8] ss:$100 sps:$4 sm:$0xff]  }
 0x523   : > { %v11076_v54 = vpop.eup %11075  ;;  %10321 = vmatprep.mubr.msk.bf16.mxu1 %vm11845_vm0, %v11843_v22  ;;  %2075 = vmatpush1.bf16.msra.mxu1 %v10731_v42 }
 0x524   : > { %v922_v56 = vmul.f32 %v11076_v54, %v11066_v27  ;;  %v11093_v27 = vld [vmem:[#allocation2 + $0x10] sm:$0xff]  ;;  %2076 = vmatprep.subr.bf16.mxu1 %v10739_v52  ;;  %v10740_v54 = vld [vmem:[%s12145_s16 + $0xe0] ss:$100 sps:$4 sm:$0xff]  }
 0x525   : > { %v11078_v55 = vpop.eup %11077 }
 0x526   : > { %v923_v57 = vmul.f32 %v11078_v55, %v11068_v31 }
 0x527   : > { %2077 = vmatpush1.bf16.msra.mxu1 %v10737_v49 }
 0x528   : > { %v926_v58 = vpack.c.bf16 %v923_v57, %v922_v56 }
 0x52a   : > { %10322 = vmatmul.mubr.msk.bf16.gmra.mrb[28].mxu1 %vm869_vm2, %v926_v58 }
 0x52b   : > { %v11080_v59 = vpop.eup %11079  ;;  %10325 = vmatprep.mubr.msk.bf16.mxu1 %vm11845_vm0, %v11843_v22 }
 0x52c   : > { %v924_v60 = vmul.f32 %v11080_v59, %v11070_v33 }
 0x52e   : > { %v927_v61 = vpack.c.bf16 %v924_v60, %v924_v60 }
 0x532   : > { %10326 = vmatmul.mubr.msk.bf16.gmra.mrb[32].mxu1 %vm869_vm2, %v927_v61 }
 0x533   : > { %2106 = vmatprep.mubr.bf16.mxu1 %v11844_v63 }
 0x5f5   : > { %v978_v0 = vpop.f32.mrb[24].mxu1 }
 0x5f6   : > { %v10319_v1 = vpop.f32.mrb[25].mxu1 }
 0x5f7   : > { %v981_v2 = vpop.f32.mrb[26].mxu1 }
 0x5f8   : > { %v1016_v3 = vpack.c.bf16 %v981_v2, %v978_v0  ;;  %v10320_v4 = vpop.f32.mrb[27].mxu1 }
 0x5fa   : > { %10346 = vmatmul.mubr.bf16.vlgmr.msra.gmra.mrb[12].mxu0 %v1016_v3 }
 0x5fb   : > { %10349 = vmatprep.mubr.msk.bf16.mxu0 %vm11845_vm0, %v11843_v22  ;;  %2136 = vmatpush1.bf16.msra.mxu0 %v10734_v50 }
 0x5fc   : > { %2137 = vmatprep.subr.bf16.mxu0 %v10742_v53 }
 0x5fd   : > { %v986_v5 = vpop.f32.mrb[28].mxu1 }
 0x5fe   : > { %v10323_v6 = vpop.f32.mrb[29].mxu1 }
 0x5ff   : > { %v989_v7 = vpop.f32.mrb[30].mxu1  ;;  %2138 = vmatpush1.bf16.msra.mxu0 %v10740_v54 }
 0x600   : > { %v1017_v8 = vpack.c.bf16 %v989_v7, %v986_v5  ;;  %v10324_v9 = vpop.f32.mrb[31].mxu1 }
 0x602   : > { %10350 = vmatmul.mubr.bf16.gmra.mrb[16].mxu0 %v1017_v8 }
 0x603   : > { %10353 = vmatprep.mubr.msk.bf16.mxu0 %vm11845_vm0, %v11843_v22 }
 0x605   : > { %v994_v10 = vpop.f32.mrb[32].mxu1 }
 0x606   : > { %v10327_v11 = vpop.f32.mrb[33].mxu1  ;;  %v1018_v13 = vpack.c.bf16 %v994_v10, %v994_v10 }
 0x607   : > { %v997_v12 = vpop.f32.mrb[34].mxu1  ;;  %v10745_v11 = vld [vmem:[%s12145_s16 + $0x1a4] ss:$100 sps:$4 sm:$0xff]  }
 0x608   : > { %v10328_v14 = vpop.f32.mrb[35].mxu1  ;;  %v10748_v12 = vld [vmem:[%s12145_s16 + $0x1ac] ss:$100 sps:$4 sm:$0xff]   ;;  %2078 = vmatprep.subr.bf16.mxu1 %v10745_v11 }
 0x609   : > { %v10746_v14 = vld [vmem:[%s12145_s16 + $0x1a8] ss:$100 sps:$4 sm:$0xff]   ;;  %2139 = vmatprep.subr.bf16.mxu0 %v10748_v12 }
 0x60a   : > { %10354 = vmatmul.mubr.bf16.gmra.mrb[20].mxu0 %v1018_v13  ;;  %v10743_v13 = vld [vmem:[%s12145_s16 + $0x1a0] ss:$100 sps:$4 sm:$0xff]  }
 0x60b   : > { %2167 = vmatprep.mubr.bf16.mxu0 %v11844_v63  ;;  %2079 = vmatpush1.bf16.msra.mxu1 %v10743_v13 }
 0x60c   : > { %2140 = vmatpush1.bf16.msra.mxu0 %v10746_v14 }
 0x6cd   : > { %v1101_v15 = vpop.f32.mrb[12].mxu0 }
 0x6ce   : > { %v1123_v18 = vadd.f32 %v11091_v17, %v1101_v15  ;;  %v10347_v19 = vpop.f32.mrb[13].mxu0  ;;  %v10754_v17 = vld [vmem:[%s12145_s16 + $0x274] ss:$100 sps:$4 sm:$0xff]  }
 0x6cf   : > { %v1104_v20 = vpop.f32.mrb[14].mxu0  ;;  %v10752_v19 = vld [vmem:[%s12145_s16 + $0x270] ss:$100 sps:$4 sm:$0xff]   ;;  %2141 = vmatprep.subr.bf16.mxu0 %v10754_v17 }
 0x6d0   : > { %v12309_v21 = vadd.f32 %v8995_v16, %v1123_v18  ;;  %v1124_v24 = vadd.f32 %v11092_v23, %v1104_v20  ;;  %v10348_v25 = vpop.f32.mrb[15].mxu0  ;;  %v10749_v18 = vld [vmem:[%s12145_s16 + $0x268] ss:$100 sps:$4 sm:$0xff]   ;;  %2142 = vmatpush1.bf16.msra.mxu0 %v10752_v19  ;;  %v10757_v20 = vld [vmem:[%s12145_s16 + $0x334] ss:$100 sps:$4 sm:$0xff]  }
 0x6d1   : > { %v10760_v23 = vld [vmem:[%s12145_s16 + $0x33c] ss:$100 sps:$4 sm:$0xff]   ;;  %v10790_v19 = vld [vmem:[%s12145_s16 + $0xf4] ss:$100 sps:$4 sm:$0xff]  }
 0x6d2   : > { %v12311_v22 = vadd.f32 %v8995_v16, %v1124_v24  ;;  %1142 = vadd.xlane.f32.xlu0 %v12309_v21  ;;  %v10755_v24 = vld [vmem:[%s12145_s16 + $0x330] ss:$100 sps:$4 sm:$0xff]   ;;  %v10758_v25 = vld [vmem:[%s12145_s16 + $0x338] ss:$100 sps:$4 sm:$0xff]   ;;  %2143 = vmatprep.subr.bf16.mxu0 %v10760_v23 }
 0x6d4   : > { %1144 = vadd.xlane.f32.xlu1 %v12311_v22  ;;  %2144 = vmatpush1.bf16.msra.mxu0 %v10758_v25  ;;  %v10788_v25 = vld [vmem:[%s12145_s16 + $0xf0] ss:$100 sps:$4 sm:$0xff]  }
 0x6d5   : > { %v1109_v26 = vpop.f32.mrb[16].mxu0 }
 0x6d6   : > { %v1125_v28 = vadd.f32 %v11093_v27, %v1109_v26  ;;  %v10351_v31 = vpop.f32.mrb[17].mxu0  ;;  %v10763_v26 = vld [vmem:[%s12145_s16 + $0x3fc] ss:$100 sps:$4 sm:$0xff]   ;;  %v10766_v27 = vld [vmem:[%s12145_s16 + $0x404] ss:$100 sps:$4 sm:$0xff]  }
 0x6d7   : > { %v1112_v32 = vpop.f32.mrb[18].mxu0  ;;  %v10764_v31 = vld [vmem:[%s12145_s16 + $0x400] ss:$100 sps:$4 sm:$0xff]   ;;  %2145 = vmatprep.subr.bf16.mxu0 %v10766_v27 }
 0x6d8   : > { %v12315_v33 = vadd.f32 %v8995_v16, %v1125_v28  ;;  %v1126_v35 = vadd.f32 %v11094_v34, %v1112_v32  ;;  %v10352_v38 = vpop.f32.mrb[19].mxu0  ;;  %v10761_v28 = vld [vmem:[%s12145_s16 + $0x3f8] ss:$100 sps:$4 sm:$0xff]   ;;  %2146 = vmatpush1.bf16.msra.mxu0 %v10764_v31  ;;  %v10769_v32 = vld [vmem:[%s12145_s16 + $0x4c4] ss:$100 sps:$4 sm:$0xff]  }
 0x6d9   : > { %v10772_v34 = vld [vmem:[%s12145_s16 + $0x4cc] ss:$100 sps:$4 sm:$0xff]   ;;  %v10796_v27 = vld [vmem:[%s12145_s16 + $0x1bc] ss:$100 sps:$4 sm:$0xff]  }
 0x6da   : > { %v12317_v29 = vadd.f32 %v8995_v16, %v1126_v35  ;;  %1146 = vadd.xlane.f32.xlu0 %v12315_v33  ;;  %v10767_v35 = vld [vmem:[%s12145_s16 + $0x4c0] ss:$100 sps:$4 sm:$0xff]   ;;  %v10770_v38 = vld [vmem:[%s12145_s16 + $0x4c8] ss:$100 sps:$4 sm:$0xff]   ;;  %2147 = vmatprep.subr.bf16.mxu0 %v10772_v34  ;;  %v10794_v34 = vld [vmem:[%s12145_s16 + $0x1b8] ss:$100 sps:$4 sm:$0xff]  }
 0x6dc   : > { %1148 = vadd.xlane.f32.xlu1 %v12317_v29  ;;  %2148 = vmatpush1.bf16.msra.mxu0 %v10770_v38 }
 0x6dd   : > { %v1117_v36 = vpop.f32.mrb[20].mxu0 }
 0x6de   : > { %v1127_v40 = vadd.f32 %v11095_v39, %v1117_v36  ;;  %v10355_v41 = vpop.f32.mrb[21].mxu0  ;;  %v10775_v36 = vld [vmem:[%s12145_s16 + $0x58c] ss:$100 sps:$4 sm:$0xff]   ;;  %v10778_v39 = vld [vmem:[%s12145_s16 + $0x594] ss:$100 sps:$4 sm:$0xff]  }
 0x6df   : > { %v1120_v30 = vpop.f32.mrb[22].mxu0  ;;  %v10776_v41 = vld [vmem:[%s12145_s16 + $0x590] ss:$100 sps:$4 sm:$0xff]   ;;  %2149 = vmatprep.subr.bf16.mxu0 %v10778_v39  ;;  %v10802_v39 = vld [vmem:[%s12145_s16 + $0x284] ss:$100 sps:$4 sm:$0xff]  }
 0x6e0   : > { %v12321_v37 = vadd.f32 %v8995_v16, %v1127_v40  ;;  %v10356_v43 = vpop.f32.mrb[23].mxu0  ;;  %v10751_v16 = vld [vmem:[%s12145_s16 + $0x26c] ss:$100 sps:$4 sm:$0xff]   ;;  %2150 = vmatpush1.bf16.msra.mxu0 %v10776_v41  ;;  %v10781_v30 = vld [vmem:[%s12145_s16 + $0x24] ss:$100 sps:$4 sm:$0xff]  }
 0x6e1   : > { %2080 = vmatprep.subr.bf16.mxu1 %v10751_v16  ;;  %v10773_v40 = vld [vmem:[%s12145_s16 + $0x588] ss:$100 sps:$4 sm:$0xff]   ;;  %v10797_v41 = vld [vmem:[%s12145_s16 + $0x278] ss:$100 sps:$4 sm:$0xff]  }
 0x6e2   : > { %1150 = vadd.xlane.f32.xlu0 %v12321_v37  ;;  %2081 = vmatpush1.bf16.msra.mxu1 %v10749_v18  ;;  %v10784_v43 = vld [vmem:[%s12145_s16 + $0x2c] ss:$100 sps:$4 sm:$0xff]  }
 0x6e3   : > { %2082 = vmatprep.subr.bf16.mxu1 %v10757_v20  ;;  %2257 = vmatprep.subr.bf16.mxu0 %v10784_v43  ;;  %v10782_v16 = vld [vmem:[%s12145_s16 + $0x28] ss:$100 sps:$4 sm:$0xff]  }
 0x6e4   : > { %v10787_v18 = vld [vmem:[%s12145_s16 + $0xec] ss:$100 sps:$4 sm:$0xff]  }
 0x6e6   : > { %2083 = vmatpush1.bf16.msra.mxu1 %v10755_v24  ;;  %v10785_v24 = vld [vmem:[%s12145_s16 + $0xe8] ss:$100 sps:$4 sm:$0xff]  }
 0x6e7   : > { %2084 = vmatprep.subr.bf16.mxu1 %v10763_v26 }
 0x6ea   : > { %2085 = vmatpush1.bf16.msra.mxu1 %v10761_v28 }
 0x6eb   : > { %2086 = vmatprep.subr.bf16.mxu1 %v10769_v32  ;;  %v10791_v32 = vld [vmem:[%s12145_s16 + $0x1b0] ss:$100 sps:$4 sm:$0xff]  }
 0x6ee   : > { %2087 = vmatpush1.bf16.msra.mxu1 %v10767_v35 }
 0x6ef   : > { %2088 = vmatprep.subr.bf16.mxu1 %v10775_v36  ;;  %v10799_v36 = vld [vmem:[%s12145_s16 + $0x27c] ss:$100 sps:$4 sm:$0xff]  }
 0x6f2   : > { %2089 = vmatpush1.bf16.msra.mxu1 %v10773_v40 }
 0x6f3   : > { %2196 = vmatprep.subr.bf16.mxu1 %v10781_v30  ;;  %v10800_v30 = vld [vmem:[%s12145_s16 + $0x280] ss:$100 sps:$4 sm:$0xff]  }
 0x75f   : > { %v1143_v55 = vpop.xlane.xlu0 %1142 }
 0x760   : > { %v1152_v56 = vmul.f32 0.0078125, %v1143_v55 }
 0x761   : > { %v1145_v57 = vpop.xlane.xlu1 %1144 }
 0x762   : > { %v12333_v58 = vsub.f32 %v12309_v21, %v1152_v56  ;;  %v1153_v59 = vmul.f32 0.0078125, %v1145_v57 }
 0x764   : > { %v12336_v60 = vsub.f32 %v12311_v22, %v1153_v59  ;;  %v1162_v61 = vmul.f32 %v12333_v58, %v12333_v58 }
 0x766   : > { %1167 = vadd.xlane.f32.xlu1 %v1162_v61  ;;  %v1163_v62 = vmul.f32 %v12336_v60, %v12336_v60 }
 0x767   : > { %v1147_v0 = vpop.xlane.xlu0 %1146 }
 0x768   : > { %v1154_v1 = vmul.f32 0.0078125, %v1147_v0  ;;  %1169 = vadd.xlane.f32.xlu0 %v1163_v62  ;;  %v8996_v62 = vld [vmem:[%s12153_s29 + $0x6] ss:$0 sm:$0xff] }
 0x769   : > { %v1149_v2 = vpop.xlane.xlu1 %1148 }
 0x76a   : > { %v12343_v3 = vsub.f32 %v12315_v33, %v1154_v1  ;;  %v1155_v4 = vmul.f32 0.0078125, %v1149_v2 }
 0x76c   : > { %v12346_v5 = vsub.f32 %v12317_v29, %v1155_v4  ;;  %v1164_v6 = vmul.f32 %v12343_v3, %v12343_v3 }
 0x76e   : > { %1171 = vadd.xlane.f32.xlu1 %v1164_v6  ;;  %v1165_v7 = vmul.f32 %v12346_v5, %v12346_v5 }
 0x76f   : > { %v1151_v8 = vpop.xlane.xlu0 %1150 }
 0x770   : > { %v1156_v9 = vmul.f32 0.0078125, %v1151_v8  ;;  %1173 = vadd.xlane.f32.xlu0 %v1165_v7  ;;  %v8997_v8 = vld [vmem:[%s12153_s29 + $0x7] ss:$0 sm:$0xff] }
 0x772   : > { %v12353_v10 = vsub.f32 %v12321_v37, %v1156_v9 }
 0x774   : > { %v1166_v15 = vmul.f32 %v12353_v10, %v12353_v10 }
 0x776   : > { %1175 = vadd.xlane.f32.xlu1 %v1166_v15  ;;  %v10779_v15 = vld [vmem:[%s12145_s16 + $0x20] ss:$100 sps:$4 sm:$0xff]  }
 0x7f3   : > { %v1168_v42 = vpop.xlane.xlu1 %1167 }
 0x7f4   : > { %v1177_v47 = vmul.f32 0.0078125, %v1168_v42  ;;  %v10808_v42 = vld [vmem:[%s12145_s16 + $0x34c] ss:$100 sps:$4 sm:$0xff]  }
 0x7f5   : > { %v1170_v50 = vpop.xlane.xlu0 %1169 }
 0x7f6   : > { %v1182_v51 = vadd.f32 1e-05, %v1177_v47  ;;  %v1178_v52 = vmul.f32 0.0078125, %v1170_v50  ;;  %v10803_v47 = vld [vmem:[%s12145_s16 + $0x340] ss:$100 sps:$4 sm:$0xff]  }
 0x7f7   : > { %v10806_v50 = vld [vmem:[%s12145_s16 + $0x348] ss:$100 sps:$4 sm:$0xff]  }
 0x7f8   : > { %11081 = vrsqrt.f32 %v1182_v51  ;;  %v1183_v53 = vadd.f32 1e-05, %v1178_v52  ;;  %v10811_v52 = vld [vmem:[%s12145_s16 + $0x40c] ss:$100 sps:$4 sm:$0xff]  }
 0x7fa   : > { %11083 = vrsqrt.f32 %v1183_v53  ;;  %v10814_v53 = vld [vmem:[%s12145_s16 + $0x414] ss:$100 sps:$4 sm:$0xff]  }
 0x7fb   : > { %v1172_v49 = vpop.xlane.xlu1 %1171 }
 0x7fc   : > { %v1179_v54 = vmul.f32 0.0078125, %v1172_v49  ;;  %v10809_v49 = vld [vmem:[%s12145_s16 + $0x408] ss:$100 sps:$4 sm:$0xff]  }
 0x7fd   : > { %v1174_v55 = vpop.xlane.xlu0 %1173 }
 0x7fe   : > { %v1184_v56 = vadd.f32 1e-05, %v1179_v54  ;;  %v1180_v57 = vmul.f32 0.0078125, %v1174_v55  ;;  %v10812_v54 = vld [vmem:[%s12145_s16 + $0x410] ss:$100 sps:$4 sm:$0xff]  }
 0x7ff   : > { %v10817_v55 = vld [vmem:[%s12145_s16 + $0x4d4] ss:$100 sps:$4 sm:$0xff]  }
 0x800   : > { %11085 = vrsqrt.f32 %v1184_v56  ;;  %v1185_v59 = vadd.f32 1e-05, %v1180_v57  ;;  %v10820_v56 = vld [vmem:[%s12145_s16 + $0x4dc] ss:$100 sps:$4 sm:$0xff]   ;;  %v10815_v57 = vld [vmem:[%s12145_s16 + $0x4d0] ss:$100 sps:$4 sm:$0xff]  }
 0x802   : > { %v11082_v61 = vpop.eup %11081  ;;  %11087 = vrsqrt.f32 %v1185_v59  ;;  %v10818_v59 = vld [vmem:[%s12145_s16 + $0x4d8] ss:$100 sps:$4 sm:$0xff]  }
 0x803   : > { %v1192_v0 = vmul.f32 %v11082_v61, %v12333_v58  ;;  %v1176_v1 = vpop.xlane.xlu1 %1175  ;;  %v10823_v61 = vld [vmem:[%s12145_s16 + $0x59c] ss:$100 sps:$4 sm:$0xff]  }
 0x804   : > { %v11084_v2 = vpop.eup %11083  ;;  %v1181_v4 = vmul.f32 0.0078125, %v1176_v1  ;;  %v10824_v1 = vld [vmem:[%s12145_s16 + $0x5a0] ss:$100 sps:$4 sm:$0xff]  }
 0x805   : > { %v1203_v6 = vmul.f32 %v8996_v62, %v1192_v0  ;;  %v1193_v7 = vmul.f32 %v11084_v2, %v12336_v60  ;;  %v10821_v0 = vld [vmem:[%s12145_s16 + $0x598] ss:$100 sps:$4 sm:$0xff]  }
 0x806   : > { %v1186_v9 = vadd.f32 1e-05, %v1181_v4  ;;  %v10829_v2 = vld [vmem:[%s12145_s16 + $0x34] ss:$100 sps:$4 sm:$0xff]   ;;  %v10832_v4 = vld [vmem:[%s12145_s16 + $0x3c] ss:$100 sps:$4 sm:$0xff]  }
 0x807   : > { %v1204_v11 = vmul.f32 %v8996_v62, %v1193_v7  ;;  %v1214_v12 = vadd.f32 %v8997_v8, %v1203_v6  ;;  %v10827_v6 = vld [vmem:[%s12145_s16 + $0x30] ss:$100 sps:$4 sm:$0xff]   ;;  %v10830_v7 = vld [vmem:[%s12145_s16 + $0x38] ss:$100 sps:$4 sm:$0xff]  }
 0x808   : > { %11089 = vrsqrt.f32 %v1186_v9  ;;  %v10838_v9 = vld [vmem:[%s12145_s16 + $0x104] ss:$100 sps:$4 sm:$0xff]  }
 0x809   : > { %v1215_v13 = vadd.f32 %v8997_v8, %v1204_v11  ;;  %v10833_v11 = vld [vmem:[%s12145_s16 + $0xf8] ss:$100 sps:$4 sm:$0xff]  }
 0x80a   : > { %v11086_v14 = vpop.eup %11085 }
 0x80b   : > { %v12389_v58 = vpack.c.bf16 %v1215_v13, %v1214_v12  ;;  %v1194_v17 = vmul.f32 %v11086_v14, %v12343_v3  ;;  %v10793_v3 = vld [vmem:[%s12145_s16 + $0x1b4] ss:$100 sps:$4 sm:$0xff]   ;;  %v10836_v12 = vld [vmem:[%s12145_s16 + $0x100] ss:$100 sps:$4 sm:$0xff]   ;;  %v10844_v14 = vld [vmem:[%s12145_s16 + $0x1cc] ss:$100 sps:$4 sm:$0xff]  }
 0x80c   : > { %v11088_v60 = vpop.eup %11087  ;;  %v10841_v13 = vld [vmem:[%s12145_s16 + $0x1c4] ss:$100 sps:$4 sm:$0xff]  }
 0x80d   : > { %v1205_v20 = vmul.f32 %v8996_v62, %v1194_v17  ;;  %v1195_v23 = vmul.f32 %v11088_v60, %v12346_v5  ;;  %2107 = vmatmul.mubr.bf16.vlgmr.msra.gmra.mrb[36].mxu1 %v12389_v58  ;;  %2168 = vmatmul.mubr.bf16.vlgmr.msra.gmra.mrb[24].mxu0 %v12389_v58  ;;  %v10847_v17 = vld [vmem:[%s12145_s16 + $0x28c] ss:$100 sps:$4 sm:$0xff]  }
 0x80e   : > { %2197 = vmatpush1.bf16.msra.mxu1 %v10779_v15  ;;  %2258 = vmatpush1.bf16.msra.mxu0 %v10782_v16  ;;  %v10839_v15 = vld [vmem:[%s12145_s16 + $0x1c0] ss:$100 sps:$4 sm:$0xff]   ;;  %v10842_v16 = vld [vmem:[%s12145_s16 + $0x1c8] ss:$100 sps:$4 sm:$0xff]   ;;  %v10848_v60 = vld [vmem:[%s12145_s16 + $0x290] ss:$100 sps:$4 sm:$0xff]  }
 0x80f   : > { %v1206_v26 = vmul.f32 %v8996_v62, %v1195_v23  ;;  %2198 = vmatprep.subr.bf16.mxu1 %v10787_v18  ;;  %2259 = vmatprep.subr.bf16.mxu0 %v10790_v19  ;;  %v1216_v5 = vadd.f32 %v8997_v8, %v1205_v20  ;;  %v10850_v18 = vld [vmem:[%s12145_s16 + $0x294] ss:$100 sps:$4 sm:$0xff]   ;;  %v10845_v19 = vld [vmem:[%s12145_s16 + $0x288] ss:$100 sps:$4 sm:$0xff]   ;;  %v10856_v23 = vld [vmem:[%s12145_s16 + $0x35c] ss:$100 sps:$4 sm:$0xff]  }
 0x810   : > { %2116 = vmatprep.mubr.bf16.mxu1 %v11844_v63  ;;  %2177 = vmatprep.mubr.bf16.mxu0 %v11844_v63  ;;  %v10853_v20 = vld [vmem:[%s12145_s16 + $0x354] ss:$100 sps:$4 sm:$0xff]  }
 0x811   : > { %v1217_v28 = vadd.f32 %v8997_v8, %v1206_v26  ;;  %v10859_v26 = vld [vmem:[%s12145_s16 + $0x41c] ss:$100 sps:$4 sm:$0xff]  }
 0x812   : > { %v11090_v31 = vpop.eup %11089  ;;  %2199 = vmatpush1.bf16.msra.mxu1 %v10785_v24  ;;  %2260 = vmatpush1.bf16.msra.mxu0 %v10788_v25  ;;  %v10851_v24 = vld [vmem:[%s12145_s16 + $0x350] ss:$100 sps:$4 sm:$0xff]   ;;  %v10854_v25 = vld [vmem:[%s12145_s16 + $0x358] ss:$100 sps:$4 sm:$0xff]  }
 0x813   : > { %v12405_v35 = vpack.c.bf16 %v1217_v28, %v1216_v5  ;;  %v1196_v38 = vmul.f32 %v11090_v31, %v12353_v10  ;;  %2200 = vmatprep.subr.bf16.mxu1 %v10793_v3  ;;  %2261 = vmatprep.subr.bf16.mxu0 %v10796_v27  ;;  %v10805_v10 = vld [vmem:[%s12145_s16 + $0x344] ss:$100 sps:$4 sm:$0xff]   ;;  %v10857_v27 = vld [vmem:[%s12145_s16 + $0x418] ss:$100 sps:$4 sm:$0xff]   ;;  %v10868_v31 = vld [vmem:[%s12145_s16 + $0x4ec] ss:$100 sps:$4 sm:$0xff]  }
 0x814   : > { %v10862_v3 = vld [vmem:[%s12145_s16 + $0x424] ss:$100 sps:$4 sm:$0xff]  }
 0x815   : > { %v1207_v40 = vmul.f32 %v8996_v62, %v1196_v38  ;;  %2117 = vmatmul.mubr.bf16.gmra.mrb[40].mxu1 %v12405_v35  ;;  %2178 = vmatmul.mubr.bf16.gmra.mrb[28].mxu0 %v12405_v35  ;;  %v10826_v62 = vld [vmem:[%s12145_s16 + $0x5a4] ss:$100 sps:$4 sm:$0xff]   ;;  %v10871_v38 = vld [vmem:[%s12145_s16 + $0x5ac] ss:$100 sps:$4 sm:$0xff]  }
 0x816   : > { %2201 = vmatpush1.bf16.msra.mxu1 %v10791_v32  ;;  %2262 = vmatpush1.bf16.msra.mxu0 %v10794_v34  ;;  %v10860_v5 = vld [vmem:[%s12145_s16 + $0x420] ss:$100 sps:$4 sm:$0xff]   ;;  %v10866_v34 = vld [vmem:[%s12145_s16 + $0x4e8] ss:$100 sps:$4 sm:$0xff]  }
 0x817   : > { %v1218_v43 = vadd.f32 %v8997_v8, %v1207_v40  ;;  %2202 = vmatprep.subr.bf16.mxu1 %v10799_v36  ;;  %2263 = vmatprep.subr.bf16.mxu0 %v10802_v39  ;;  %v10835_v8 = vld [vmem:[%s12145_s16 + $0xfc] ss:$100 sps:$4 sm:$0xff]   ;;  %v10865_v28 = vld [vmem:[%s12145_s16 + $0x4e4] ss:$100 sps:$4 sm:$0xff]   ;;  %v10874_v36 = vld [vmem:[%s12145_s16 + $0x5b4] ss:$100 sps:$4 sm:$0xff]  }
 0x818   : > { %2126 = vmatprep.mubr.bf16.mxu1 %v11844_v63  ;;  %2187 = vmatprep.mubr.bf16.mxu0 %v11844_v63  ;;  %v10863_v32 = vld [vmem:[%s12145_s16 + $0x4e0] ss:$100 sps:$4 sm:$0xff]   ;;  %v10869_v39 = vld [vmem:[%s12145_s16 + $0x5a8] ss:$100 sps:$4 sm:$0xff]   ;;  %v10872_v40 = vld [vmem:[%s12145_s16 + $0x5b0] ss:$100 sps:$4 sm:$0xff]  }
 0x819   : > { %v12420_v51 = vpack.c.bf16 %v1218_v43, %v1218_v43  ;;  %v10875_v43 = vld [vmem:[%s12145_s16 + $0x40] ss:$100 sps:$4 sm:$0xff]  }
 0x81a   : > { %2203 = vmatpush1.bf16.msra.mxu1 %v10797_v41  ;;  %2264 = vmatpush1.bf16.msra.mxu0 %v10800_v30  ;;  %v10877_v41 = vld [vmem:[%s12145_s16 + $0x44] ss:$100 sps:$4 sm:$0xff]   ;;  %v10880_v30 = vld [vmem:[%s12145_s16 + $0x4c] ss:$100 sps:$4 sm:$0xff]  }
 0x81b   : > { %2204 = vmatprep.subr.bf16.mxu1 %v10805_v10  ;;  %2265 = vmatprep.subr.bf16.mxu0 %v10808_v42  ;;  %v10878_v10 = vld [vmem:[%s12145_s16 + $0x48] ss:$100 sps:$4 sm:$0xff]  }
 0x81c   : > { %v10883_v42 = vld [vmem:[%s12145_s16 + $0x10c] ss:$100 sps:$4 sm:$0xff]  }
 0x81d   : > { %2127 = vmatmul.mubr.bf16.gmra.mrb[44].mxu1 %v12420_v51  ;;  %2188 = vmatmul.mubr.bf16.gmra.mrb[32].mxu0 %v12420_v51 }
 0x81e   : > { %2205 = vmatpush1.bf16.msra.mxu1 %v10803_v47  ;;  %2266 = vmatpush1.bf16.msra.mxu0 %v10806_v50  ;;  %v10886_v47 = vld [vmem:[%s12145_s16 + $0x114] ss:$100 sps:$4 sm:$0xff]   ;;  %v10881_v50 = vld [vmem:[%s12145_s16 + $0x108] ss:$100 sps:$4 sm:$0xff]  }
 0x81f   : > { %2206 = vmatprep.subr.bf16.mxu1 %v10811_v52  ;;  %2267 = vmatprep.subr.bf16.mxu0 %v10814_v53  ;;  %v10884_v52 = vld [vmem:[%s12145_s16 + $0x110] ss:$100 sps:$4 sm:$0xff]  }
 0x820   : > { %2228 = vmatprep.mubr.bf16.mxu1 %v11844_v63  ;;  %2289 = vmatprep.mubr.bf16.mxu0 %v11844_v63  ;;  %v10889_v53 = vld [vmem:[%s12145_s16 + $0x1d4] ss:$100 sps:$4 sm:$0xff]  }
 0x822   : > { %2207 = vmatpush1.bf16.msra.mxu1 %v10809_v49  ;;  %2268 = vmatpush1.bf16.msra.mxu0 %v10812_v54  ;;  %v10892_v49 = vld [vmem:[%s12145_s16 + $0x1dc] ss:$100 sps:$4 sm:$0xff]   ;;  %v10887_v54 = vld [vmem:[%s12145_s16 + $0x1d0] ss:$100 sps:$4 sm:$0xff]  }
 0x823   : > { %2208 = vmatprep.subr.bf16.mxu1 %v10817_v55  ;;  %2269 = vmatprep.subr.bf16.mxu0 %v10820_v56  ;;  %v10890_v55 = vld [vmem:[%s12145_s16 + $0x1d8] ss:$100 sps:$4 sm:$0xff]  }
 0x824   : > { %v10895_v56 = vld [vmem:[%s12145_s16 + $0x29c] ss:$100 sps:$4 sm:$0xff]  }
 0x826   : > { %2209 = vmatpush1.bf16.msra.mxu1 %v10815_v57  ;;  %2270 = vmatpush1.bf16.msra.mxu0 %v10818_v59  ;;  %v10898_v57 = vld [vmem:[%s12145_s16 + $0x2a4] ss:$100 sps:$4 sm:$0xff]   ;;  %v10893_v59 = vld [vmem:[%s12145_s16 + $0x298] ss:$100 sps:$4 sm:$0xff]  }
 0x827   : > { %2210 = vmatprep.subr.bf16.mxu1 %v10823_v61  ;;  %2271 = vmatprep.subr.bf16.mxu0 %v10826_v62  ;;  %v10896_v61 = vld [vmem:[%s12145_s16 + $0x2a0] ss:$100 sps:$4 sm:$0xff]  }
 0x828   : > { %v10901_v62 = vld [vmem:[%s12145_s16 + $0x364] ss:$100 sps:$4 sm:$0xff]  }
 0x82a   : > { %2211 = vmatpush1.bf16.msra.mxu1 %v10821_v0  ;;  %2272 = vmatpush1.bf16.msra.mxu0 %v10824_v1  ;;  %v10904_v0 = vld [vmem:[%s12145_s16 + $0x36c] ss:$100 sps:$4 sm:$0xff]   ;;  %v10899_v1 = vld [vmem:[%s12145_s16 + $0x360] ss:$100 sps:$4 sm:$0xff]  }
 0x82b   : > { %2318 = vmatprep.subr.bf16.mxu1 %v10829_v2  ;;  %2379 = vmatprep.subr.bf16.mxu0 %v10832_v4  ;;  %v10902_v2 = vld [vmem:[%s12145_s16 + $0x368] ss:$100 sps:$4 sm:$0xff]  }
 0x82c   : > { %v10907_v4 = vld [vmem:[%s12145_s16 + $0x42c] ss:$100 sps:$4 sm:$0xff]  }
 0x82d   : > { %2229 = vmatmul.mubr.bf16.vlgmr.msra.gmra.mrb[48].mxu1 %v12389_v58  ;;  %2290 = vmatmul.mubr.bf16.vlgmr.msra.gmra.mrb[36].mxu0 %v12389_v58 }
 0x82e   : > { %2319 = vmatpush1.bf16.msra.mxu1 %v10827_v6  ;;  %2380 = vmatpush1.bf16.msra.mxu0 %v10830_v7  ;;  %v10910_v6 = vld [vmem:[%s12145_s16 + $0x434] ss:$100 sps:$4 sm:$0xff]   ;;  %v10905_v7 = vld [vmem:[%s12145_s16 + $0x428] ss:$100 sps:$4 sm:$0xff]  }
 0x82f   : > { %2320 = vmatprep.subr.bf16.mxu1 %v10835_v8  ;;  %2381 = vmatprep.subr.bf16.mxu0 %v10838_v9  ;;  %v10908_v8 = vld [vmem:[%s12145_s16 + $0x430] ss:$100 sps:$4 sm:$0xff]  }
 0x830   : > { %2238 = vmatprep.mubr.bf16.mxu1 %v11844_v63  ;;  %2299 = vmatprep.mubr.bf16.mxu0 %v11844_v63  ;;  %v10913_v9 = vld [vmem:[%s12145_s16 + $0x4f4] ss:$100 sps:$4 sm:$0xff]  }
 0x832   : > { %2321 = vmatpush1.bf16.msra.mxu1 %v10833_v11  ;;  %2382 = vmatpush1.bf16.msra.mxu0 %v10836_v12  ;;  %v10916_v11 = vld [vmem:[%s12145_s16 + $0x4fc] ss:$100 sps:$4 sm:$0xff]   ;;  %v10911_v12 = vld [vmem:[%s12145_s16 + $0x4f0] ss:$100 sps:$4 sm:$0xff]  }
 0x833   : > { %2322 = vmatprep.subr.bf16.mxu1 %v10841_v13  ;;  %2383 = vmatprep.subr.bf16.mxu0 %v10844_v14  ;;  %v10914_v13 = vld [vmem:[%s12145_s16 + $0x4f8] ss:$100 sps:$4 sm:$0xff]  }
 0x834   : > { %v10919_v14 = vld [vmem:[%s12145_s16 + $0x5bc] ss:$100 sps:$4 sm:$0xff]  }
 0x835   : > { %2239 = vmatmul.mubr.bf16.gmra.mrb[52].mxu1 %v12405_v35  ;;  %2300 = vmatmul.mubr.bf16.gmra.mrb[40].mxu0 %v12405_v35 }
 0x836   : > { %2323 = vmatpush1.bf16.msra.mxu1 %v10839_v15  ;;  %2384 = vmatpush1.bf16.msra.mxu0 %v10842_v16  ;;  %v10922_v15 = vld [vmem:[%s12145_s16 + $0x5c4] ss:$100 sps:$4 sm:$0xff]   ;;  %v10917_v16 = vld [vmem:[%s12145_s16 + $0x5b8] ss:$100 sps:$4 sm:$0xff]  }
 0x837   : > { %2324 = vmatprep.subr.bf16.mxu1 %v10847_v17  ;;  %2385 = vmatprep.subr.bf16.mxu0 %v10850_v18  ;;  %v10920_v17 = vld [vmem:[%s12145_s16 + $0x5c0] ss:$100 sps:$4 sm:$0xff]  }
 0x838   : > { %2248 = vmatprep.mubr.bf16.mxu1 %v11844_v63  ;;  %2309 = vmatprep.mubr.bf16.mxu0 %v11844_v63  ;;  %v10923_v18 = vld [vmem:[%s12151_s18 + $0x40] sm:$0xff]  }
 0x83a   : > { %2325 = vmatpush1.bf16.msra.mxu1 %v10845_v19  ;;  %2386 = vmatpush1.bf16.msra.mxu0 %v10848_v60  ;;  %v10924_v19 = vld [vmem:[%s12151_s18 + $0xc0] sm:$0xff]  }
 0x83b   : > { %2326 = vmatprep.subr.bf16.mxu1 %v10853_v20  ;;  %2387 = vmatprep.subr.bf16.mxu0 %v10856_v23  ;;  %v10925_v60 = vld [vmem:[%s12151_s18] sm:$0xff]   ;;  %v10927_v23 = vld [vmem:[%s12151_s18 + $0x48] sm:$0xff]  }
 0x83c   : > { %v10926_v20 = vld [vmem:[%s12151_s18 + $0x80] sm:$0xff]  }
 0x83d   : > { %2249 = vmatmul.mubr.bf16.gmra.mrb[56].mxu1 %v12420_v51  ;;  %2310 = vmatmul.mubr.bf16.gmra.mrb[44].mxu0 %v12420_v51 }
 0x83e   : > { %2327 = vmatpush1.bf16.msra.mxu1 %v10851_v24  ;;  %2388 = vmatpush1.bf16.msra.mxu0 %v10854_v25  ;;  %v10928_v24 = vld [vmem:[%s12151_s18 + $0xc8] sm:$0xff]  }
 0x83f   : > { %2328 = vmatprep.subr.bf16.mxu1 %v10859_v26  ;;  %2389 = vmatprep.subr.bf16.mxu0 %v10862_v3  ;;  %v10929_v25 = vld [vmem:[%s12151_s18 + $0x8] sm:$0xff]   ;;  %v10931_v3 = vld [vmem:[%s12151_s18 + $0x50] sm:$0xff]  }
 0x840   : > { %2350 = vmatprep.mubr.bf16.mxu1 %v11844_v63  ;;  %2411 = vmatprep.mubr.bf16.mxu0 %v11844_v63  ;;  %v10930_v26 = vld [vmem:[%s12151_s18 + $0x88] sm:$0xff]  }
 0x842   : > { %2329 = vmatpush1.bf16.msra.mxu1 %v10857_v27  ;;  %2390 = vmatpush1.bf16.msra.mxu0 %v10860_v5  ;;  %v10932_v27 = vld [vmem:[%s12151_s18 + $0xd0] sm:$0xff]  }
 0x843   : > { %2330 = vmatprep.subr.bf16.mxu1 %v10865_v28  ;;  %2391 = vmatprep.subr.bf16.mxu0 %v10868_v31  ;;  %v10933_v5 = vld [vmem:[%s12151_s18 + $0x10] sm:$0xff]   ;;  %v10935_v28 = vld [vmem:[%s12151_s18 + $0x58] sm:$0xff]  }
 0x844   : > { %v10936_v31 = vld [vmem:[%s12151_s18 + $0xd8] sm:$0xff]  }
 0x846   : > { %2331 = vmatpush1.bf16.msra.mxu1 %v10863_v32  ;;  %2392 = vmatpush1.bf16.msra.mxu0 %v10866_v34  ;;  %v10937_v32 = vld [vmem:[%s12151_s18 + $0x18] sm:$0xff]  }
 0x847   : > { %2332 = vmatprep.subr.bf16.mxu1 %v10871_v38  ;;  %2393 = vmatprep.subr.bf16.mxu0 %v10874_v36  ;;  %v10938_v34 = vld [vmem:[%s12151_s18 + $0x98] sm:$0xff]   ;;  %v10939_v38 = vld [vmem:[%s12151_s18 + $0x60] sm:$0xff]  }
 0x848   : > { %v10940_v36 = vld [vmem:[%s12151_s18 + $0xe0] sm:$0xff]  }
 0x84a   : > { %2333 = vmatpush1.bf16.msra.mxu1 %v10869_v39  ;;  %2394 = vmatpush1.bf16.msra.mxu0 %v10872_v40  ;;  %v10942_v39 = vld [vmem:[%s12151_s18 + $0xa0] sm:$0xff]   ;;  %v10944_v40 = vld [vmem:[%s12151_s18 + $0xe8] sm:$0xff]  }
 0x84b   : > { %2440 = vmatprep.subr.bf16.mxu1 %v10877_v41  ;;  %2501 = vmatprep.subr.bf16.mxu0 %v10880_v30  ;;  %v10945_v41 = vld [vmem:[%s12151_s18 + $0x28] sm:$0xff]  }
 0x84c   : > { %v10946_v30 = vld [vmem:[%s12151_s18 + $0xa8] sm:$0xff]  }
 0x84d   : > { %2351 = vmatmul.mubr.bf16.vlgmr.msra.gmra.mrb[60].mxu1 %v12389_v58  ;;  %2412 = vmatmul.mubr.bf16.vlgmr.msra.gmra.mrb[48].mxu0 %v12389_v58 }
 0x84e   : > { %2441 = vmatpush1.bf16.msra.mxu1 %v10875_v43  ;;  %2502 = vmatpush1.bf16.msra.mxu0 %v10878_v10  ;;  %v10947_v43 = vld [vmem:[%s12151_s18 + $0x70] sm:$0xff]  }
 0x84f   : > { %2442 = vmatprep.subr.bf16.mxu1 %v10883_v42  ;;  %2503 = vmatprep.subr.bf16.mxu0 %v10886_v47  ;;  %v10948_v10 = vld [vmem:[%s12151_s18 + $0xf0] sm:$0xff]  }
 0x850   : > { %2360 = vmatprep.mubr.bf16.mxu1 %v11844_v63  ;;  %2421 = vmatprep.mubr.bf16.mxu0 %v11844_v63  ;;  %v10949_v42 = vld [vmem:[%s12151_s18 + $0x30] sm:$0xff]  }
 0x851   : > { %v10950_v47 = vld [vmem:[%s12151_s18 + $0xb0] sm:$0xff]  }
 0x852   : > { %2443 = vmatpush1.bf16.msra.mxu1 %v10881_v50  ;;  %2504 = vmatpush1.bf16.msra.mxu0 %v10884_v52  ;;  %v10952_v50 = vld [vmem:[%s12151_s18 + $0xf8] sm:$0xff]  }
 0x853   : > { %2444 = vmatprep.subr.bf16.mxu1 %v10889_v53  ;;  %2505 = vmatprep.subr.bf16.mxu0 %v10892_v49  ;;  %v10953_v52 = vld [vmem:[%s12151_s18 + $0x38] sm:$0xff]   ;;  %v10955_v49 = vld [vmem:[%s12151_s18 + $0x140] sm:$0xff]  }
 0x854   : > { %v10954_v53 = vld [vmem:[%s12151_s18 + $0xb8] sm:$0xff]  }
 0x855   : > { %2361 = vmatmul.mubr.bf16.gmra.mrb[64].mxu1 %v12405_v35  ;;  %2422 = vmatmul.mubr.bf16.gmra.mrb[52].mxu0 %v12405_v35 }
 0x856   : > { %2445 = vmatpush1.bf16.msra.mxu1 %v10887_v54  ;;  %2506 = vmatpush1.bf16.msra.mxu0 %v10890_v55  ;;  %v10956_v54 = vld [vmem:[%s12151_s18 + $0x1c0] sm:$0xff]   ;;  %v12571_v55 = vld [vmem:[%s12153_s29 + $0x8] sm:$0xff] }
 0x857   : > { %2446 = vmatprep.subr.bf16.mxu1 %v10895_v56  ;;  %2507 = vmatprep.subr.bf16.mxu0 %v10898_v57  ;;  %v1368_v56 = vsub.s32 3, %v12237_v44  ;;  %v12576_v57 = vrot.slane %v12571_v55, %v12240_v45 }
 0x858   : > { %2370 = vmatprep.mubr.bf16.mxu1 %v11844_v63  ;;  %2431 = vmatprep.mubr.bf16.mxu0 %v11844_v63 }
 0x85a   : > { %2447 = vmatpush1.bf16.msra.mxu1 %v10893_v59  ;;  %2508 = vmatpush1.bf16.msra.mxu0 %v10896_v61  ;;  %v12580_v59 = vrot.slane %v12571_v55, %v12243_v46  ;;  %v12584_v61 = vrot.slane %v12571_v55, %v12247_v48 }
 0x85b   : > { %2448 = vmatprep.subr.bf16.mxu1 %v10901_v62  ;;  %2509 = vmatprep.subr.bf16.mxu0 %v10904_v0  ;;  %v12589_v62 = vrot.slane %v12571_v55, %v1368_v56 }
 0x85d   : > { %2371 = vmatmul.mubr.bf16.gmra.mrb[68].mxu1 %v12420_v51  ;;  %2432 = vmatmul.mubr.bf16.gmra.mrb[56].mxu0 %v12420_v51 }
 0x85e   : > { %2449 = vmatpush1.bf16.msra.mxu1 %v10899_v1  ;;  %2510 = vmatpush1.bf16.msra.mxu0 %v10902_v2 }
 0x85f   : > { %2450 = vmatprep.subr.bf16.mxu1 %v10907_v4  ;;  %2511 = vmatprep.subr.bf16.mxu0 %v10910_v6 }
 0x860   : > { %2472 = vmatprep.mubr.bf16.mxu1 %v11844_v63  ;;  %2533 = vmatprep.mubr.bf16.mxu0 %v11844_v63 }
 0x862   : > { %2451 = vmatpush1.bf16.msra.mxu1 %v10905_v7  ;;  %2512 = vmatpush1.bf16.msra.mxu0 %v10908_v8 }
 0x863   : > { %2452 = vmatprep.subr.bf16.mxu1 %v10913_v9  ;;  %2513 = vmatprep.subr.bf16.mxu0 %v10916_v11 }
 0x866   : > { %2453 = vmatpush1.bf16.msra.mxu1 %v10911_v12  ;;  %2514 = vmatpush1.bf16.msra.mxu0 %v10914_v13 }
 0x867   : > { %2454 = vmatprep.subr.bf16.mxu1 %v10919_v14  ;;  %2515 = vmatprep.subr.bf16.mxu0 %v10922_v15 }
 0x86a   : > { %2455 = vmatpush1.bf16.msra.mxu1 %v10917_v16  ;;  %2516 = vmatpush1.bf16.msra.mxu0 %v10920_v17 }
 0x86b   : > { %9642 = vmatprep.subr.bf16.mxu1 %v10923_v18  ;;  %9676 = vmatprep.subr.bf16.mxu0 %v10924_v19 }
 0x86d   : > { %2473 = vmatmul.mubr.bf16.vlgmr.msra.gmra.mrb[72].mxu1 %v12389_v58  ;;  %2534 = vmatmul.mubr.bf16.vlgmr.msra.gmra.mrb[60].mxu0 %v12389_v58  ;;  %v10934_v58 = vld [vmem:[%s12151_s18 + $0x90] sm:$0xff]  }
 0x86e   : > { %2482 = vmatprep.mubr.bf16.mxu1 %v11844_v63  ;;  %2543 = vmatprep.mubr.bf16.mxu0 %v11844_v63 }
 0x86f   : > { %9643 = vmatpush3.bf16.msra.mxu1 %v10925_v60  ;;  %9677 = vmatpush3.bf16.msra.mxu0 %v10926_v20 }
 0x870   : > { %9644 = vmatprep.subr.bf16.mxu1 %v10927_v23  ;;  %9678 = vmatprep.subr.bf16.mxu0 %v10928_v24 }
 0x873   : > { %9645 = vmatpush3.bf16.msra.mxu1 %v10929_v25  ;;  %9679 = vmatpush3.bf16.msra.mxu0 %v10930_v26 }
 0x874   : > { %9646 = vmatprep.subr.bf16.mxu1 %v10931_v3  ;;  %9680 = vmatprep.subr.bf16.mxu0 %v10932_v27 }
 0x875   : > { %2483 = vmatmul.mubr.bf16.gmra.mrb[76].mxu1 %v12405_v35  ;;  %2544 = vmatmul.mubr.bf16.gmra.mrb[64].mxu0 %v12405_v35  ;;  %v10941_v35 = vld [vmem:[%s12151_s18 + $0x20] sm:$0xff]  }
 0x876   : > { %2492 = vmatprep.mubr.bf16.mxu1 %v11844_v63  ;;  %2553 = vmatprep.mubr.bf16.mxu0 %v11844_v63  ;;  %v10943_v63 = vld [vmem:[%s12151_s18 + $0x68] sm:$0xff]  }
 0x877   : > { %9647 = vmatpush3.bf16.msra.mxu1 %v10933_v5  ;;  %9681 = vmatpush3.bf16.msra.mxu0 %v10934_v58 }
 0x878   : > { %9648 = vmatprep.subr.bf16.mxu1 %v10935_v28  ;;  %9682 = vmatprep.subr.bf16.mxu0 %v10936_v31 }
 0x87b   : > { %9649 = vmatpush3.bf16.msra.mxu1 %v10937_v32  ;;  %9683 = vmatpush3.bf16.msra.mxu0 %v10938_v34  ;;  %v10957_v34 = vld [vmem:[%s12151_s18 + $0x100] sm:$0xff]  }
 0x87c   : > { %9650 = vmatprep.subr.bf16.mxu1 %v10939_v38  ;;  %9684 = vmatprep.subr.bf16.mxu0 %v10940_v36  ;;  %v10958_v38 = vld [vmem:[%s12151_s18 + $0x180] sm:$0xff]  }
 0x87d   : > { %2493 = vmatmul.mubr.bf16.gmra.mrb[80].mxu1 %v12420_v51  ;;  %2554 = vmatmul.mubr.bf16.gmra.mrb[68].mxu0 %v12420_v51  ;;  %v10951_v51 = vld [vmem:[%s12151_s18 + $0x78] sm:$0xff]  }
 0x87f   : > { %9651 = vmatpush3.bf16.msra.mxu1 %v10941_v35  ;;  %9685 = vmatpush3.bf16.msra.mxu0 %v10942_v39 }
 0x880   : > { %9652 = vmatprep.subr.bf16.mxu1 %v10943_v63  ;;  %9686 = vmatprep.subr.bf16.mxu0 %v10944_v40  ;;  %v10959_v40 = vld [vmem:[%s12151_s18 + $0x148] sm:$0xff]  }
 0x883   : > { %9653 = vmatpush3.bf16.msra.mxu1 %v10945_v41  ;;  %9687 = vmatpush3.bf16.msra.mxu0 %v10946_v30  ;;  %v10960_v41 = vld [vmem:[%s12151_s18 + $0x1c8] sm:$0xff]  }
 0x884   : > { %9654 = vmatprep.subr.bf16.mxu1 %v10947_v43  ;;  %9688 = vmatprep.subr.bf16.mxu0 %v10948_v10 }
 0x887   : > { %9655 = vmatpush3.bf16.msra.mxu1 %v10949_v42  ;;  %9689 = vmatpush3.bf16.msra.mxu0 %v10950_v47 }
 0x888   : > { %9656 = vmatprep.subr.bf16.mxu1 %v10951_v51  ;;  %9690 = vmatprep.subr.bf16.mxu0 %v10952_v50 }
 0x88b   : > { %9657 = vmatpush3.bf16.msra.mxu1 %v10953_v52  ;;  %9691 = vmatpush3.bf16.msra.mxu0 %v10954_v53 }
 0x88c   : > { %9710 = vmatprep.subr.bf16.mxu1 %v10955_v49  ;;  %9744 = vmatprep.subr.bf16.mxu0 %v10956_v54  ;;  %v10961_v54 = vld [vmem:[%s12151_s18 + $0x108] sm:$0xff]  }
 0x8e0   : > { %v2108_v0 = vpop.f32.mrb[36].mxu1  ;;  %v2169_v1 = vpop.f32.mrb[24].mxu0 }
 0x8e1   : > { %v2109_v2 = vadd.f32 %v2108_v0, %v12576_v57  ;;  %v2170_v4 = vadd.f32 %v2169_v1, %v12580_v59  ;;  %v2110_v6 = vpop.f32.mrb[37].mxu1  ;;  %v2171_v7 = vpop.f32.mrb[25].mxu0  ;;  %v10962_v0 = vld [vmem:[%s12151_s18 + $0x188] sm:$0xff]  }
 0x8e2   : > { %v2111_v8 = vadd.f32 %v2110_v6, %v12584_v61  ;;  %v2172_v9 = vadd.f32 %v2171_v7, %v12589_v62  ;;  %v2112_v11 = vpop.f32.mrb[38].mxu1  ;;  %v2173_v12 = vpop.f32.mrb[26].mxu0  ;;  %v10963_v7 = vld [vmem:[%s12151_s18 + $0x150] sm:$0xff]  }
 0x8e3   : > { %v2113_v13 = vadd.f32 %v2112_v11, %v12576_v57  ;;  %v2174_v14 = vadd.f32 %v2173_v12, %v12580_v59  ;;  %v2114_v15 = vpop.f32.mrb[39].mxu1  ;;  %v2175_v16 = vpop.f32.mrb[27].mxu0  ;;  %v2562_v19 = vmax.f32 %v2109_v2, 0.0  ;;  %v2564_v60 = vmax.f32 %v2170_v4, 0.0 }
 0x8e4   : > { %v2115_v17 = vadd.f32 %v2114_v15, %v12584_v61  ;;  %v2176_v18 = vadd.f32 %v2175_v16, %v12589_v62  ;;  %v2563_v24 = vmax.f32 %v2111_v8, 0.0  ;;  %v2565_v25 = vmax.f32 %v2172_v9, 0.0  ;;  %v10964_v8 = vld [vmem:[%s12151_s18 + $0x1d0] sm:$0xff]  }
 0x8e5   : > { %v2578_v20 = vmax.f32 %v2113_v13, 0.0  ;;  %v2580_v23 = vmax.f32 %v2174_v14, 0.0 }
 0x8e6   : > { %v2579_v26 = vmax.f32 %v2115_v17, 0.0  ;;  %v2581_v3 = vmax.f32 %v2176_v18, 0.0 }
 0x8e7   : > { %v2642_v27 = vpack.c.bf16 %v2578_v20, %v2562_v19  ;;  %v2644_v5 = vpack.c.bf16 %v2580_v23, %v2564_v60  ;;  %v10965_v60 = vld [vmem:[%s12151_s18 + $0x110] sm:$0xff]  }
 0x8e8   : > { %v2643_v58 = vpack.c.bf16 %v2579_v26, %v2563_v24  ;;  %v2645_v28 = vpack.c.bf16 %v2581_v3, %v2565_v25  ;;  %v2118_v31 = vpop.f32.mrb[40].mxu1  ;;  %v2179_v32 = vpop.f32.mrb[28].mxu0  ;;  %v10966_v20 = vld [vmem:[%s12151_s18 + $0x190] sm:$0xff]   ;;  %v10967_v3 = vld [vmem:[%s12151_s18 + $0x158] sm:$0xff]  }
 0x8e9   : > { %v2119_v36 = vadd.f32 %v2118_v31, %v12576_v57  ;;  %v2180_v35 = vadd.f32 %v2179_v32, %v12580_v59  ;;  %v2120_v39 = vpop.f32.mrb[41].mxu1  ;;  %v2181_v63 = vpop.f32.mrb[29].mxu0 }
 0x8ea   : > { %v2121_v30 = vadd.f32 %v2120_v39, %v12584_v61  ;;  %v2182_v43 = vadd.f32 %v2181_v63, %v12589_v62  ;;  %v2122_v10 = vpop.f32.mrb[42].mxu1  ;;  %v2183_v42 = vpop.f32.mrb[30].mxu0  ;;  %3753 = vmatprep.mubr.bf16.mxu1 %v2643_v58  ;;  %3809 = vmatprep.mubr.bf16.mxu0 %v2645_v28  ;;  %v10971_v63 = vld [vmem:[%s12151_s18 + $0x160] sm:$0xff]  }
 0x8eb   : > { %v2123_v47 = vadd.f32 %v2122_v10, %v12576_v57  ;;  %v2184_v51 = vadd.f32 %v2183_v42, %v12580_v59  ;;  %v2124_v50 = vpop.f32.mrb[43].mxu1  ;;  %v2185_v52 = vpop.f32.mrb[31].mxu0  ;;  %3754 = vmatmul.mubr.bf16.vlgmr.msra.gmra.mrb[84].mxu1 %v2642_v27  ;;  %3810 = vmatmul.mubr.bf16.vlgmr.msra.gmra.mrb[72].mxu0 %v2644_v5  ;;  %v2594_v1 = vmax.f32 %v2119_v36, 0.0  ;;  %v2596_v2 = vmax.f32 %v2180_v35, 0.0  ;;  %v10968_v27 = vld [vmem:[%s12151_s18 + $0x1d8] sm:$0xff]   ;;  %v10975_v42 = vld [vmem:[%s12151_s18 + $0x168] sm:$0xff]  }
 0x8ec   : > { %v2125_v53 = vadd.f32 %v2124_v50, %v12584_v61  ;;  %v2186_v49 = vadd.f32 %v2185_v52, %v12589_v62  ;;  %9711 = vmatpush3.bf16.msra.mxu1 %v10957_v34  ;;  %9745 = vmatpush3.bf16.msra.mxu0 %v10958_v38  ;;  %v2595_v9 = vmax.f32 %v2121_v30, 0.0  ;;  %v2597_v11 = vmax.f32 %v2182_v43, 0.0  ;;  %v10969_v38 = vld [vmem:[%s12151_s18 + $0x118] sm:$0xff]   ;;  %v10974_v30 = vld [vmem:[%s12151_s18 + $0x1a0] sm:$0xff]  }
 0x8ed   : > { %v2610_v4 = vmax.f32 %v2123_v47, 0.0  ;;  %v2612_v6 = vmax.f32 %v2184_v51, 0.0  ;;  %9712 = vmatprep.subr.bf16.mxu1 %v10959_v40  ;;  %9746 = vmatprep.subr.bf16.mxu0 %v10960_v41  ;;  %v10972_v40 = vld [vmem:[%s12151_s18 + $0x1e0] sm:$0xff]   ;;  %v10976_v47 = vld [vmem:[%s12151_s18 + $0x1e8] sm:$0xff]   ;;  %v1372_v51 = vsub.s32 4, %v12237_v44  ;;  %v1380_v50 = vsub.s32 6, %v12237_v44 }
 0x8ee   : > { %v2611_v12 = vmax.f32 %v2125_v53, 0.0  ;;  %v2613_v13 = vmax.f32 %v2186_v49, 0.0  ;;  %v10973_v41 = vld [vmem:[%s12151_s18 + $0x120] sm:$0xff]   ;;  %v1376_v52 = vsub.s32 5, %v12237_v44  ;;  %v1384_v53 = vsub.s32 7, %v12237_v44  ;;  %v10977_v49 = vld [vmem:[%s12151_s18 + $0x128] sm:$0xff]  }
 0x8ef   : > { %v2658_v14 = vpack.c.bf16 %v2610_v4, %v2594_v1  ;;  %v2660_v15 = vpack.c.bf16 %v2612_v6, %v2596_v2  ;;  %v12645_v1 = vrot.slane %v12571_v55, %v1380_v50  ;;  %v10979_v2 = vld [vmem:[%s12151_s18 + $0x170] sm:$0xff]  }
 0x8f0   : > { %v2659_v16 = vpack.c.bf16 %v2611_v12, %v2595_v9  ;;  %v2661_v17 = vpack.c.bf16 %v2613_v13, %v2597_v11  ;;  %9713 = vmatpush3.bf16.msra.mxu1 %v10961_v54  ;;  %9747 = vmatpush3.bf16.msra.mxu0 %v10962_v0  ;;  %v2128_v18 = vpop.f32.mrb[44].mxu1  ;;  %v2189_v19 = vpop.f32.mrb[32].mxu0  ;;  %v10978_v54 = vld [vmem:[%s12151_s18 + $0x1a8] sm:$0xff]   ;;  %v12640_v0 = vrot.slane %v12571_v55, %v1372_v51  ;;  %v10980_v4 = vld [vmem:[%s12151_s18 + $0x1f0] sm:$0xff]  }
 0x8f1   : > { %v2129_v23 = vadd.f32 %v2128_v18, %v12576_v57  ;;  %v2190_v24 = vadd.f32 %v2189_v19, %v12580_v59  ;;  %v2130_v25 = vpop.f32.mrb[45].mxu1  ;;  %v2191_v26 = vpop.f32.mrb[33].mxu0  ;;  %9714 = vmatprep.subr.bf16.mxu1 %v10963_v7  ;;  %9748 = vmatprep.subr.bf16.mxu0 %v10964_v8  ;;  %v12652_v6 = vrot.slane %v12571_v55, %v1376_v52  ;;  %v10981_v11 = vld [vmem:[%s12151_s18 + $0x130] sm:$0xff]   ;;  %v10984_v18 = vld [vmem:[%s12151_s18 + $0x1f8] sm:$0xff]  }
 0x8f2   : > { %v2131_v5 = vadd.f32 %v2130_v25, %v12584_v61  ;;  %v2192_v58 = vadd.f32 %v2191_v26, %v12589_v62  ;;  %v2132_v28 = vpop.f32.mrb[46].mxu1  ;;  %v2193_v31 = vpop.f32.mrb[34].mxu0  ;;  %3761 = vmatprep.mubr.bf16.mxu1 %v2659_v16  ;;  %3817 = vmatprep.mubr.bf16.mxu0 %v2661_v17  ;;  %v10970_v61 = vld [vmem:[%s12151_s18 + $0x198] sm:$0xff]   ;;  %v12657_v7 = vrot.slane %v12571_v55, %v1384_v53  ;;  %v10982_v12 = vld [vmem:[%s12151_s18 + $0x1b0] sm:$0xff]  }
 0x8f3   : > { %v2133_v32 = vpop.f32.mrb[47].mxu1  ;;  %v2194_v57 = vpop.f32.mrb[35].mxu0  ;;  %3762 = vmatmul.mubr.bf16.gmra.mrb[88].mxu1 %v2658_v14  ;;  %3818 = vmatmul.mubr.bf16.gmra.mrb[76].mxu0 %v2660_v15  ;;  %v2626_v36 = vmax.f32 %v2129_v23, 0.0  ;;  %v2628_v62 = vmax.f32 %v2190_v24, 0.0  ;;  %v10983_v17 = vld [vmem:[%s12151_s18 + $0x178] sm:$0xff]  }
 0x8f4   : > { %v2627_v59 = vmax.f32 %v2131_v5, 0.0  ;;  %v2629_v34 = vmax.f32 %v2192_v58, 0.0  ;;  %9715 = vmatpush3.bf16.msra.mxu1 %v10965_v60  ;;  %9749 = vmatpush3.bf16.msra.mxu0 %v10966_v20  ;;  %v10985_v5 = vld [vmem:[%s12151_s18 + $0x138] sm:$0xff]  }
 0x8f5   : > { %9716 = vmatprep.subr.bf16.mxu1 %v10967_v3  ;;  %9750 = vmatprep.subr.bf16.mxu0 %v10968_v27  ;;  %v2674_v43 = vpack.c.bf16 %v2626_v36, %v2626_v36  ;;  %v2676_v10 = vpack.c.bf16 %v2628_v62, %v2628_v62  ;;  %v10986_v58 = vld [vmem:[%s12151_s18 + $0x1b8] sm:$0xff]  }
 0x8f6   : > { %v2675_v35 = vpack.c.bf16 %v2627_v59, %v2627_v59  ;;  %v2677_v39 = vpack.c.bf16 %v2629_v34, %v2629_v34  ;;  %v10987_v59 = vld [vmem:[%s12151_s18 + $0x240] sm:$0xff]  }
 0x8f7   : > { %v10988_v34 = vld [vmem:[%s12151_s18 + $0x2c0] sm:$0xff]  }
 0x8f8   : > { %9717 = vmatpush3.bf16.msra.mxu1 %v10969_v38  ;;  %9751 = vmatpush3.bf16.msra.mxu0 %v10970_v61 }
 0x8f9   : > { %3769 = vmatprep.mubr.bf16.mxu1 %v2675_v35  ;;  %3825 = vmatprep.mubr.bf16.mxu0 %v2677_v39 }
 0x8fa   : > { %9718 = vmatprep.subr.bf16.mxu1 %v10971_v63  ;;  %9752 = vmatprep.subr.bf16.mxu0 %v10972_v40 }
 0x8fb   : > { %3770 = vmatmul.mubr.bf16.gmra.mrb[92].mxu1 %v2674_v43  ;;  %3826 = vmatmul.mubr.bf16.gmra.mrb[80].mxu0 %v2676_v10  ;;  %v10989_v43 = vld [vmem:[%s12151_s18 + $0x200] sm:$0xff]  }
 0x8fc   : > { %9719 = vmatpush3.bf16.msra.mxu1 %v10973_v41  ;;  %9753 = vmatpush3.bf16.msra.mxu0 %v10974_v30  ;;  %v10990_v10 = vld [vmem:[%s12151_s18 + $0x280] sm:$0xff]  }
 0x8fd   : > { %9720 = vmatprep.subr.bf16.mxu1 %v10975_v42  ;;  %9754 = vmatprep.subr.bf16.mxu0 %v10976_v47 }
 0x900   : > { %v2230_v8 = vpop.f32.mrb[48].mxu1  ;;  %v2291_v9 = vpop.f32.mrb[36].mxu0  ;;  %9721 = vmatpush3.bf16.msra.mxu1 %v10977_v49  ;;  %9755 = vmatpush3.bf16.msra.mxu0 %v10978_v54 }
 0x901   : > { %v2231_v13 = vadd.f32 %v2230_v8, %v12640_v0  ;;  %v2292_v14 = vadd.f32 %v2291_v9, %v12645_v1  ;;  %v2232_v15 = vpop.f32.mrb[49].mxu1  ;;  %v2293_v16 = vpop.f32.mrb[37].mxu0  ;;  %9722 = vmatprep.subr.bf16.mxu1 %v10979_v2  ;;  %9756 = vmatprep.subr.bf16.mxu0 %v10980_v4  ;;  %v10991_v2 = vld [vmem:[%s12151_s18 + $0x248] sm:$0xff]  }
 0x902   : > { %v2233_v55 = vadd.f32 %v2232_v15, %v12652_v6  ;;  %v2294_v19 = vadd.f32 %v2293_v16, %v12657_v7  ;;  %v2234_v60 = vpop.f32.mrb[50].mxu1  ;;  %v2295_v20 = vpop.f32.mrb[38].mxu0  ;;  %v10992_v4 = vld [vmem:[%s12151_s18 + $0x2c8] sm:$0xff]  }
 0x903   : > { %v2235_v23 = vadd.f32 %v2234_v60, %v12640_v0  ;;  %v2296_v24 = vadd.f32 %v2295_v20, %v12645_v1  ;;  %v2236_v25 = vpop.f32.mrb[51].mxu1  ;;  %v2297_v26 = vpop.f32.mrb[39].mxu0  ;;  %v2566_v28 = vmax.f32 %v2231_v13, 0.0  ;;  %v2568_v31 = vmax.f32 %v2292_v14, 0.0 }
 0x904   : > { %v2237_v3 = vadd.f32 %v2236_v25, %v12652_v6  ;;  %v2298_v27 = vadd.f32 %v2297_v26, %v12657_v7  ;;  %9723 = vmatpush3.bf16.msra.mxu1 %v10981_v11  ;;  %9757 = vmatpush3.bf16.msra.mxu0 %v10982_v12  ;;  %v2567_v38 = vmax.f32 %v2233_v55, 0.0  ;;  %v2569_v61 = vmax.f32 %v2294_v19, 0.0  ;;  %v10993_v55 = vld [vmem:[%s12151_s18 + $0x208] sm:$0xff]   ;;  %v10995_v25 = vld [vmem:[%s12151_s18 + $0x250] sm:$0xff]  }
 0x905   : > { %v2582_v32 = vmax.f32 %v2235_v23, 0.0  ;;  %v2584_v57 = vmax.f32 %v2296_v24, 0.0  ;;  %9724 = vmatprep.subr.bf16.mxu1 %v10983_v17  ;;  %9758 = vmatprep.subr.bf16.mxu0 %v10984_v18  ;;  %v10994_v19 = vld [vmem:[%s12151_s18 + $0x288] sm:$0xff]   ;;  %v10996_v26 = vld [vmem:[%s12151_s18 + $0x2d0] sm:$0xff]  }
 0x906   : > { %v2583_v36 = vmax.f32 %v2237_v3, 0.0  ;;  %v2585_v62 = vmax.f32 %v2298_v27, 0.0 }
 0x907   : > { %v2646_v35 = vpack.c.bf16 %v2582_v32, %v2566_v28  ;;  %v2648_v39 = vpack.c.bf16 %v2584_v57, %v2568_v31 }
 0x908   : > { %v2647_v63 = vpack.c.bf16 %v2583_v36, %v2567_v38  ;;  %v2649_v40 = vpack.c.bf16 %v2585_v62, %v2569_v61  ;;  %v2240_v41 = vpop.f32.mrb[52].mxu1  ;;  %v2301_v30 = vpop.f32.mrb[40].mxu0  ;;  %9725 = vmatpush3.bf16.msra.mxu1 %v10985_v5  ;;  %9759 = vmatpush3.bf16.msra.mxu0 %v10986_v58  ;;  %v10997_v38 = vld [vmem:[%s12151_s18 + $0x210] sm:$0xff]  }
 0x909   : > { %v2241_v42 = vadd.f32 %v2240_v41, %v12640_v0  ;;  %v2302_v47 = vadd.f32 %v2301_v30, %v12645_v1  ;;  %v2242_v49 = vpop.f32.mrb[53].mxu1  ;;  %v2303_v54 = vpop.f32.mrb[41].mxu0  ;;  %9778 = vmatprep.subr.bf16.mxu1 %v10987_v59  ;;  %9812 = vmatprep.subr.bf16.mxu0 %v10988_v34  ;;  %v10998_v61 = vld [vmem:[%s12151_s18 + $0x290] sm:$0xff]  }
 0x90a   : > { %v2243_v8 = vadd.f32 %v2242_v49, %v12652_v6  ;;  %v2304_v9 = vadd.f32 %v2303_v54, %v12657_v7  ;;  %v2244_v11 = vpop.f32.mrb[54].mxu1  ;;  %v2305_v12 = vpop.f32.mrb[42].mxu0  ;;  %3865 = vmatprep.mubr.bf16.mxu1 %v2647_v63  ;;  %3921 = vmatprep.mubr.bf16.mxu0 %v2649_v40  ;;  %v10999_v63 = vld [vmem:[%s12151_s18 + $0x258] sm:$0xff]  }
 0x90b   : > { %v2245_v13 = vadd.f32 %v2244_v11, %v12640_v0  ;;  %v2306_v14 = vadd.f32 %v2305_v12, %v12645_v1  ;;  %v2246_v15 = vpop.f32.mrb[55].mxu1  ;;  %v2307_v16 = vpop.f32.mrb[43].mxu0  ;;  %3866 = vmatmul.mubr.bf16.vlgmr.msra.gmra.mrb[96].mxu1 %v2646_v35  ;;  %3922 = vmatmul.mubr.bf16.vlgmr.msra.gmra.mrb[84].mxu0 %v2648_v39  ;;  %v2598_v60 = vmax.f32 %v2241_v42, 0.0  ;;  %v2600_v20 = vmax.f32 %v2302_v47, 0.0  ;;  %v11000_v40 = vld [vmem:[%s12151_s18 + $0x2d8] sm:$0xff]  }
 0x90c   : > { %v2247_v17 = vadd.f32 %v2246_v15, %v12652_v6  ;;  %v2308_v18 = vadd.f32 %v2307_v16, %v12657_v7  ;;  %9779 = vmatpush3.bf16.msra.mxu1 %v10989_v43  ;;  %9813 = vmatpush3.bf16.msra.mxu0 %v10990_v10  ;;  %v2599_v3 = vmax.f32 %v2243_v8, 0.0  ;;  %v2601_v27 = vmax.f32 %v2304_v9, 0.0  ;;  %v11002_v54 = vld [vmem:[%s12151_s18 + $0x298] sm:$0xff]   ;;  %v11003_v8 = vld [vmem:[%s12151_s18 + $0x260] sm:$0xff]   ;;  %v11007_v15 = vld [vmem:[%s12151_s18 + $0x268] sm:$0xff]  }
 0x90d   : > { %v2614_v23 = vmax.f32 %v2245_v13, 0.0  ;;  %v2616_v24 = vmax.f32 %v2306_v14, 0.0  ;;  %9780 = vmatprep.subr.bf16.mxu1 %v10991_v2  ;;  %9814 = vmatprep.subr.bf16.mxu0 %v10992_v4  ;;  %v11004_v9 = vld [vmem:[%s12151_s18 + $0x2e0] sm:$0xff]   ;;  %v11008_v16 = vld [vmem:[%s12151_s18 + $0x2e8] sm:$0xff]  }
 0x90e   : > { %v2615_v5 = vmax.f32 %v2247_v17, 0.0  ;;  %v2617_v58 = vmax.f32 %v2308_v18, 0.0  ;;  %v11005_v13 = vld [vmem:[%s12151_s18 + $0x220] sm:$0xff]   ;;  %v12708_v17 = vld [vmem:[%s12153_s29 + $0x10] sm:$0xff] }
 0x90f   : > { %v2662_v28 = vpack.c.bf16 %v2614_v23, %v2598_v60  ;;  %v2664_v31 = vpack.c.bf16 %v2616_v24, %v2600_v20  ;;  %v11006_v14 = vld [vmem:[%s12151_s18 + $0x2a0] sm:$0xff]   ;;  %v12712_v18 = vrot.slane %v12708_v17, %v12240_v45  ;;  %v11010_v60 = vld [vmem:[%s12151_s18 + $0x2a8] sm:$0xff]   ;;  %v12722_v20 = vrot.slane %v12708_v17, %v12247_v48  ;;  %v11011_v45 = vld [vmem:[%s12151_s18 + $0x270] sm:$0xff]  }
 0x910   : > { %v2663_v32 = vpack.c.bf16 %v2615_v5, %v2599_v3  ;;  %v2665_v57 = vpack.c.bf16 %v2617_v58, %v2601_v27  ;;  %v2250_v59 = vpop.f32.mrb[56].mxu1  ;;  %v2311_v34 = vpop.f32.mrb[44].mxu0  ;;  %9781 = vmatpush3.bf16.msra.mxu1 %v10993_v55  ;;  %9815 = vmatpush3.bf16.msra.mxu0 %v10994_v19  ;;  %v12716_v55 = vrot.slane %v12708_v17, %v12243_v46  ;;  %v11009_v19 = vld [vmem:[%s12151_s18 + $0x228] sm:$0xff]   ;;  %v11012_v24 = vld [vmem:[%s12151_s18 + $0x2f0] sm:$0xff]  }
 0x911   : > { %v2251_v36 = vadd.f32 %v2250_v59, %v12640_v0  ;;  %v2312_v62 = vadd.f32 %v2311_v34, %v12645_v1  ;;  %v2252_v35 = vpop.f32.mrb[57].mxu1  ;;  %v2313_v39 = vpop.f32.mrb[45].mxu0  ;;  %9782 = vmatprep.subr.bf16.mxu1 %v10995_v25  ;;  %9816 = vmatprep.subr.bf16.mxu0 %v10996_v26  ;;  %v12727_v23 = vrot.slane %v12708_v17, %v1368_v56  ;;  %v11013_v5 = vld [vmem:[%s12151_s18 + $0x230] sm:$0xff]   ;;  %v11016_v59 = vld [vmem:[%s12151_s18 + $0x2f8] sm:$0xff]  }
 0x912   : > { %v2253_v41 = vadd.f32 %v2252_v35, %v12652_v6  ;;  %v2314_v30 = vadd.f32 %v2313_v39, %v12657_v7  ;;  %v2254_v43 = vpop.f32.mrb[58].mxu1  ;;  %v2315_v10 = vpop.f32.mrb[46].mxu0  ;;  %3873 = vmatprep.mubr.bf16.mxu1 %v2663_v32  ;;  %3929 = vmatprep.mubr.bf16.mxu0 %v2665_v57  ;;  %v11001_v7 = vld [vmem:[%s12151_s18 + $0x218] sm:$0xff]   ;;  %v11014_v58 = vld [vmem:[%s12151_s18 + $0x2b0] sm:$0xff]  }
 0x913   : > { %v2255_v42 = vpop.f32.mrb[59].mxu1  ;;  %v2316_v0 = vpop.f32.mrb[47].mxu0  ;;  %3874 = vmatmul.mubr.bf16.gmra.mrb[100].mxu1 %v2662_v28  ;;  %3930 = vmatmul.mubr.bf16.gmra.mrb[88].mxu0 %v2664_v31  ;;  %v2630_v49 = vmax.f32 %v2251_v36, 0.0  ;;  %v2632_v6 = vmax.f32 %v2312_v62, 0.0  ;;  %v11015_v57 = vld [vmem:[%s12151_s18 + $0x278] sm:$0xff]  }
 0x914   : > { %v2631_v1 = vmax.f32 %v2253_v41, 0.0  ;;  %v2633_v47 = vmax.f32 %v2314_v30, 0.0  ;;  %9783 = vmatpush3.bf16.msra.mxu1 %v10997_v38  ;;  %9817 = vmatpush3.bf16.msra.mxu0 %v10998_v61  ;;  %v11017_v30 = vld [vmem:[%s12151_s18 + $0x238] sm:$0xff]  }
 0x915   : > { %9784 = vmatprep.subr.bf16.mxu1 %v10999_v63  ;;  %9818 = vmatprep.subr.bf16.mxu0 %v11000_v40  ;;  %v2678_v11 = vpack.c.bf16 %v2630_v49, %v2630_v49  ;;  %v2680_v12 = vpack.c.bf16 %v2632_v6, %v2632_v6  ;;  %v11018_v43 = vld [vmem:[%s12151_s18 + $0x2b8] sm:$0xff]   ;;  %v11019_v6 = vld [vmem:[%s12151_s18 + $0x340] sm:$0xff]  }
 0x916   : > { %v2679_v2 = vpack.c.bf16 %v2631_v1, %v2631_v1  ;;  %v2681_v4 = vpack.c.bf16 %v2633_v47, %v2633_v47 }
 0x918   : > { %3881 = vmatprep.mubr.bf16.mxu1 %v2679_v2  ;;  %3937 = vmatprep.mubr.bf16.mxu0 %v2681_v4 }
 0x919   : > { %9785 = vmatpush3.bf16.msra.mxu1 %v11001_v7  ;;  %9819 = vmatpush3.bf16.msra.mxu0 %v11002_v54  ;;  %v11020_v7 = vld [vmem:[%s12151_s18 + $0x3c0] sm:$0xff]  }
 0x91a   : > { %9786 = vmatprep.subr.bf16.mxu1 %v11003_v8  ;;  %9820 = vmatprep.subr.bf16.mxu0 %v11004_v9 }
 0x91b   : > { %3882 = vmatmul.mubr.bf16.gmra.mrb[104].mxu1 %v2678_v11  ;;  %3938 = vmatmul.mubr.bf16.gmra.mrb[92].mxu0 %v2680_v12 }
 0x91d   : > { %9787 = vmatpush3.bf16.msra.mxu1 %v11005_v13  ;;  %9821 = vmatpush3.bf16.msra.mxu0 %v11006_v14  ;;  %v11021_v14 = vld [vmem:[%s12151_s18 + $0x300] sm:$0xff]  }
 0x91e   : > { %9788 = vmatprep.subr.bf16.mxu1 %v11007_v15  ;;  %9822 = vmatprep.subr.bf16.mxu0 %v11008_v16  ;;  %v11022_v15 = vld [vmem:[%s12151_s18 + $0x380] sm:$0xff]  }
 0x920   : > { %v2352_v25 = vpop.f32.mrb[60].mxu1  ;;  %v2413_v46 = vpop.f32.mrb[48].mxu0 }
 0x921   : > { %v2353_v26 = vadd.f32 %v2352_v25, %v12712_v18  ;;  %v2414_v3 = vadd.f32 %v2413_v46, %v12716_v55  ;;  %9789 = vmatpush3.bf16.msra.mxu1 %v11009_v19  ;;  %9823 = vmatpush3.bf16.msra.mxu0 %v11010_v60  ;;  %v2354_v27 = vpop.f32.mrb[61].mxu1  ;;  %v2415_v48 = vpop.f32.mrb[49].mxu0  ;;  %v11024_v25 = vld [vmem:[%s12151_s18 + $0x3c8] sm:$0xff]  }
 0x922   : > { %v2355_v28 = vadd.f32 %v2354_v27, %v12722_v20  ;;  %v2416_v56 = vadd.f32 %v2415_v48, %v12727_v23  ;;  %v2356_v31 = vpop.f32.mrb[62].mxu1  ;;  %v2417_v32 = vpop.f32.mrb[50].mxu0  ;;  %9790 = vmatprep.subr.bf16.mxu1 %v11011_v45  ;;  %9824 = vmatprep.subr.bf16.mxu0 %v11012_v24  ;;  %v11023_v24 = vld [vmem:[%s12151_s18 + $0x348] sm:$0xff]  }
 0x923   : > { %v2357_v34 = vadd.f32 %v2356_v31, %v12712_v18  ;;  %v2418_v38 = vadd.f32 %v2417_v32, %v12716_v55  ;;  %v2358_v61 = vpop.f32.mrb[63].mxu1  ;;  %v2419_v36 = vpop.f32.mrb[51].mxu0  ;;  %v2570_v39 = vmax.f32 %v2353_v26, 0.0  ;;  %v2572_v63 = vmax.f32 %v2414_v3, 0.0  ;;  %v11025_v32 = vld [vmem:[%s12151_s18 + $0x308] sm:$0xff]  }
 0x924   : > { %v2359_v62 = vadd.f32 %v2358_v61, %v12722_v20  ;;  %v2420_v35 = vadd.f32 %v2419_v36, %v12727_v23  ;;  %v2571_v10 = vmax.f32 %v2355_v28, 0.0  ;;  %v2573_v42 = vmax.f32 %v2416_v56, 0.0 }
 0x925   : > { %v2586_v40 = vmax.f32 %v2357_v34, 0.0  ;;  %v2588_v41 = vmax.f32 %v2418_v38, 0.0  ;;  %9791 = vmatpush3.bf16.msra.mxu1 %v11013_v5  ;;  %9825 = vmatpush3.bf16.msra.mxu0 %v11014_v58 }
 0x926   : > { %v2587_v0 = vmax.f32 %v2359_v62, 0.0  ;;  %v2589_v1 = vmax.f32 %v2420_v35, 0.0  ;;  %9792 = vmatprep.subr.bf16.mxu1 %v11015_v57  ;;  %9826 = vmatprep.subr.bf16.mxu0 %v11016_v59  ;;  %v11026_v57 = vld [vmem:[%s12151_s18 + $0x388] sm:$0xff]   ;;  %v11027_v35 = vld [vmem:[%s12151_s18 + $0x350] sm:$0xff]  }
 0x927   : > { %v2650_v47 = vpack.c.bf16 %v2586_v40, %v2570_v39  ;;  %v2652_v49 = vpack.c.bf16 %v2588_v41, %v2572_v63  ;;  %v11028_v39 = vld [vmem:[%s12151_s18 + $0x3d0] sm:$0xff]  }
 0x928   : > { %v2651_v54 = vpack.c.bf16 %v2587_v0, %v2571_v10  ;;  %v2653_v2 = vpack.c.bf16 %v2589_v1, %v2573_v42  ;;  %v2362_v4 = vpop.f32.mrb[64].mxu1  ;;  %v2423_v8 = vpop.f32.mrb[52].mxu0  ;;  %v11029_v0 = vld [vmem:[%s12151_s18 + $0x310] sm:$0xff]  }
 0x929   : > { %v2363_v9 = vadd.f32 %v2362_v4, %v12712_v18  ;;  %v2424_v11 = vadd.f32 %v2423_v8, %v12716_v55  ;;  %9793 = vmatpush3.bf16.msra.mxu1 %v11017_v30  ;;  %9827 = vmatpush3.bf16.msra.mxu0 %v11018_v43  ;;  %v2364_v12 = vpop.f32.mrb[65].mxu1  ;;  %v2425_v13 = vpop.f32.mrb[53].mxu0  ;;  %v11030_v1 = vld [vmem:[%s12151_s18 + $0x390] sm:$0xff]  }
 0x92a   : > { %v2365_v16 = vadd.f32 %v2364_v12, %v12722_v20  ;;  %v2426_v19 = vadd.f32 %v2425_v13, %v12727_v23  ;;  %v2366_v60 = vpop.f32.mrb[66].mxu1  ;;  %v2427_v45 = vpop.f32.mrb[54].mxu0  ;;  %3977 = vmatprep.mubr.bf16.mxu1 %v2651_v54  ;;  %4033 = vmatprep.mubr.bf16.mxu0 %v2653_v2  ;;  %v11031_v2 = vld [vmem:[%s12151_s18 + $0x358] sm:$0xff]  }
 0x92b   : > { %v2367_v46 = vadd.f32 %v2366_v60, %v12712_v18  ;;  %v2428_v26 = vadd.f32 %v2427_v45, %v12716_v55  ;;  %v2368_v3 = vpop.f32.mrb[67].mxu1  ;;  %v2429_v27 = vpop.f32.mrb[55].mxu0  ;;  %9846 = vmatprep.subr.bf16.mxu1 %v11019_v6  ;;  %9880 = vmatprep.subr.bf16.mxu0 %v11020_v7  ;;  %v2602_v58 = vmax.f32 %v2363_v9, 0.0  ;;  %v2604_v28 = vmax.f32 %v2424_v11, 0.0  ;;  %v11038_v60 = vld [vmem:[%s12151_s18 + $0x3a0] sm:$0xff]  }
 0x92c   : > { %v2369_v48 = vadd.f32 %v2368_v3, %v12722_v20  ;;  %v2430_v5 = vadd.f32 %v2429_v27, %v12727_v23  ;;  %3978 = vmatmul.mubr.bf16.vlgmr.msra.gmra.mrb[108].mxu1 %v2650_v47  ;;  %4034 = vmatmul.mubr.bf16.vlgmr.msra.gmra.mrb[96].mxu0 %v2652_v49  ;;  %v2603_v59 = vmax.f32 %v2365_v16, 0.0  ;;  %v2605_v34 = vmax.f32 %v2426_v19, 0.0  ;;  %v11036_v16 = vld [vmem:[%s12151_s18 + $0x3e0] sm:$0xff]   ;;  %v11041_v27 = vld [vmem:[%s12151_s18 + $0x328] sm:$0xff]  }
 0x92d   : > { %v2618_v56 = vmax.f32 %v2367_v46, 0.0  ;;  %v2620_v31 = vmax.f32 %v2428_v26, 0.0  ;;  %9847 = vmatpush3.bf16.msra.mxu1 %v11021_v14  ;;  %9881 = vmatpush3.bf16.msra.mxu0 %v11022_v15  ;;  %v11035_v15 = vld [vmem:[%s12151_s18 + $0x360] sm:$0xff]   ;;  %v11040_v46 = vld [vmem:[%s12151_s18 + $0x3e8] sm:$0xff]   ;;  %v12782_v26 = vrot.slane %v12708_v17, %v1372_v51  ;;  %v12787_v3 = vrot.slane %v12708_v17, %v1380_v50 }
 0x92e   : > { %v2619_v38 = vmax.f32 %v2369_v48, 0.0  ;;  %v2621_v61 = vmax.f32 %v2430_v5, 0.0  ;;  %9848 = vmatprep.subr.bf16.mxu1 %v11023_v24  ;;  %9882 = vmatprep.subr.bf16.mxu0 %v11024_v25  ;;  %v11037_v19 = vld [vmem:[%s12151_s18 + $0x320] sm:$0xff]   ;;  %v11039_v25 = vld [vmem:[%s12151_s18 + $0x368] sm:$0xff]   ;;  %v12794_v5 = vrot.slane %v12708_v17, %v1376_v52  ;;  %v12799_v51 = vrot.slane %v12708_v17, %v1384_v53 }
 0x92f   : > { %v2666_v36 = vpack.c.bf16 %v2618_v56, %v2602_v58  ;;  %v2668_v62 = vpack.c.bf16 %v2620_v31, %v2604_v28  ;;  %v11042_v48 = vld [vmem:[%s12151_s18 + $0x3a8] sm:$0xff]   ;;  %v11043_v58 = vld [vmem:[%s12151_s18 + $0x370] sm:$0xff]  }
 0x930   : > { %v2667_v63 = vpack.c.bf16 %v2619_v38, %v2603_v59  ;;  %v2669_v40 = vpack.c.bf16 %v2621_v61, %v2605_v34  ;;  %v2372_v41 = vpop.f32.mrb[68].mxu1  ;;  %v2433_v30 = vpop.f32.mrb[56].mxu0  ;;  %v11044_v28 = vld [vmem:[%s12151_s18 + $0x3f0] sm:$0xff]   ;;  %v11047_v61 = vld [vmem:[%s12151_s18 + $0x378] sm:$0xff]  }
 0x931   : > { %v2373_v43 = vadd.f32 %v2372_v41, %v12712_v18  ;;  %9849 = vmatpush3.bf16.msra.mxu1 %v11025_v32  ;;  %9883 = vmatpush3.bf16.msra.mxu0 %v11026_v57  ;;  %v2374_v10 = vpop.f32.mrb[69].mxu1  ;;  %v2435_v42 = vpop.f32.mrb[57].mxu0  ;;  %v2434_v47 = vadd.f32 %v2433_v30, %v12716_v55  ;;  %v11032_v18 = vld [vmem:[%s12151_s18 + $0x3d8] sm:$0xff]   ;;  %v11045_v59 = vld [vmem:[%s12151_s18 + $0x330] sm:$0xff]  }
 0x932   : > { %v2375_v49 = vadd.f32 %v2374_v10, %v12722_v20  ;;  %v2436_v6 = vadd.f32 %v2435_v42, %v12727_v23  ;;  %v2376_v7 = vpop.f32.mrb[70].mxu1  ;;  %v2437_v54 = vpop.f32.mrb[58].mxu0  ;;  %3985 = vmatprep.mubr.bf16.mxu1 %v2667_v63  ;;  %4041 = vmatprep.mubr.bf16.mxu0 %v2669_v40  ;;  %v11033_v20 = vld [vmem:[%s12151_s18 + $0x318] sm:$0xff]   ;;  %v11046_v34 = vld [vmem:[%s12151_s18 + $0x3b0] sm:$0xff]  }
 0x933   : > { %v2377_v4 = vpop.f32.mrb[71].mxu1  ;;  %v2438_v8 = vpop.f32.mrb[59].mxu0  ;;  %9850 = vmatprep.subr.bf16.mxu1 %v11027_v35  ;;  %9884 = vmatprep.subr.bf16.mxu0 %v11028_v39  ;;  %v11034_v23 = vld [vmem:[%s12151_s18 + $0x398] sm:$0xff]   ;;  %v2634_v11 = vmax.f32 %v2373_v43, 0.0  ;;  %v2636_v12 = vmax.f32 %v2434_v47, 0.0 }
 0x934   : > { %v2635_v9 = vmax.f32 %v2375_v49, 0.0  ;;  %v2637_v55 = vmax.f32 %v2436_v6, 0.0  ;;  %3986 = vmatmul.mubr.bf16.gmra.mrb[112].mxu1 %v2666_v36  ;;  %4042 = vmatmul.mubr.bf16.gmra.mrb[100].mxu0 %v2668_v62  ;;  %v11048_v36 = vld [vmem:[%s12151_s18 + $0x3f8] sm:$0xff]  }
 0x935   : > { %9851 = vmatpush3.bf16.msra.mxu1 %v11029_v0  ;;  %9885 = vmatpush3.bf16.msra.mxu0 %v11030_v1  ;;  %v2682_v45 = vpack.c.bf16 %v2634_v11, %v2634_v11  ;;  %v2684_v24 = vpack.c.bf16 %v2636_v12, %v2636_v12  ;;  %v11049_v0 = vld [vmem:[%s12151_s18 + $0x338] sm:$0xff]  }
 0x936   : > { %v2683_v13 = vpack.c.bf16 %v2635_v9, %v2635_v9  ;;  %v2685_v14 = vpack.c.bf16 %v2637_v55, %v2637_v55  ;;  %9852 = vmatprep.subr.bf16.mxu1 %v11031_v2  ;;  %9886 = vmatprep.subr.bf16.mxu0 %v11032_v18  ;;  %v11050_v1 = vld [vmem:[%s12151_s18 + $0x3b8] sm:$0xff]  }
 0x938   : > { %3993 = vmatprep.mubr.bf16.mxu1 %v2683_v13  ;;  %4049 = vmatprep.mubr.bf16.mxu0 %v2685_v14 }
 0x939   : > { %9853 = vmatpush3.bf16.msra.mxu1 %v11033_v20  ;;  %9887 = vmatpush3.bf16.msra.mxu0 %v11034_v23 }
 0x93a   : > { %9854 = vmatprep.subr.bf16.mxu1 %v11035_v15  ;;  %9888 = vmatprep.subr.bf16.mxu0 %v11036_v16 }
 0x93c   : > { %3994 = vmatmul.mubr.bf16.gmra.mrb[116].mxu1 %v2682_v45  ;;  %4050 = vmatmul.mubr.bf16.gmra.mrb[104].mxu0 %v2684_v24 }
 0x93d   : > { %9855 = vmatpush3.bf16.msra.mxu1 %v11037_v19  ;;  %9889 = vmatpush3.bf16.msra.mxu0 %v11038_v60 }
 0x93e   : > { %9856 = vmatprep.subr.bf16.mxu1 %v11039_v25  ;;  %9890 = vmatprep.subr.bf16.mxu0 %v11040_v46 }
 0x940   : > { %v2474_v50 = vpop.f32.mrb[72].mxu1  ;;  %v2535_v56 = vpop.f32.mrb[60].mxu0 }
 0x941   : > { %v2475_v31 = vadd.f32 %v2474_v50, %v12782_v26  ;;  %v2536_v32 = vadd.f32 %v2535_v56, %v12787_v3  ;;  %9857 = vmatpush3.bf16.msra.mxu1 %v11041_v27  ;;  %9891 = vmatpush3.bf16.msra.mxu0 %v11042_v48  ;;  %v2476_v57 = vpop.f32.mrb[73].mxu1  ;;  %v2537_v52 = vpop.f32.mrb[61].mxu0 }
 0x942   : > { %v2477_v44 = vadd.f32 %v2476_v57, %v12794_v5  ;;  %v2538_v53 = vadd.f32 %v2537_v52, %v12799_v51  ;;  %v2478_v17 = vpop.f32.mrb[74].mxu1  ;;  %v2539_v38 = vpop.f32.mrb[62].mxu0  ;;  %9858 = vmatprep.subr.bf16.mxu1 %v11043_v58  ;;  %9892 = vmatprep.subr.bf16.mxu0 %v11044_v28 }
 0x943   : > { %v2479_v62 = vadd.f32 %v2478_v17, %v12782_v26  ;;  %v2540_v35 = vadd.f32 %v2539_v38, %v12787_v3  ;;  %v2480_v39 = vpop.f32.mrb[75].mxu1  ;;  %v2541_v63 = vpop.f32.mrb[63].mxu0  ;;  %v2574_v30 = vmax.f32 %v2475_v31, 0.0  ;;  %v2576_v43 = vmax.f32 %v2536_v32, 0.0 }
 0x944   : > { %v2481_v40 = vadd.f32 %v2480_v39, %v12794_v5  ;;  %v2542_v41 = vadd.f32 %v2541_v63, %v12799_v51  ;;  %v2575_v47 = vmax.f32 %v2477_v44, 0.0  ;;  %v2577_v49 = vmax.f32 %v2538_v53, 0.0 }
 0x945   : > { %v2590_v10 = vmax.f32 %v2479_v62, 0.0  ;;  %v2592_v42 = vmax.f32 %v2540_v35, 0.0  ;;  %9859 = vmatpush3.bf16.msra.mxu1 %v11045_v59  ;;  %9893 = vmatpush3.bf16.msra.mxu0 %v11046_v34 }
 0x946   : > { %v2591_v6 = vmax.f32 %v2481_v40, 0.0  ;;  %v2593_v7 = vmax.f32 %v2542_v41, 0.0  ;;  %9860 = vmatprep.subr.bf16.mxu1 %v11047_v61  ;;  %9894 = vmatprep.subr.bf16.mxu0 %v11048_v36 }
 0x947   : > { %v2654_v54 = vpack.c.bf16 %v2590_v10, %v2574_v30  ;;  %v2656_v2 = vpack.c.bf16 %v2592_v42, %v2576_v43 }
 0x948   : > { %v2655_v18 = vpack.c.bf16 %v2591_v6, %v2575_v47  ;;  %v2657_v4 = vpack.c.bf16 %v2593_v7, %v2577_v49  ;;  %v2484_v8 = vpop.f32.mrb[76].mxu1  ;;  %v2545_v9 = vpop.f32.mrb[64].mxu0 }
 0x949   : > { %v2485_v55 = vadd.f32 %v2484_v8, %v12782_v26  ;;  %v2546_v20 = vadd.f32 %v2545_v9, %v12787_v3  ;;  %9861 = vmatpush3.bf16.msra.mxu1 %v11049_v0  ;;  %9895 = vmatpush3.bf16.msra.mxu0 %v11050_v1  ;;  %v2486_v23 = vpop.f32.mrb[77].mxu1  ;;  %v2547_v11 = vpop.f32.mrb[65].mxu0  ;;  %v9126_v1 = vld [vmem:[%s12153_s29 + $0x18] ss:$0 sm:$0xff] }
 0x94a   : > { %v2487_v12 = vadd.f32 %v2486_v23, %v12794_v5  ;;  %v2548_v13 = vadd.f32 %v2547_v11, %v12799_v51  ;;  %v2488_v14 = vpop.f32.mrb[78].mxu1  ;;  %v2549_v15 = vpop.f32.mrb[66].mxu0  ;;  %4089 = vmatprep.mubr.bf16.mxu1 %v2655_v18  ;;  %4145 = vmatprep.mubr.bf16.mxu0 %v2657_v4 }
 0x94b   : > { %v2489_v16 = vadd.f32 %v2488_v14, %v12782_v26  ;;  %v2550_v19 = vadd.f32 %v2549_v15, %v12787_v3  ;;  %v2490_v60 = vpop.f32.mrb[79].mxu1  ;;  %v2551_v45 = vpop.f32.mrb[67].mxu0  ;;  %v2606_v46 = vmax.f32 %v2485_v55, 0.0  ;;  %v2608_v27 = vmax.f32 %v2546_v20, 0.0 }
 0x94c   : > { %v2491_v24 = vadd.f32 %v2490_v60, %v12794_v5  ;;  %v2552_v25 = vadd.f32 %v2551_v45, %v12799_v51  ;;  %4090 = vmatmul.mubr.bf16.vlgmr.msra.gmra.mrb[120].mxu1 %v2654_v54  ;;  %4146 = vmatmul.mubr.bf16.vlgmr.msra.gmra.mrb[108].mxu0 %v2656_v2  ;;  %v2607_v28 = vmax.f32 %v2487_v12, 0.0  ;;  %v2609_v50 = vmax.f32 %v2548_v13, 0.0 }
 0x94d   : > { %v2622_v48 = vmax.f32 %v2489_v16, 0.0  ;;  %v2624_v58 = vmax.f32 %v2550_v19, 0.0 }
 0x94e   : > { %v2623_v56 = vmax.f32 %v2491_v24, 0.0  ;;  %v2625_v31 = vmax.f32 %v2552_v25, 0.0 }
 0x94f   : > { %v2670_v32 = vpack.c.bf16 %v2622_v48, %v2606_v46  ;;  %v2672_v57 = vpack.c.bf16 %v2624_v58, %v2608_v27 }
 0x950   : > { %v2671_v52 = vpack.c.bf16 %v2623_v56, %v2607_v28  ;;  %v2673_v59 = vpack.c.bf16 %v2625_v31, %v2609_v50  ;;  %v2494_v34 = vpop.f32.mrb[80].mxu1  ;;  %v2555_v44 = vpop.f32.mrb[68].mxu0 }
 0x951   : > { %v2495_v53 = vadd.f32 %v2494_v34, %v12782_v26  ;;  %v2496_v17 = vpop.f32.mrb[81].mxu1  ;;  %v2557_v38 = vpop.f32.mrb[69].mxu0  ;;  %v2556_v61 = vadd.f32 %v2555_v44, %v12787_v3 }
 0x952   : > { %v2497_v36 = vadd.f32 %v2496_v17, %v12794_v5  ;;  %v2558_v62 = vadd.f32 %v2557_v38, %v12799_v51  ;;  %v2498_v35 = vpop.f32.mrb[82].mxu1  ;;  %v2559_v39 = vpop.f32.mrb[70].mxu0  ;;  %4097 = vmatprep.mubr.bf16.mxu1 %v2671_v52  ;;  %4153 = vmatprep.mubr.bf16.mxu0 %v2673_v59 }
 0x953   : > { %v2499_v63 = vpop.f32.mrb[83].mxu1  ;;  %v2560_v40 = vpop.f32.mrb[71].mxu0  ;;  %v2638_v26 = vmax.f32 %v2495_v53, 0.0  ;;  %v2640_v43 = vmax.f32 %v2556_v61, 0.0 }
 0x954   : > { %v2639_v41 = vmax.f32 %v2497_v36, 0.0  ;;  %v2641_v30 = vmax.f32 %v2558_v62, 0.0  ;;  %4098 = vmatmul.mubr.bf16.gmra.mrb[124].mxu1 %v2670_v32  ;;  %4154 = vmatmul.mubr.bf16.gmra.mrb[112].mxu0 %v2672_v57 }
 0x955   : > { %v2686_v3 = vpack.c.bf16 %v2638_v26, %v2638_v26  ;;  %v2688_v5 = vpack.c.bf16 %v2640_v43, %v2640_v43 }
 0x956   : > { %v2687_v10 = vpack.c.bf16 %v2639_v41, %v2639_v41  ;;  %v2689_v42 = vpack.c.bf16 %v2641_v30, %v2641_v30 }
 0x958   : > { %4105 = vmatprep.mubr.bf16.mxu1 %v2687_v10  ;;  %4161 = vmatprep.mubr.bf16.mxu0 %v2689_v42 }
 0x95c   : > { %4106 = vmatmul.mubr.bf16.gmra.mrb[128].mxu1 %v2686_v3  ;;  %4162 = vmatmul.mubr.bf16.gmra.mrb[116].mxu0 %v2688_v5 }
 0x9be   : > { %v9658_v51 = vpop.f32.mrb[84].mxu1  ;;  %v9692_v0 = vpop.f32.mrb[72].mxu0 }
 0x9bf   : > { %v9659_v47 = vpop.f32.mrb[85].mxu1  ;;  %v9693_v49 = vpop.f32.mrb[73].mxu0 }
 0x9c0   : > { %v9660_v6 = vadd.f32 %v9659_v47, %v9658_v51  ;;  %v9694_v7 = vadd.f32 %v9693_v49, %v9692_v0  ;;  %v9661_v54 = vpop.f32.mrb[86].mxu1  ;;  %v9695_v2 = vpop.f32.mrb[74].mxu0 }
 0x9c1   : > { %v9662_v18 = vpop.f32.mrb[87].mxu1  ;;  %v9696_v4 = vpop.f32.mrb[75].mxu0 }
 0x9c2   : > { %v3756_v8 = vadd.f32 %v9660_v6, %v9126_v1  ;;  %v9663_v9 = vadd.f32 %v9662_v18, %v9661_v54  ;;  %v9697_v55 = vadd.f32 %v9696_v4, %v9695_v2 }
 0x9c4   : > { %v3812_v20 = vadd.f32 %v9694_v7, %v3756_v8  ;;  %v3759_v23 = vadd.f32 %v9663_v9, %v9126_v1 }
 0x9c6   : > { %v3815_v11 = vadd.f32 %v9697_v55, %v3759_v23  ;;  %v9664_v12 = vpop.f32.mrb[88].mxu1  ;;  %v9698_v13 = vpop.f32.mrb[76].mxu0 }
 0x9c7   : > { %v9665_v14 = vpop.f32.mrb[89].mxu1  ;;  %v9699_v15 = vpop.f32.mrb[77].mxu0 }
 0x9c8   : > { %v9666_v16 = vadd.f32 %v9665_v14, %v9664_v12  ;;  %v9700_v19 = vadd.f32 %v9699_v15, %v9698_v13  ;;  %v9667_v60 = vpop.f32.mrb[90].mxu1  ;;  %v9701_v45 = vpop.f32.mrb[78].mxu0 }
 0x9c9   : > { %v9668_v24 = vpop.f32.mrb[91].mxu1  ;;  %v9702_v25 = vpop.f32.mrb[79].mxu0 }
 0x9ca   : > { %v3764_v46 = vadd.f32 %v9666_v16, %v9126_v1  ;;  %v9669_v27 = vadd.f32 %v9668_v24, %v9667_v60  ;;  %v9703_v48 = vadd.f32 %v9702_v25, %v9701_v45 }
 0x9cc   : > { %v3820_v58 = vadd.f32 %v9700_v19, %v3764_v46  ;;  %v3767_v28 = vadd.f32 %v9669_v27, %v9126_v1 }
 0x9ce   : > { %v3823_v50 = vadd.f32 %v9703_v48, %v3767_v28  ;;  %v9670_v56 = vpop.f32.mrb[92].mxu1  ;;  %v9704_v31 = vpop.f32.mrb[80].mxu0 }
 0x9cf   : > { %v9671_v32 = vpop.f32.mrb[93].mxu1  ;;  %v9705_v57 = vpop.f32.mrb[81].mxu0 }
 0x9d0   : > { %v9672_v52 = vadd.f32 %v9671_v32, %v9670_v56  ;;  %v9706_v59 = vadd.f32 %v9705_v57, %v9704_v31  ;;  %v9673_v34 = vpop.f32.mrb[94].mxu1  ;;  %v9707_v44 = vpop.f32.mrb[82].mxu0 }
 0x9d1   : > { %v9674_v53 = vpop.f32.mrb[95].mxu1  ;;  %v9708_v17 = vpop.f32.mrb[83].mxu0 }
 0x9d2   : > { %v3772_v38 = vadd.f32 %v9672_v52, %v9126_v1 }
 0x9d4   : > { %v3828_v61 = vadd.f32 %v9706_v59, %v3772_v38 }
 0x9de   : > { %v9726_v36 = vpop.f32.mrb[96].mxu1  ;;  %v9760_v62 = vpop.f32.mrb[84].mxu0 }
 0x9df   : > { %v9727_v35 = vpop.f32.mrb[97].mxu1  ;;  %v9761_v39 = vpop.f32.mrb[85].mxu0 }
 0x9e0   : > { %v9728_v63 = vadd.f32 %v9727_v35, %v9726_v36  ;;  %v9762_v40 = vadd.f32 %v9761_v39, %v9760_v62  ;;  %v9729_v41 = vpop.f32.mrb[98].mxu1  ;;  %v9763_v30 = vpop.f32.mrb[86].mxu0 }
 0x9e1   : > { %v9730_v26 = vpop.f32.mrb[99].mxu1  ;;  %v9764_v43 = vpop.f32.mrb[87].mxu0 }
 0x9e2   : > { %v3868_v10 = vadd.f32 %v9728_v63, %v3812_v20  ;;  %v9731_v42 = vadd.f32 %v9730_v26, %v9729_v41  ;;  %v9765_v3 = vadd.f32 %v9764_v43, %v9763_v30 }
 0x9e4   : > { %v3924_v5 = vadd.f32 %v9762_v40, %v3868_v10  ;;  %v3871_v51 = vadd.f32 %v9731_v42, %v3815_v11 }
 0x9e6   : > { %v3927_v0 = vadd.f32 %v9765_v3, %v3871_v51  ;;  %v9732_v47 = vpop.f32.mrb[100].mxu1  ;;  %v9766_v49 = vpop.f32.mrb[88].mxu0 }
 0x9e7   : > { %v9733_v1 = vpop.f32.mrb[101].mxu1  ;;  %v9767_v6 = vpop.f32.mrb[89].mxu0 }
 0x9e8   : > { %v9734_v7 = vadd.f32 %v9733_v1, %v9732_v47  ;;  %v9768_v54 = vadd.f32 %v9767_v6, %v9766_v49  ;;  %v9735_v2 = vpop.f32.mrb[102].mxu1  ;;  %v9769_v18 = vpop.f32.mrb[90].mxu0 }
 0x9e9   : > { %v9736_v4 = vpop.f32.mrb[103].mxu1  ;;  %v9770_v8 = vpop.f32.mrb[91].mxu0 }
 0x9ea   : > { %v3876_v9 = vadd.f32 %v9734_v7, %v3820_v58  ;;  %v9737_v55 = vadd.f32 %v9736_v4, %v9735_v2  ;;  %v9771_v23 = vadd.f32 %v9770_v8, %v9769_v18 }
 0x9ec   : > { %v3932_v12 = vadd.f32 %v9768_v54, %v3876_v9  ;;  %v3879_v20 = vadd.f32 %v9737_v55, %v3823_v50 }
 0x9ee   : > { %v3935_v13 = vadd.f32 %v9771_v23, %v3879_v20  ;;  %v9738_v14 = vpop.f32.mrb[104].mxu1  ;;  %v9772_v15 = vpop.f32.mrb[92].mxu0 }
 0x9ef   : > { %v9739_v11 = vpop.f32.mrb[105].mxu1  ;;  %v9773_v16 = vpop.f32.mrb[93].mxu0 }
 0x9f0   : > { %v9740_v19 = vadd.f32 %v9739_v11, %v9738_v14  ;;  %v9774_v60 = vadd.f32 %v9773_v16, %v9772_v15  ;;  %v9741_v45 = vpop.f32.mrb[106].mxu1  ;;  %v9775_v24 = vpop.f32.mrb[94].mxu0 }
 0x9f1   : > { %v9742_v25 = vpop.f32.mrb[107].mxu1  ;;  %v9776_v46 = vpop.f32.mrb[95].mxu0 }
 0x9f2   : > { %v3884_v27 = vadd.f32 %v9740_v19, %v3828_v61 }
 0x9f4   : > { %v3940_v48 = vadd.f32 %v9774_v60, %v3884_v27 }
 0x9ff   : > { %v9794_v28 = vpop.f32.mrb[108].mxu1  ;;  %v9828_v56 = vpop.f32.mrb[96].mxu0 }
 0xa00   : > { %v9795_v58 = vpop.f32.mrb[109].mxu1  ;;  %v9829_v31 = vpop.f32.mrb[97].mxu0 }
 0xa01   : > { %v9796_v32 = vadd.f32 %v9795_v58, %v9794_v28  ;;  %v9830_v57 = vadd.f32 %v9829_v31, %v9828_v56  ;;  %v9797_v50 = vpop.f32.mrb[110].mxu1  ;;  %v9831_v52 = vpop.f32.mrb[98].mxu0 }
 0xa02   : > { %v9798_v59 = vpop.f32.mrb[111].mxu1  ;;  %v9832_v34 = vpop.f32.mrb[99].mxu0 }
 0xa03   : > { %v3980_v44 = vadd.f32 %v9796_v32, %v3924_v5  ;;  %v9799_v53 = vadd.f32 %v9798_v59, %v9797_v50  ;;  %v9833_v17 = vadd.f32 %v9832_v34, %v9831_v52 }
 0xa05   : > { %v4036_v38 = vadd.f32 %v9830_v57, %v3980_v44  ;;  %v3983_v36 = vadd.f32 %v9799_v53, %v3927_v0 }
 0xa07   : > { %v4039_v62 = vadd.f32 %v9833_v17, %v3983_v36  ;;  %v9800_v35 = vpop.f32.mrb[112].mxu1  ;;  %v9834_v39 = vpop.f32.mrb[100].mxu0 }
 0xa08   : > { %v9801_v61 = vpop.f32.mrb[113].mxu1  ;;  %v9835_v63 = vpop.f32.mrb[101].mxu0 }
 0xa09   : > { %v9802_v40 = vadd.f32 %v9801_v61, %v9800_v35  ;;  %v9836_v41 = vadd.f32 %v9835_v63, %v9834_v39  ;;  %v9803_v30 = vpop.f32.mrb[114].mxu1  ;;  %v9837_v26 = vpop.f32.mrb[102].mxu0 }
 0xa0a   : > { %v9804_v43 = vpop.f32.mrb[115].mxu1  ;;  %v9838_v10 = vpop.f32.mrb[103].mxu0 }
 0xa0b   : > { %v3988_v42 = vadd.f32 %v9802_v40, %v3932_v12  ;;  %v9805_v3 = vadd.f32 %v9804_v43, %v9803_v30  ;;  %v9839_v51 = vadd.f32 %v9838_v10, %v9837_v26 }
 0xa0d   : > { %v4044_v47 = vadd.f32 %v9836_v41, %v3988_v42  ;;  %v3991_v5 = vadd.f32 %v9805_v3, %v3935_v13 }
 0xa0f   : > { %v4047_v49 = vadd.f32 %v9839_v51, %v3991_v5  ;;  %v9806_v1 = vpop.f32.mrb[116].mxu1  ;;  %v9840_v6 = vpop.f32.mrb[104].mxu0 }
 0xa10   : > { %v9807_v0 = vpop.f32.mrb[117].mxu1  ;;  %v9841_v7 = vpop.f32.mrb[105].mxu0 }
 0xa11   : > { %v9808_v54 = vadd.f32 %v9807_v0, %v9806_v1  ;;  %v9842_v2 = vadd.f32 %v9841_v7, %v9840_v6  ;;  %v9809_v18 = vpop.f32.mrb[118].mxu1  ;;  %v9843_v4 = vpop.f32.mrb[106].mxu0 }
 0xa12   : > { %v9810_v8 = vpop.f32.mrb[119].mxu1  ;;  %v9844_v9 = vpop.f32.mrb[107].mxu0 }
 0xa13   : > { %v3996_v55 = vadd.f32 %v9808_v54, %v3940_v48 }
 0xa15   : > { %v4052_v23 = vadd.f32 %v9842_v2, %v3996_v55 }
 0xa1f   : > { %v9862_v20 = vpop.f32.mrb[120].mxu1  ;;  %v9896_v14 = vpop.f32.mrb[108].mxu0 }
 0xa20   : > { %v9863_v12 = vpop.f32.mrb[121].mxu1  ;;  %v9897_v15 = vpop.f32.mrb[109].mxu0 }
 0xa21   : > { %v9864_v11 = vadd.f32 %v9863_v12, %v9862_v20  ;;  %v9898_v16 = vadd.f32 %v9897_v15, %v9896_v14  ;;  %v9865_v13 = vpop.f32.mrb[122].mxu1  ;;  %v9899_v19 = vpop.f32.mrb[110].mxu0 }
 0xa22   : > { %v9866_v60 = vpop.f32.mrb[123].mxu1  ;;  %v9900_v45 = vpop.f32.mrb[111].mxu0 }
 0xa23   : > { %v4092_v24 = vadd.f32 %v9864_v11, %v4036_v38  ;;  %v9867_v25 = vadd.f32 %v9866_v60, %v9865_v13  ;;  %v9901_v46 = vadd.f32 %v9900_v45, %v9899_v19 }
 0xa25   : > { %v4148_v27 = vadd.f32 %v9898_v16, %v4092_v24  ;;  %v4095_v28 = vadd.f32 %v9867_v25, %v4039_v62 }
 0xa27   : > { %v4169_v56 = vadd.f32 %v4148_v27, %v12309_v21  ;;  %v4151_v58 = vadd.f32 %v9901_v46, %v4095_v28  ;;  %v9868_v48 = vpop.f32.mrb[124].mxu1  ;;  %v9902_v31 = vpop.f32.mrb[112].mxu0 }
 0xa28   : > { %v9869_v32 = vpop.f32.mrb[125].mxu1  ;;  %v9903_v57 = vpop.f32.mrb[113].mxu0 }
 0xa29   : > { %4174 = vst [vmem:[#allocation2] sm:$0xff] %v4169_v56  ;;  %v4170_v50 = vadd.f32 %v4151_v58, %v12311_v22  ;;  %v9870_v52 = vadd.f32 %v9869_v32, %v9868_v48  ;;  %v9904_v59 = vadd.f32 %v9903_v57, %v9902_v31  ;;  %v9871_v34 = vpop.f32.mrb[126].mxu1  ;;  %v9905_v44 = vpop.f32.mrb[114].mxu0 }
 0xa2a   : > { %v9872_v53 = vpop.f32.mrb[127].mxu1  ;;  %v9906_v17 = vpop.f32.mrb[115].mxu0 }
 0xa2b   : > { %4175 = vst [vmem:[#allocation2 + $0x8] sm:$0xff] %v4170_v50  ;;  %v4100_v38 = vadd.f32 %v9870_v52, %v4044_v47  ;;  %v9873_v36 = vadd.f32 %v9872_v53, %v9871_v34  ;;  %v9907_v62 = vadd.f32 %v9906_v17, %v9905_v44 }
 0xa2d   : > { %v4156_v35 = vadd.f32 %v9904_v59, %v4100_v38  ;;  %v4103_v21 = vadd.f32 %v9873_v36, %v4047_v49 }
 0xa2f   : > { %v4171_v39 = vadd.f32 %v4156_v35, %v12315_v33  ;;  %v4159_v61 = vadd.f32 %v9907_v62, %v4103_v21  ;;  %v9874_v63 = vpop.f32.mrb[128].mxu1  ;;  %v9908_v40 = vpop.f32.mrb[116].mxu0 }
 0xa30   : > { %v9875_v41 = vpop.f32.mrb[129].mxu1  ;;  %v9909_v30 = vpop.f32.mrb[117].mxu0 }
 0xa31   : > { %4176 = vst [vmem:[#allocation2 + $0x10] sm:$0xff] %v4171_v39  ;;  %v4172_v22 = vadd.f32 %v4159_v61, %v12317_v29  ;;  %v9876_v26 = vadd.f32 %v9875_v41, %v9874_v63  ;;  %v9910_v43 = vadd.f32 %v9909_v30, %v9908_v40  ;;  %v9877_v10 = vpop.f32.mrb[130].mxu1  ;;  %v9911_v42 = vpop.f32.mrb[118].mxu0 }
 0xa32   : > { %v9878_v3 = vpop.f32.mrb[131].mxu1  ;;  %v9912_v51 = vpop.f32.mrb[119].mxu0 }
 0xa33   : > { %4177 = vst [vmem:[#allocation2 + $0x18] sm:$0xff] %v4172_v22  ;;  %v4108_v47 = vadd.f32 %v9876_v26, %v4052_v23 }
 0xa35   : > { %v4164_v5 = vadd.f32 %v9910_v43, %v4108_v47 }
 0xa37   : > { %v4173_v49 = vadd.f32 %v4164_v5, %v12321_v37 }
 0xa39   : > { %4178 = vst [vmem:[#allocation2 + $0x20] sm:$0xff] %v4173_v49 }
 0xa3a PF: > { %p9255_p6 = scmp.lt.s32.totalorder %s11908_s25, 2 }
 0xa3b   : > { %v4183_v33 = vld [vmem:[#allocation2] sm:$0xff] (!%p9255_p6)  ;;  %v4185_v29 = vld [vmem:[#allocation2 + $0x10] sm:$0xff] (!%p9255_p6)  ;;  %v4184_v1 = vld [vmem:[#allocation2 + $0x8] sm:$0xff] (!%p9255_p6)  ;;  %v11846_v54 = vmov (!%p9255_p6), 0.0   ;;  %v11847_v39 = vmov (!%p9255_p6), 0   ;;  %vm11848_vm3 = vmmov (!%p9255_p6), 0  }
 0xa3c   : > { %4182 = sbr.rel (%p9255_p6) target bundleno = 6760 (0x1a68), region = 84  ;;  %4195 = vadd.xlane.f32.xlu0 (!%p9255_p6), %v4183_v33  ;;  %4199 = vadd.xlane.f32.xlu1 (!%p9255_p6), %v4185_v29  ;;  %v4186_v6 = vld [vmem:[#allocation2 + $0x18] sm:$0xff] (!%p9255_p6)  ;;  %v11096_v37 = vld [vmem:[%s12145_s16 + $0x4] ss:$100 sps:$4 sm:$0xff] (!%p9255_p6)   ;;  %v11107_v32 = vld [vmem:[%s12145_s16 + $0x198] ss:$100 sps:$4 sm:$0xff] (!%p9255_p6)  }
 0xa3d   : > { %v11098_v7 = vld [vmem:[%s12145_s16] ss:$100 sps:$4 sm:$0xff] (!%p9255_p6)   ;;  %10357 = vmatprep.subr.bf16.mxu1 (!%p9255_p6), %v11846_v54  ;;  %v11099_v2 = vld [vmem:[%s12145_s16 + $0x8] ss:$100 sps:$4 sm:$0xff] (!%p9255_p6)   ;;  %4453 = vmatprep.subr.bf16.mxu0 (!%p9255_p6), %v11096_v37  ;;  %v11103_v58 = vld [vmem:[%s12145_s16 + $0xd0] ss:$100 sps:$4 sm:$0xff] (!%p9255_p6)  }
 0xa3e   : > { %v11100_v18 = vld [vmem:[%s12145_s16 + $0xcc] ss:$100 sps:$4 sm:$0xff] (!%p9255_p6)   ;;  %4454 = vmatpush1.bf16.msra.mxu0 (!%p9255_p6), %v11098_v7  ;;  %10358 = vmatpush3.bf16.msra.mxu1 (!%p9255_p6), %v11099_v2  ;;  %v11104_v48 = vld [vmem:[%s12145_s16 + $0x194] ss:$100 sps:$4 sm:$0xff] (!%p9255_p6)   ;;  %v11108_v57 = vld [vmem:[%s12145_s16 + $0x25c] ss:$100 sps:$4 sm:$0xff] (!%p9255_p6)  }
 0xa3f   : > { %4455 = vmatprep.subr.bf16.mxu0 (!%p9255_p6), %v11100_v18  ;;  %10359 = vmatprep.subr.bf16.mxu1 (!%p9255_p6), %v11846_v54  ;;  %v11102_v56 = vld [vmem:[%s12145_s16 + $0xc8] ss:$100 sps:$4 sm:$0xff] (!%p9255_p6)   ;;  %v11106_v31 = vld [vmem:[%s12145_s16 + $0x190] ss:$100 sps:$4 sm:$0xff] (!%p9255_p6)   ;;  %v11110_v50 = vld [vmem:[%s12145_s16 + $0x258] ss:$100 sps:$4 sm:$0xff] (!%p9255_p6)  }
 0xa40   : > { %v4187_v0 = vld [vmem:[#allocation2 + $0x20] sm:$0xff] (!%p9255_p6)  ;;  %4197 = vadd.xlane.f32.xlu0 (!%p9255_p6), %v4184_v1  ;;  %4201 = vadd.xlane.f32.xlu1 (!%p9255_p6), %v4186_v6  ;;  %v11111_v52 = vld [vmem:[%s12145_s16 + $0x260] ss:$100 sps:$4 sm:$0xff] (!%p9255_p6)   ;;  %v11115_v44 = vld [vmem:[%s12145_s16 + $0x328] ss:$100 sps:$4 sm:$0xff] (!%p9255_p6)   ;;  %vm4708_vm4 = vcmask (!%p9255_p6), 1043456  }
 0xa41   : > { %v11112_v59 = vld [vmem:[%s12145_s16 + $0x324] ss:$100 sps:$4 sm:$0xff] (!%p9255_p6)   ;;  %v11116_v53 = vld [vmem:[%s12145_s16 + $0x3ec] ss:$100 sps:$4 sm:$0xff] (!%p9255_p6)   ;;  %v11120_v36 = vld [vmem:[%s12145_s16 + $0x4b4] ss:$100 sps:$4 sm:$0xff] (!%p9255_p6)   ;;  %4485 = vmatprep.mubr.bf16.mxu0 (!%p9255_p6), %v11847_v39  ;;  %10373 = vmatprep.mubr.msk.bf16.mxu1 (!%p9255_p6), %vm11848_vm3, %v11846_v54 }
 0xa42   : > { %4456 = vmatpush1.bf16.msra.mxu0 (!%p9255_p6), %v11102_v56  ;;  %10360 = vmatpush3.bf16.msra.mxu1 (!%p9255_p6), %v11103_v58  ;;  %v11114_v34 = vld [vmem:[%s12145_s16 + $0x320] ss:$100 sps:$4 sm:$0xff] (!%p9255_p6)   ;;  %v11118_v17 = vld [vmem:[%s12145_s16 + $0x3e8] ss:$100 sps:$4 sm:$0xff] (!%p9255_p6)   ;;  %v11119_v38 = vld [vmem:[%s12145_s16 + $0x3f0] ss:$100 sps:$4 sm:$0xff] (!%p9255_p6)  }
 0xa43   : > { %10361 = vmatprep.subr.bf16.mxu1 %v11846_v54  ;;  %4457 = vmatprep.subr.bf16.mxu0 %v11104_v48  ;;  %v11122_v62 = vld [vmem:[%s12145_s16 + $0x4b0] ss:$100 sps:$4 sm:$0xff]   ;;  %v11123_v35 = vld [vmem:[%s12145_s16 + $0x4b8] ss:$100 sps:$4 sm:$0xff]   ;;  %v11127_v63 = vld [vmem:[%s12145_s16 + $0x580] ss:$100 sps:$4 sm:$0xff]  }
 0xa44   : > { %4203 = vadd.xlane.f32.xlu0 %v4187_v0  ;;  %v11124_v21 = vld [vmem:[%s12145_s16 + $0x57c] ss:$100 sps:$4 sm:$0xff]   ;;  %vm4637_vm5 = vcmask 326656   ;;  %p9592_p7 = scmp.ne.s32.totalorder %s11908_s25, 3 }
 0xa45   : > { %v11126_v61 = vld [vmem:[%s12145_s16 + $0x578] ss:$100 sps:$4 sm:$0xff]   ;;  %v4308_v48 = vld [vmem:[%s12153_s29 + $0x2] sm:$0x7]  ;;  %vm11850_vm6 = vmmov (!%p9592_p7), 0  }
 0xa46   : > { %4458 = vmatpush1.bf16.msra.mxu0 %v11106_v31  ;;  %10362 = vmatpush3.bf16.msra.mxu1 %v11107_v32 }
 0xa47   : > { %10363 = vmatprep.subr.bf16.mxu1 %v11846_v54  ;;  %4459 = vmatprep.subr.bf16.mxu0 %v11108_v57 }
 0xa4a   : > { %4460 = vmatpush1.bf16.msra.mxu0 %v11110_v50  ;;  %10364 = vmatpush3.bf16.msra.mxu1 %v11111_v52 }
 0xa4b   : > { %10365 = vmatprep.subr.bf16.mxu1 %v11846_v54  ;;  %4461 = vmatprep.subr.bf16.mxu0 %v11112_v59 }
 0xa4e   : > { %4462 = vmatpush1.bf16.msra.mxu0 %v11114_v34  ;;  %10366 = vmatpush3.bf16.msra.mxu1 %v11115_v44 }
 0xa4f   : > { %10367 = vmatprep.subr.bf16.mxu1 %v11846_v54  ;;  %4463 = vmatprep.subr.bf16.mxu0 %v11116_v53 }
 0xa52   : > { %4464 = vmatpush1.bf16.msra.mxu0 %v11118_v17  ;;  %10368 = vmatpush3.bf16.msra.mxu1 %v11119_v38 }
 0xa53   : > { %4465 = vmatprep.subr.bf16.mxu0 %v11120_v36  ;;  %10369 = vmatprep.subr.bf16.mxu1 %v11846_v54 }
 0xa56   : > { %4466 = vmatpush1.bf16.msra.mxu0 %v11122_v62  ;;  %10370 = vmatpush3.bf16.msra.mxu1 %v11123_v35 }
 0xa57   : > { %4467 = vmatprep.subr.bf16.mxu0 %v11124_v21  ;;  %10371 = vmatprep.subr.bf16.mxu1 %v11846_v54 }
 0xa5a   : > { %4468 = vmatpush1.bf16.msra.mxu0 %v11126_v61  ;;  %10372 = vmatpush3.bf16.msra.mxu1 %v11127_v63 }
 0xa5b   : > { %10403 = vmatprep.subr.bf16.mxu1 %v11846_v54  ;;  %10385 = vmatprep.subr.bf16.mxu0 %v11846_v54 }
 0xac9   : > { %v4196_v4 = vpop.xlane.xlu0 %4195  ;;  %v4200_v8 = vpop.xlane.xlu1 %4199 }
 0xaca   : > { %v4206_v9 = vmul.f32 0.0078125, %v4196_v4  ;;  %v4208_v55 = vmul.f32 0.0078125, %v4200_v8  ;;  %v9257_v4 = vld [vmem:[%s12153_s29 + $0x1] ss:$0 sm:$0xff] }
 0xacc   : > { %v12842_v23 = vsub.f32 %v4183_v33, %v4206_v9  ;;  %v12844_v20 = vsub.f32 %v4185_v29, %v4208_v55 }
 0xacd   : > { %v4198_v14 = vpop.xlane.xlu0 %4197  ;;  %v4202_v12 = vpop.xlane.xlu1 %4201 }
 0xace   : > { %v4207_v15 = vmul.f32 0.0078125, %v4198_v14  ;;  %v4216_v11 = vmul.f32 %v12842_v23, %v12842_v23  ;;  %v4209_v16 = vmul.f32 0.0078125, %v4202_v12  ;;  %v4218_v60 = vmul.f32 %v12844_v20, %v12844_v20 }
 0xad0   : > { %v12848_v13 = vsub.f32 %v4184_v1, %v4207_v15  ;;  %4221 = vadd.xlane.f32.xlu1 %v4216_v11  ;;  %v12850_v19 = vsub.f32 %v4186_v6, %v4209_v16 }
 0xad1   : > { %v4204_v45 = vpop.xlane.xlu0 %4203 }
 0xad2   : > { %v4210_v24 = vmul.f32 0.0078125, %v4204_v45  ;;  %v4217_v25 = vmul.f32 %v12848_v13, %v12848_v13  ;;  %v4219_v27 = vmul.f32 %v12850_v19, %v12850_v19 }
 0xad4   : > { %v12856_v46 = vsub.f32 %v4187_v0, %v4210_v24  ;;  %4225 = vadd.xlane.f32.xlu1 %v4218_v60  ;;  %4223 = vadd.xlane.f32.xlu0 %v4217_v25  ;;  %v9256_v0 = vld [vmem:[%s12153_s29] ss:$0 sm:$0xff] }
 0xad6   : > { %v4220_v28 = vmul.f32 %v12856_v46, %v12856_v46 }
 0xad8   : > { %4227 = vadd.xlane.f32.xlu0 %v4219_v27  ;;  %4229 = vadd.xlane.f32.xlu1 %v4220_v28 }
 0xb5d   : > { %v4222_v40 = vpop.xlane.xlu1 %4221 }
 0xb5e   : > { %v4231_v41 = vmul.f32 0.0078125, %v4222_v40 }
 0xb60   : > { %v4236_v30 = vadd.f32 1e-05, %v4231_v41 }
 0xb61   : > { %v4226_v22 = vpop.xlane.xlu1 %4225  ;;  %v4224_v26 = vpop.xlane.xlu0 %4223 }
 0xb62   : > { %11496 = vrsqrt.f32 %v4236_v30  ;;  %v4233_v43 = vmul.f32 0.0078125, %v4226_v22  ;;  %v4232_v10 = vmul.f32 0.0078125, %v4224_v26 }
 0xb64   : > { %v4237_v42 = vadd.f32 1e-05, %v4232_v10  ;;  %v4238_v3 = vadd.f32 1e-05, %v4233_v43 }
 0xb65   : > { %v4230_v51 = vpop.xlane.xlu1 %4229  ;;  %v4228_v47 = vpop.xlane.xlu0 %4227 }
 0xb66   : > { %v4234_v5 = vmul.f32 0.0078125, %v4228_v47  ;;  %11498 = vrsqrt.f32 %v4237_v42  ;;  %v4235_v49 = vmul.f32 0.0078125, %v4230_v51 }
 0xb67   : > { %11500 = vrsqrt.f32 %v4238_v3 }
 0xb68   : > { %v4239_v33 = vadd.f32 1e-05, %v4234_v5  ;;  %v4240_v29 = vadd.f32 1e-05, %v4235_v49 }
 0xb6a   : > { %11502 = vrsqrt.f32 %v4239_v33 }
 0xb6b   : > { %11504 = vrsqrt.f32 %v4240_v29 }
 0xb6c   : > { %v11497_v1 = vpop.eup %11496 }
 0xb6d   : > { %v4246_v6 = vmul.f32 %v11497_v1, %v12842_v23 }
 0xb6f   : > { %v4257_v2 = vmul.f32 %v9256_v0, %v4246_v6 }
 0xb70   : > { %v11499_v37 = vpop.eup %11498 }
 0xb71   : > { %v4247_v7 = vmul.f32 %v11499_v37, %v12848_v13  ;;  %v11501_v18 = vpop.eup %11500  ;;  %v4268_v55 = vadd.f32 %v9257_v4, %v4257_v2 }
 0xb72   : > { %v4248_v12 = vmul.f32 %v11501_v18, %v12844_v20 }
 0xb73   : > { %v4258_v8 = vmul.f32 %v9256_v0, %v4247_v7 }
 0xb74   : > { %v11503_v9 = vpop.eup %11502  ;;  %v4259_v23 = vmul.f32 %v9256_v0, %v4248_v12 }
 0xb75   : > { %v4269_v14 = vadd.f32 %v9257_v4, %v4258_v8  ;;  %v4249_v15 = vmul.f32 %v11503_v9, %v12850_v19  ;;  %v11505_v60 = vpop.eup %11504 }
 0xb76   : > { %v4250_v45 = vmul.f32 %v11505_v60, %v12856_v46  ;;  %v4270_v24 = vadd.f32 %v9257_v4, %v4259_v23  ;;  %v4310_v46 = vlaneseq }
 0xb77   : > { %v4305_v11 = vpack.c.bf16 %v4269_v14, %v4268_v55  ;;  %v4260_v16 = vmul.f32 %v9256_v0, %v4249_v15 }
 0xb78   : > { %v4261_v20 = vmul.f32 %v9256_v0, %v4250_v45  ;;  %v12910_v28 = vshrl.u32 %v4310_v46, 7 }
 0xb79   : > { %4486 = vmatmul.mubr.bf16.vlgmr.msra.gmra.mrb[0].mxu0 %v4305_v11  ;;  %10374 = vmatmul.mubr.bf16.vlgmr.msra.gmra.mrb[0].mxu1 %v4305_v11  ;;  %v4271_v13 = vadd.f32 %v9257_v4, %v4260_v16 }
 0xb7a   : > { %4495 = vmatprep.mubr.bf16.mxu0 %v11847_v39  ;;  %10377 = vmatprep.mubr.msk.bf16.mxu1 %vm11848_vm3, %v11846_v54  ;;  %v4272_v19 = vadd.f32 %v9257_v4, %v4261_v20  ;;  %v12913_v56 = vsub.s32 0, %v12910_v28  ;;  %v12916_v58 = vsub.s32 2, %v12910_v28  ;;  %v12920_v31 = vsub.s32 1, %v12910_v28 }
 0xb7b   : > { %v4306_v25 = vpack.c.bf16 %v4271_v13, %v4270_v24 }
 0xb7c   : > { %v4307_v27 = vpack.c.bf16 %v4272_v19, %v4272_v19  ;;  %v12923_v32 = vrot.slane %v4308_v48, %v12913_v56  ;;  %v4321_v57 = vrot.slane %v4308_v48, %v12916_v58  ;;  %v4317_v59 = vrot.slane %v4308_v48, %v12920_v31  ;;  %v4571_v19 = vld [vmem:[#allocation7 + $0x8] sm:$0xff] }
 0xb81   : > { %4496 = vmatmul.mubr.bf16.gmra.mrb[4].mxu0 %v4306_v25  ;;  %10378 = vmatmul.mubr.bf16.gmra.mrb[4].mxu1 %v4306_v25  ;;  %v4570_v25 = vld [vmem:[#allocation7] sm:$0xff] }
 0xb82   : > { %4505 = vmatprep.mubr.bf16.mxu0 %v11847_v39  ;;  %10381 = vmatprep.mubr.msk.bf16.mxu1 %vm11848_vm3, %v11846_v54 }
 0xb89   : > { %4506 = vmatmul.mubr.bf16.gmra.mrb[8].mxu0 %v4307_v27  ;;  %10382 = vmatmul.mubr.bf16.gmra.mrb[8].mxu1 %v4307_v27 }
 0xb8a   : > { %10391 = vmatprep.mubr.msk.bf16.mxu0 %vm11848_vm3, %v11846_v54  ;;  %10409 = vmatprep.mubr.msk.bf16.mxu1 %vm11848_vm3, %v11846_v54 }
 0xc4c   : > { %v4487_v50 = vpop.f32.mrb[0].mxu0  ;;  %v4548_v52 = vpop.f32.mrb[0].mxu1 }
 0xc4d   : > { %v4489_v34 = vpop.f32.mrb[1].mxu0  ;;  %v10375_v44 = vpop.f32.mrb[1].mxu1  ;;  %v4488_v38 = vadd.f32 %v4487_v50, %v12923_v32  ;;  %v4549_v36 = vadd.f32 %v4548_v52, %v4321_v57 }
 0xc4e   : > { %v4491_v53 = vpop.f32.mrb[2].mxu0  ;;  %v4551_v17 = vpop.f32.mrb[2].mxu1  ;;  %v4490_v63 = vadd.f32 %v4489_v34, %v4317_v59  ;;  %v4573_v44 = vld [vmem:[#allocation7 + $0x18] sm:$0xff] }
 0xc4f   : > { %v4492_v62 = vadd.f32 %v4491_v53, %v12923_v32  ;;  %v4552_v35 = vadd.f32 %v4551_v17, %v4321_v57  ;;  %v4493_v21 = vpop.f32.mrb[3].mxu0  ;;  %v10376_v61 = vpop.f32.mrb[3].mxu1 }
 0xc50   : > { %v4494_v40 = vadd.f32 %v4493_v21, %v4317_v59  ;;  %v4574_v61 = vld [vmem:[#allocation7 + $0x20] sm:$0xff] }
 0xc51   : > { %v4575_v41 = vpack.c.bf16 %v4492_v62, %v4488_v38  ;;  %v4696_v30 = vpack.c.bf16 %v4552_v35, %v4549_v36 }
 0xc52   : > { %v4578_v22 = vpack.c.bf16 %v4494_v40, %v4490_v63 }
 0xc53   : > { %10404 = vmatpush3.bf16.msra.mxu1 %v4696_v30 }
 0xc54   : > { %v4497_v26 = vpop.f32.mrb[4].mxu0  ;;  %v4556_v43 = vpop.f32.mrb[4].mxu1  ;;  %10386 = vmatpush3.bf16.xpose.msra.mxu0 %v4578_v22  ;;  %10405 = vmatprep.subr.bf16.mxu1 %v11846_v54 }
 0xc55   : > { %v4499_v10 = vpop.f32.mrb[5].mxu0  ;;  %v10379_v42 = vpop.f32.mrb[5].mxu1  ;;  %10387 = vmatprep.subr.bf16.mxu0 %v11846_v54  ;;  %v4498_v47 = vadd.f32 %v4497_v26, %v12923_v32  ;;  %v4557_v5 = vadd.f32 %v4556_v43, %v4321_v57 }
 0xc56   : > { %v4501_v3 = vpop.f32.mrb[6].mxu0  ;;  %v4559_v51 = vpop.f32.mrb[6].mxu1  ;;  %v4500_v6 = vadd.f32 %v4499_v10, %v4317_v59 }
 0xc57   : > { %v4502_v49 = vadd.f32 %v4501_v3, %v12923_v32  ;;  %v4560_v33 = vadd.f32 %v4559_v51, %v4321_v57  ;;  %v4503_v29 = vpop.f32.mrb[7].mxu0  ;;  %v10380_v1 = vpop.f32.mrb[7].mxu1 }
 0xc58   : > { %v4504_v0 = vadd.f32 %v4503_v29, %v4317_v59 }
 0xc59   : > { %v4576_v37 = vpack.c.bf16 %v4502_v49, %v4498_v47  ;;  %v4697_v7 = vpack.c.bf16 %v4560_v33, %v4557_v5 }
 0xc5a   : > { %v4579_v2 = vpack.c.bf16 %v4504_v0, %v4500_v6 }
 0xc5b   : > { %10406 = vmatpush3.bf16.msra.mxu1 %v4697_v7 }
 0xc5c   : > { %v4507_v18 = vpop.f32.mrb[8].mxu0  ;;  %v4564_v4 = vpop.f32.mrb[8].mxu1  ;;  %10388 = vmatpush3.bf16.xpose.msra.mxu0 %v4579_v2  ;;  %10407 = vmatprep.subr.bf16.mxu1 %v11846_v54 }
 0xc5d   : > { %v4565_v8 = vadd.f32 %v4564_v4, %v4321_v57  ;;  %v4509_v9 = vpop.f32.mrb[9].mxu0  ;;  %v10383_v55 = vpop.f32.mrb[9].mxu1  ;;  %10389 = vmatprep.subr.bf16.mxu0 %v11846_v54  ;;  %v4508_v45 = vadd.f32 %v4507_v18, %v12923_v32  ;;  %v4572_v32 = vld [vmem:[#allocation7 + $0x10] sm:$0xff] }
 0xc5e   : > { %v4510_v14 = vadd.f32 %v4509_v9, %v4317_v59  ;;  %v4511_v12 = vpop.f32.mrb[10].mxu0  ;;  %v4567_v15 = vpop.f32.mrb[10].mxu1 }
 0xc5f   : > { %v4698_v11 = vpack.c.bf16 %v4565_v8, %v4565_v8  ;;  %v4512_v16 = vpop.f32.mrb[11].mxu0  ;;  %v10384_v60 = vpop.f32.mrb[11].mxu1  ;;  %v4577_v24 = vpack.c.bf16 %v4508_v45, %v4508_v45  ;;  %v11132_v45 = vld [vmem:[%s12145_s16 + $0x32c] ss:$100 sps:$4 sm:$0xff]  }
 0xc60   : > { %v4580_v13 = vpack.c.bf16 %v4510_v14, %v4510_v14  ;;  %v11128_v16 = vld [vmem:[%s12145_s16 + $0xc] ss:$100 sps:$4 sm:$0xff]   ;;  %v11129_v60 = vld [vmem:[%s12145_s16 + $0xd4] ss:$100 sps:$4 sm:$0xff]  }
 0xc61   : > { %v4710_v23 = vsel %vm4708_vm4, %v4698_v11, 0 }
 0xc62   : > { %10408 = vmatpush3.bf16.msra.mxu1 %v4710_v23  ;;  %v11130_v23 = vld [vmem:[%s12145_s16 + $0x19c] ss:$100 sps:$4 sm:$0xff]  }
 0xc63   : > { %10449 = vmatprep.subr.bf16.mxu1 %v11846_v54 }
 0xc64   : > { %10390 = vmatpush3.bf16.xpose.msra.mxu0 %v4580_v13  ;;  %v11131_v13 = vld [vmem:[%s12145_s16 + $0x264] ss:$100 sps:$4 sm:$0xff]  }
 0xc65   : > { %10421 = vmatprep.subr.bf16.mxu0 %v11846_v54 }
 0xc6b   : > { %10392 = vmatmul.mubr.bf16.vlgmr.msra.gmra.mrb[12].mxu0 %v4575_v41 }
 0xc6c   : > { %10395 = vmatprep.mubr.msk.bf16.mxu0 %vm11848_vm3, %v11846_v54  ;;  %10422 = vmatpush3.bf16.msra.mxu0 %v11128_v16  ;;  %v11569_v16 = vld [vmem:[#allocation2 + $0x18] sm:$0xff] }
 0xc6d   : > { %10423 = vmatprep.subr.bf16.mxu0 %v11846_v54 }
 0xc70   : > { %10424 = vmatpush3.bf16.msra.mxu0 %v11129_v60 }
 0xc71   : > { %10425 = vmatprep.subr.bf16.mxu0 %v11846_v54 }
 0xc73   : > { %10396 = vmatmul.mubr.bf16.gmra.mrb[16].mxu0 %v4576_v37 }
 0xc74   : > { %10399 = vmatprep.mubr.msk.bf16.mxu0 %vm11848_vm3, %v11846_v54  ;;  %10426 = vmatpush3.bf16.msra.mxu0 %v11130_v23 }
 0xc75   : > { %10427 = vmatprep.subr.bf16.mxu0 %v11846_v54 }
 0xc78   : > { %10428 = vmatpush3.bf16.msra.mxu0 %v11131_v13 }
 0xc79   : > { %10429 = vmatprep.subr.bf16.mxu0 %v11846_v54 }
 0xc7b   : > { %10400 = vmatmul.mubr.bf16.gmra.mrb[20].mxu0 %v4577_v24  ;;  %v11133_v24 = vld [vmem:[%s12145_s16 + $0x3f4] ss:$100 sps:$4 sm:$0xff]  }
 0xc7c   : > { %10437 = vmatprep.mubr.msk.bf16.mxu0 %vm11848_vm3, %v11846_v54  ;;  %10430 = vmatpush3.bf16.msra.mxu0 %v11132_v45 }
 0xc7d   : > { %10431 = vmatprep.subr.bf16.mxu0 %v11846_v54 }
 0xc80   : > { %10432 = vmatpush3.bf16.msra.mxu0 %v11133_v24  ;;  %v11570_v24 = vld [vmem:[#allocation2 + $0x20] sm:$0xff] }
 0xc81   : > { %10433 = vmatprep.subr.bf16.mxu0 %v11846_v54 }
 0xd3e   : > { %v4615_v20 = vpop.f32.mrb[12].mxu0 }
 0xd3f   : > { %v4616_v27 = vadd.f32 %v4615_v20, %v4570_v25  ;;  %v10393_v46 = vpop.f32.mrb[13].mxu0  ;;  %v11134_v25 = vld [vmem:[%s12145_s16 + $0x4bc] ss:$100 sps:$4 sm:$0xff]  }
 0xd40   : > { %v4618_v48 = vpop.f32.mrb[14].mxu0  ;;  %10434 = vmatpush3.bf16.msra.mxu0 %v11134_v25 }
 0xd41   : > { %v4619_v57 = vadd.f32 %v4618_v48, %v4571_v19  ;;  %v10394_v50 = vpop.f32.mrb[15].mxu0  ;;  %v4638_v52 = vsel %vm4637_vm5, %v4616_v27, -inf  ;;  %10435 = vmatprep.subr.bf16.mxu0 %v11846_v54 }
 0xd42   : > { %4639 = vmax.xlane.f32.xlu0 %v4638_v52 }
 0xd43   : > { %v4641_v59 = vsel %vm4637_vm5, %v4619_v57, -inf }
 0xd44   : > { %4642 = vmax.xlane.f32.xlu1 %v4641_v59 }
 0xd46   : > { %v4623_v34 = vpop.f32.mrb[16].mxu0 }
 0xd47   : > { %v4624_v53 = vadd.f32 %v4623_v34, %v4572_v32  ;;  %v10397_v17 = vpop.f32.mrb[17].mxu0 }
 0xd48   : > { %v4626_v38 = vpop.f32.mrb[18].mxu0 }
 0xd49   : > { %v4627_v36 = vadd.f32 %v4626_v38, %v4573_v44  ;;  %v10398_v62 = vpop.f32.mrb[19].mxu0  ;;  %v4644_v35 = vsel %vm4637_vm5, %v4624_v53, -inf }
 0xd4a   : > { %4645 = vmax.xlane.f32.xlu0 %v4644_v35 }
 0xd4b   : > { %v4647_v21 = vsel %vm4637_vm5, %v4627_v36, -inf }
 0xd4c   : > { %4648 = vmax.xlane.f32.xlu1 %v4647_v21  ;;  %v11135_v21 = vld [vmem:[%s12145_s16 + $0x584] ss:$100 sps:$4 sm:$0xff]  }
 0xd4d   : > { %10436 = vmatpush3.bf16.msra.mxu0 %v11135_v21  ;;  %v11156_v21 = vld [vmem:[%s12145_s16 + $0x4c8] ss:$100 sps:$4 sm:$0xff]  }
 0xd4e   : > { %v4631_v63 = vpop.f32.mrb[20].mxu0 }
 0xd4f   : > { %v4632_v40 = vadd.f32 %v4631_v63, %v4574_v61  ;;  %v10401_v41 = vpop.f32.mrb[21].mxu0 }
 0xd50   : > { %v4634_v30 = vpop.f32.mrb[22].mxu0 }
 0xd51   : > { %v10402_v22 = vpop.f32.mrb[23].mxu0  ;;  %v4650_v26 = vsel %vm4637_vm5, %v4632_v40, -inf }
 0xd52   : > { %4651 = vmax.xlane.f32.xlu0 %v4650_v26 }
 0xdcf   : > { %v4640_v43 = vpop.xlane.xlu0 %4639 }
 0xdd0   : > { %v4653_v10 = vsub.f32 %v4616_v27, %v4640_v43 }
 0xdd1   : > { %v4643_v42 = vpop.xlane.xlu1 %4642 }
 0xdd2   : > { %v4658_v3 = vmul.f32 1.442695, %v4653_v10  ;;  %v4654_v51 = vsub.f32 %v4619_v57, %v4643_v42 }
 0xdd4   : > { %11506 = vpow2.f32 %v4658_v3  ;;  %v4660_v47 = vmul.f32 1.442695, %v4654_v51 }
 0xdd6   : > { %11508 = vpow2.f32 %v4660_v47 }
 0xdd7   : > { %v4646_v5 = vpop.xlane.xlu0 %4645 }
 0xdd8   : > { %v4655_v49 = vsub.f32 %v4624_v53, %v4646_v5 }
 0xdd9   : > { %v4649_v33 = vpop.xlane.xlu1 %4648 }
 0xdda   : > { %v4662_v29 = vmul.f32 1.442695, %v4655_v49  ;;  %v4656_v1 = vsub.f32 %v4627_v36, %v4649_v33 }
 0xddc   : > { %11510 = vpow2.f32 %v4662_v29  ;;  %v4664_v6 = vmul.f32 1.442695, %v4656_v1  ;;  %v9293_v29 = vld [vmem:[%s12153_s29 + $0x5] ss:$0 sm:$0xff]  ;;  %v11566_v1 = vld [vmem:[#allocation2] sm:$0xff] }
 0xdde   : > { %v11507_v0 = vpop.eup %11506  ;;  %11512 = vpow2.f32 %v4664_v6 }
 0xddf   : > { %v4652_v37 = vpop.xlane.xlu0 %4651  ;;  %v4668_v7 = vsel %vm4637_vm5, %v11507_v0, 0.0 }
 0xde0   : > { %v11509_v2 = vpop.eup %11508  ;;  %v4657_v18 = vsub.f32 %v4632_v40, %v4652_v37  ;;  %4669 = vadd.xlane.f32.xlu1 %v4668_v7 }
 0xde1   : > { %v4671_v4 = vsel %vm4637_vm5, %v11509_v2, 0.0 }
 0xde2   : > { %v4666_v8 = vmul.f32 1.442695, %v4657_v18  ;;  %4672 = vadd.xlane.f32.xlu0 %v4671_v4 }
 0xde4   : > { %11514 = vpow2.f32 %v4666_v8 }
 0xde6   : > { %v11511_v9 = vpop.eup %11510 }
 0xde7   : > { %v4674_v55 = vsel %vm4637_vm5, %v11511_v9, 0.0 }
 0xde8   : > { %v11513_v14 = vpop.eup %11512  ;;  %4675 = vadd.xlane.f32.xlu1 %v4674_v55  ;;  %v11568_v55 = vld [vmem:[#allocation2 + $0x10] sm:$0xff] }
 0xde9   : > { %v4677_v12 = vsel %vm4637_vm5, %v11513_v14, 0.0 }
 0xdea   : > { %4678 = vadd.xlane.f32.xlu0 %v4677_v12 }
 0xdee   : > { %v11515_v15 = vpop.eup %11514 }
 0xdef   : > { %v4680_v11 = vsel %vm4637_vm5, %v11515_v15, 0.0 }
 0xdf0   : > { %4681 = vadd.xlane.f32.xlu1 %v4680_v11 }
 0xe6d   : > { %v4670_v20 = vpop.xlane.xlu1 %4669 }
 0xe6e   : > { %11516 = vrcp.f32 %v4670_v20 }
 0xe6f   : > { %v4673_v19 = vpop.xlane.xlu0 %4672 }
 0xe70   : > { %11518 = vrcp.f32 %v4673_v19 }
 0xe75   : > { %v4676_v27 = vpop.xlane.xlu1 %4675 }
 0xe76   : > { %11520 = vrcp.f32 %v4676_v27 }
 0xe77   : > { %v4679_v46 = vpop.xlane.xlu0 %4678 }
 0xe78   : > { %v11517_v48 = vpop.eup %11516  ;;  %11522 = vrcp.f32 %v4679_v46 }
 0xe79   : > { %v4688_v50 = vmul.f32 %v11517_v48, %v11507_v0  ;;  %v11136_v48 = vld [vmem:[%s12145_s16 + $0x14] ss:$100 sps:$4 sm:$0xff]  }
 0xe7a   : > { %v11519_v57 = vpop.eup %11518 }
 0xe7b   : > { %v4689_v52 = vmul.f32 %v11519_v57, %v11509_v2  ;;  %v11567_v2 = vld [vmem:[#allocation2 + $0x8] sm:$0xff]  ;;  %v11138_v57 = vld [vmem:[%s12145_s16 + $0x18] ss:$100 sps:$4 sm:$0xff]  }
 0xe7c   : > { %5228 = vmatprep.subr.bf16.mxu0 %v11138_v57 }
 0xe7d   : > { %v4693_v59 = vpack.c.bf16 %v4689_v52, %v4688_v50  ;;  %v4682_v32 = vpop.xlane.xlu1 %4681  ;;  %v11141_v50 = vld [vmem:[%s12145_s16 + $0xe0] ss:$100 sps:$4 sm:$0xff]  }
 0xe7e   : > { %11524 = vrcp.f32 %v4682_v32  ;;  %v11139_v52 = vld [vmem:[%s12145_s16 + $0xdc] ss:$100 sps:$4 sm:$0xff]   ;;  %v11157_v32 = vld [vmem:[%s12145_s16 + $0x10] ss:$100 sps:$4 sm:$0xff]  }
 0xe7f   : > { %10410 = vmatmul.mubr.msk.bf16.vlgmr.msra.gmra.mrb[12].mxu1 %vm4637_vm5, %v4693_v59  ;;  %v11144_v59 = vld [vmem:[%s12145_s16 + $0x1a8] ss:$100 sps:$4 sm:$0xff]  }
 0xe80   : > { %v11521_v34 = vpop.eup %11520  ;;  %10413 = vmatprep.mubr.msk.bf16.mxu1 %vm11848_vm3, %v11846_v54  ;;  %10450 = vmatpush3.bf16.msra.mxu1 %v11157_v32 }
 0xe81   : > { %v4690_v53 = vmul.f32 %v11521_v34, %v11511_v9  ;;  %v11161_v34 = vld [vmem:[%s12145_s16 + $0xd8] ss:$100 sps:$4 sm:$0xff]   ;;  %10451 = vmatprep.subr.bf16.mxu1 %v11846_v54 }
 0xe82   : > { %v11523_v44 = vpop.eup %11522 }
 0xe83   : > { %v4691_v17 = vmul.f32 %v11523_v44, %v11513_v14  ;;  %v11142_v44 = vld [vmem:[%s12145_s16 + $0x1a4] ss:$100 sps:$4 sm:$0xff]  }
 0xe84   : > { %10452 = vmatpush3.bf16.msra.mxu1 %v11161_v34 }
 0xe85   : > { %v4694_v38 = vpack.c.bf16 %v4691_v17, %v4690_v53  ;;  %v11147_v53 = vld [vmem:[%s12145_s16 + $0x270] ss:$100 sps:$4 sm:$0xff]   ;;  %10453 = vmatprep.subr.bf16.mxu1 %v11846_v54 }
 0xe86   : > { %v11145_v17 = vld [vmem:[%s12145_s16 + $0x26c] ss:$100 sps:$4 sm:$0xff]  }
 0xe87   : > { %10414 = vmatmul.mubr.msk.bf16.gmra.mrb[16].mxu1 %vm4637_vm5, %v4694_v38  ;;  %v11150_v38 = vld [vmem:[%s12145_s16 + $0x338] ss:$100 sps:$4 sm:$0xff]  }
 0xe88   : > { %v11525_v36 = vpop.eup %11524  ;;  %10417 = vmatprep.mubr.msk.bf16.mxu1 %vm11848_vm3, %v11846_v54 }
 0xe89   : > { %v4692_v62 = vmul.f32 %v11525_v36, %v11515_v15  ;;  %v11148_v36 = vld [vmem:[%s12145_s16 + $0x334] ss:$100 sps:$4 sm:$0xff]  }
 0xe8b   : > { %v4695_v35 = vpack.c.bf16 %v4692_v62, %v4692_v62  ;;  %v11153_v62 = vld [vmem:[%s12145_s16 + $0x400] ss:$100 sps:$4 sm:$0xff]  }
 0xe8f   : > { %10418 = vmatmul.mubr.msk.bf16.gmra.mrb[20].mxu1 %vm4637_vm5, %v4695_v35  ;;  %v11151_v35 = vld [vmem:[%s12145_s16 + $0x3fc] ss:$100 sps:$4 sm:$0xff]  }
 0xe90   : > { %10465 = vmatprep.mubr.msk.bf16.mxu1 %vm11848_vm3, %v11846_v54 }
 0xf52   : > { %v4746_v61 = vpop.f32.mrb[12].mxu1 }
 0xf53   : > { %v10411_v63 = vpop.f32.mrb[13].mxu1 }
 0xf54   : > { %v4749_v40 = vpop.f32.mrb[14].mxu1  ;;  %v11160_v63 = vld [vmem:[%s12145_s16 + $0x590] ss:$100 sps:$4 sm:$0xff]  }
 0xf55   : > { %v4784_v41 = vpack.c.bf16 %v4749_v40, %v4746_v61  ;;  %v10412_v30 = vpop.f32.mrb[15].mxu1  ;;  %v11154_v61 = vld [vmem:[%s12145_s16 + $0x4c4] ss:$100 sps:$4 sm:$0xff]   ;;  %v11158_v40 = vld [vmem:[%s12145_s16 + $0x58c] ss:$100 sps:$4 sm:$0xff]  }
 0xf56   : > { %v4189_v30 = vld [vmem:[#allocation3 + $0x8] sm:$0xff] }
 0xf57   : > { %10438 = vmatmul.mubr.bf16.vlgmr.msra.gmra.mrb[24].mxu0 %v4784_v41  ;;  %v4188_v41 = vld [vmem:[#allocation3] sm:$0xff] }
 0xf58   : > { %10441 = vmatprep.mubr.msk.bf16.mxu0 %vm11848_vm3, %v11846_v54  ;;  %5229 = vmatpush1.bf16.msra.mxu0 %v11136_v48 }
 0xf59   : > { %5230 = vmatprep.subr.bf16.mxu0 %v11141_v50 }
 0xf5a   : > { %v4754_v22 = vpop.f32.mrb[16].mxu1 }
 0xf5b   : > { %v10415_v26 = vpop.f32.mrb[17].mxu1 }
 0xf5c   : > { %v4757_v43 = vpop.f32.mrb[18].mxu1  ;;  %5231 = vmatpush1.bf16.msra.mxu0 %v11139_v52 }
 0xf5d   : > { %v4785_v10 = vpack.c.bf16 %v4757_v43, %v4754_v22  ;;  %v10416_v42 = vpop.f32.mrb[19].mxu1  ;;  %5232 = vmatprep.subr.bf16.mxu0 %v11144_v59  ;;  %v5133_v22 = vpack.c.bf16 %v4189_v30, %v4188_v41 }
 0xf5f   : > { %10442 = vmatmul.mubr.bf16.gmra.mrb[28].mxu0 %v4785_v10 }
 0xf60   : > { %10445 = vmatprep.mubr.msk.bf16.mxu0 %vm11848_vm3, %v11846_v54  ;;  %5233 = vmatpush1.bf16.msra.mxu0 %v11142_v44 }
 0xf61   : > { %5234 = vmatprep.subr.bf16.mxu0 %v11147_v53 }
 0xf62   : > { %v4762_v3 = vpop.f32.mrb[20].mxu1 }
 0xf63   : > { %v10419_v51 = vpop.f32.mrb[21].mxu1  ;;  %v4786_v5 = vpack.c.bf16 %v4762_v3, %v4762_v3 }
 0xf64   : > { %v4765_v47 = vpop.f32.mrb[22].mxu1  ;;  %5235 = vmatpush1.bf16.msra.mxu0 %v11145_v17 }
 0xf65   : > { %v10420_v49 = vpop.f32.mrb[23].mxu1  ;;  %5236 = vmatprep.subr.bf16.mxu0 %v11150_v38 }
 0xf67   : > { %10446 = vmatmul.mubr.bf16.gmra.mrb[32].mxu0 %v4786_v5 }
 0xf68   : > { %5260 = vmatprep.mubr.bf16.mxu0 %v11847_v39  ;;  %5237 = vmatpush1.bf16.msra.mxu0 %v11148_v36 }
 0xf69   : > { %5238 = vmatprep.subr.bf16.mxu0 %v11153_v62 }
 0xf6c   : > { %5239 = vmatpush1.bf16.msra.mxu0 %v11151_v35 }
 0xf6d   : > { %5240 = vmatprep.subr.bf16.mxu0 %v11156_v21 }
 0xf70   : > { %5241 = vmatpush1.bf16.msra.mxu0 %v11154_v61 }
 0xf71   : > { %5242 = vmatprep.subr.bf16.mxu0 %v11160_v63 }
 0xf74   : > { %5243 = vmatpush1.bf16.msra.mxu0 %v11158_v40 }
 0xf75   : > { %10513 = vmatprep.subr.bf16.mxu0 %v11846_v54 }
 0xf77   : > { %5261 = vmatmul.mubr.bf16.vlgmr.msra.gmra.mrb[36].mxu0 %v5133_v22 }
 0xf78   : > { %5270 = vmatprep.mubr.bf16.mxu0 %v11847_v39 }
0x102a   : > { %v4869_v33 = vpop.f32.mrb[24].mxu0 }
0x102b   : > { %v4891_v6 = vadd.f32 %v11566_v1, %v4869_v33  ;;  %v10439_v0 = vpop.f32.mrb[25].mxu0 }
0x102c   : > { %v4872_v37 = vpop.f32.mrb[26].mxu0 }
0x102d   : > { %v12985_v7 = vadd.f32 %v9293_v29, %v4891_v6  ;;  %v4892_v18 = vadd.f32 %v11567_v2, %v4872_v37  ;;  %v10440_v4 = vpop.f32.mrb[27].mxu0 }
0x102f   : > { %v12987_v8 = vadd.f32 %v9293_v29, %v4892_v18  ;;  %4910 = vadd.xlane.f32.xlu0 %v12985_v7 }
0x1031   : > { %4912 = vadd.xlane.f32.xlu1 %v12987_v8 }
0x1032   : > { %v4877_v9 = vpop.f32.mrb[28].mxu0 }
0x1033   : > { %v4893_v14 = vadd.f32 %v11568_v55, %v4877_v9  ;;  %v10443_v12 = vpop.f32.mrb[29].mxu0 }
0x1034   : > { %v4880_v15 = vpop.f32.mrb[30].mxu0  ;;  %v11163_v12 = vld [vmem:[%s12145_s16 + $0x268] ss:$100 sps:$4 sm:$0xff]  }
0x1035   : > { %v12991_v11 = vadd.f32 %v9293_v29, %v4893_v14  ;;  %v4894_v60 = vadd.f32 %v11569_v16, %v4880_v15  ;;  %v10444_v23 = vpop.f32.mrb[31].mxu0  ;;  %v11162_v14 = vld [vmem:[%s12145_s16 + $0x1a0] ss:$100 sps:$4 sm:$0xff]   ;;  %v4190_v15 = vld [vmem:[#allocation3 + $0x10] sm:$0xff]  ;;  %v4191_v16 = vld [vmem:[#allocation3 + $0x18] sm:$0xff] }
0x1036   : > { %10454 = vmatpush3.bf16.msra.mxu1 %v11162_v14  ;;  %v11164_v23 = vld [vmem:[%s12145_s16 + $0x330] ss:$100 sps:$4 sm:$0xff]  }
0x1037   : > { %v12993_v13 = vadd.f32 %v9293_v29, %v4894_v60  ;;  %4914 = vadd.xlane.f32.xlu0 %v12991_v11  ;;  %10455 = vmatprep.subr.bf16.mxu1 %v11846_v54  ;;  %v5134_v60 = vpack.c.bf16 %v4191_v16, %v4190_v15 }
0x1039   : > { %4916 = vadd.xlane.f32.xlu1 %v12993_v13  ;;  %5271 = vmatmul.mubr.bf16.gmra.mrb[40].mxu0 %v5134_v60 }
0x103a   : > { %v4885_v45 = vpop.f32.mrb[32].mxu0  ;;  %10456 = vmatpush3.bf16.msra.mxu1 %v11163_v12  ;;  %5280 = vmatprep.mubr.bf16.mxu0 %v11847_v39 }
0x103b   : > { %v4895_v25 = vadd.f32 %v11570_v24, %v4885_v45  ;;  %v10447_v20 = vpop.f32.mrb[33].mxu0  ;;  %10457 = vmatprep.subr.bf16.mxu1 %v11846_v54  ;;  %v11165_v45 = vld [vmem:[%s12145_s16 + $0x3f8] ss:$100 sps:$4 sm:$0xff]   ;;  %v4192_v24 = vld [vmem:[#allocation3 + $0x20] sm:$0xff] }
0x103c   : > { %v4888_v19 = vpop.f32.mrb[34].mxu0  ;;  %v11166_v20 = vld [vmem:[%s12145_s16 + $0x4c0] ss:$100 sps:$4 sm:$0xff]  }
0x103d   : > { %v12997_v27 = vadd.f32 %v9293_v29, %v4895_v25  ;;  %v10448_v46 = vpop.f32.mrb[35].mxu0  ;;  %v5135_v25 = vpack.c.bf16 %v4192_v24, %v4192_v24  ;;  %v11167_v19 = vld [vmem:[%s12145_s16 + $0x588] ss:$100 sps:$4 sm:$0xff]  }
0x103e   : > { %10458 = vmatpush3.bf16.msra.mxu1 %v11164_v23  ;;  %v5136_v46 = vld [vmem:[%s12153_s29 + $0x9] sm:$0x3] }
0x103f   : > { %4918 = vadd.xlane.f32.xlu0 %v12997_v27  ;;  %10459 = vmatprep.subr.bf16.mxu1 %v11846_v54  ;;  %v13064_v48 = vrot.slane %v5136_v46, %v12913_v56  ;;  %v13067_v57 = vrot.slane %v5136_v46, %v12920_v31 }
0x1041   : > { %5281 = vmatmul.mubr.bf16.gmra.mrb[44].mxu0 %v5135_v25 }
0x1042   : > { %10460 = vmatpush3.bf16.msra.mxu1 %v11165_v45  ;;  %10529 = vmatprep.mubr.msk.bf16.mxu0 %vm11848_vm3, %v11846_v54 }
0x1043   : > { %10461 = vmatprep.subr.bf16.mxu1 %v11846_v54 }
0x1046   : > { %10462 = vmatpush3.bf16.msra.mxu1 %v11166_v20 }
0x1047   : > { %10463 = vmatprep.subr.bf16.mxu1 %v11846_v54 }
0x104a   : > { %10464 = vmatpush3.bf16.msra.mxu1 %v11167_v19  ;;  %v5262_v50 = vpop.f32.mrb[36].mxu0 }
0x104b   : > { %10477 = vmatprep.subr.bf16.mxu1 %v11846_v54  ;;  %v5263_v52 = vadd.f32 %v5262_v50, %v13064_v48  ;;  %v5264_v59 = vpop.f32.mrb[37].mxu0 }
0x104c   : > { %v13071_v32 = vadd.f32 %v5264_v59, %v13067_v57  ;;  %v5266_v34 = vpop.f32.mrb[38].mxu0 }
0x104d   : > { %v5267_v44 = vadd.f32 %v5266_v34, %v13064_v48  ;;  %v5268_v53 = vpop.f32.mrb[39].mxu0 }
0x104e   : > { %v13075_v17 = vadd.f32 %v5268_v53, %v13067_v57 }
0x104f   : > { %v5297_v38 = vpack.c.bf16 %v5267_v44, %v5263_v52 }
0x1050   : > { %v5414_v36 = vpack.c.bf16 %v13075_v17, %v13071_v32 }
0x10bc   : > { %v4911_v26 = vpop.xlane.xlu0 %4910 }
0x10bd   : > { %v4920_v43 = vmul.f32 0.0078125, %v4911_v26 }
0x10be   : > { %v4913_v10 = vpop.xlane.xlu1 %4912 }
0x10bf   : > { %v13023_v42 = vsub.f32 %v12985_v7, %v4920_v43  ;;  %v4921_v3 = vmul.f32 0.0078125, %v4913_v10 }
0x10c1   : > { %v13026_v51 = vsub.f32 %v12987_v8, %v4921_v3  ;;  %v4930_v47 = vmul.f32 %v13023_v42, %v13023_v42 }
0x10c3   : > { %4935 = vadd.xlane.f32.xlu1 %v4930_v47  ;;  %v4931_v5 = vmul.f32 %v13026_v51, %v13026_v51  ;;  %v9294_v47 = vld [vmem:[%s12153_s29 + $0x6] ss:$0 sm:$0xff] }
0x10c4   : > { %v4915_v49 = vpop.xlane.xlu0 %4914 }
0x10c5   : > { %v4922_v33 = vmul.f32 0.0078125, %v4915_v49  ;;  %4937 = vadd.xlane.f32.xlu0 %v4931_v5 }
0x10c6   : > { %v4917_v29 = vpop.xlane.xlu1 %4916 }
0x10c7   : > { %v13033_v1 = vsub.f32 %v12991_v11, %v4922_v33  ;;  %v4923_v6 = vmul.f32 0.0078125, %v4917_v29 }
0x10c9   : > { %v13036_v0 = vsub.f32 %v12993_v13, %v4923_v6  ;;  %v4932_v37 = vmul.f32 %v13033_v1, %v13033_v1 }
0x10cb   : > { %4939 = vadd.xlane.f32.xlu1 %v4932_v37  ;;  %v4933_v2 = vmul.f32 %v13036_v0, %v13036_v0 }
0x10cc   : > { %v4919_v18 = vpop.xlane.xlu0 %4918 }
0x10cd   : > { %v4924_v4 = vmul.f32 0.0078125, %v4919_v18  ;;  %4941 = vadd.xlane.f32.xlu0 %v4933_v2  ;;  %v9295_v18 = vld [vmem:[%s12153_s29 + $0x7] ss:$0 sm:$0xff] }
0x10cf   : > { %v13043_v9 = vsub.f32 %v12997_v27, %v4924_v4 }
0x10d1   : > { %v4934_v55 = vmul.f32 %v13043_v9, %v13043_v9 }
0x10d3   : > { %4943 = vadd.xlane.f32.xlu1 %v4934_v55 }
0x110c   : > { %v5272_v50 = vpop.f32.mrb[40].mxu0 }
0x110d   : > { %v5273_v52 = vadd.f32 %v5272_v50, %v13064_v48  ;;  %v5274_v59 = vpop.f32.mrb[41].mxu0 }
0x110e   : > { %v5275_v34 = vadd.f32 %v5274_v59, %v13067_v57  ;;  %v5276_v44 = vpop.f32.mrb[42].mxu0 }
0x110f   : > { %v5278_v53 = vpop.f32.mrb[43].mxu0 }
0x1150   : > { %v4936_v62 = vpop.xlane.xlu1 %4935 }
0x1151   : > { %v4945_v35 = vmul.f32 0.0078125, %v4936_v62 }
0x1152   : > { %v4938_v21 = vpop.xlane.xlu0 %4937 }
0x1153   : > { %v4950_v61 = vadd.f32 1e-05, %v4945_v35  ;;  %v4946_v63 = vmul.f32 0.0078125, %v4938_v21  ;;  %v5282_v21 = vpop.f32.mrb[44].mxu0 }
0x1155   : > { %11526 = vrsqrt.f32 %v4950_v61  ;;  %v4951_v40 = vadd.f32 1e-05, %v4946_v63  ;;  %v5283_v61 = vadd.f32 %v5282_v21, %v13064_v48  ;;  %v5284_v63 = vpop.f32.mrb[45].mxu0 }
0x1157   : > { %11528 = vrsqrt.f32 %v4951_v40  ;;  %v5285_v40 = vadd.f32 %v5284_v63, %v13067_v57 }
0x1158   : > { %v4940_v41 = vpop.xlane.xlu1 %4939 }
0x1159   : > { %v4947_v30 = vmul.f32 0.0078125, %v4940_v41  ;;  %v5286_v41 = vpop.f32.mrb[46].mxu0 }
0x115a   : > { %v4942_v22 = vpop.xlane.xlu0 %4941 }
0x115b   : > { %v4952_v26 = vadd.f32 1e-05, %v4947_v30  ;;  %v4948_v43 = vmul.f32 0.0078125, %v4942_v22  ;;  %v5299_v30 = vpack.c.bf16 %v5283_v61, %v5283_v61  ;;  %v5287_v22 = vpop.f32.mrb[47].mxu0 }
0x115d   : > { %11530 = vrsqrt.f32 %v4952_v26  ;;  %v4953_v10 = vadd.f32 1e-05, %v4948_v43  ;;  %v9296_v26 = vld [vmem:[%s12153_s29 + $0x8] ss:$0 sm:$0xff] }
0x115f   : > { %v11527_v3 = vpop.eup %11526  ;;  %11532 = vrsqrt.f32 %v4953_v10 }
0x1160   : > { %v4960_v5 = vmul.f32 %v11527_v3, %v13023_v42  ;;  %v4944_v49 = vpop.xlane.xlu1 %4943 }
0x1161   : > { %v11529_v33 = vpop.eup %11528  ;;  %v4949_v29 = vmul.f32 0.0078125, %v4944_v49 }
0x1162   : > { %v4971_v6 = vmul.f32 %v9294_v47, %v4960_v5  ;;  %v4961_v37 = vmul.f32 %v11529_v33, %v13026_v51 }
0x1163   : > { %v4954_v2 = vadd.f32 1e-05, %v4949_v29 }
0x1164   : > { %v4972_v4 = vmul.f32 %v9294_v47, %v4961_v37  ;;  %v4982_v55 = vadd.f32 %v9295_v18, %v4971_v6  ;;  %v5416_v6 = vpack.c.bf16 %v5285_v40, %v5285_v40 }
0x1165   : > { %11534 = vrsqrt.f32 %v4954_v2 }
0x1166   : > { %v4983_v14 = vadd.f32 %v9295_v18, %v4972_v4 }
0x1167   : > { %v11531_v12 = vpop.eup %11530 }
0x1168   : > { %v5003_v15 = vpack.c.bf16 %v4983_v14, %v4982_v55  ;;  %v4962_v16 = vmul.f32 %v11531_v12, %v13033_v1  ;;  %v5427_v55 = vsel %vm4708_vm4, %v5416_v6, 0 }
0x1169   : > { %v11533_v60 = vpop.eup %11532 }
0x116a   : > { %10466 = vmatmul.mubr.bf16.vlgmr.msra.gmra.mrb[24].mxu1 %v5003_v15  ;;  %v4963_v42 = vmul.f32 %v11533_v60, %v13036_v0  ;;  %v4973_v23 = vmul.f32 %v9294_v47, %v4962_v16  ;;  %v5289_v16 = vld [vmem:[#allocation9] sm:$0xff] }
0x116b   : > { %10469 = vmatprep.mubr.msk.bf16.mxu1 %vm11848_vm3, %v11846_v54  ;;  %10478 = vmatpush3.bf16.xpose.msra.mxu1 %v5297_v38  ;;  %v5279_v38 = vadd.f32 %v5278_v53, %v13067_v57 }
0x116c   : > { %v4974_v51 = vmul.f32 %v9294_v47, %v4963_v42  ;;  %10479 = vmatprep.subr.bf16.mxu1 %v11846_v54  ;;  %v4984_v45 = vadd.f32 %v9295_v18, %v4973_v23  ;;  %v5290_v42 = vld [vmem:[#allocation9 + $0x8] sm:$0xff] }
0x116d   : > { %v5415_v35 = vpack.c.bf16 %v5279_v38, %v5275_v34  ;;  %v5293_v38 = vld [vmem:[#allocation9 + $0x20] sm:$0xff] }
0x116e   : > { %v4985_v24 = vadd.f32 %v9295_v18, %v4974_v51 }
0x116f   : > { %v11535_v25 = vpop.eup %11534 }
0x1170   : > { %v5004_v20 = vpack.c.bf16 %v4985_v24, %v4984_v45  ;;  %v4964_v19 = vmul.f32 %v11535_v25, %v13043_v9  ;;  %v5277_v9 = vadd.f32 %v5276_v44, %v13064_v48 }
0x1172   : > { %10470 = vmatmul.mubr.bf16.gmra.mrb[28].mxu1 %v5004_v20  ;;  %v4975_v1 = vmul.f32 %v9294_v47, %v4964_v19  ;;  %v5298_v62 = vpack.c.bf16 %v5277_v9, %v5273_v52 }
0x1173   : > { %10473 = vmatprep.mubr.msk.bf16.mxu1 %vm11848_vm3, %v11846_v54 }
0x1174   : > { %v4986_v0 = vadd.f32 %v9295_v18, %v4975_v1  ;;  %10480 = vmatpush3.bf16.xpose.msra.mxu1 %v5298_v62  ;;  %v5291_v1 = vld [vmem:[#allocation9 + $0x10] sm:$0xff] }
0x1175   : > { %10481 = vmatprep.subr.bf16.mxu1 %v11846_v54 }
0x1176   : > { %v5005_v46 = vpack.c.bf16 %v4986_v0, %v4986_v0 }
0x117a   : > { %10474 = vmatmul.mubr.bf16.gmra.mrb[32].mxu1 %v5005_v46  ;;  %v5292_v46 = vld [vmem:[#allocation9 + $0x18] sm:$0xff] }
0x117b   : > { %10483 = vmatprep.mubr.msk.bf16.mxu1 %vm11848_vm3, %v11846_v54 }
0x117c   : > { %10482 = vmatpush3.bf16.xpose.msra.mxu1 %v5299_v30 }
0x117d   : > { %10495 = vmatprep.subr.bf16.mxu1 %v11846_v54 }
0x123d   : > { %v5095_v43 = vpop.f32.mrb[24].mxu1 }
0x123e   : > { %v10467_v10 = vpop.f32.mrb[25].mxu1  ;;  %v5096_v47 = vadd.f32 %v9296_v26, %v5095_v43 }
0x123f   : > { %v5098_v3 = vpop.f32.mrb[26].mxu1 }
0x1240   : > { %v5099_v5 = vadd.f32 %v9296_v26, %v5098_v3  ;;  %v10468_v49 = vpop.f32.mrb[27].mxu1 }
0x1242   : > { %v5294_v33 = vpack.c.bf16 %v5099_v5, %v5096_v47 }
0x1244   : > { %10484 = vmatmul.mubr.bf16.vlgmr.msra.gmra.mrb[36].mxu1 %v5294_v33 }
0x1245   : > { %10496 = vmatpush3.bf16.msra.mxu1 %v5414_v36  ;;  %v5103_v48 = vpop.f32.mrb[28].mxu1  ;;  %10487 = vmatprep.mubr.msk.bf16.mxu1 %vm11848_vm3, %v11846_v54 }
0x1246   : > { %v10471_v57 = vpop.f32.mrb[29].mxu1  ;;  %10497 = vmatprep.subr.bf16.mxu1 %v11846_v54  ;;  %v5104_v37 = vadd.f32 %v9296_v26, %v5103_v48 }
0x1247   : > { %v5106_v29 = vpop.f32.mrb[30].mxu1 }
0x1248   : > { %v5107_v2 = vadd.f32 %v9296_v26, %v5106_v29  ;;  %v10472_v18 = vpop.f32.mrb[31].mxu1 }
0x1249   : > { %10498 = vmatpush3.bf16.msra.mxu1 %v5415_v35 }
0x124a   : > { %v5295_v4 = vpack.c.bf16 %v5107_v2, %v5104_v37  ;;  %10499 = vmatprep.subr.bf16.mxu1 %v11846_v54 }
0x124c   : > { %10488 = vmatmul.mubr.bf16.gmra.mrb[40].mxu1 %v5295_v4 }
0x124d   : > { %10500 = vmatpush3.bf16.msra.mxu1 %v5427_v55  ;;  %v5111_v32 = vpop.f32.mrb[32].mxu1  ;;  %10491 = vmatprep.mubr.msk.bf16.mxu1 %vm11848_vm3, %v11846_v54 }
0x124e   : > { %v5112_v17 = vadd.f32 %v9296_v26, %v5111_v32  ;;  %v10475_v36 = vpop.f32.mrb[33].mxu1 }
0x124f   : > { %v5114_v14 = vpop.f32.mrb[34].mxu1 }
0x1250   : > { %v10476_v12 = vpop.f32.mrb[35].mxu1  ;;  %v5296_v15 = vpack.c.bf16 %v5112_v17, %v5112_v17 }
0x1254   : > { %10492 = vmatmul.mubr.bf16.gmra.mrb[44].mxu1 %v5296_v15  ;;  %v11168_v15 = vld [vmem:[%s12145_s16 + $0x1c] ss:$100 sps:$4 sm:$0xff]  }
0x1255   : > { %10501 = vmatprep.mubr.msk.bf16.mxu1 %vm11848_vm3, %v11846_v54  ;;  %10514 = vmatpush3.bf16.msra.mxu0 %v11168_v15 }
0x1256   : > { %10515 = vmatprep.subr.bf16.mxu0 %v11846_v54 }
0x1317   : > { %v5334_v60 = vpop.f32.mrb[36].mxu1 }
0x1318   : > { %v5335_v23 = vadd.f32 %v5334_v60, %v5289_v16  ;;  %v10485_v51 = vpop.f32.mrb[37].mxu1  ;;  %v11169_v16 = vld [vmem:[%s12145_s16 + $0xe4] ss:$100 sps:$4 sm:$0xff]   ;;  %v11170_v60 = vld [vmem:[%s12145_s16 + $0x1ac] ss:$100 sps:$4 sm:$0xff]  }
0x1319   : > { %v5337_v45 = vpop.f32.mrb[38].mxu1  ;;  %10516 = vmatpush3.bf16.msra.mxu0 %v11169_v16  ;;  %v11173_v51 = vld [vmem:[%s12145_s16 + $0x404] ss:$100 sps:$4 sm:$0xff]  }
0x131a   : > { %v5338_v24 = vadd.f32 %v5337_v45, %v5290_v42  ;;  %v10486_v25 = vpop.f32.mrb[39].mxu1  ;;  %v5356_v20 = vsel %vm4637_vm5, %v5335_v23, -inf  ;;  %10517 = vmatprep.subr.bf16.mxu0 %v11846_v54  ;;  %v11171_v42 = vld [vmem:[%s12145_s16 + $0x274] ss:$100 sps:$4 sm:$0xff]   ;;  %v11174_v45 = vld [vmem:[%s12145_s16 + $0x4cc] ss:$100 sps:$4 sm:$0xff]  }
0x131b   : > { %5357 = vmax.xlane.f32.xlu0 %v5356_v20 }
0x131c   : > { %v5359_v19 = vsel %vm4637_vm5, %v5338_v24, -inf }
0x131d   : > { %5360 = vmax.xlane.f32.xlu1 %v5359_v19  ;;  %10518 = vmatpush3.bf16.msra.mxu0 %v11170_v60 }
0x131e   : > { %10519 = vmatprep.subr.bf16.mxu0 %v11846_v54 }
0x131f   : > { %v5342_v0 = vpop.f32.mrb[40].mxu1 }
0x1320   : > { %v5343_v50 = vadd.f32 %v5342_v0, %v5291_v1  ;;  %v10489_v52 = vpop.f32.mrb[41].mxu1 }
0x1321   : > { %v5345_v59 = vpop.f32.mrb[42].mxu1  ;;  %10520 = vmatpush3.bf16.msra.mxu0 %v11171_v42 }
0x1322   : > { %v5346_v34 = vadd.f32 %v5345_v59, %v5292_v46  ;;  %v10490_v44 = vpop.f32.mrb[43].mxu1  ;;  %v5362_v9 = vsel %vm4637_vm5, %v5343_v50, -inf  ;;  %10521 = vmatprep.subr.bf16.mxu0 %v11846_v54 }
0x1323   : > { %5363 = vmax.xlane.f32.xlu0 %v5362_v9 }
0x1324   : > { %v5365_v53 = vsel %vm4637_vm5, %v5346_v34, -inf }
0x1325   : > { %5366 = vmax.xlane.f32.xlu1 %v5365_v53 }
0x1327   : > { %v5350_v62 = vpop.f32.mrb[44].mxu1 }
0x1328   : > { %v5351_v35 = vadd.f32 %v5350_v62, %v5293_v38  ;;  %v10493_v21 = vpop.f32.mrb[45].mxu1 }
0x1329   : > { %v5353_v61 = vpop.f32.mrb[46].mxu1 }
0x132a   : > { %v10494_v63 = vpop.f32.mrb[47].mxu1  ;;  %v5368_v40 = vsel %vm4637_vm5, %v5351_v35, -inf  ;;  %v11175_v61 = vld [vmem:[%s12145_s16 + $0x594] ss:$100 sps:$4 sm:$0xff]  }
0x132b   : > { %5369 = vmax.xlane.f32.xlu0 %v5368_v40 }
0x13a8   : > { %v5358_v41 = vpop.xlane.xlu0 %5357 }
0x13a9   : > { %v5371_v30 = vsub.f32 %v5335_v23, %v5358_v41  ;;  %v11172_v23 = vld [vmem:[%s12145_s16 + $0x33c] ss:$100 sps:$4 sm:$0xff]  }
0x13aa   : > { %v5361_v22 = vpop.xlane.xlu1 %5360  ;;  %10522 = vmatpush3.bf16.msra.mxu0 %v11172_v23 }
0x13ab   : > { %v5376_v26 = vmul.f32 1.442695, %v5371_v30  ;;  %v5372_v43 = vsub.f32 %v5338_v24, %v5361_v22  ;;  %10523 = vmatprep.subr.bf16.mxu0 %v11846_v54 }
0x13ad   : > { %11536 = vpow2.f32 %v5376_v26  ;;  %v5378_v10 = vmul.f32 1.442695, %v5372_v43 }
0x13ae   : > { %10524 = vmatpush3.bf16.msra.mxu0 %v11173_v51 }
0x13af   : > { %11538 = vpow2.f32 %v5378_v10  ;;  %10525 = vmatprep.subr.bf16.mxu0 %v11846_v54 }
0x13b0   : > { %v5364_v3 = vpop.xlane.xlu0 %5363 }
0x13b1   : > { %v5373_v47 = vsub.f32 %v5343_v50, %v5364_v3 }
0x13b2   : > { %v5367_v5 = vpop.xlane.xlu1 %5366  ;;  %10526 = vmatpush3.bf16.msra.mxu0 %v11174_v45 }
0x13b3   : > { %v5380_v49 = vmul.f32 1.442695, %v5373_v47  ;;  %v5374_v33 = vsub.f32 %v5346_v34, %v5367_v5  ;;  %10527 = vmatprep.subr.bf16.mxu0 %v11846_v54 }
0x13b5   : > { %11540 = vpow2.f32 %v5380_v49  ;;  %v5382_v48 = vmul.f32 1.442695, %v5374_v33 }
0x13b6   : > { %10528 = vmatpush3.bf16.msra.mxu0 %v11175_v61 }
0x13b7   : > { %v11537_v57 = vpop.eup %11536  ;;  %11542 = vpow2.f32 %v5382_v48 }
0x13b8   : > { %v5370_v29 = vpop.xlane.xlu0 %5369  ;;  %v5386_v6 = vsel %vm4637_vm5, %v11537_v57, 0.0 }
0x13b9   : > { %v11539_v37 = vpop.eup %11538  ;;  %v5375_v2 = vsub.f32 %v5351_v35, %v5370_v29  ;;  %5387 = vadd.xlane.f32.xlu1 %v5386_v6  ;;  %v9332_v6 = vld [vmem:[%s12153_s29 + $0xb] ss:$0 sm:$0xff] }
0x13ba   : > { %v5389_v18 = vsel %vm4637_vm5, %v11539_v37, 0.0 }
0x13bb   : > { %v5384_v4 = vmul.f32 1.442695, %v5375_v2  ;;  %5390 = vadd.xlane.f32.xlu0 %v5389_v18 }
0x13bd   : > { %11544 = vpow2.f32 %v5384_v4 }
0x13bf   : > { %v11541_v55 = vpop.eup %11540 }
0x13c0   : > { %v5392_v32 = vsel %vm4637_vm5, %v11541_v55, 0.0 }
0x13c1   : > { %v11543_v17 = vpop.eup %11542  ;;  %5393 = vadd.xlane.f32.xlu1 %v5392_v32 }
0x13c2   : > { %v5395_v36 = vsel %vm4637_vm5, %v11543_v17, 0.0 }
0x13c3   : > { %5396 = vadd.xlane.f32.xlu0 %v5395_v36 }
0x13c7   : > { %v11545_v14 = vpop.eup %11544 }
0x13c8   : > { %v5398_v12 = vsel %vm4637_vm5, %v11545_v14, 0.0 }
0x13c9   : > { %5399 = vadd.xlane.f32.xlu1 %v5398_v12 }
0x1446   : > { %v5388_v24 = vpop.xlane.xlu1 %5387 }
0x1447   : > { %11546 = vrcp.f32 %v5388_v24  ;;  %v11178_v24 = vld [vmem:[%s12145_s16 + $0x24] ss:$100 sps:$4 sm:$0xff]  }
0x1448   : > { %v5391_v25 = vpop.xlane.xlu0 %5390  ;;  %6559 = vmatprep.subr.bf16.mxu1 %v11178_v24 }
0x1449   : > { %11548 = vrcp.f32 %v5391_v25  ;;  %v11179_v25 = vld [vmem:[%s12145_s16 + $0x28] ss:$100 sps:$4 sm:$0xff]  }
0x144e   : > { %v5394_v20 = vpop.xlane.xlu1 %5393 }
0x144f   : > { %11550 = vrcp.f32 %v5394_v20  ;;  %v11181_v20 = vld [vmem:[%s12145_s16 + $0x2c] ss:$100 sps:$4 sm:$0xff]  }
0x1450   : > { %v5397_v19 = vpop.xlane.xlu0 %5396  ;;  %6620 = vmatprep.subr.bf16.mxu0 %v11181_v20 }
0x1451   : > { %v11547_v1 = vpop.eup %11546  ;;  %11552 = vrcp.f32 %v5397_v19  ;;  %v11184_v19 = vld [vmem:[%s12145_s16 + $0xec] ss:$100 sps:$4 sm:$0xff]  }
0x1452   : > { %v5406_v46 = vmul.f32 %v11547_v1, %v11537_v57  ;;  %v11187_v1 = vld [vmem:[%s12145_s16 + $0xf4] ss:$100 sps:$4 sm:$0xff]  }
0x1453   : > { %v11549_v0 = vpop.eup %11548 }
0x1454   : > { %v5407_v50 = vmul.f32 %v11549_v0, %v11539_v37  ;;  %v11182_v0 = vld [vmem:[%s12145_s16 + $0xe8] ss:$100 sps:$4 sm:$0xff]  }
0x1456   : > { %v5411_v52 = vpack.c.bf16 %v5407_v50, %v5406_v46  ;;  %v5400_v59 = vpop.xlane.xlu1 %5399 }
0x1457   : > { %11554 = vrcp.f32 %v5400_v59 }
0x1458   : > { %10502 = vmatmul.mubr.msk.bf16.vlgmr.msra.gmra.mrb[48].mxu1 %vm4637_vm5, %v5411_v52 }
0x1459   : > { %v11551_v34 = vpop.eup %11550  ;;  %10505 = vmatprep.mubr.msk.bf16.mxu1 %vm11848_vm3, %v11846_v54 }
0x145a   : > { %v5408_v9 = vmul.f32 %v11551_v34, %v11541_v55 }
0x145b   : > { %v11553_v44 = vpop.eup %11552 }
0x145c   : > { %v5409_v53 = vmul.f32 %v11553_v44, %v11543_v17 }
0x145e   : > { %v5412_v38 = vpack.c.bf16 %v5409_v53, %v5408_v9 }
0x1460   : > { %10506 = vmatmul.mubr.msk.bf16.gmra.mrb[52].mxu1 %vm4637_vm5, %v5412_v38 }
0x1461   : > { %v11555_v62 = vpop.eup %11554  ;;  %10509 = vmatprep.mubr.msk.bf16.mxu1 %vm11848_vm3, %v11846_v54 }
0x1462   : > { %v5410_v35 = vmul.f32 %v11555_v62, %v11545_v14 }
0x1464   : > { %v5413_v21 = vpack.c.bf16 %v5410_v35, %v5410_v35 }
0x1468   : > { %10510 = vmatmul.mubr.msk.bf16.gmra.mrb[56].mxu1 %vm4637_vm5, %v5413_v21 }
0x1469   : > { %6591 = vmatprep.mubr.bf16.mxu1 %v11847_v39 }
0x152b   : > { %v5463_v63 = vpop.f32.mrb[48].mxu1 }
0x152c   : > { %v10503_v40 = vpop.f32.mrb[49].mxu1 }
0x152d   : > { %v5466_v41 = vpop.f32.mrb[50].mxu1 }
0x152e   : > { %v5501_v30 = vpack.c.bf16 %v5466_v41, %v5463_v63  ;;  %v10504_v22 = vpop.f32.mrb[51].mxu1 }
0x1530   : > { %10530 = vmatmul.mubr.bf16.vlgmr.msra.gmra.mrb[48].mxu0 %v5501_v30 }
0x1531   : > { %10533 = vmatprep.mubr.msk.bf16.mxu0 %vm11848_vm3, %v11846_v54  ;;  %6621 = vmatpush1.bf16.msra.mxu0 %v11179_v25 }
0x1532   : > { %6622 = vmatprep.subr.bf16.mxu0 %v11187_v1 }
0x1533   : > { %v5471_v26 = vpop.f32.mrb[52].mxu1 }
0x1534   : > { %v10507_v43 = vpop.f32.mrb[53].mxu1 }
0x1535   : > { %v5474_v10 = vpop.f32.mrb[54].mxu1  ;;  %v11190_v43 = vld [vmem:[%s12145_s16 + $0x1b4] ss:$100 sps:$4 sm:$0xff]  }
0x1536   : > { %v5502_v3 = vpack.c.bf16 %v5474_v10, %v5471_v26  ;;  %v10508_v47 = vpop.f32.mrb[55].mxu1  ;;  %v11193_v10 = vld [vmem:[%s12145_s16 + $0x1bc] ss:$100 sps:$4 sm:$0xff]  }
0x1537   : > { %v11188_v47 = vld [vmem:[%s12145_s16 + $0x1b0] ss:$100 sps:$4 sm:$0xff]  }
0x1538   : > { %10534 = vmatmul.mubr.bf16.gmra.mrb[52].mxu0 %v5502_v3 }
0x1539   : > { %10537 = vmatprep.mubr.msk.bf16.mxu0 %vm11848_vm3, %v11846_v54 }
0x153b   : > { %v5479_v5 = vpop.f32.mrb[56].mxu1 }
0x153c   : > { %v10511_v49 = vpop.f32.mrb[57].mxu1  ;;  %v5503_v48 = vpack.c.bf16 %v5479_v5, %v5479_v5  ;;  %v11191_v5 = vld [vmem:[%s12145_s16 + $0x1b8] ss:$100 sps:$4 sm:$0xff]  }
0x153d   : > { %v5482_v33 = vpop.f32.mrb[58].mxu1  ;;  %v11196_v49 = vld [vmem:[%s12145_s16 + $0x27c] ss:$100 sps:$4 sm:$0xff]  }
0x153e   : > { %v10512_v57 = vpop.f32.mrb[59].mxu1  ;;  %v11199_v33 = vld [vmem:[%s12145_s16 + $0x284] ss:$100 sps:$4 sm:$0xff]  }
0x153f   : > { %v11197_v57 = vld [vmem:[%s12145_s16 + $0x280] ss:$100 sps:$4 sm:$0xff]  }
0x1540   : > { %10538 = vmatmul.mubr.bf16.gmra.mrb[56].mxu0 %v5503_v48  ;;  %v11194_v48 = vld [vmem:[%s12145_s16 + $0x278] ss:$100 sps:$4 sm:$0xff]  }
0x1541   : > { %6652 = vmatprep.mubr.bf16.mxu0 %v11847_v39 }
0x1603   : > { %v5586_v29 = vpop.f32.mrb[48].mxu0 }
0x1604   : > { %v5608_v37 = vadd.f32 %v5586_v29, %v12985_v7  ;;  %v10531_v2 = vpop.f32.mrb[49].mxu0  ;;  %v11202_v29 = vld [vmem:[%s12145_s16 + $0x344] ss:$100 sps:$4 sm:$0xff]  }
0x1605   : > { %v5589_v18 = vpop.f32.mrb[50].mxu0  ;;  %v11203_v2 = vld [vmem:[%s12145_s16 + $0x348] ss:$100 sps:$4 sm:$0xff]  }
0x1606   : > { %v13154_v4 = vadd.f32 %v9332_v6, %v5608_v37  ;;  %v5609_v55 = vadd.f32 %v5589_v18, %v12987_v8  ;;  %v10532_v32 = vpop.f32.mrb[51].mxu0  ;;  %v11200_v37 = vld [vmem:[%s12145_s16 + $0x340] ss:$100 sps:$4 sm:$0xff]   ;;  %v11208_v18 = vld [vmem:[%s12145_s16 + $0x40c] ss:$100 sps:$4 sm:$0xff]  }
0x1607   : > { %v11206_v32 = vld [vmem:[%s12145_s16 + $0x408] ss:$100 sps:$4 sm:$0xff]  }
0x1608   : > { %v13157_v54 = vadd.f32 %v9332_v6, %v5609_v55  ;;  %5627 = vadd.xlane.f32.xlu0 %v13154_v4  ;;  %v11211_v55 = vld [vmem:[%s12145_s16 + $0x414] ss:$100 sps:$4 sm:$0xff]  }
0x160a   : > { %5629 = vadd.xlane.f32.xlu1 %v13157_v54 }
0x160b   : > { %v5594_v17 = vpop.f32.mrb[52].mxu0 }
0x160c   : > { %v5610_v36 = vadd.f32 %v5594_v17, %v12991_v11  ;;  %v10535_v14 = vpop.f32.mrb[53].mxu0  ;;  %v11209_v17 = vld [vmem:[%s12145_s16 + $0x410] ss:$100 sps:$4 sm:$0xff]  }
0x160d   : > { %v5597_v7 = vpop.f32.mrb[54].mxu0  ;;  %v11217_v14 = vld [vmem:[%s12145_s16 + $0x4dc] ss:$100 sps:$4 sm:$0xff]  }
0x160e   : > { %v13162_v12 = vadd.f32 %v9332_v6, %v5610_v36  ;;  %v5611_v8 = vadd.f32 %v5597_v7, %v12993_v13  ;;  %v10536_v15 = vpop.f32.mrb[55].mxu0  ;;  %v11176_v13 = vld [vmem:[%s12145_s16 + $0x20] ss:$100 sps:$4 sm:$0xff]   ;;  %v11214_v36 = vld [vmem:[%s12145_s16 + $0x4d4] ss:$100 sps:$4 sm:$0xff]  }
0x160f   : > { %6560 = vmatpush1.bf16.msra.mxu1 %v11176_v13  ;;  %v11212_v7 = vld [vmem:[%s12145_s16 + $0x4d0] ss:$100 sps:$4 sm:$0xff]   ;;  %v11220_v15 = vld [vmem:[%s12145_s16 + $0x59c] ss:$100 sps:$4 sm:$0xff]  }
0x1610   : > { %v13165_v16 = vadd.f32 %v9332_v6, %v5611_v8  ;;  %5631 = vadd.xlane.f32.xlu0 %v13162_v12  ;;  %6561 = vmatprep.subr.bf16.mxu1 %v11184_v19  ;;  %v11215_v8 = vld [vmem:[%s12145_s16 + $0x4d8] ss:$100 sps:$4 sm:$0xff]  }
0x1612   : > { %5633 = vadd.xlane.f32.xlu1 %v13165_v16 }
0x1613   : > { %v5602_v11 = vpop.f32.mrb[56].mxu0  ;;  %6562 = vmatpush1.bf16.msra.mxu1 %v11182_v0 }
0x1614   : > { %v5612_v60 = vadd.f32 %v5602_v11, %v12997_v27  ;;  %v10539_v42 = vpop.f32.mrb[57].mxu0  ;;  %v11185_v27 = vld [vmem:[%s12145_s16 + $0xf0] ss:$100 sps:$4 sm:$0xff]   ;;  %6563 = vmatprep.subr.bf16.mxu1 %v11190_v43  ;;  %v11223_v11 = vld [vmem:[%s12145_s16 + $0x5a4] ss:$100 sps:$4 sm:$0xff]  }
0x1615   : > { %v5605_v23 = vpop.f32.mrb[58].mxu0  ;;  %6623 = vmatpush1.bf16.msra.mxu0 %v11185_v27  ;;  %v11221_v42 = vld [vmem:[%s12145_s16 + $0x5a0] ss:$100 sps:$4 sm:$0xff]  }
0x1616   : > { %v13170_v51 = vadd.f32 %v9332_v6, %v5612_v60  ;;  %v10540_v45 = vpop.f32.mrb[59].mxu0  ;;  %6624 = vmatprep.subr.bf16.mxu0 %v11193_v10  ;;  %v11205_v6 = vld [vmem:[%s12145_s16 + $0x34c] ss:$100 sps:$4 sm:$0xff]   ;;  %v11218_v60 = vld [vmem:[%s12145_s16 + $0x598] ss:$100 sps:$4 sm:$0xff]  }
0x1617   : > { %6564 = vmatpush1.bf16.msra.mxu1 %v11188_v47  ;;  %v11226_v23 = vld [vmem:[%s12145_s16 + $0x34] ss:$100 sps:$4 sm:$0xff]   ;;  %v11229_v45 = vld [vmem:[%s12145_s16 + $0x3c] ss:$100 sps:$4 sm:$0xff]  }
0x1618   : > { %5635 = vadd.xlane.f32.xlu0 %v13170_v51  ;;  %6565 = vmatprep.subr.bf16.mxu1 %v11196_v49  ;;  %v11227_v49 = vld [vmem:[%s12145_s16 + $0x38] ss:$100 sps:$4 sm:$0xff]  }
0x1619   : > { %6625 = vmatpush1.bf16.msra.mxu0 %v11191_v5  ;;  %v11224_v5 = vld [vmem:[%s12145_s16 + $0x30] ss:$100 sps:$4 sm:$0xff]  }
0x161a   : > { %6626 = vmatprep.subr.bf16.mxu0 %v11199_v33 }
0x161b   : > { %6566 = vmatpush1.bf16.msra.mxu1 %v11194_v48  ;;  %v11232_v48 = vld [vmem:[%s12145_s16 + $0xfc] ss:$100 sps:$4 sm:$0xff]  }
0x161c   : > { %6567 = vmatprep.subr.bf16.mxu1 %v11202_v29 }
0x161d   : > { %6627 = vmatpush1.bf16.msra.mxu0 %v11197_v57  ;;  %v11235_v57 = vld [vmem:[%s12145_s16 + $0x104] ss:$100 sps:$4 sm:$0xff]  }
0x161e   : > { %6628 = vmatprep.subr.bf16.mxu0 %v11205_v6 }
0x161f   : > { %6568 = vmatpush1.bf16.msra.mxu1 %v11200_v37  ;;  %v11230_v37 = vld [vmem:[%s12145_s16 + $0xf8] ss:$100 sps:$4 sm:$0xff]  }
0x1620   : > { %6569 = vmatprep.subr.bf16.mxu1 %v11208_v18 }
0x1621   : > { %6629 = vmatpush1.bf16.msra.mxu0 %v11203_v2  ;;  %v11233_v2 = vld [vmem:[%s12145_s16 + $0x100] ss:$100 sps:$4 sm:$0xff]  }
0x1622   : > { %6630 = vmatprep.subr.bf16.mxu0 %v11211_v55  ;;  %v11241_v55 = vld [vmem:[%s12145_s16 + $0x1cc] ss:$100 sps:$4 sm:$0xff]  }
0x1623   : > { %6570 = vmatpush1.bf16.msra.mxu1 %v11206_v32 }
0x1624   : > { %6571 = vmatprep.subr.bf16.mxu1 %v11214_v36  ;;  %v11236_v36 = vld [vmem:[%s12145_s16 + $0x1c0] ss:$100 sps:$4 sm:$0xff]  }
0x1625   : > { %6631 = vmatpush1.bf16.msra.mxu0 %v11209_v17 }
0x1626   : > { %6632 = vmatprep.subr.bf16.mxu0 %v11217_v14  ;;  %v11239_v14 = vld [vmem:[%s12145_s16 + $0x1c8] ss:$100 sps:$4 sm:$0xff]  }
0x1627   : > { %6572 = vmatpush1.bf16.msra.mxu1 %v11212_v7 }
0x1628   : > { %6573 = vmatprep.subr.bf16.mxu1 %v11220_v15  ;;  %v11244_v15 = vld [vmem:[%s12145_s16 + $0x28c] ss:$100 sps:$4 sm:$0xff]  }
0x1629   : > { %6633 = vmatpush1.bf16.msra.mxu0 %v11215_v8 }
0x162a   : > { %6634 = vmatprep.subr.bf16.mxu0 %v11223_v11  ;;  %v11247_v11 = vld [vmem:[%s12145_s16 + $0x294] ss:$100 sps:$4 sm:$0xff]  }
0x162b   : > { %6574 = vmatpush1.bf16.msra.mxu1 %v11218_v60 }
0x162c   : > { %6681 = vmatprep.subr.bf16.mxu1 %v11226_v23  ;;  %v11245_v23 = vld [vmem:[%s12145_s16 + $0x290] ss:$100 sps:$4 sm:$0xff]  }
0x162d   : > { %6635 = vmatpush1.bf16.msra.mxu0 %v11221_v42  ;;  %v11242_v42 = vld [vmem:[%s12145_s16 + $0x288] ss:$100 sps:$4 sm:$0xff]  }
0x162e   : > { %6742 = vmatprep.subr.bf16.mxu0 %v11229_v45 }
0x1695   : > { %v5628_v46 = vpop.xlane.xlu0 %5627 }
0x1696   : > { %v5637_v50 = vmul.f32 0.0078125, %v5628_v46 }
0x1697   : > { %v5630_v52 = vpop.xlane.xlu1 %5629 }
0x1698   : > { %v13182_v59 = vsub.f32 %v13154_v4, %v5637_v50  ;;  %v5638_v34 = vmul.f32 0.0078125, %v5630_v52 }
0x169a   : > { %v13185_v44 = vsub.f32 %v13157_v54, %v5638_v34  ;;  %v5647_v9 = vmul.f32 %v13182_v59, %v13182_v59 }
0x169c   : > { %5652 = vadd.xlane.f32.xlu1 %v5647_v9  ;;  %v5648_v53 = vmul.f32 %v13185_v44, %v13185_v44 }
0x169d   : > { %v5632_v38 = vpop.xlane.xlu0 %5631 }
0x169e   : > { %v5639_v62 = vmul.f32 0.0078125, %v5632_v38  ;;  %5654 = vadd.xlane.f32.xlu0 %v5648_v53  ;;  %v9333_v53 = vld [vmem:[%s12153_s29 + $0xc] ss:$0 sm:$0xff] }
0x169f   : > { %v5634_v35 = vpop.xlane.xlu1 %5633 }
0x16a0   : > { %v13192_v21 = vsub.f32 %v13162_v12, %v5639_v62  ;;  %v5640_v61 = vmul.f32 0.0078125, %v5634_v35 }
0x16a2   : > { %v13195_v63 = vsub.f32 %v13165_v16, %v5640_v61  ;;  %v5649_v40 = vmul.f32 %v13192_v21, %v13192_v21 }
0x16a4   : > { %5656 = vadd.xlane.f32.xlu1 %v5649_v40  ;;  %v5650_v41 = vmul.f32 %v13195_v63, %v13195_v63 }
0x16a5   : > { %v5636_v30 = vpop.xlane.xlu0 %5635 }
0x16a6   : > { %v5641_v22 = vmul.f32 0.0078125, %v5636_v30  ;;  %5658 = vadd.xlane.f32.xlu0 %v5650_v41  ;;  %v9334_v30 = vld [vmem:[%s12153_s29 + $0xd] ss:$0 sm:$0xff] }
0x16a8   : > { %v13202_v26 = vsub.f32 %v13170_v51, %v5641_v22 }
0x16aa   : > { %v5651_v3 = vmul.f32 %v13202_v26, %v13202_v26 }
0x16ac   : > { %5660 = vadd.xlane.f32.xlu1 %v5651_v3 }
0x1729   : > { %v5653_v13 = vpop.xlane.xlu1 %5652 }
0x172a   : > { %v5662_v24 = vmul.f32 0.0078125, %v5653_v13  ;;  %v11253_v13 = vld [vmem:[%s12145_s16 + $0x35c] ss:$100 sps:$4 sm:$0xff]  }
0x172b   : > { %v5655_v25 = vpop.xlane.xlu0 %5654 }
0x172c   : > { %v5667_v20 = vadd.f32 1e-05, %v5662_v24  ;;  %v5663_v19 = vmul.f32 0.0078125, %v5655_v25  ;;  %v11248_v24 = vld [vmem:[%s12145_s16 + $0x350] ss:$100 sps:$4 sm:$0xff]  }
0x172d   : > { %v11251_v25 = vld [vmem:[%s12145_s16 + $0x358] ss:$100 sps:$4 sm:$0xff]  }
0x172e   : > { %11556 = vrsqrt.f32 %v5667_v20  ;;  %v5668_v1 = vadd.f32 1e-05, %v5663_v19  ;;  %v11256_v19 = vld [vmem:[%s12145_s16 + $0x41c] ss:$100 sps:$4 sm:$0xff]  }
0x1730   : > { %11558 = vrsqrt.f32 %v5668_v1  ;;  %v11259_v1 = vld [vmem:[%s12145_s16 + $0x424] ss:$100 sps:$4 sm:$0xff]  }
0x1731   : > { %v5657_v0 = vpop.xlane.xlu1 %5656 }
0x1732   : > { %v5664_v27 = vmul.f32 0.0078125, %v5657_v0  ;;  %v11254_v0 = vld [vmem:[%s12145_s16 + $0x418] ss:$100 sps:$4 sm:$0xff]  }
0x1733   : > { %v5659_v46 = vpop.xlane.xlu0 %5658 }
0x1734   : > { %v5669_v50 = vadd.f32 1e-05, %v5664_v27  ;;  %v5665_v52 = vmul.f32 0.0078125, %v5659_v46  ;;  %v11257_v27 = vld [vmem:[%s12145_s16 + $0x420] ss:$100 sps:$4 sm:$0xff]  }
0x1735   : > { %v11262_v46 = vld [vmem:[%s12145_s16 + $0x4e4] ss:$100 sps:$4 sm:$0xff]  }
0x1736   : > { %11560 = vrsqrt.f32 %v5669_v50  ;;  %v5670_v34 = vadd.f32 1e-05, %v5665_v52  ;;  %v11265_v50 = vld [vmem:[%s12145_s16 + $0x4ec] ss:$100 sps:$4 sm:$0xff]   ;;  %v11260_v52 = vld [vmem:[%s12145_s16 + $0x4e0] ss:$100 sps:$4 sm:$0xff]  }
0x1738   : > { %v11557_v9 = vpop.eup %11556  ;;  %11562 = vrsqrt.f32 %v5670_v34  ;;  %v11263_v34 = vld [vmem:[%s12145_s16 + $0x4e8] ss:$100 sps:$4 sm:$0xff]  }
0x1739   : > { %v5677_v38 = vmul.f32 %v11557_v9, %v13182_v59  ;;  %v5661_v62 = vpop.xlane.xlu1 %5660  ;;  %v11268_v9 = vld [vmem:[%s12145_s16 + $0x5ac] ss:$100 sps:$4 sm:$0xff]  }
0x173a   : > { %v11559_v35 = vpop.eup %11558  ;;  %v5666_v61 = vmul.f32 0.0078125, %v5661_v62  ;;  %v11269_v62 = vld [vmem:[%s12145_s16 + $0x5b0] ss:$100 sps:$4 sm:$0xff]  }
0x173b   : > { %v5688_v40 = vmul.f32 %v9333_v53, %v5677_v38  ;;  %v5678_v41 = vmul.f32 %v11559_v35, %v13185_v44  ;;  %v11266_v38 = vld [vmem:[%s12145_s16 + $0x5a8] ss:$100 sps:$4 sm:$0xff]  }
0x173c   : > { %v5671_v22 = vadd.f32 1e-05, %v5666_v61  ;;  %v11274_v35 = vld [vmem:[%s12145_s16 + $0x44] ss:$100 sps:$4 sm:$0xff]   ;;  %v11277_v61 = vld [vmem:[%s12145_s16 + $0x4c] ss:$100 sps:$4 sm:$0xff]  }
0x173d   : > { %v5689_v43 = vmul.f32 %v9333_v53, %v5678_v41  ;;  %v5699_v10 = vadd.f32 %v9334_v30, %v5688_v40  ;;  %v11272_v40 = vld [vmem:[%s12145_s16 + $0x40] ss:$100 sps:$4 sm:$0xff]   ;;  %v11275_v41 = vld [vmem:[%s12145_s16 + $0x48] ss:$100 sps:$4 sm:$0xff]  }
0x173e   : > { %11564 = vrsqrt.f32 %v5671_v22  ;;  %v11283_v22 = vld [vmem:[%s12145_s16 + $0x114] ss:$100 sps:$4 sm:$0xff]  }
0x173f   : > { %v5700_v3 = vadd.f32 %v9334_v30, %v5689_v43  ;;  %v11278_v43 = vld [vmem:[%s12145_s16 + $0x108] ss:$100 sps:$4 sm:$0xff]  }
0x1740   : > { %v11561_v47 = vpop.eup %11560 }
0x1741   : > { %v13238_v59 = vpack.c.bf16 %v5700_v3, %v5699_v10  ;;  %v5679_v33 = vmul.f32 %v11561_v47, %v13192_v21  ;;  %v11238_v21 = vld [vmem:[%s12145_s16 + $0x1c4] ss:$100 sps:$4 sm:$0xff]   ;;  %v11281_v10 = vld [vmem:[%s12145_s16 + $0x110] ss:$100 sps:$4 sm:$0xff]   ;;  %v11289_v47 = vld [vmem:[%s12145_s16 + $0x1dc] ss:$100 sps:$4 sm:$0xff]  }
0x1742   : > { %v11563_v44 = vpop.eup %11562  ;;  %v11286_v3 = vld [vmem:[%s12145_s16 + $0x1d4] ss:$100 sps:$4 sm:$0xff]  }
0x1743   : > { %v5690_v29 = vmul.f32 %v9333_v53, %v5679_v33  ;;  %v5680_v6 = vmul.f32 %v11563_v44, %v13195_v63  ;;  %6592 = vmatmul.mubr.bf16.vlgmr.msra.gmra.mrb[60].mxu1 %v13238_v59  ;;  %6653 = vmatmul.mubr.bf16.vlgmr.msra.gmra.mrb[60].mxu0 %v13238_v59  ;;  %v11292_v33 = vld [vmem:[%s12145_s16 + $0x29c] ss:$100 sps:$4 sm:$0xff]  }
0x1744   : > { %6682 = vmatpush1.bf16.msra.mxu1 %v11224_v5  ;;  %6743 = vmatpush1.bf16.msra.mxu0 %v11227_v49  ;;  %v11284_v5 = vld [vmem:[%s12145_s16 + $0x1d0] ss:$100 sps:$4 sm:$0xff]   ;;  %v11287_v49 = vld [vmem:[%s12145_s16 + $0x1d8] ss:$100 sps:$4 sm:$0xff]   ;;  %v11293_v44 = vld [vmem:[%s12145_s16 + $0x2a0] ss:$100 sps:$4 sm:$0xff]  }
0x1745   : > { %v5691_v18 = vmul.f32 %v9333_v53, %v5680_v6  ;;  %6683 = vmatprep.subr.bf16.mxu1 %v11232_v48  ;;  %6744 = vmatprep.subr.bf16.mxu0 %v11235_v57  ;;  %v5701_v63 = vadd.f32 %v9334_v30, %v5690_v29  ;;  %v11295_v48 = vld [vmem:[%s12145_s16 + $0x2a4] ss:$100 sps:$4 sm:$0xff]   ;;  %v11290_v57 = vld [vmem:[%s12145_s16 + $0x298] ss:$100 sps:$4 sm:$0xff]   ;;  %v11301_v6 = vld [vmem:[%s12145_s16 + $0x36c] ss:$100 sps:$4 sm:$0xff]  }
0x1746   : > { %6601 = vmatprep.mubr.bf16.mxu1 %v11847_v39  ;;  %6662 = vmatprep.mubr.bf16.mxu0 %v11847_v39  ;;  %v11298_v29 = vld [vmem:[%s12145_s16 + $0x364] ss:$100 sps:$4 sm:$0xff]  }
0x1747   : > { %v5702_v32 = vadd.f32 %v9334_v30, %v5691_v18  ;;  %v11304_v18 = vld [vmem:[%s12145_s16 + $0x42c] ss:$100 sps:$4 sm:$0xff]  }
0x1748   : > { %v11565_v17 = vpop.eup %11564  ;;  %6684 = vmatpush1.bf16.msra.mxu1 %v11230_v37  ;;  %6745 = vmatpush1.bf16.msra.mxu0 %v11233_v2  ;;  %v11296_v37 = vld [vmem:[%s12145_s16 + $0x360] ss:$100 sps:$4 sm:$0xff]   ;;  %v11299_v2 = vld [vmem:[%s12145_s16 + $0x368] ss:$100 sps:$4 sm:$0xff]  }
0x1749   : > { %v13254_v7 = vpack.c.bf16 %v5702_v32, %v5701_v63  ;;  %v5681_v8 = vmul.f32 %v11565_v17, %v13202_v26  ;;  %6685 = vmatprep.subr.bf16.mxu1 %v11238_v21  ;;  %6746 = vmatprep.subr.bf16.mxu0 %v11241_v55  ;;  %v11250_v26 = vld [vmem:[%s12145_s16 + $0x354] ss:$100 sps:$4 sm:$0xff]   ;;  %v11302_v55 = vld [vmem:[%s12145_s16 + $0x428] ss:$100 sps:$4 sm:$0xff]   ;;  %v11313_v17 = vld [vmem:[%s12145_s16 + $0x4fc] ss:$100 sps:$4 sm:$0xff]  }
0x174a   : > { %v11307_v21 = vld [vmem:[%s12145_s16 + $0x434] ss:$100 sps:$4 sm:$0xff]  }
0x174b   : > { %v5692_v60 = vmul.f32 %v9333_v53, %v5681_v8  ;;  %6602 = vmatmul.mubr.bf16.gmra.mrb[64].mxu1 %v13254_v7  ;;  %6663 = vmatmul.mubr.bf16.gmra.mrb[64].mxu0 %v13254_v7  ;;  %v11271_v53 = vld [vmem:[%s12145_s16 + $0x5b4] ss:$100 sps:$4 sm:$0xff]   ;;  %v11316_v8 = vld [vmem:[%s12145_s16 + $0x5bc] ss:$100 sps:$4 sm:$0xff]  }
0x174c   : > { %6686 = vmatpush1.bf16.msra.mxu1 %v11236_v36  ;;  %6747 = vmatpush1.bf16.msra.mxu0 %v11239_v14  ;;  %v11305_v63 = vld [vmem:[%s12145_s16 + $0x430] ss:$100 sps:$4 sm:$0xff]   ;;  %v11311_v14 = vld [vmem:[%s12145_s16 + $0x4f8] ss:$100 sps:$4 sm:$0xff]  }
0x174d   : > { %v5703_v45 = vadd.f32 %v9334_v30, %v5692_v60  ;;  %6687 = vmatprep.subr.bf16.mxu1 %v11244_v15  ;;  %6748 = vmatprep.subr.bf16.mxu0 %v11247_v11  ;;  %v11280_v30 = vld [vmem:[%s12145_s16 + $0x10c] ss:$100 sps:$4 sm:$0xff]   ;;  %v11310_v32 = vld [vmem:[%s12145_s16 + $0x4f4] ss:$100 sps:$4 sm:$0xff]   ;;  %v11319_v15 = vld [vmem:[%s12145_s16 + $0x5c4] ss:$100 sps:$4 sm:$0xff]  }
0x174e   : > { %6611 = vmatprep.mubr.bf16.mxu1 %v11847_v39  ;;  %6672 = vmatprep.mubr.bf16.mxu0 %v11847_v39  ;;  %v11308_v36 = vld [vmem:[%s12145_s16 + $0x4f0] ss:$100 sps:$4 sm:$0xff]   ;;  %v11314_v11 = vld [vmem:[%s12145_s16 + $0x5b8] ss:$100 sps:$4 sm:$0xff]   ;;  %v11317_v60 = vld [vmem:[%s12145_s16 + $0x5c0] ss:$100 sps:$4 sm:$0xff]  }
0x174f   : > { %v13269_v20 = vpack.c.bf16 %v5703_v45, %v5703_v45  ;;  %v11320_v45 = vld [vmem:[%s12145_s16 + $0x50] ss:$100 sps:$4 sm:$0xff]  }
0x1750   : > { %6688 = vmatpush1.bf16.msra.mxu1 %v11242_v42  ;;  %6749 = vmatpush1.bf16.msra.mxu0 %v11245_v23  ;;  %v11322_v42 = vld [vmem:[%s12145_s16 + $0x54] ss:$100 sps:$4 sm:$0xff]   ;;  %v11325_v23 = vld [vmem:[%s12145_s16 + $0x5c] ss:$100 sps:$4 sm:$0xff]  }
0x1751   : > { %6689 = vmatprep.subr.bf16.mxu1 %v11250_v26  ;;  %6750 = vmatprep.subr.bf16.mxu0 %v11253_v13  ;;  %v11323_v26 = vld [vmem:[%s12145_s16 + $0x58] ss:$100 sps:$4 sm:$0xff]  }
0x1752   : > { %v11328_v13 = vld [vmem:[%s12145_s16 + $0x11c] ss:$100 sps:$4 sm:$0xff]  }
0x1753   : > { %6612 = vmatmul.mubr.bf16.gmra.mrb[68].mxu1 %v13269_v20  ;;  %6673 = vmatmul.mubr.bf16.gmra.mrb[68].mxu0 %v13269_v20 }
0x1754   : > { %6690 = vmatpush1.bf16.msra.mxu1 %v11248_v24  ;;  %6751 = vmatpush1.bf16.msra.mxu0 %v11251_v25  ;;  %v11331_v24 = vld [vmem:[%s12145_s16 + $0x124] ss:$100 sps:$4 sm:$0xff]   ;;  %v11326_v25 = vld [vmem:[%s12145_s16 + $0x118] ss:$100 sps:$4 sm:$0xff]  }
0x1755   : > { %6691 = vmatprep.subr.bf16.mxu1 %v11256_v19  ;;  %6752 = vmatprep.subr.bf16.mxu0 %v11259_v1  ;;  %v11329_v19 = vld [vmem:[%s12145_s16 + $0x120] ss:$100 sps:$4 sm:$0xff]  }
0x1756   : > { %6713 = vmatprep.mubr.bf16.mxu1 %v11847_v39  ;;  %6774 = vmatprep.mubr.bf16.mxu0 %v11847_v39  ;;  %v11334_v1 = vld [vmem:[%s12145_s16 + $0x1e4] ss:$100 sps:$4 sm:$0xff]  }
0x1758   : > { %6692 = vmatpush1.bf16.msra.mxu1 %v11254_v0  ;;  %6753 = vmatpush1.bf16.msra.mxu0 %v11257_v27  ;;  %v11337_v0 = vld [vmem:[%s12145_s16 + $0x1ec] ss:$100 sps:$4 sm:$0xff]   ;;  %v11332_v27 = vld [vmem:[%s12145_s16 + $0x1e0] ss:$100 sps:$4 sm:$0xff]  }
0x1759   : > { %6693 = vmatprep.subr.bf16.mxu1 %v11262_v46  ;;  %6754 = vmatprep.subr.bf16.mxu0 %v11265_v50  ;;  %v11335_v46 = vld [vmem:[%s12145_s16 + $0x1e8] ss:$100 sps:$4 sm:$0xff]  }
0x175a   : > { %v11340_v50 = vld [vmem:[%s12145_s16 + $0x2ac] ss:$100 sps:$4 sm:$0xff]  }
0x175c   : > { %6694 = vmatpush1.bf16.msra.mxu1 %v11260_v52  ;;  %6755 = vmatpush1.bf16.msra.mxu0 %v11263_v34  ;;  %v11343_v52 = vld [vmem:[%s12145_s16 + $0x2b4] ss:$100 sps:$4 sm:$0xff]   ;;  %v11338_v34 = vld [vmem:[%s12145_s16 + $0x2a8] ss:$100 sps:$4 sm:$0xff]  }
0x175d   : > { %6695 = vmatprep.subr.bf16.mxu1 %v11268_v9  ;;  %6756 = vmatprep.subr.bf16.mxu0 %v11271_v53  ;;  %v11341_v9 = vld [vmem:[%s12145_s16 + $0x2b0] ss:$100 sps:$4 sm:$0xff]  }
0x175e   : > { %v11346_v53 = vld [vmem:[%s12145_s16 + $0x374] ss:$100 sps:$4 sm:$0xff]  }
0x1760   : > { %6696 = vmatpush1.bf16.msra.mxu1 %v11266_v38  ;;  %6757 = vmatpush1.bf16.msra.mxu0 %v11269_v62  ;;  %v11349_v38 = vld [vmem:[%s12145_s16 + $0x37c] ss:$100 sps:$4 sm:$0xff]   ;;  %v11344_v62 = vld [vmem:[%s12145_s16 + $0x370] ss:$100 sps:$4 sm:$0xff]  }
0x1761   : > { %6803 = vmatprep.subr.bf16.mxu1 %v11274_v35  ;;  %6864 = vmatprep.subr.bf16.mxu0 %v11277_v61  ;;  %v11347_v35 = vld [vmem:[%s12145_s16 + $0x378] ss:$100 sps:$4 sm:$0xff]  }
0x1762   : > { %v11352_v61 = vld [vmem:[%s12145_s16 + $0x43c] ss:$100 sps:$4 sm:$0xff]  }
0x1763   : > { %6714 = vmatmul.mubr.bf16.vlgmr.msra.gmra.mrb[72].mxu1 %v13238_v59  ;;  %6775 = vmatmul.mubr.bf16.vlgmr.msra.gmra.mrb[72].mxu0 %v13238_v59 }
0x1764   : > { %6804 = vmatpush1.bf16.msra.mxu1 %v11272_v40  ;;  %6865 = vmatpush1.bf16.msra.mxu0 %v11275_v41  ;;  %v11355_v40 = vld [vmem:[%s12145_s16 + $0x444] ss:$100 sps:$4 sm:$0xff]   ;;  %v11350_v41 = vld [vmem:[%s12145_s16 + $0x438] ss:$100 sps:$4 sm:$0xff]  }
0x1765   : > { %6805 = vmatprep.subr.bf16.mxu1 %v11280_v30  ;;  %6866 = vmatprep.subr.bf16.mxu0 %v11283_v22  ;;  %v11353_v30 = vld [vmem:[%s12145_s16 + $0x440] ss:$100 sps:$4 sm:$0xff]  }
0x1766   : > { %6723 = vmatprep.mubr.bf16.mxu1 %v11847_v39  ;;  %6784 = vmatprep.mubr.bf16.mxu0 %v11847_v39  ;;  %v11358_v22 = vld [vmem:[%s12145_s16 + $0x504] ss:$100 sps:$4 sm:$0xff]  }
0x1768   : > { %6806 = vmatpush1.bf16.msra.mxu1 %v11278_v43  ;;  %6867 = vmatpush1.bf16.msra.mxu0 %v11281_v10  ;;  %v11361_v43 = vld [vmem:[%s12145_s16 + $0x50c] ss:$100 sps:$4 sm:$0xff]   ;;  %v11356_v10 = vld [vmem:[%s12145_s16 + $0x500] ss:$100 sps:$4 sm:$0xff]  }
0x1769   : > { %6807 = vmatprep.subr.bf16.mxu1 %v11286_v3  ;;  %6868 = vmatprep.subr.bf16.mxu0 %v11289_v47  ;;  %v11359_v3 = vld [vmem:[%s12145_s16 + $0x508] ss:$100 sps:$4 sm:$0xff]  }
0x176a   : > { %v11364_v47 = vld [vmem:[%s12145_s16 + $0x5cc] ss:$100 sps:$4 sm:$0xff]  }
0x176b   : > { %6724 = vmatmul.mubr.bf16.gmra.mrb[76].mxu1 %v13254_v7  ;;  %6785 = vmatmul.mubr.bf16.gmra.mrb[76].mxu0 %v13254_v7 }
0x176c   : > { %6808 = vmatpush1.bf16.msra.mxu1 %v11284_v5  ;;  %6869 = vmatpush1.bf16.msra.mxu0 %v11287_v49  ;;  %v11367_v5 = vld [vmem:[%s12145_s16 + $0x5d4] ss:$100 sps:$4 sm:$0xff]   ;;  %v11362_v49 = vld [vmem:[%s12145_s16 + $0x5c8] ss:$100 sps:$4 sm:$0xff]  }
0x176d   : > { %6809 = vmatprep.subr.bf16.mxu1 %v11292_v33  ;;  %6870 = vmatprep.subr.bf16.mxu0 %v11295_v48  ;;  %v11365_v33 = vld [vmem:[%s12145_s16 + $0x5d0] ss:$100 sps:$4 sm:$0xff]   ;;  %v11368_v48 = vld [vmem:[%s12151_s18 + $0x40] sm:$0xff]  }
0x176e   : > { %6733 = vmatprep.mubr.bf16.mxu1 %v11847_v39  ;;  %6794 = vmatprep.mubr.bf16.mxu0 %v11847_v39 }
0x1770   : > { %6810 = vmatpush1.bf16.msra.mxu1 %v11290_v57  ;;  %6871 = vmatpush1.bf16.msra.mxu0 %v11293_v44  ;;  %v11369_v57 = vld [vmem:[%s12151_s18 + $0xc0] sm:$0xff]  }
0x1771   : > { %6811 = vmatprep.subr.bf16.mxu1 %v11298_v29  ;;  %6872 = vmatprep.subr.bf16.mxu0 %v11301_v6  ;;  %v11370_v44 = vld [vmem:[%s12151_s18] sm:$0xff]   ;;  %v11372_v6 = vld [vmem:[%s12151_s18 + $0x48] sm:$0xff]  }
0x1772   : > { %v11371_v29 = vld [vmem:[%s12151_s18 + $0x80] sm:$0xff]  }
0x1773   : > { %6734 = vmatmul.mubr.bf16.gmra.mrb[80].mxu1 %v13269_v20  ;;  %6795 = vmatmul.mubr.bf16.gmra.mrb[80].mxu0 %v13269_v20 }
0x1774   : > { %6812 = vmatpush1.bf16.msra.mxu1 %v11296_v37  ;;  %6873 = vmatpush1.bf16.msra.mxu0 %v11299_v2  ;;  %v11373_v37 = vld [vmem:[%s12151_s18 + $0xc8] sm:$0xff]  }
0x1775   : > { %6813 = vmatprep.subr.bf16.mxu1 %v11304_v18  ;;  %6874 = vmatprep.subr.bf16.mxu0 %v11307_v21  ;;  %v11374_v2 = vld [vmem:[%s12151_s18 + $0x8] sm:$0xff]   ;;  %v11376_v21 = vld [vmem:[%s12151_s18 + $0x50] sm:$0xff]  }
0x1776   : > { %6835 = vmatprep.mubr.bf16.mxu1 %v11847_v39  ;;  %6896 = vmatprep.mubr.bf16.mxu0 %v11847_v39  ;;  %v11375_v18 = vld [vmem:[%s12151_s18 + $0x88] sm:$0xff]  }
0x1778   : > { %6814 = vmatpush1.bf16.msra.mxu1 %v11302_v55  ;;  %6875 = vmatpush1.bf16.msra.mxu0 %v11305_v63  ;;  %v11377_v55 = vld [vmem:[%s12151_s18 + $0xd0] sm:$0xff]  }
0x1779   : > { %6815 = vmatprep.subr.bf16.mxu1 %v11310_v32  ;;  %6876 = vmatprep.subr.bf16.mxu0 %v11313_v17  ;;  %v11378_v63 = vld [vmem:[%s12151_s18 + $0x10] sm:$0xff]   ;;  %v11380_v32 = vld [vmem:[%s12151_s18 + $0x58] sm:$0xff]  }
0x177a   : > { %v11381_v17 = vld [vmem:[%s12151_s18 + $0xd8] sm:$0xff]  }
0x177c   : > { %6816 = vmatpush1.bf16.msra.mxu1 %v11308_v36  ;;  %6877 = vmatpush1.bf16.msra.mxu0 %v11311_v14  ;;  %v11382_v36 = vld [vmem:[%s12151_s18 + $0x18] sm:$0xff]  }
0x177d   : > { %6817 = vmatprep.subr.bf16.mxu1 %v11316_v8  ;;  %6878 = vmatprep.subr.bf16.mxu0 %v11319_v15  ;;  %v11383_v14 = vld [vmem:[%s12151_s18 + $0x98] sm:$0xff]   ;;  %v11384_v8 = vld [vmem:[%s12151_s18 + $0x60] sm:$0xff]  }
0x177e   : > { %v11385_v15 = vld [vmem:[%s12151_s18 + $0xe0] sm:$0xff]  }
0x1780   : > { %6818 = vmatpush1.bf16.msra.mxu1 %v11314_v11  ;;  %6879 = vmatpush1.bf16.msra.mxu0 %v11317_v60  ;;  %v11387_v11 = vld [vmem:[%s12151_s18 + $0xa0] sm:$0xff]   ;;  %v11389_v60 = vld [vmem:[%s12151_s18 + $0xe8] sm:$0xff]  }
0x1781   : > { %6925 = vmatprep.subr.bf16.mxu1 %v11322_v42  ;;  %6986 = vmatprep.subr.bf16.mxu0 %v11325_v23  ;;  %v11390_v42 = vld [vmem:[%s12151_s18 + $0x28] sm:$0xff]  }
0x1782   : > { %v11391_v23 = vld [vmem:[%s12151_s18 + $0xa8] sm:$0xff]  }
0x1783   : > { %6836 = vmatmul.mubr.bf16.vlgmr.msra.gmra.mrb[84].mxu1 %v13238_v59  ;;  %6897 = vmatmul.mubr.bf16.vlgmr.msra.gmra.mrb[84].mxu0 %v13238_v59 }
0x1784   : > { %6926 = vmatpush1.bf16.msra.mxu1 %v11320_v45  ;;  %6987 = vmatpush1.bf16.msra.mxu0 %v11323_v26  ;;  %v11392_v45 = vld [vmem:[%s12151_s18 + $0x70] sm:$0xff]  }
0x1785   : > { %6927 = vmatprep.subr.bf16.mxu1 %v11328_v13  ;;  %6988 = vmatprep.subr.bf16.mxu0 %v11331_v24  ;;  %v11393_v26 = vld [vmem:[%s12151_s18 + $0xf0] sm:$0xff]  }
0x1786   : > { %6845 = vmatprep.mubr.bf16.mxu1 %v11847_v39  ;;  %6906 = vmatprep.mubr.bf16.mxu0 %v11847_v39  ;;  %v11394_v13 = vld [vmem:[%s12151_s18 + $0x30] sm:$0xff]  }
0x1787   : > { %v11395_v24 = vld [vmem:[%s12151_s18 + $0xb0] sm:$0xff]  }
0x1788   : > { %6928 = vmatpush1.bf16.msra.mxu1 %v11326_v25  ;;  %6989 = vmatpush1.bf16.msra.mxu0 %v11329_v19  ;;  %v11397_v25 = vld [vmem:[%s12151_s18 + $0xf8] sm:$0xff]  }
0x1789   : > { %6929 = vmatprep.subr.bf16.mxu1 %v11334_v1  ;;  %6990 = vmatprep.subr.bf16.mxu0 %v11337_v0  ;;  %v11398_v19 = vld [vmem:[%s12151_s18 + $0x38] sm:$0xff]   ;;  %v11400_v0 = vld [vmem:[%s12151_s18 + $0x140] sm:$0xff]  }
0x178a   : > { %v11399_v1 = vld [vmem:[%s12151_s18 + $0xb8] sm:$0xff]  }
0x178b   : > { %6846 = vmatmul.mubr.bf16.gmra.mrb[88].mxu1 %v13254_v7  ;;  %6907 = vmatmul.mubr.bf16.gmra.mrb[88].mxu0 %v13254_v7 }
0x178c   : > { %6930 = vmatpush1.bf16.msra.mxu1 %v11332_v27  ;;  %6991 = vmatpush1.bf16.msra.mxu0 %v11335_v46  ;;  %v11401_v27 = vld [vmem:[%s12151_s18 + $0x1c0] sm:$0xff]   ;;  %v13420_v46 = vld [vmem:[%s12153_s29 + $0xe] sm:$0xff] }
0x178d   : > { %6931 = vmatprep.subr.bf16.mxu1 %v11340_v50  ;;  %6992 = vmatprep.subr.bf16.mxu0 %v11343_v52  ;;  %v5853_v50 = vsub.s32 3, %v12910_v28  ;;  %v13425_v52 = vrot.slane %v13420_v46, %v12913_v56 }
0x178e   : > { %6855 = vmatprep.mubr.bf16.mxu1 %v11847_v39  ;;  %6916 = vmatprep.mubr.bf16.mxu0 %v11847_v39 }
0x1790   : > { %6932 = vmatpush1.bf16.msra.mxu1 %v11338_v34  ;;  %6993 = vmatpush1.bf16.msra.mxu0 %v11341_v9  ;;  %v13429_v34 = vrot.slane %v13420_v46, %v12916_v58  ;;  %v13433_v9 = vrot.slane %v13420_v46, %v12920_v31 }
0x1791   : > { %6933 = vmatprep.subr.bf16.mxu1 %v11346_v53  ;;  %6994 = vmatprep.subr.bf16.mxu0 %v11349_v38  ;;  %v13438_v53 = vrot.slane %v13420_v46, %v5853_v50 }
0x1793   : > { %6856 = vmatmul.mubr.bf16.gmra.mrb[92].mxu1 %v13269_v20  ;;  %6917 = vmatmul.mubr.bf16.gmra.mrb[92].mxu0 %v13269_v20 }
0x1794   : > { %6934 = vmatpush1.bf16.msra.mxu1 %v11344_v62  ;;  %6995 = vmatpush1.bf16.msra.mxu0 %v11347_v35 }
0x1795   : > { %6935 = vmatprep.subr.bf16.mxu1 %v11352_v61  ;;  %6996 = vmatprep.subr.bf16.mxu0 %v11355_v40 }
0x1796   : > { %6957 = vmatprep.mubr.bf16.mxu1 %v11847_v39  ;;  %7018 = vmatprep.mubr.bf16.mxu0 %v11847_v39 }
0x1798   : > { %6936 = vmatpush1.bf16.msra.mxu1 %v11350_v41  ;;  %6997 = vmatpush1.bf16.msra.mxu0 %v11353_v30 }
0x1799   : > { %6937 = vmatprep.subr.bf16.mxu1 %v11358_v22  ;;  %6998 = vmatprep.subr.bf16.mxu0 %v11361_v43 }
0x179c   : > { %6938 = vmatpush1.bf16.msra.mxu1 %v11356_v10  ;;  %6999 = vmatpush1.bf16.msra.mxu0 %v11359_v3 }
0x179d   : > { %6939 = vmatprep.subr.bf16.mxu1 %v11364_v47  ;;  %7000 = vmatprep.subr.bf16.mxu0 %v11367_v5 }
0x17a0   : > { %6940 = vmatpush1.bf16.msra.mxu1 %v11362_v49  ;;  %7001 = vmatpush1.bf16.msra.mxu0 %v11365_v33 }
0x17a1   : > { %9982 = vmatprep.subr.bf16.mxu1 %v11368_v48  ;;  %10016 = vmatprep.subr.bf16.mxu0 %v11369_v57 }
0x17a3   : > { %6958 = vmatmul.mubr.bf16.vlgmr.msra.gmra.mrb[96].mxu1 %v13238_v59  ;;  %7019 = vmatmul.mubr.bf16.vlgmr.msra.gmra.mrb[96].mxu0 %v13238_v59  ;;  %v11379_v59 = vld [vmem:[%s12151_s18 + $0x90] sm:$0xff]  }
0x17a4   : > { %6967 = vmatprep.mubr.bf16.mxu1 %v11847_v39  ;;  %7028 = vmatprep.mubr.bf16.mxu0 %v11847_v39 }
0x17a5   : > { %9983 = vmatpush3.bf16.msra.mxu1 %v11370_v44  ;;  %10017 = vmatpush3.bf16.msra.mxu0 %v11371_v29 }
0x17a6   : > { %9984 = vmatprep.subr.bf16.mxu1 %v11372_v6  ;;  %10018 = vmatprep.subr.bf16.mxu0 %v11373_v37 }
0x17a9   : > { %9985 = vmatpush3.bf16.msra.mxu1 %v11374_v2  ;;  %10019 = vmatpush3.bf16.msra.mxu0 %v11375_v18 }
0x17aa   : > { %9986 = vmatprep.subr.bf16.mxu1 %v11376_v21  ;;  %10020 = vmatprep.subr.bf16.mxu0 %v11377_v55 }
0x17ab   : > { %6968 = vmatmul.mubr.bf16.gmra.mrb[100].mxu1 %v13254_v7  ;;  %7029 = vmatmul.mubr.bf16.gmra.mrb[100].mxu0 %v13254_v7  ;;  %v11386_v7 = vld [vmem:[%s12151_s18 + $0x20] sm:$0xff]  }
0x17ac   : > { %6977 = vmatprep.mubr.bf16.mxu1 %v11847_v39  ;;  %7038 = vmatprep.mubr.bf16.mxu0 %v11847_v39  ;;  %v11388_v39 = vld [vmem:[%s12151_s18 + $0x68] sm:$0xff]  }
0x17ad   : > { %9987 = vmatpush3.bf16.msra.mxu1 %v11378_v63  ;;  %10021 = vmatpush3.bf16.msra.mxu0 %v11379_v59 }
0x17ae   : > { %9988 = vmatprep.subr.bf16.mxu1 %v11380_v32  ;;  %10022 = vmatprep.subr.bf16.mxu0 %v11381_v17 }
0x17b1   : > { %9989 = vmatpush3.bf16.msra.mxu1 %v11382_v36  ;;  %10023 = vmatpush3.bf16.msra.mxu0 %v11383_v14  ;;  %v11402_v14 = vld [vmem:[%s12151_s18 + $0x100] sm:$0xff]  }
0x17b2   : > { %9990 = vmatprep.subr.bf16.mxu1 %v11384_v8  ;;  %10024 = vmatprep.subr.bf16.mxu0 %v11385_v15  ;;  %v11403_v8 = vld [vmem:[%s12151_s18 + $0x180] sm:$0xff]  }
0x17b3   : > { %6978 = vmatmul.mubr.bf16.gmra.mrb[104].mxu1 %v13269_v20  ;;  %7039 = vmatmul.mubr.bf16.gmra.mrb[104].mxu0 %v13269_v20  ;;  %v11396_v20 = vld [vmem:[%s12151_s18 + $0x78] sm:$0xff]  }
0x17b5   : > { %9991 = vmatpush3.bf16.msra.mxu1 %v11386_v7  ;;  %10025 = vmatpush3.bf16.msra.mxu0 %v11387_v11 }
0x17b6   : > { %9992 = vmatprep.subr.bf16.mxu1 %v11388_v39  ;;  %10026 = vmatprep.subr.bf16.mxu0 %v11389_v60  ;;  %v11404_v60 = vld [vmem:[%s12151_s18 + $0x148] sm:$0xff]  }
0x17b9   : > { %9993 = vmatpush3.bf16.msra.mxu1 %v11390_v42  ;;  %10027 = vmatpush3.bf16.msra.mxu0 %v11391_v23  ;;  %v11405_v42 = vld [vmem:[%s12151_s18 + $0x1c8] sm:$0xff]  }
0x17ba   : > { %9994 = vmatprep.subr.bf16.mxu1 %v11392_v45  ;;  %10028 = vmatprep.subr.bf16.mxu0 %v11393_v26 }
0x17bd   : > { %9995 = vmatpush3.bf16.msra.mxu1 %v11394_v13  ;;  %10029 = vmatpush3.bf16.msra.mxu0 %v11395_v24 }
0x17be   : > { %9996 = vmatprep.subr.bf16.mxu1 %v11396_v20  ;;  %10030 = vmatprep.subr.bf16.mxu0 %v11397_v25 }
0x17c1   : > { %9997 = vmatpush3.bf16.msra.mxu1 %v11398_v19  ;;  %10031 = vmatpush3.bf16.msra.mxu0 %v11399_v1 }
0x17c2   : > { %10050 = vmatprep.subr.bf16.mxu1 %v11400_v0  ;;  %10084 = vmatprep.subr.bf16.mxu0 %v11401_v27  ;;  %v11406_v27 = vld [vmem:[%s12151_s18 + $0x108] sm:$0xff]  }
0x1816   : > { %v6593_v38 = vpop.f32.mrb[60].mxu1  ;;  %v6654_v62 = vpop.f32.mrb[60].mxu0 }
0x1817   : > { %v6594_v35 = vadd.f32 %v6593_v38, %v13425_v52  ;;  %v6655_v61 = vadd.f32 %v6654_v62, %v13429_v34  ;;  %v6595_v40 = vpop.f32.mrb[61].mxu1  ;;  %v6656_v41 = vpop.f32.mrb[61].mxu0  ;;  %v11407_v38 = vld [vmem:[%s12151_s18 + $0x188] sm:$0xff]  }
0x1818   : > { %v6596_v30 = vadd.f32 %v6595_v40, %v13433_v9  ;;  %v6657_v22 = vadd.f32 %v6656_v41, %v13438_v53  ;;  %v6597_v43 = vpop.f32.mrb[62].mxu1  ;;  %v6658_v10 = vpop.f32.mrb[62].mxu0  ;;  %v11408_v41 = vld [vmem:[%s12151_s18 + $0x150] sm:$0xff]  }
0x1819   : > { %v6598_v3 = vadd.f32 %v6597_v43, %v13425_v52  ;;  %v6659_v47 = vadd.f32 %v6658_v10, %v13429_v34  ;;  %v6599_v5 = vpop.f32.mrb[63].mxu1  ;;  %v6660_v49 = vpop.f32.mrb[63].mxu0  ;;  %v7047_v57 = vmax.f32 %v6594_v35, 0.0  ;;  %v7049_v44 = vmax.f32 %v6655_v61, 0.0 }
0x181a   : > { %v6600_v33 = vadd.f32 %v6599_v5, %v13433_v9  ;;  %v6661_v48 = vadd.f32 %v6660_v49, %v13438_v53  ;;  %v7048_v37 = vmax.f32 %v6596_v30, 0.0  ;;  %v7050_v2 = vmax.f32 %v6657_v22, 0.0  ;;  %v11409_v30 = vld [vmem:[%s12151_s18 + $0x1d0] sm:$0xff]  }
0x181b   : > { %v7063_v29 = vmax.f32 %v6598_v3, 0.0  ;;  %v7065_v6 = vmax.f32 %v6659_v47, 0.0 }
0x181c   : > { %v7064_v18 = vmax.f32 %v6600_v33, 0.0  ;;  %v7066_v21 = vmax.f32 %v6661_v48, 0.0 }
0x181d   : > { %v7127_v55 = vpack.c.bf16 %v7063_v29, %v7047_v57  ;;  %v7129_v63 = vpack.c.bf16 %v7065_v6, %v7049_v44  ;;  %v11410_v44 = vld [vmem:[%s12151_s18 + $0x110] sm:$0xff]  }
0x181e   : > { %v7128_v59 = vpack.c.bf16 %v7064_v18, %v7048_v37  ;;  %v7130_v32 = vpack.c.bf16 %v7066_v21, %v7050_v2  ;;  %v6603_v17 = vpop.f32.mrb[64].mxu1  ;;  %v6664_v36 = vpop.f32.mrb[64].mxu0  ;;  %v11411_v29 = vld [vmem:[%s12151_s18 + $0x190] sm:$0xff]   ;;  %v11412_v21 = vld [vmem:[%s12151_s18 + $0x158] sm:$0xff]  }
0x181f   : > { %v6604_v15 = vadd.f32 %v6603_v17, %v13425_v52  ;;  %v6665_v7 = vadd.f32 %v6664_v36, %v13429_v34  ;;  %v6605_v11 = vpop.f32.mrb[65].mxu1  ;;  %v6666_v39 = vpop.f32.mrb[65].mxu0 }
0x1820   : > { %v6606_v23 = vadd.f32 %v6605_v11, %v13433_v9  ;;  %v6667_v45 = vadd.f32 %v6666_v39, %v13438_v53  ;;  %v6607_v26 = vpop.f32.mrb[66].mxu1  ;;  %v6668_v13 = vpop.f32.mrb[66].mxu0  ;;  %8238 = vmatprep.mubr.bf16.mxu1 %v7128_v59  ;;  %8294 = vmatprep.mubr.bf16.mxu0 %v7130_v32  ;;  %v11416_v39 = vld [vmem:[%s12151_s18 + $0x160] sm:$0xff]  }
0x1821   : > { %v6608_v24 = vadd.f32 %v6607_v26, %v13425_v52  ;;  %v6669_v20 = vadd.f32 %v6668_v13, %v13429_v34  ;;  %v6609_v25 = vpop.f32.mrb[67].mxu1  ;;  %v6670_v19 = vpop.f32.mrb[67].mxu0  ;;  %8239 = vmatmul.mubr.bf16.vlgmr.msra.gmra.mrb[108].mxu1 %v7127_v55  ;;  %8295 = vmatmul.mubr.bf16.vlgmr.msra.gmra.mrb[108].mxu0 %v7129_v63  ;;  %v7079_v62 = vmax.f32 %v6604_v15, 0.0  ;;  %v7081_v35 = vmax.f32 %v6665_v7, 0.0  ;;  %v11413_v55 = vld [vmem:[%s12151_s18 + $0x1d8] sm:$0xff]   ;;  %v11420_v13 = vld [vmem:[%s12151_s18 + $0x168] sm:$0xff]  }
0x1822   : > { %v6610_v1 = vadd.f32 %v6609_v25, %v13433_v9  ;;  %v6671_v0 = vadd.f32 %v6670_v19, %v13438_v53  ;;  %10051 = vmatpush3.bf16.msra.mxu1 %v11402_v14  ;;  %10085 = vmatpush3.bf16.msra.mxu0 %v11403_v8  ;;  %v7080_v22 = vmax.f32 %v6606_v23, 0.0  ;;  %v7082_v43 = vmax.f32 %v6667_v45, 0.0  ;;  %v11414_v8 = vld [vmem:[%s12151_s18 + $0x118] sm:$0xff]   ;;  %v11419_v23 = vld [vmem:[%s12151_s18 + $0x1a0] sm:$0xff]  }
0x1823   : > { %v7095_v61 = vmax.f32 %v6608_v24, 0.0  ;;  %v7097_v40 = vmax.f32 %v6669_v20, 0.0  ;;  %10052 = vmatprep.subr.bf16.mxu1 %v11404_v60  ;;  %10086 = vmatprep.subr.bf16.mxu0 %v11405_v42  ;;  %v11417_v60 = vld [vmem:[%s12151_s18 + $0x1e0] sm:$0xff]   ;;  %v11421_v24 = vld [vmem:[%s12151_s18 + $0x1e8] sm:$0xff]   ;;  %v5857_v20 = vsub.s32 4, %v12910_v28  ;;  %v5865_v25 = vsub.s32 6, %v12910_v28 }
0x1824   : > { %v7096_v10 = vmax.f32 %v6610_v1, 0.0  ;;  %v7098_v3 = vmax.f32 %v6671_v0, 0.0  ;;  %v11418_v42 = vld [vmem:[%s12151_s18 + $0x120] sm:$0xff]   ;;  %v5861_v19 = vsub.s32 5, %v12910_v28  ;;  %v5869_v1 = vsub.s32 7, %v12910_v28  ;;  %v11422_v0 = vld [vmem:[%s12151_s18 + $0x128] sm:$0xff]  }
0x1825   : > { %v7143_v47 = vpack.c.bf16 %v7095_v61, %v7079_v62  ;;  %v7145_v5 = vpack.c.bf16 %v7097_v40, %v7081_v35  ;;  %v13494_v62 = vrot.slane %v13420_v46, %v5865_v25  ;;  %v11424_v35 = vld [vmem:[%s12151_s18 + $0x170] sm:$0xff]  }
0x1826   : > { %v7144_v49 = vpack.c.bf16 %v7096_v10, %v7080_v22  ;;  %v7146_v33 = vpack.c.bf16 %v7098_v3, %v7082_v43  ;;  %10053 = vmatpush3.bf16.msra.mxu1 %v11406_v27  ;;  %10087 = vmatpush3.bf16.msra.mxu0 %v11407_v38  ;;  %v6613_v48 = vpop.f32.mrb[68].mxu1  ;;  %v6674_v57 = vpop.f32.mrb[68].mxu0  ;;  %v11423_v27 = vld [vmem:[%s12151_s18 + $0x1a8] sm:$0xff]   ;;  %v13489_v38 = vrot.slane %v13420_v46, %v5857_v20  ;;  %v11425_v61 = vld [vmem:[%s12151_s18 + $0x1f0] sm:$0xff]  }
0x1827   : > { %v6614_v6 = vadd.f32 %v6613_v48, %v13425_v52  ;;  %v6675_v37 = vadd.f32 %v6674_v57, %v13429_v34  ;;  %v6615_v2 = vpop.f32.mrb[69].mxu1  ;;  %v6676_v18 = vpop.f32.mrb[69].mxu0  ;;  %10054 = vmatprep.subr.bf16.mxu1 %v11408_v41  ;;  %10088 = vmatprep.subr.bf16.mxu0 %v11409_v30  ;;  %v13501_v40 = vrot.slane %v13420_v46, %v5861_v19  ;;  %v11426_v43 = vld [vmem:[%s12151_s18 + $0x130] sm:$0xff]   ;;  %v11429_v48 = vld [vmem:[%s12151_s18 + $0x1f8] sm:$0xff]  }
0x1828   : > { %v6616_v63 = vadd.f32 %v6615_v2, %v13433_v9  ;;  %v6677_v59 = vadd.f32 %v6676_v18, %v13438_v53  ;;  %v6617_v32 = vpop.f32.mrb[70].mxu1  ;;  %v6678_v17 = vpop.f32.mrb[70].mxu0  ;;  %8246 = vmatprep.mubr.bf16.mxu1 %v7144_v49  ;;  %8302 = vmatprep.mubr.bf16.mxu0 %v7146_v33  ;;  %v11415_v9 = vld [vmem:[%s12151_s18 + $0x198] sm:$0xff]   ;;  %v13506_v41 = vrot.slane %v13420_v46, %v5869_v1  ;;  %v11427_v10 = vld [vmem:[%s12151_s18 + $0x1b0] sm:$0xff]  }
0x1829   : > { %v6618_v36 = vpop.f32.mrb[71].mxu1  ;;  %v6679_v52 = vpop.f32.mrb[71].mxu0  ;;  %8247 = vmatmul.mubr.bf16.gmra.mrb[112].mxu1 %v7143_v47  ;;  %8303 = vmatmul.mubr.bf16.gmra.mrb[112].mxu0 %v7145_v5  ;;  %v7111_v15 = vmax.f32 %v6614_v6, 0.0  ;;  %v7113_v53 = vmax.f32 %v6675_v37, 0.0  ;;  %v11428_v33 = vld [vmem:[%s12151_s18 + $0x178] sm:$0xff]  }
0x182a   : > { %v7112_v34 = vmax.f32 %v6616_v63, 0.0  ;;  %v7114_v14 = vmax.f32 %v6677_v59, 0.0  ;;  %10055 = vmatpush3.bf16.msra.mxu1 %v11410_v44  ;;  %10089 = vmatpush3.bf16.msra.mxu0 %v11411_v29  ;;  %v11430_v63 = vld [vmem:[%s12151_s18 + $0x138] sm:$0xff]  }
0x182b   : > { %10056 = vmatprep.subr.bf16.mxu1 %v11412_v21  ;;  %10090 = vmatprep.subr.bf16.mxu0 %v11413_v55  ;;  %v7159_v45 = vpack.c.bf16 %v7111_v15, %v7111_v15  ;;  %v7161_v26 = vpack.c.bf16 %v7113_v53, %v7113_v53  ;;  %v11431_v59 = vld [vmem:[%s12151_s18 + $0x1b8] sm:$0xff]  }
0x182c   : > { %v7160_v7 = vpack.c.bf16 %v7112_v34, %v7112_v34  ;;  %v7162_v11 = vpack.c.bf16 %v7114_v14, %v7114_v14  ;;  %v11432_v34 = vld [vmem:[%s12151_s18 + $0x240] sm:$0xff]  }
0x182d   : > { %v11433_v14 = vld [vmem:[%s12151_s18 + $0x2c0] sm:$0xff]  }
0x182e   : > { %10057 = vmatpush3.bf16.msra.mxu1 %v11414_v8  ;;  %10091 = vmatpush3.bf16.msra.mxu0 %v11415_v9 }
0x182f   : > { %8254 = vmatprep.mubr.bf16.mxu1 %v7160_v7  ;;  %8310 = vmatprep.mubr.bf16.mxu0 %v7162_v11 }
0x1830   : > { %10058 = vmatprep.subr.bf16.mxu1 %v11416_v39  ;;  %10092 = vmatprep.subr.bf16.mxu0 %v11417_v60 }
0x1831   : > { %8255 = vmatmul.mubr.bf16.gmra.mrb[116].mxu1 %v7159_v45  ;;  %8311 = vmatmul.mubr.bf16.gmra.mrb[116].mxu0 %v7161_v26  ;;  %v11434_v45 = vld [vmem:[%s12151_s18 + $0x200] sm:$0xff]  }
0x1832   : > { %10059 = vmatpush3.bf16.msra.mxu1 %v11418_v42  ;;  %10093 = vmatpush3.bf16.msra.mxu0 %v11419_v23  ;;  %v11435_v26 = vld [vmem:[%s12151_s18 + $0x280] sm:$0xff]  }
0x1833   : > { %10060 = vmatprep.subr.bf16.mxu1 %v11420_v13  ;;  %10094 = vmatprep.subr.bf16.mxu0 %v11421_v24 }
0x1836   : > { %v6715_v30 = vpop.f32.mrb[72].mxu1  ;;  %v6776_v22 = vpop.f32.mrb[72].mxu0  ;;  %10061 = vmatpush3.bf16.msra.mxu1 %v11422_v0  ;;  %10095 = vmatpush3.bf16.msra.mxu0 %v11423_v27 }
0x1837   : > { %v6716_v3 = vadd.f32 %v6715_v30, %v13489_v38  ;;  %v6777_v47 = vadd.f32 %v6776_v22, %v13494_v62  ;;  %v6717_v5 = vpop.f32.mrb[73].mxu1  ;;  %v6778_v49 = vpop.f32.mrb[73].mxu0  ;;  %10062 = vmatprep.subr.bf16.mxu1 %v11424_v35  ;;  %10096 = vmatprep.subr.bf16.mxu0 %v11425_v61  ;;  %v11436_v35 = vld [vmem:[%s12151_s18 + $0x248] sm:$0xff]  }
0x1838   : > { %v6718_v46 = vadd.f32 %v6717_v5, %v13501_v40  ;;  %v6779_v57 = vadd.f32 %v6778_v49, %v13506_v41  ;;  %v6719_v44 = vpop.f32.mrb[74].mxu1  ;;  %v6780_v29 = vpop.f32.mrb[74].mxu0  ;;  %v11437_v61 = vld [vmem:[%s12151_s18 + $0x2c8] sm:$0xff]  }
0x1839   : > { %v6720_v6 = vadd.f32 %v6719_v44, %v13489_v38  ;;  %v6781_v37 = vadd.f32 %v6780_v29, %v13494_v62  ;;  %v6721_v2 = vpop.f32.mrb[75].mxu1  ;;  %v6782_v18 = vpop.f32.mrb[75].mxu0  ;;  %v7051_v32 = vmax.f32 %v6716_v3, 0.0  ;;  %v7053_v17 = vmax.f32 %v6777_v47, 0.0 }
0x183a   : > { %v6722_v21 = vadd.f32 %v6721_v2, %v13501_v40  ;;  %v6783_v55 = vadd.f32 %v6782_v18, %v13506_v41  ;;  %10063 = vmatpush3.bf16.msra.mxu1 %v11426_v43  ;;  %10097 = vmatpush3.bf16.msra.mxu0 %v11427_v10  ;;  %v7052_v8 = vmax.f32 %v6718_v46, 0.0  ;;  %v7054_v9 = vmax.f32 %v6779_v57, 0.0  ;;  %v11438_v46 = vld [vmem:[%s12151_s18 + $0x208] sm:$0xff]   ;;  %v11440_v2 = vld [vmem:[%s12151_s18 + $0x250] sm:$0xff]  }
0x183b   : > { %v7067_v36 = vmax.f32 %v6720_v6, 0.0  ;;  %v7069_v52 = vmax.f32 %v6781_v37, 0.0  ;;  %10064 = vmatprep.subr.bf16.mxu1 %v11428_v33  ;;  %10098 = vmatprep.subr.bf16.mxu0 %v11429_v48  ;;  %v11439_v57 = vld [vmem:[%s12151_s18 + $0x288] sm:$0xff]   ;;  %v11441_v18 = vld [vmem:[%s12151_s18 + $0x2d0] sm:$0xff]  }
0x183c   : > { %v7068_v15 = vmax.f32 %v6722_v21, 0.0  ;;  %v7070_v53 = vmax.f32 %v6783_v55, 0.0 }
0x183d   : > { %v7131_v7 = vpack.c.bf16 %v7067_v36, %v7051_v32  ;;  %v7133_v11 = vpack.c.bf16 %v7069_v52, %v7053_v17 }
0x183e   : > { %v7132_v39 = vpack.c.bf16 %v7068_v15, %v7052_v8  ;;  %v7134_v60 = vpack.c.bf16 %v7070_v53, %v7054_v9  ;;  %v6725_v42 = vpop.f32.mrb[76].mxu1  ;;  %v6786_v23 = vpop.f32.mrb[76].mxu0  ;;  %10065 = vmatpush3.bf16.msra.mxu1 %v11430_v63  ;;  %10099 = vmatpush3.bf16.msra.mxu0 %v11431_v59  ;;  %v11442_v8 = vld [vmem:[%s12151_s18 + $0x210] sm:$0xff]  }
0x183f   : > { %v6726_v13 = vadd.f32 %v6725_v42, %v13489_v38  ;;  %v6787_v24 = vadd.f32 %v6786_v23, %v13494_v62  ;;  %v6727_v0 = vpop.f32.mrb[77].mxu1  ;;  %v6788_v27 = vpop.f32.mrb[77].mxu0  ;;  %10118 = vmatprep.subr.bf16.mxu1 %v11432_v34  ;;  %10152 = vmatprep.subr.bf16.mxu0 %v11433_v14  ;;  %v11443_v9 = vld [vmem:[%s12151_s18 + $0x290] sm:$0xff]  }
0x1840   : > { %v6728_v30 = vadd.f32 %v6727_v0, %v13501_v40  ;;  %v6789_v22 = vadd.f32 %v6788_v27, %v13506_v41  ;;  %v6729_v43 = vpop.f32.mrb[78].mxu1  ;;  %v6790_v10 = vpop.f32.mrb[78].mxu0  ;;  %8350 = vmatprep.mubr.bf16.mxu1 %v7132_v39  ;;  %8406 = vmatprep.mubr.bf16.mxu0 %v7134_v60  ;;  %v11444_v39 = vld [vmem:[%s12151_s18 + $0x258] sm:$0xff]  }
0x1841   : > { %v6730_v3 = vadd.f32 %v6729_v43, %v13489_v38  ;;  %v6791_v47 = vadd.f32 %v6790_v10, %v13494_v62  ;;  %v6731_v5 = vpop.f32.mrb[79].mxu1  ;;  %v6792_v49 = vpop.f32.mrb[79].mxu0  ;;  %8351 = vmatmul.mubr.bf16.vlgmr.msra.gmra.mrb[120].mxu1 %v7131_v7  ;;  %8407 = vmatmul.mubr.bf16.vlgmr.msra.gmra.mrb[120].mxu0 %v7133_v11  ;;  %v7083_v44 = vmax.f32 %v6726_v13, 0.0  ;;  %v7085_v29 = vmax.f32 %v6787_v24, 0.0  ;;  %v11445_v60 = vld [vmem:[%s12151_s18 + $0x2d8] sm:$0xff]  }
0x1842   : > { %v6732_v33 = vadd.f32 %v6731_v5, %v13501_v40  ;;  %v6793_v48 = vadd.f32 %v6792_v49, %v13506_v41  ;;  %10119 = vmatpush3.bf16.msra.mxu1 %v11434_v45  ;;  %10153 = vmatpush3.bf16.msra.mxu0 %v11435_v26  ;;  %v7084_v21 = vmax.f32 %v6728_v30, 0.0  ;;  %v7086_v55 = vmax.f32 %v6789_v22, 0.0  ;;  %v11447_v27 = vld [vmem:[%s12151_s18 + $0x298] sm:$0xff]   ;;  %v11448_v30 = vld [vmem:[%s12151_s18 + $0x260] sm:$0xff]   ;;  %v11452_v5 = vld [vmem:[%s12151_s18 + $0x268] sm:$0xff]  }
0x1843   : > { %v7099_v6 = vmax.f32 %v6730_v3, 0.0  ;;  %v7101_v37 = vmax.f32 %v6791_v47, 0.0  ;;  %10120 = vmatprep.subr.bf16.mxu1 %v11436_v35  ;;  %10154 = vmatprep.subr.bf16.mxu0 %v11437_v61  ;;  %v11449_v22 = vld [vmem:[%s12151_s18 + $0x2e0] sm:$0xff]   ;;  %v11453_v49 = vld [vmem:[%s12151_s18 + $0x2e8] sm:$0xff]  }
0x1844   : > { %v7100_v63 = vmax.f32 %v6732_v33, 0.0  ;;  %v7102_v59 = vmax.f32 %v6793_v48, 0.0  ;;  %v11450_v3 = vld [vmem:[%s12151_s18 + $0x220] sm:$0xff]   ;;  %v13557_v33 = vld [vmem:[%s12153_s29 + $0x16] sm:$0xff] }
0x1845   : > { %v7147_v32 = vpack.c.bf16 %v7099_v6, %v7083_v44  ;;  %v7149_v17 = vpack.c.bf16 %v7101_v37, %v7085_v29  ;;  %v11451_v47 = vld [vmem:[%s12151_s18 + $0x2a0] sm:$0xff]   ;;  %v13561_v48 = vrot.slane %v13557_v33, %v12913_v56  ;;  %v11455_v44 = vld [vmem:[%s12151_s18 + $0x2a8] sm:$0xff]   ;;  %v13571_v29 = vrot.slane %v13557_v33, %v12920_v31  ;;  %v11456_v56 = vld [vmem:[%s12151_s18 + $0x270] sm:$0xff]  }
0x1846   : > { %v7148_v36 = vpack.c.bf16 %v7100_v63, %v7084_v21  ;;  %v7150_v52 = vpack.c.bf16 %v7102_v59, %v7086_v55  ;;  %v6735_v34 = vpop.f32.mrb[80].mxu1  ;;  %v6796_v14 = vpop.f32.mrb[80].mxu0  ;;  %10121 = vmatpush3.bf16.msra.mxu1 %v11438_v46  ;;  %10155 = vmatpush3.bf16.msra.mxu0 %v11439_v57  ;;  %v13565_v46 = vrot.slane %v13557_v33, %v12916_v58  ;;  %v11454_v57 = vld [vmem:[%s12151_s18 + $0x228] sm:$0xff]   ;;  %v11457_v37 = vld [vmem:[%s12151_s18 + $0x2f0] sm:$0xff]  }
0x1847   : > { %v6736_v15 = vadd.f32 %v6735_v34, %v13489_v38  ;;  %v6797_v53 = vadd.f32 %v6796_v14, %v13494_v62  ;;  %v6737_v7 = vpop.f32.mrb[81].mxu1  ;;  %v6798_v11 = vpop.f32.mrb[81].mxu0  ;;  %10122 = vmatprep.subr.bf16.mxu1 %v11440_v2  ;;  %10156 = vmatprep.subr.bf16.mxu0 %v11441_v18  ;;  %v13576_v6 = vrot.slane %v13557_v33, %v5853_v50  ;;  %v11458_v63 = vld [vmem:[%s12151_s18 + $0x230] sm:$0xff]   ;;  %v11461_v34 = vld [vmem:[%s12151_s18 + $0x2f8] sm:$0xff]  }
0x1848   : > { %v6738_v42 = vadd.f32 %v6737_v7, %v13501_v40  ;;  %v6799_v23 = vadd.f32 %v6798_v11, %v13506_v41  ;;  %v6739_v45 = vpop.f32.mrb[82].mxu1  ;;  %v6800_v26 = vpop.f32.mrb[82].mxu0  ;;  %8358 = vmatprep.mubr.bf16.mxu1 %v7148_v36  ;;  %8414 = vmatprep.mubr.bf16.mxu0 %v7150_v52  ;;  %v11446_v41 = vld [vmem:[%s12151_s18 + $0x218] sm:$0xff]   ;;  %v11459_v59 = vld [vmem:[%s12151_s18 + $0x2b0] sm:$0xff]  }
0x1849   : > { %v6740_v13 = vpop.f32.mrb[83].mxu1  ;;  %v6801_v38 = vpop.f32.mrb[83].mxu0  ;;  %8359 = vmatmul.mubr.bf16.gmra.mrb[124].mxu1 %v7147_v32  ;;  %8415 = vmatmul.mubr.bf16.gmra.mrb[124].mxu0 %v7149_v17  ;;  %v7115_v0 = vmax.f32 %v6736_v15, 0.0  ;;  %v7117_v40 = vmax.f32 %v6797_v53, 0.0  ;;  %v11460_v52 = vld [vmem:[%s12151_s18 + $0x278] sm:$0xff]  }
0x184a   : > { %v7116_v62 = vmax.f32 %v6738_v42, 0.0  ;;  %v7118_v24 = vmax.f32 %v6799_v23, 0.0  ;;  %10123 = vmatpush3.bf16.msra.mxu1 %v11442_v8  ;;  %10157 = vmatpush3.bf16.msra.mxu0 %v11443_v9  ;;  %v11462_v23 = vld [vmem:[%s12151_s18 + $0x238] sm:$0xff]  }
0x184b   : > { %10124 = vmatprep.subr.bf16.mxu1 %v11444_v39  ;;  %10158 = vmatprep.subr.bf16.mxu0 %v11445_v60  ;;  %v7163_v43 = vpack.c.bf16 %v7115_v0, %v7115_v0  ;;  %v7165_v10 = vpack.c.bf16 %v7117_v40, %v7117_v40  ;;  %v11463_v45 = vld [vmem:[%s12151_s18 + $0x2b8] sm:$0xff]   ;;  %v11464_v40 = vld [vmem:[%s12151_s18 + $0x340] sm:$0xff]  }
0x184c   : > { %v7164_v35 = vpack.c.bf16 %v7116_v62, %v7116_v62  ;;  %v7166_v61 = vpack.c.bf16 %v7118_v24, %v7118_v24 }
0x184e   : > { %8366 = vmatprep.mubr.bf16.mxu1 %v7164_v35  ;;  %8422 = vmatprep.mubr.bf16.mxu0 %v7166_v61 }
0x184f   : > { %10125 = vmatpush3.bf16.msra.mxu1 %v11446_v41  ;;  %10159 = vmatpush3.bf16.msra.mxu0 %v11447_v27  ;;  %v11465_v41 = vld [vmem:[%s12151_s18 + $0x3c0] sm:$0xff]  }
0x1850   : > { %10126 = vmatprep.subr.bf16.mxu1 %v11448_v30  ;;  %10160 = vmatprep.subr.bf16.mxu0 %v11449_v22 }
0x1851   : > { %8367 = vmatmul.mubr.bf16.gmra.mrb[128].mxu1 %v7163_v43  ;;  %8423 = vmatmul.mubr.bf16.gmra.mrb[128].mxu0 %v7165_v10 }
0x1853   : > { %10127 = vmatpush3.bf16.msra.mxu1 %v11450_v3  ;;  %10161 = vmatpush3.bf16.msra.mxu0 %v11451_v47  ;;  %v11466_v47 = vld [vmem:[%s12151_s18 + $0x300] sm:$0xff]  }
0x1854   : > { %10128 = vmatprep.subr.bf16.mxu1 %v11452_v5  ;;  %10162 = vmatprep.subr.bf16.mxu0 %v11453_v49  ;;  %v11467_v5 = vld [vmem:[%s12151_s18 + $0x380] sm:$0xff]  }
0x1856   : > { %v6837_v2 = vpop.f32.mrb[84].mxu1  ;;  %v6898_v58 = vpop.f32.mrb[84].mxu0 }
0x1857   : > { %v6838_v18 = vadd.f32 %v6837_v2, %v13561_v48  ;;  %v6899_v21 = vadd.f32 %v6898_v58, %v13565_v46  ;;  %10129 = vmatpush3.bf16.msra.mxu1 %v11454_v57  ;;  %10163 = vmatpush3.bf16.msra.mxu0 %v11455_v44  ;;  %v6839_v55 = vpop.f32.mrb[85].mxu1  ;;  %v6900_v31 = vpop.f32.mrb[85].mxu0  ;;  %v11469_v2 = vld [vmem:[%s12151_s18 + $0x3c8] sm:$0xff]  }
0x1858   : > { %v6840_v32 = vadd.f32 %v6839_v55, %v13571_v29  ;;  %v6901_v50 = vadd.f32 %v6900_v31, %v13576_v6  ;;  %v6841_v17 = vpop.f32.mrb[86].mxu1  ;;  %v6902_v36 = vpop.f32.mrb[86].mxu0  ;;  %10130 = vmatprep.subr.bf16.mxu1 %v11456_v56  ;;  %10164 = vmatprep.subr.bf16.mxu0 %v11457_v37  ;;  %v11468_v37 = vld [vmem:[%s12151_s18 + $0x348] sm:$0xff]  }
0x1859   : > { %v6842_v14 = vadd.f32 %v6841_v17, %v13561_v48  ;;  %v6903_v8 = vadd.f32 %v6902_v36, %v13565_v46  ;;  %v6843_v9 = vpop.f32.mrb[87].mxu1  ;;  %v6904_v15 = vpop.f32.mrb[87].mxu0  ;;  %v7055_v11 = vmax.f32 %v6838_v18, 0.0  ;;  %v7057_v39 = vmax.f32 %v6899_v21, 0.0  ;;  %v11470_v36 = vld [vmem:[%s12151_s18 + $0x308] sm:$0xff]  }
0x185a   : > { %v6844_v53 = vadd.f32 %v6843_v9, %v13571_v29  ;;  %v6905_v7 = vadd.f32 %v6904_v15, %v13576_v6  ;;  %v7056_v26 = vmax.f32 %v6840_v32, 0.0  ;;  %v7058_v13 = vmax.f32 %v6901_v50, 0.0 }
0x185b   : > { %v7071_v60 = vmax.f32 %v6842_v14, 0.0  ;;  %v7073_v42 = vmax.f32 %v6903_v8, 0.0  ;;  %10131 = vmatpush3.bf16.msra.mxu1 %v11458_v63  ;;  %10165 = vmatpush3.bf16.msra.mxu0 %v11459_v59 }
0x185c   : > { %v7072_v38 = vmax.f32 %v6844_v53, 0.0  ;;  %v7074_v62 = vmax.f32 %v6905_v7, 0.0  ;;  %10132 = vmatprep.subr.bf16.mxu1 %v11460_v52  ;;  %10166 = vmatprep.subr.bf16.mxu0 %v11461_v34  ;;  %v11471_v52 = vld [vmem:[%s12151_s18 + $0x388] sm:$0xff]   ;;  %v11472_v7 = vld [vmem:[%s12151_s18 + $0x350] sm:$0xff]  }
0x185d   : > { %v7135_v24 = vpack.c.bf16 %v7071_v60, %v7055_v11  ;;  %v7137_v0 = vpack.c.bf16 %v7073_v42, %v7057_v39  ;;  %v11473_v11 = vld [vmem:[%s12151_s18 + $0x3d0] sm:$0xff]  }
0x185e   : > { %v7136_v27 = vpack.c.bf16 %v7072_v38, %v7056_v26  ;;  %v7138_v35 = vpack.c.bf16 %v7074_v62, %v7058_v13  ;;  %v6847_v61 = vpop.f32.mrb[88].mxu1  ;;  %v6908_v30 = vpop.f32.mrb[88].mxu0  ;;  %v11474_v38 = vld [vmem:[%s12151_s18 + $0x310] sm:$0xff]  }
0x185f   : > { %v6848_v22 = vadd.f32 %v6847_v61, %v13561_v48  ;;  %v6909_v43 = vadd.f32 %v6908_v30, %v13565_v46  ;;  %10133 = vmatpush3.bf16.msra.mxu1 %v11462_v23  ;;  %10167 = vmatpush3.bf16.msra.mxu0 %v11463_v45  ;;  %v6849_v10 = vpop.f32.mrb[89].mxu1  ;;  %v6910_v3 = vpop.f32.mrb[89].mxu0  ;;  %v11475_v62 = vld [vmem:[%s12151_s18 + $0x390] sm:$0xff]  }
0x1860   : > { %v6850_v49 = vadd.f32 %v6849_v10, %v13571_v29  ;;  %v6911_v57 = vadd.f32 %v6910_v3, %v13576_v6  ;;  %v6851_v44 = vpop.f32.mrb[90].mxu1  ;;  %v6912_v56 = vpop.f32.mrb[90].mxu0  ;;  %8462 = vmatprep.mubr.bf16.mxu1 %v7136_v27  ;;  %8518 = vmatprep.mubr.bf16.mxu0 %v7138_v35  ;;  %v11476_v35 = vld [vmem:[%s12151_s18 + $0x358] sm:$0xff]  }
0x1861   : > { %v6852_v58 = vadd.f32 %v6851_v44, %v13561_v48  ;;  %v6913_v18 = vadd.f32 %v6912_v56, %v13565_v46  ;;  %v6853_v21 = vpop.f32.mrb[91].mxu1  ;;  %v6914_v55 = vpop.f32.mrb[91].mxu0  ;;  %10186 = vmatprep.subr.bf16.mxu1 %v11464_v40  ;;  %10220 = vmatprep.subr.bf16.mxu0 %v11465_v41  ;;  %v7087_v59 = vmax.f32 %v6848_v22, 0.0  ;;  %v7089_v32 = vmax.f32 %v6909_v43, 0.0  ;;  %v11483_v44 = vld [vmem:[%s12151_s18 + $0x3a0] sm:$0xff]  }
0x1862   : > { %v6854_v31 = vadd.f32 %v6853_v21, %v13571_v29  ;;  %v6915_v63 = vadd.f32 %v6914_v55, %v13576_v6  ;;  %8463 = vmatmul.mubr.bf16.vlgmr.msra.gmra.mrb[132].mxu1 %v7135_v24  ;;  %8519 = vmatmul.mubr.bf16.vlgmr.msra.gmra.mrb[132].mxu0 %v7137_v0  ;;  %v7088_v34 = vmax.f32 %v6850_v49, 0.0  ;;  %v7090_v14 = vmax.f32 %v6911_v57, 0.0  ;;  %v11481_v49 = vld [vmem:[%s12151_s18 + $0x3e0] sm:$0xff]   ;;  %v11486_v55 = vld [vmem:[%s12151_s18 + $0x328] sm:$0xff]  }
0x1863   : > { %v7103_v50 = vmax.f32 %v6852_v58, 0.0  ;;  %v7105_v17 = vmax.f32 %v6913_v18, 0.0  ;;  %10187 = vmatpush3.bf16.msra.mxu1 %v11466_v47  ;;  %10221 = vmatpush3.bf16.msra.mxu0 %v11467_v5  ;;  %v11480_v5 = vld [vmem:[%s12151_s18 + $0x360] sm:$0xff]   ;;  %v11485_v58 = vld [vmem:[%s12151_s18 + $0x3e8] sm:$0xff]   ;;  %v13631_v18 = vrot.slane %v13557_v33, %v5857_v20  ;;  %v13636_v21 = vrot.slane %v13557_v33, %v5865_v25 }
0x1864   : > { %v7104_v8 = vmax.f32 %v6854_v31, 0.0  ;;  %v7106_v9 = vmax.f32 %v6915_v63, 0.0  ;;  %10188 = vmatprep.subr.bf16.mxu1 %v11468_v37  ;;  %10222 = vmatprep.subr.bf16.mxu0 %v11469_v2  ;;  %v11482_v57 = vld [vmem:[%s12151_s18 + $0x320] sm:$0xff]   ;;  %v11484_v2 = vld [vmem:[%s12151_s18 + $0x368] sm:$0xff]   ;;  %v13643_v63 = vrot.slane %v13557_v33, %v5861_v19  ;;  %v13648_v20 = vrot.slane %v13557_v33, %v5869_v1 }
0x1865   : > { %v7151_v15 = vpack.c.bf16 %v7103_v50, %v7087_v59  ;;  %v7153_v53 = vpack.c.bf16 %v7105_v17, %v7089_v32  ;;  %v11487_v31 = vld [vmem:[%s12151_s18 + $0x3a8] sm:$0xff]   ;;  %v11488_v59 = vld [vmem:[%s12151_s18 + $0x370] sm:$0xff]  }
0x1866   : > { %v7152_v39 = vpack.c.bf16 %v7104_v8, %v7088_v34  ;;  %v7154_v60 = vpack.c.bf16 %v7106_v9, %v7090_v14  ;;  %v6857_v42 = vpop.f32.mrb[92].mxu1  ;;  %v6918_v23 = vpop.f32.mrb[92].mxu0  ;;  %v11489_v32 = vld [vmem:[%s12151_s18 + $0x3f0] sm:$0xff]   ;;  %v11492_v9 = vld [vmem:[%s12151_s18 + $0x378] sm:$0xff]  }
0x1867   : > { %v6858_v45 = vadd.f32 %v6857_v42, %v13561_v48  ;;  %10189 = vmatpush3.bf16.msra.mxu1 %v11470_v36  ;;  %10223 = vmatpush3.bf16.msra.mxu0 %v11471_v52  ;;  %v6859_v26 = vpop.f32.mrb[93].mxu1  ;;  %v6920_v13 = vpop.f32.mrb[93].mxu0  ;;  %v6919_v24 = vadd.f32 %v6918_v23, %v13565_v46  ;;  %v11477_v48 = vld [vmem:[%s12151_s18 + $0x3d8] sm:$0xff]   ;;  %v11490_v34 = vld [vmem:[%s12151_s18 + $0x330] sm:$0xff]  }
0x1868   : > { %v6860_v0 = vadd.f32 %v6859_v26, %v13571_v29  ;;  %v6921_v40 = vadd.f32 %v6920_v13, %v13576_v6  ;;  %v6861_v41 = vpop.f32.mrb[94].mxu1  ;;  %v6922_v27 = vpop.f32.mrb[94].mxu0  ;;  %8470 = vmatprep.mubr.bf16.mxu1 %v7152_v39  ;;  %8526 = vmatprep.mubr.bf16.mxu0 %v7154_v60  ;;  %v11478_v29 = vld [vmem:[%s12151_s18 + $0x318] sm:$0xff]   ;;  %v11491_v14 = vld [vmem:[%s12151_s18 + $0x3b0] sm:$0xff]  }
0x1869   : > { %v6862_v61 = vpop.f32.mrb[95].mxu1  ;;  %v6923_v30 = vpop.f32.mrb[95].mxu0  ;;  %10190 = vmatprep.subr.bf16.mxu1 %v11472_v7  ;;  %10224 = vmatprep.subr.bf16.mxu0 %v11473_v11  ;;  %v11479_v6 = vld [vmem:[%s12151_s18 + $0x398] sm:$0xff]   ;;  %v7119_v43 = vmax.f32 %v6858_v45, 0.0  ;;  %v7121_v10 = vmax.f32 %v6919_v24, 0.0 }
0x186a   : > { %v7120_v22 = vmax.f32 %v6860_v0, 0.0  ;;  %v7122_v46 = vmax.f32 %v6921_v40, 0.0  ;;  %8471 = vmatmul.mubr.bf16.gmra.mrb[136].mxu1 %v7151_v15  ;;  %8527 = vmatmul.mubr.bf16.gmra.mrb[136].mxu0 %v7153_v53  ;;  %v11493_v15 = vld [vmem:[%s12151_s18 + $0x3f8] sm:$0xff]  }
0x186b   : > { %10191 = vmatpush3.bf16.msra.mxu1 %v11474_v38  ;;  %10225 = vmatpush3.bf16.msra.mxu0 %v11475_v62  ;;  %v7167_v56 = vpack.c.bf16 %v7119_v43, %v7119_v43  ;;  %v7169_v37 = vpack.c.bf16 %v7121_v10, %v7121_v10  ;;  %v11494_v38 = vld [vmem:[%s12151_s18 + $0x338] sm:$0xff]  }
0x186c   : > { %v7168_v3 = vpack.c.bf16 %v7120_v22, %v7120_v22  ;;  %v7170_v47 = vpack.c.bf16 %v7122_v46, %v7122_v46  ;;  %10192 = vmatprep.subr.bf16.mxu1 %v11476_v35  ;;  %10226 = vmatprep.subr.bf16.mxu0 %v11477_v48  ;;  %v11495_v62 = vld [vmem:[%s12151_s18 + $0x3b8] sm:$0xff]  }
0x186e   : > { %8478 = vmatprep.mubr.bf16.mxu1 %v7168_v3  ;;  %8534 = vmatprep.mubr.bf16.mxu0 %v7170_v47 }
0x186f   : > { %10193 = vmatpush3.bf16.msra.mxu1 %v11478_v29  ;;  %10227 = vmatpush3.bf16.msra.mxu0 %v11479_v6 }
0x1870   : > { %10194 = vmatprep.subr.bf16.mxu1 %v11480_v5  ;;  %10228 = vmatprep.subr.bf16.mxu0 %v11481_v49 }
0x1872   : > { %8479 = vmatmul.mubr.bf16.gmra.mrb[140].mxu1 %v7167_v56  ;;  %8535 = vmatmul.mubr.bf16.gmra.mrb[140].mxu0 %v7169_v37 }
0x1873   : > { %10195 = vmatpush3.bf16.msra.mxu1 %v11482_v57  ;;  %10229 = vmatpush3.bf16.msra.mxu0 %v11483_v44 }
0x1874   : > { %10196 = vmatprep.subr.bf16.mxu1 %v11484_v2  ;;  %10230 = vmatprep.subr.bf16.mxu0 %v11485_v58 }
0x1876   : > { %v6959_v25 = vpop.f32.mrb[96].mxu1  ;;  %v7020_v50 = vpop.f32.mrb[96].mxu0 }
0x1877   : > { %v6960_v17 = vadd.f32 %v6959_v25, %v13631_v18  ;;  %v7021_v36 = vadd.f32 %v7020_v50, %v13636_v21  ;;  %10197 = vmatpush3.bf16.msra.mxu1 %v11486_v55  ;;  %10231 = vmatpush3.bf16.msra.mxu0 %v11487_v31  ;;  %v6961_v52 = vpop.f32.mrb[97].mxu1  ;;  %v7022_v19 = vpop.f32.mrb[97].mxu0 }
0x1878   : > { %v6962_v28 = vadd.f32 %v6961_v52, %v13643_v63  ;;  %v7023_v1 = vadd.f32 %v7022_v19, %v13648_v20  ;;  %v6963_v33 = vpop.f32.mrb[98].mxu1  ;;  %v7024_v8 = vpop.f32.mrb[98].mxu0  ;;  %10198 = vmatprep.subr.bf16.mxu1 %v11488_v59  ;;  %10232 = vmatprep.subr.bf16.mxu0 %v11489_v32 }
0x1879   : > { %v6964_v53 = vadd.f32 %v6963_v33, %v13631_v18  ;;  %v7025_v7 = vadd.f32 %v7024_v8, %v13636_v21  ;;  %v6965_v11 = vpop.f32.mrb[99].mxu1  ;;  %v7026_v39 = vpop.f32.mrb[99].mxu0  ;;  %v7059_v23 = vmax.f32 %v6960_v17, 0.0  ;;  %v7061_v45 = vmax.f32 %v7021_v36, 0.0 }
0x187a   : > { %v6966_v60 = vadd.f32 %v6965_v11, %v13643_v63  ;;  %v7027_v42 = vadd.f32 %v7026_v39, %v13648_v20  ;;  %v7060_v24 = vmax.f32 %v6962_v28, 0.0  ;;  %v7062_v0 = vmax.f32 %v7023_v1, 0.0 }
0x187b   : > { %v7075_v26 = vmax.f32 %v6964_v53, 0.0  ;;  %v7077_v13 = vmax.f32 %v7025_v7, 0.0  ;;  %10199 = vmatpush3.bf16.msra.mxu1 %v11490_v34  ;;  %10233 = vmatpush3.bf16.msra.mxu0 %v11491_v14 }
0x187c   : > { %v7076_v40 = vmax.f32 %v6966_v60, 0.0  ;;  %v7078_v41 = vmax.f32 %v7027_v42, 0.0  ;;  %10200 = vmatprep.subr.bf16.mxu1 %v11492_v9  ;;  %10234 = vmatprep.subr.bf16.mxu0 %v11493_v15 }
0x187d   : > { %v7139_v27 = vpack.c.bf16 %v7075_v26, %v7059_v23  ;;  %v7141_v35 = vpack.c.bf16 %v7077_v13, %v7061_v45 }
0x187e   : > { %v7140_v48 = vpack.c.bf16 %v7076_v40, %v7060_v24  ;;  %v7142_v61 = vpack.c.bf16 %v7078_v41, %v7062_v0  ;;  %v6969_v30 = vpop.f32.mrb[100].mxu1  ;;  %v7030_v22 = vpop.f32.mrb[100].mxu0 }
0x187f   : > { %v6970_v46 = vadd.f32 %v6969_v30, %v13631_v18  ;;  %v7031_v29 = vadd.f32 %v7030_v22, %v13636_v21  ;;  %10201 = vmatpush3.bf16.msra.mxu1 %v11494_v38  ;;  %10235 = vmatpush3.bf16.msra.mxu0 %v11495_v62  ;;  %v6971_v6 = vpop.f32.mrb[101].mxu1  ;;  %v7032_v43 = vpop.f32.mrb[101].mxu0  ;;  %v9463_v62 = vld [vmem:[%s12153_s29 + $0x1e] ss:$0 sm:$0xff] }
0x1880   : > { %v6972_v10 = vadd.f32 %v6971_v6, %v13643_v63  ;;  %v7033_v3 = vadd.f32 %v7032_v43, %v13648_v20  ;;  %v6973_v47 = vpop.f32.mrb[102].mxu1  ;;  %v7034_v5 = vpop.f32.mrb[102].mxu0  ;;  %8574 = vmatprep.mubr.bf16.mxu1 %v7140_v48  ;;  %8630 = vmatprep.mubr.bf16.mxu0 %v7142_v61 }
0x1881   : > { %v6974_v49 = vadd.f32 %v6973_v47, %v13631_v18  ;;  %v7035_v57 = vadd.f32 %v7034_v5, %v13636_v21  ;;  %v6975_v44 = vpop.f32.mrb[103].mxu1  ;;  %v7036_v56 = vpop.f32.mrb[103].mxu0  ;;  %v7091_v58 = vmax.f32 %v6970_v46, 0.0  ;;  %v7093_v55 = vmax.f32 %v7031_v29, 0.0 }
0x1882   : > { %v6976_v37 = vadd.f32 %v6975_v44, %v13643_v63  ;;  %v7037_v2 = vadd.f32 %v7036_v56, %v13648_v20  ;;  %8575 = vmatmul.mubr.bf16.vlgmr.msra.gmra.mrb[144].mxu1 %v7139_v27  ;;  %8631 = vmatmul.mubr.bf16.vlgmr.msra.gmra.mrb[144].mxu0 %v7141_v35  ;;  %v7092_v32 = vmax.f32 %v6972_v10, 0.0  ;;  %v7094_v25 = vmax.f32 %v7033_v3, 0.0 }
0x1883   : > { %v7107_v31 = vmax.f32 %v6974_v49, 0.0  ;;  %v7109_v59 = vmax.f32 %v7035_v57, 0.0 }
0x1884   : > { %v7108_v50 = vmax.f32 %v6976_v37, 0.0  ;;  %v7110_v17 = vmax.f32 %v7037_v2, 0.0 }
0x1885   : > { %v7155_v36 = vpack.c.bf16 %v7107_v31, %v7091_v58  ;;  %v7157_v52 = vpack.c.bf16 %v7109_v59, %v7093_v55 }
0x1886   : > { %v7156_v19 = vpack.c.bf16 %v7108_v50, %v7092_v32  ;;  %v7158_v34 = vpack.c.bf16 %v7110_v17, %v7094_v25  ;;  %v6979_v14 = vpop.f32.mrb[104].mxu1  ;;  %v7040_v28 = vpop.f32.mrb[104].mxu0 }
0x1887   : > { %v6980_v1 = vadd.f32 %v6979_v14, %v13631_v18  ;;  %v6981_v33 = vpop.f32.mrb[105].mxu1  ;;  %v7042_v8 = vpop.f32.mrb[105].mxu0  ;;  %v7041_v9 = vadd.f32 %v7040_v28, %v13636_v21 }
0x1888   : > { %v6982_v15 = vadd.f32 %v6981_v33, %v13643_v63  ;;  %v7043_v53 = vadd.f32 %v7042_v8, %v13648_v20  ;;  %v6983_v7 = vpop.f32.mrb[106].mxu1  ;;  %v7044_v11 = vpop.f32.mrb[106].mxu0  ;;  %8582 = vmatprep.mubr.bf16.mxu1 %v7156_v19  ;;  %8638 = vmatprep.mubr.bf16.mxu0 %v7158_v34 }
0x1889   : > { %v6984_v39 = vpop.f32.mrb[107].mxu1  ;;  %v7045_v60 = vpop.f32.mrb[107].mxu0  ;;  %v7123_v18 = vmax.f32 %v6980_v1, 0.0  ;;  %v7125_v45 = vmax.f32 %v7041_v9, 0.0 }
0x188a   : > { %v7124_v42 = vmax.f32 %v6982_v15, 0.0  ;;  %v7126_v23 = vmax.f32 %v7043_v53, 0.0  ;;  %8583 = vmatmul.mubr.bf16.gmra.mrb[148].mxu1 %v7155_v36  ;;  %8639 = vmatmul.mubr.bf16.gmra.mrb[148].mxu0 %v7157_v52 }
0x188b   : > { %v7171_v21 = vpack.c.bf16 %v7123_v18, %v7123_v18  ;;  %v7173_v63 = vpack.c.bf16 %v7125_v45, %v7125_v45 }
0x188c   : > { %v7172_v26 = vpack.c.bf16 %v7124_v42, %v7124_v42  ;;  %v7174_v13 = vpack.c.bf16 %v7126_v23, %v7126_v23 }
0x188e   : > { %8590 = vmatprep.mubr.bf16.mxu1 %v7172_v26  ;;  %8646 = vmatprep.mubr.bf16.mxu0 %v7174_v13 }
0x1892   : > { %8591 = vmatmul.mubr.bf16.gmra.mrb[152].mxu1 %v7171_v21  ;;  %8647 = vmatmul.mubr.bf16.gmra.mrb[152].mxu0 %v7173_v63 }
0x18f4   : > { %v9998_v20 = vpop.f32.mrb[108].mxu1  ;;  %v10032_v38 = vpop.f32.mrb[108].mxu0 }
0x18f5   : > { %v9999_v24 = vpop.f32.mrb[109].mxu1  ;;  %v10033_v0 = vpop.f32.mrb[109].mxu0 }
0x18f6   : > { %v10000_v40 = vadd.f32 %v9999_v24, %v9998_v20  ;;  %v10034_v41 = vadd.f32 %v10033_v0, %v10032_v38  ;;  %v10001_v27 = vpop.f32.mrb[110].mxu1  ;;  %v10035_v35 = vpop.f32.mrb[110].mxu0 }
0x18f7   : > { %v10002_v48 = vpop.f32.mrb[111].mxu1  ;;  %v10036_v61 = vpop.f32.mrb[111].mxu0 }
0x18f8   : > { %v8241_v30 = vadd.f32 %v10000_v40, %v9463_v62  ;;  %v10003_v22 = vadd.f32 %v10002_v48, %v10001_v27  ;;  %v10037_v46 = vadd.f32 %v10036_v61, %v10035_v35 }
0x18fa   : > { %v8297_v29 = vadd.f32 %v10034_v41, %v8241_v30  ;;  %v8244_v6 = vadd.f32 %v10003_v22, %v9463_v62 }
0x18fc   : > { %v8300_v43 = vadd.f32 %v10037_v46, %v8244_v6  ;;  %v10004_v10 = vpop.f32.mrb[112].mxu1  ;;  %v10038_v3 = vpop.f32.mrb[112].mxu0 }
0x18fd   : > { %v10005_v47 = vpop.f32.mrb[113].mxu1  ;;  %v10039_v5 = vpop.f32.mrb[113].mxu0 }
0x18fe   : > { %v10006_v49 = vadd.f32 %v10005_v47, %v10004_v10  ;;  %v10040_v57 = vadd.f32 %v10039_v5, %v10038_v3  ;;  %v10007_v44 = vpop.f32.mrb[114].mxu1  ;;  %v10041_v56 = vpop.f32.mrb[114].mxu0 }
0x18ff   : > { %v10008_v37 = vpop.f32.mrb[115].mxu1  ;;  %v10042_v2 = vpop.f32.mrb[115].mxu0 }
0x1900   : > { %v8249_v58 = vadd.f32 %v10006_v49, %v9463_v62  ;;  %v10009_v55 = vadd.f32 %v10008_v37, %v10007_v44  ;;  %v10043_v31 = vadd.f32 %v10042_v2, %v10041_v56 }
0x1902   : > { %v8305_v59 = vadd.f32 %v10040_v57, %v8249_v58  ;;  %v8252_v32 = vadd.f32 %v10009_v55, %v9463_v62 }
0x1904   : > { %v8308_v25 = vadd.f32 %v10043_v31, %v8252_v32  ;;  %v10010_v50 = vpop.f32.mrb[116].mxu1  ;;  %v10044_v17 = vpop.f32.mrb[116].mxu0 }
0x1905   : > { %v10011_v36 = vpop.f32.mrb[117].mxu1  ;;  %v10045_v52 = vpop.f32.mrb[117].mxu0 }
0x1906   : > { %v10012_v19 = vadd.f32 %v10011_v36, %v10010_v50  ;;  %v10046_v34 = vadd.f32 %v10045_v52, %v10044_v17  ;;  %v10013_v14 = vpop.f32.mrb[118].mxu1  ;;  %v10047_v28 = vpop.f32.mrb[118].mxu0 }
0x1907   : > { %v10014_v1 = vpop.f32.mrb[119].mxu1  ;;  %v10048_v33 = vpop.f32.mrb[119].mxu0 }
0x1908   : > { %v8257_v8 = vadd.f32 %v10012_v19, %v9463_v62 }
0x190a   : > { %v8313_v9 = vadd.f32 %v10046_v34, %v8257_v8 }
0x1914   : > { %v10066_v15 = vpop.f32.mrb[120].mxu1  ;;  %v10100_v53 = vpop.f32.mrb[120].mxu0 }
0x1915   : > { %v10067_v7 = vpop.f32.mrb[121].mxu1  ;;  %v10101_v11 = vpop.f32.mrb[121].mxu0 }
0x1916   : > { %v10068_v39 = vadd.f32 %v10067_v7, %v10066_v15  ;;  %v10102_v60 = vadd.f32 %v10101_v11, %v10100_v53  ;;  %v10069_v42 = vpop.f32.mrb[122].mxu1  ;;  %v10103_v23 = vpop.f32.mrb[122].mxu0 }
0x1917   : > { %v10070_v18 = vpop.f32.mrb[123].mxu1  ;;  %v10104_v45 = vpop.f32.mrb[123].mxu0 }
0x1918   : > { %v8353_v26 = vadd.f32 %v10068_v39, %v8297_v29  ;;  %v10071_v13 = vadd.f32 %v10070_v18, %v10069_v42  ;;  %v10105_v21 = vadd.f32 %v10104_v45, %v10103_v23 }
0x191a   : > { %v8409_v63 = vadd.f32 %v10102_v60, %v8353_v26  ;;  %v8356_v20 = vadd.f32 %v10071_v13, %v8300_v43 }
0x191c   : > { %v8412_v38 = vadd.f32 %v10105_v21, %v8356_v20  ;;  %v10072_v24 = vpop.f32.mrb[124].mxu1  ;;  %v10106_v0 = vpop.f32.mrb[124].mxu0 }
0x191d   : > { %v10073_v62 = vpop.f32.mrb[125].mxu1  ;;  %v10107_v40 = vpop.f32.mrb[125].mxu0 }
0x191e   : > { %v10074_v41 = vadd.f32 %v10073_v62, %v10072_v24  ;;  %v10108_v27 = vadd.f32 %v10107_v40, %v10106_v0  ;;  %v10075_v35 = vpop.f32.mrb[126].mxu1  ;;  %v10109_v48 = vpop.f32.mrb[126].mxu0 }
0x191f   : > { %v10076_v61 = vpop.f32.mrb[127].mxu1  ;;  %v10110_v30 = vpop.f32.mrb[127].mxu0 }
0x1920   : > { %v8361_v22 = vadd.f32 %v10074_v41, %v8305_v59  ;;  %v10077_v46 = vadd.f32 %v10076_v61, %v10075_v35  ;;  %v10111_v6 = vadd.f32 %v10110_v30, %v10109_v48 }
0x1922   : > { %v8417_v10 = vadd.f32 %v10108_v27, %v8361_v22  ;;  %v8364_v29 = vadd.f32 %v10077_v46, %v8308_v25 }
0x1924   : > { %v8420_v3 = vadd.f32 %v10111_v6, %v8364_v29  ;;  %v10078_v47 = vpop.f32.mrb[128].mxu1  ;;  %v10112_v5 = vpop.f32.mrb[128].mxu0 }
0x1925   : > { %v10079_v43 = vpop.f32.mrb[129].mxu1  ;;  %v10113_v49 = vpop.f32.mrb[129].mxu0 }
0x1926   : > { %v10080_v57 = vadd.f32 %v10079_v43, %v10078_v47  ;;  %v10114_v44 = vadd.f32 %v10113_v49, %v10112_v5  ;;  %v10081_v56 = vpop.f32.mrb[130].mxu1  ;;  %v10115_v37 = vpop.f32.mrb[130].mxu0 }
0x1927   : > { %v10082_v2 = vpop.f32.mrb[131].mxu1  ;;  %v10116_v58 = vpop.f32.mrb[131].mxu0 }
0x1928   : > { %v8369_v55 = vadd.f32 %v10080_v57, %v8313_v9 }
0x192a   : > { %v8425_v31 = vadd.f32 %v10114_v44, %v8369_v55 }
0x1935   : > { %v10134_v32 = vpop.f32.mrb[132].mxu1  ;;  %v10168_v50 = vpop.f32.mrb[132].mxu0 }
0x1936   : > { %v10135_v59 = vpop.f32.mrb[133].mxu1  ;;  %v10169_v17 = vpop.f32.mrb[133].mxu0 }
0x1937   : > { %v10136_v36 = vadd.f32 %v10135_v59, %v10134_v32  ;;  %v10170_v52 = vadd.f32 %v10169_v17, %v10168_v50  ;;  %v10137_v25 = vpop.f32.mrb[134].mxu1  ;;  %v10171_v19 = vpop.f32.mrb[134].mxu0 }
0x1938   : > { %v10138_v34 = vpop.f32.mrb[135].mxu1  ;;  %v10172_v14 = vpop.f32.mrb[135].mxu0 }
0x1939   : > { %v8465_v28 = vadd.f32 %v10136_v36, %v8409_v63  ;;  %v10139_v1 = vadd.f32 %v10138_v34, %v10137_v25  ;;  %v10173_v33 = vadd.f32 %v10172_v14, %v10171_v19 }
0x193b   : > { %v8521_v8 = vadd.f32 %v10170_v52, %v8465_v28  ;;  %v8468_v15 = vadd.f32 %v10139_v1, %v8412_v38 }
0x193d   : > { %v8524_v53 = vadd.f32 %v10173_v33, %v8468_v15  ;;  %v10140_v7 = vpop.f32.mrb[136].mxu1  ;;  %v10174_v11 = vpop.f32.mrb[136].mxu0 }
0x193e   : > { %v10141_v9 = vpop.f32.mrb[137].mxu1  ;;  %v10175_v39 = vpop.f32.mrb[137].mxu0 }
0x193f   : > { %v10142_v60 = vadd.f32 %v10141_v9, %v10140_v7  ;;  %v10176_v42 = vadd.f32 %v10175_v39, %v10174_v11  ;;  %v10143_v23 = vpop.f32.mrb[138].mxu1  ;;  %v10177_v18 = vpop.f32.mrb[138].mxu0 }
0x1940   : > { %v10144_v45 = vpop.f32.mrb[139].mxu1  ;;  %v10178_v26 = vpop.f32.mrb[139].mxu0 }
0x1941   : > { %v8473_v13 = vadd.f32 %v10142_v60, %v8417_v10  ;;  %v10145_v21 = vadd.f32 %v10144_v45, %v10143_v23  ;;  %v10179_v20 = vadd.f32 %v10178_v26, %v10177_v18 }
0x1943   : > { %v8529_v24 = vadd.f32 %v10176_v42, %v8473_v13  ;;  %v8476_v63 = vadd.f32 %v10145_v21, %v8420_v3 }
0x1945   : > { %v8532_v0 = vadd.f32 %v10179_v20, %v8476_v63  ;;  %v10146_v62 = vpop.f32.mrb[140].mxu1  ;;  %v10180_v40 = vpop.f32.mrb[140].mxu0 }
0x1946   : > { %v10147_v38 = vpop.f32.mrb[141].mxu1  ;;  %v10181_v41 = vpop.f32.mrb[141].mxu0 }
0x1947   : > { %v10148_v27 = vadd.f32 %v10147_v38, %v10146_v62  ;;  %v10182_v35 = vadd.f32 %v10181_v41, %v10180_v40  ;;  %v10149_v48 = vpop.f32.mrb[142].mxu1  ;;  %v10183_v61 = vpop.f32.mrb[142].mxu0  ;;  %v11573_v62 = vld [vmem:[%s12145_s16 + $0x1f0] ss:$100 sps:$4 sm:$0xff] (!%p9592_p7)   ;;  %v11574_v40 = vld [vmem:[%s12145_s16 + $0x2b8] ss:$100 sps:$4 sm:$0xff] (!%p9592_p7)  }
0x1948   : > { %v10150_v30 = vpop.f32.mrb[143].mxu1  ;;  %v10184_v22 = vpop.f32.mrb[143].mxu0  ;;  %v11575_v38 = vld [vmem:[%s12145_s16 + $0x380] ss:$100 sps:$4 sm:$0xff] (!%p9592_p7)   ;;  %v11576_v41 = vld [vmem:[%s12145_s16 + $0x448] ss:$100 sps:$4 sm:$0xff] (!%p9592_p7)  }
0x1949   : > { %v8481_v46 = vadd.f32 %v10148_v27, %v8425_v31  ;;  %v11577_v27 = vld [vmem:[%s12145_s16 + $0x510] ss:$100 sps:$4 sm:$0xff] (!%p9592_p7)   ;;  %v9593_v22 = vld [vmem:[%s12153_s29 + $0x1f] ss:$0 sm:$0xff] (!%p9592_p7) }
0x194b   : > { %v8537_v6 = vadd.f32 %v10182_v35, %v8481_v46  ;;  %v11578_v35 = vld [vmem:[%s12145_s16 + $0x5d8] ss:$100 sps:$4 sm:$0xff] (!%p9592_p7)  }
0x1955   : > { %v10202_v29 = vpop.f32.mrb[144].mxu1  ;;  %v10236_v47 = vpop.f32.mrb[144].mxu0 }
0x1956   : > { %v10203_v10 = vpop.f32.mrb[145].mxu1  ;;  %v10237_v5 = vpop.f32.mrb[145].mxu0 }
0x1957   : > { %v10204_v43 = vadd.f32 %v10203_v10, %v10202_v29  ;;  %v10238_v49 = vadd.f32 %v10237_v5, %v10236_v47  ;;  %v10205_v3 = vpop.f32.mrb[146].mxu1  ;;  %v10239_v57 = vpop.f32.mrb[146].mxu0 }
0x1958   : > { %v10206_v44 = vpop.f32.mrb[147].mxu1  ;;  %v10240_v56 = vpop.f32.mrb[147].mxu0 }
0x1959   : > { %v8577_v37 = vadd.f32 %v10204_v43, %v8521_v8  ;;  %v10207_v2 = vadd.f32 %v10206_v44, %v10205_v3  ;;  %v10241_v58 = vadd.f32 %v10240_v56, %v10239_v57 }
0x195b   : > { %v8633_v55 = vadd.f32 %v10238_v49, %v8577_v37  ;;  %v8580_v32 = vadd.f32 %v10207_v2, %v8524_v53 }
0x195d   : > { %v13680_v50 = vadd.f32 %v8633_v55, %v13154_v4  ;;  %v8636_v31 = vadd.f32 %v10241_v58, %v8580_v32  ;;  %v10208_v59 = vpop.f32.mrb[148].mxu1  ;;  %v10242_v17 = vpop.f32.mrb[148].mxu0 }
0x195e   : > { %v10209_v36 = vpop.f32.mrb[149].mxu1  ;;  %v10243_v52 = vpop.f32.mrb[149].mxu0 }
0x195f   : > { %8659 = vst [vmem:[#allocation2] sm:$0xff] %v13680_v50  ;;  %v13684_v25 = vadd.f32 %v8636_v31, %v13157_v54  ;;  %v10210_v19 = vadd.f32 %v10209_v36, %v10208_v59  ;;  %v10244_v34 = vadd.f32 %v10243_v52, %v10242_v17  ;;  %v10211_v14 = vpop.f32.mrb[150].mxu1  ;;  %v10245_v28 = vpop.f32.mrb[150].mxu0 }
0x1960   : > { %v10212_v1 = vpop.f32.mrb[151].mxu1  ;;  %v10246_v33 = vpop.f32.mrb[151].mxu0 }
0x1961   : > { %8660 = vst [vmem:[#allocation2 + $0x8] sm:$0xff] %v13684_v25  ;;  %v8585_v4 = vadd.f32 %v10210_v19, %v8529_v24  ;;  %v10213_v8 = vadd.f32 %v10212_v1, %v10211_v14  ;;  %v10247_v15 = vadd.f32 %v10246_v33, %v10245_v28  ;;  %v8684_v61 = vpack.c.bf16 (!%p9592_p7), %v13684_v25, %v13680_v50 }
0x1963   : > { %v8641_v53 = vadd.f32 %v10244_v34, %v8585_v4  ;;  %v8588_v7 = vadd.f32 %v10213_v8, %v8532_v0  ;;  %v11849_v0 = vmov (!%p9592_p7), 0.0  }
0x1964   : > { %10569 = vmatprep.subr.bf16.mxu1 (!%p9592_p7), %v11849_v0  ;;  %10541 = vmatprep.subr.bf16.mxu0 (!%p9592_p7), %v11849_v0 }
0x1965   : > { %v13688_v11 = vadd.f32 %v8641_v53, %v13162_v12  ;;  %v8644_v9 = vadd.f32 %v10247_v15, %v8588_v7  ;;  %v10214_v39 = vpop.f32.mrb[152].mxu1  ;;  %v10248_v54 = vpop.f32.mrb[152].mxu0  ;;  %10561 = vmatprep.mubr.msk.bf16.mxu1 (!%p9592_p7), %vm11850_vm6, %v11849_v0  ;;  %10557 = vmatprep.mubr.msk.bf16.mxu0 (!%p9592_p7), %vm11850_vm6, %v11849_v0 }
0x1966   : > { %v10215_v60 = vpop.f32.mrb[153].mxu1  ;;  %v10249_v42 = vpop.f32.mrb[153].mxu0 }
0x1967   : > { %8661 = vst [vmem:[#allocation2 + $0x10] sm:$0xff] %v13688_v11  ;;  %v8657_v23 = vadd.f32 %v8644_v9, %v13165_v16  ;;  %v10216_v18 = vadd.f32 %v10215_v60, %v10214_v39  ;;  %v10250_v45 = vadd.f32 %v10249_v42, %v10248_v54  ;;  %v10217_v26 = vpop.f32.mrb[154].mxu1  ;;  %v10251_v13 = vpop.f32.mrb[154].mxu0  ;;  %v11571_v16 = vld [vmem:[%s12145_s16 + $0x60] ss:$100 sps:$4 sm:$0xff] (!%p9592_p7)  }
0x1968   : > { %v10218_v21 = vpop.f32.mrb[155].mxu1  ;;  %v10252_v20 = vpop.f32.mrb[155].mxu0  ;;  %10577 = vmatpush3.bf16.msra.mxu1 (!%p9592_p7), %v11571_v16  ;;  %10542 = vmatpush3.bf16.msra.mxu0 (!%p9592_p7), %v11571_v16 }
0x1969   : > { %8662 = vst [vmem:[#allocation2 + $0x18] sm:$0xff] %v8657_v23  ;;  %v8593_v24 = vadd.f32 %v10216_v18, %v8537_v6  ;;  %8667 = sbr.rel (%p9592_p7) target bundleno = 6760 (0x1a68), region = 88  ;;  %10570 = vmatprep.subr.bf16.mxu1 (!%p9592_p7), %v11849_v0  ;;  %10543 = vmatprep.subr.bf16.mxu0 (!%p9592_p7), %v11849_v0  ;;  %v8685_v48 = vpack.c.bf16 (!%p9592_p7), %v8657_v23, %v13688_v11 }
0x196b   : > { %v8649_v63 = vadd.f32 %v10250_v45, %v8593_v24 }
0x196d   : > { %v8658_v12 = vadd.f32 %v8649_v63, %v13170_v51  ;;  %v11572_v51 = vld [vmem:[%s12145_s16 + $0x128] ss:$100 sps:$4 sm:$0xff] (!%p9592_p7)  }
0x196e   : > { %10578 = vmatpush3.bf16.msra.mxu1 (!%p9592_p7), %v11572_v51  ;;  %10544 = vmatpush3.bf16.msra.mxu0 (!%p9592_p7), %v11572_v51 }
0x196f   : > { %8663 = vst [vmem:[#allocation2 + $0x20] sm:$0xff] %v8658_v12  ;;  %10571 = vmatprep.subr.bf16.mxu1 (!%p9592_p7), %v11849_v0  ;;  %10545 = vmatprep.subr.bf16.mxu0 (!%p9592_p7), %v11849_v0  ;;  %v8686_v30 = vpack.c.bf16 (!%p9592_p7), %v8658_v12, %v8658_v12 }
0x1972   : > { %10579 = vmatpush3.bf16.msra.mxu1 %v11573_v62  ;;  %10546 = vmatpush3.bf16.msra.mxu0 %v11573_v62 }
0x1973   : > { %10572 = vmatprep.subr.bf16.mxu1 %v11849_v0  ;;  %10547 = vmatprep.subr.bf16.mxu0 %v11849_v0 }
0x1976   : > { %10580 = vmatpush3.bf16.msra.mxu1 %v11574_v40  ;;  %10548 = vmatpush3.bf16.msra.mxu0 %v11574_v40 }
0x1977   : > { %10573 = vmatprep.subr.bf16.mxu1 %v11849_v0  ;;  %10549 = vmatprep.subr.bf16.mxu0 %v11849_v0 }
0x197a   : > { %10581 = vmatpush3.bf16.msra.mxu1 %v11575_v38  ;;  %10550 = vmatpush3.bf16.msra.mxu0 %v11575_v38 }
0x197b   : > { %10574 = vmatprep.subr.bf16.mxu1 %v11849_v0  ;;  %10551 = vmatprep.subr.bf16.mxu0 %v11849_v0 }
0x197e   : > { %10582 = vmatpush3.bf16.msra.mxu1 %v11576_v41  ;;  %10552 = vmatpush3.bf16.msra.mxu0 %v11576_v41 }
0x197f   : > { %10575 = vmatprep.subr.bf16.mxu1 %v11849_v0  ;;  %10553 = vmatprep.subr.bf16.mxu0 %v11849_v0 }
0x1982   : > { %10583 = vmatpush3.bf16.msra.mxu1 %v11577_v27  ;;  %10554 = vmatpush3.bf16.msra.mxu0 %v11577_v27 }
0x1983   : > { %10576 = vmatprep.subr.bf16.mxu1 %v11849_v0  ;;  %10555 = vmatprep.subr.bf16.mxu0 %v11849_v0 }
0x1986   : > { %10584 = vmatpush3.bf16.msra.mxu1 %v11578_v35  ;;  %10556 = vmatpush3.bf16.msra.mxu0 %v11578_v35 }
0x1989   : > { %10562 = vmatmul.mubr.bf16.vlgmr.msra.gmra.mrb[0].mxu1 %v8685_v48  ;;  %10558 = vmatmul.mubr.bf16.vlgmr.msra.gmra.mrb[0].mxu0 %v8684_v61 }
0x198a   : > { %10565 = vmatprep.mubr.msk.bf16.mxu1 %vm11850_vm6, %v11849_v0 }
0x1991   : > { %10566 = vmatmul.mubr.bf16.gmra.mrb[4].mxu1 %v8686_v30 }
0x1a5c   : > { %v8784_v46 = vpop.f32.mrb[0].mxu1  ;;  %v8776_v6 = vpop.f32.mrb[0].mxu0 }
0x1a5d   : > { %v8785_v29 = vadd.f32 %v9593_v22, %v8784_v46  ;;  %v10563_v47 = vpop.f32.mrb[1].mxu1  ;;  %v8777_v10 = vadd.f32 %v9593_v22, %v8776_v6  ;;  %v10559_v5 = vpop.f32.mrb[1].mxu0 }
0x1a5e   : > { %v8787_v43 = vpop.f32.mrb[2].mxu1  ;;  %v8779_v49 = vpop.f32.mrb[2].mxu0 }
0x1a5f   : > { %8800 = vst [vmem:[#allocation15 + $0x10] sm:$0xff] %v8785_v29  ;;  %v8788_v3 = vadd.f32 %v9593_v22, %v8787_v43  ;;  %8798 = vst [vmem:[#allocation15] sm:$0xff] %v8777_v10  ;;  %v10564_v57 = vpop.f32.mrb[3].mxu1  ;;  %v8780_v44 = vadd.f32 %v9593_v22, %v8779_v49  ;;  %v10560_v56 = vpop.f32.mrb[3].mxu0 }
0x1a61   : > { %8801 = vst [vmem:[#allocation15 + $0x18] sm:$0xff] %v8788_v3  ;;  %8799 = vst [vmem:[#allocation15 + $0x8] sm:$0xff] %v8780_v44 }
0x1a64   : > { %v8792_v37 = vpop.f32.mrb[4].mxu1 }
0x1a65   : > { %v8793_v2 = vadd.f32 %v9593_v22, %v8792_v37  ;;  %v10567_v58 = vpop.f32.mrb[5].mxu1 }
0x1a66   : > { %v8795_v55 = vpop.f32.mrb[6].mxu1 }
0x1a67   : > { %8802 = vst [vmem:[#allocation15 + $0x20] sm:$0xff] %v8793_v2  ;;  %v10568_v32 = vpop.f32.mrb[7].mxu1 }
0x1a68 PF: > { %p10637_p11 = scmp.eq.s32.totalorder %s11908_s25, 3  ;;  %s11851_s7 = smov [#allocation15]  }
0x1a69   : > { %s8809_s21 = sshll.u32 %s11851_s7, 4  ;;  %s8810_s21 = int_to_ptr.vmem [resolvable:$true] %s8809_s21 }
0x1a6a   : > { %s11753_s27 = scalar_lea.vmem %s8810_s21, 640  ;;  %p11760_p13 = scmp.lt.s32.totalorder %s8810_s21, %s8810_s21 }
0x1a6b   : > { %p11754_p4 = scmp.ne.s32.totalorder %s8810_s21, %s11753_s27  ;;  %p11761_p10 = scmp.lt.s32.totalorder %s11753_s27, %s11753_s27 }
0x1a6d   : > { %p11755_p8 = pnand %p11754_p4, %p10637_p11  ;;  %p11762_p2 = por %p11761_p10, %p11760_p13 }
0x1a6f   : > { %p11756_p9 = pneg %p11755_p8 }
0x1a71   : > { %p11763_p3 = pnand %p11762_p2, %p11756_p9 }
0x1a73   : > { %11766 = shalt.err (!%p11763_p3)
}
0x1a74   : > { %s11767_s24 = scalar_lea.hbm %s13751_s6, 640 }
0x1a75   : > { %p11768_p12 = scmp.ne.s32.totalorder %s13751_s6, %s11767_s24  ;;  %p11773_p5 = scmp.lt.u32.totalorder %s11767_s24, %s13751_s6 }
0x1a77   : > { %p11769_p0 = pnand %p11768_p12, %p10637_p11 }
0x1a79   : > { %p11770_p1 = pneg %p11769_p0 }
0x1a7b   : > { %p11775_p6 = pnand %p11773_p5, %p11770_p1 }
0x1a7d   : > { %11778 = shalt.err (!%p11775_p6)
}
0x1a7e   : > { %s11852_s23 = smov 128   ;;  %s11853_s19 = smov 8  }
0x1a7f   : > { %10607 = dma.vmem_to_hbm [thread:$0]  (%p10637_p11), %s8810_s21, 640, %s13751_s6, [#allocation6], %s11852_s23, %s11852_s23, %s11853_s19  }
0x1a80   : > { %11812 = dma.done.wait (%p10637_p11), [#allocation6], 640  }
0x1a81   : > { %11814 = vsyncadd (%p10637_p11), [#allocation6], 4294966656 }
0x1a82 PF: > { %s13794_s17 = sld [smem:[#allocation21_spill]]  ;;  %s13795_s23 = sld [smem:[#allocation22_spill]] }
0x1a83   : > { %p22_p7 = scmp.ge.s32.totalorder %s11911_s26, 6   ;;  %s13796_s21 = smov %s11821_s22 }
0x1a84   : > { %s13798_s24 = smov %s11911_s26 }
0x1a85   :  { %24 = sbr.rel (!%p22_p7) target bundleno = 11 (0xb), region = 138 }
0x1a88   : > { %s13797_s22 = smov %s13794_s17 }
0x1a8c   :  { %8825 = vsyncpa [#allocation5], 1 }
0x1a8d   :  { %8827 = vsyncpa [#allocation5 + $0x1], 1 }
0x1a8e   :  { %8828 = vsyncpa [#allocation8], 1 }
0x1a8f   :  { %8829 = vsyncpa [#allocation11], 1 }
0x1a90   :  { %8831 = vsyncpa [#allocation11 + $0x1], 1 }
0x1a91   :  { %8832 = vsyncpa [#allocation14], 1 }
0x1a92   :  { %8834 = vsyncpa [#allocation14 + $0x1], 1 }
0x1a93   :  { %8835 = vsyncpa [#allocation6], 1 }
0x1a94   :  { %8837 = vsyncpa [#allocation6 + $0x1], 1 }

</bundles_post_ra>
